<compile_context>
chip_gen: v5e
topology: v5e:2x2
jax: 0.10.0
libtpu: 0.0.40
codegen_flags: <defaults>
</compile_context>

<pallas_src>
import functools

import jax
import jax.numpy as jnp
import numpy as np
from jax.experimental import pallas as pl
from jax.experimental.pallas import tpu as pltpu

EPS = 1e-5  # PyTorch BatchNorm1d default eps
LANE = 128


# --------------------------- Fused Pallas kernel -----------------------------

def fused_forward_kernel(
        x_ref, bn_g_ref, bn_b_ref,
        wih0_ref, whh0_ref, bg0_ref,
        wih1_ref, whh1_ref, bg1_ref,
        wih2_ref, whh2_ref, bg2_ref,
        h0_ref, c0_ref,
        w1_ref, b1_ref, mbn_g_ref, mbn_b_ref,
        w2_ref, b2_ref,
        out_ref, hn_ref, cn_ref,
        y_scr):
    TB = x_ref.shape[0]
    B = h0_ref.shape[1]
    T = TB // B

    # ---- input BatchNorm (training mode: batch stats over all B*T rows) ----
    x = x_ref[...]
    mean = jnp.mean(x, axis=0, keepdims=True)
    var = jnp.mean((x - mean) ** 2, axis=0, keepdims=True)        # biased var
    y = (x - mean) * jax.lax.rsqrt(var + EPS) * bn_g_ref[...] + bn_b_ref[...]

    # ---- three stacked LSTM layers, time loop fully unrolled in-kernel -----
    layers = ((wih0_ref, whh0_ref, bg0_ref),
              (wih1_ref, whh1_ref, bg1_ref),
              (wih2_ref, whh2_ref, bg2_ref))
    for l, (wih_ref, whh_ref, bg_ref) in enumerate(layers):
        # Batched per-gate input projection for ALL timesteps at once
        # (one (T*B, Din) @ (Din, H) matmul per gate); bias hoisted here.
        xp = [jnp.dot(y, wih_ref[g], preferred_element_type=jnp.float32)
              + bg_ref[g] for g in range(4)]
        whh = [whh_ref[g] for g in range(4)]
        h = h0_ref[l]
        c = c0_ref[l]
        for t in range(T):                      # static unroll, T is small
            r0, r1 = t * B, (t + 1) * B
            gi = xp[0][r0:r1, :] + jnp.dot(h, whh[0],
                                           preferred_element_type=jnp.float32)
            gf = xp[1][r0:r1, :] + jnp.dot(h, whh[1],
                                           preferred_element_type=jnp.float32)
            gg = xp[2][r0:r1, :] + jnp.dot(h, whh[2],
                                           preferred_element_type=jnp.float32)
            go = xp[3][r0:r1, :] + jnp.dot(h, whh[3],
                                           preferred_element_type=jnp.float32)
            c = jax.nn.sigmoid(gf) * c + jax.nn.sigmoid(gi) * jnp.tanh(gg)
            h = jax.nn.sigmoid(go) * jnp.tanh(c)
            y_scr[r0:r1, :] = h                 # time-major layer output
        hn_ref[l] = h                           # final states written once
        cn_ref[l] = c
        y = y_scr[...]                          # (T*B, H) input to next layer

    # ---- output MLP: Linear -> BatchNorm(train) -> ReLU -> Linear ----------
    hm = jnp.dot(y, w1_ref[...], preferred_element_type=jnp.float32) + b1_ref[...]
    mean = jnp.mean(hm, axis=0, keepdims=True)
    var = jnp.mean((hm - mean) ** 2, axis=0, keepdims=True)
    hm = (hm - mean) * jax.lax.rsqrt(var + EPS) * mbn_g_ref[...] + mbn_b_ref[...]
    hm = jnp.maximum(hm, 0.0)
    # lane-dense (padded to 128) output store
    out_ref[...] = jnp.dot(hm, w2_ref[...],
                           preferred_element_type=jnp.float32) + b2_ref[...]


# --------------------------- Parameter preparation ---------------------------

def prepare_params(params):
    """One-time pre-transpose / pre-fuse of parameters into kernel layout."""
    pp = {}
    F = params['bn_in_w'].shape[0]
    pp['bn_g'] = params['bn_in_w'].reshape(1, F)
    pp['bn_b'] = params['bn_in_b'].reshape(1, F)

    H = params['w_hh_0'].shape[1]
    for l in range(3):
        w_ih = params[f'w_ih_{l}']                       # (4H, Din), gates i,f,g,o
        w_hh = params[f'w_hh_{l}']                       # (4H, H)
        b = params[f'b_ih_{l}'] + params[f'b_hh_{l}']    # fused bias (4H,)
        din = w_ih.shape[1]
        pp[f'wih_{l}'] = jnp.transpose(w_ih.reshape(4, H, din), (0, 2, 1))  # (4,Din,H)
        pp[f'whh_{l}'] = jnp.transpose(w_hh.reshape(4, H, H), (0, 2, 1))    # (4,H,H)
        pp[f'b_{l}'] = b.reshape(4, 1, H)

    Dh = params['mlp_w1'].shape[0]
    pp['w1'] = jnp.transpose(params['mlp_w1'])           # (H, Dh)
    pp['b1'] = params['mlp_b1'].reshape(1, Dh)
    pp['mbn_g'] = params['mlp_bn_w'].reshape(1, Dh)
    pp['mbn_b'] = params['mlp_bn_b'].reshape(1, Dh)

    Do = params['mlp_w2'].shape[0]
    Dp = ((Do + LANE - 1) // LANE) * LANE
    pp['w2'] = jnp.pad(jnp.transpose(params['mlp_w2']), ((0, 0), (0, Dp - Do)))
    pp['b2'] = jnp.pad(params['mlp_b2'], (0, Dp - Do)).reshape(1, Dp)
    return pp


# --------------------------- Full model forward ------------------------------

@functools.partial(jax.jit, static_argnames=('out_dim',))
def rnn_model_forward(pp, x, state, *, out_dim):
    """x: [B, T, input_size]; state = (h0, c0), each [B, 3, hidden]."""
    B, T, F = x.shape
    h0, c0 = state
    H = h0.shape[-1]
    Dp = pp['w2'].shape[1]

    # time-major row layout (row index = t*B + b) for the in-kernel recurrence
    x_tm = jnp.transpose(x, (1, 0, 2)).reshape(T * B, F)
    # deeppermute(state, [1, 0, 2]): [B, L, H] -> [L, B, H]
    h0_l = jnp.transpose(h0, (1, 0, 2))
    c0_l = jnp.transpose(c0, (1, 0, 2))

    out_tm, hn, cn = pl.pallas_call(
        fused_forward_kernel,
        out_shape=(jax.ShapeDtypeStruct((T * B, Dp), jnp.float32),
                   jax.ShapeDtypeStruct((3, B, H), jnp.float32),
                   jax.ShapeDtypeStruct((3, B, H), jnp.float32)),
        scratch_shapes=[pltpu.VMEM((T * B, H), jnp.float32)],
    )(x_tm, pp['bn_g'], pp['bn_b'],
      pp['wih_0'], pp['whh_0'], pp['b_0'],
      pp['wih_1'], pp['whh_1'], pp['b_1'],
      pp['wih_2'], pp['whh_2'], pp['b_2'],
      h0_l, c0_l,
      pp['w1'], pp['b1'], pp['mbn_g'], pp['mbn_b'],
      pp['w2'], pp['b2'])

    out = jnp.transpose(out_tm.reshape(T, B, Dp), (1, 0, 2))[:, :, :out_dim]
    # deeppermute(final_state, [1, 0, 2]): [L, B, H] -> [B, L, H]
    final_state = (jnp.transpose(hn, (1, 0, 2)), jnp.transpose(cn, (1, 0, 2)))
    return out, final_state


# --------------------------- Parameters --------------------------------------

def init_params(key, input_size, output_size, hidden=64, n_mlp=128, num_layers=3):
    params = {}
    keys = iter(jax.random.split(key, 4 * num_layers + 4))

    def u(k, shape, scale):
        return jax.random.uniform(k, shape, jnp.float32, -scale, scale)

    # input BatchNorm: weight=1, bias=0 (PyTorch default affine init)
    params['bn_in_w'] = jnp.ones((input_size,), jnp.float32)
    params['bn_in_b'] = jnp.zeros((input_size,), jnp.float32)
    # LSTM: PyTorch init U(-1/sqrt(H), 1/sqrt(H)); gate order i, f, g, o
    s = 1.0 / np.sqrt(hidden)
    for l in range(num_layers):
        din = input_size if l == 0 else hidden
        params[f'w_ih_{l}'] = u(next(keys), (4 * hidden, din), s)
        params[f'w_hh_{l}'] = u(next(keys), (4 * hidden, hidden), s)
        params[f'b_ih_{l}'] = u(next(keys), (4 * hidden,), s)
        params[f'b_hh_{l}'] = u(next(keys), (4 * hidden,), s)
    # out MLP
    s1 = 1.0 / np.sqrt(hidden)
    params['mlp_w1'] = u(next(keys), (n_mlp, hidden), s1)
    params['mlp_b1'] = u(next(keys), (n_mlp,), s1)
    params['mlp_bn_w'] = jnp.ones((n_mlp,), jnp.float32)
    params['mlp_bn_b'] = jnp.zeros((n_mlp,), jnp.float32)
    s2 = 1.0 / np.sqrt(n_mlp)
    params['mlp_w2'] = u(next(keys), (output_size, n_mlp), s2)
    params['mlp_b2'] = u(next(keys), (output_size,), s2)
    return params


# --------------------------- Pure-JAX reference -------------------------------

def _bn_ref(x2d, gamma, beta):
    mean = jnp.mean(x2d, axis=0, keepdims=True)
    var = jnp.mean((x2d - mean) ** 2, axis=0, keepdims=True)
    return (x2d - mean) / jnp.sqrt(var + EPS) * gamma + beta


def _lstm_layer_ref(x_tbf, w_ih, w_hh, b_ih, b_hh, h0, c0):
    def step(carry, x_t):
        h, c = carry
        gates = x_t @ w_ih.T + h @ w_hh.T + b_ih + b_hh
        i, f, g, o = jnp.split(gates, 4, axis=-1)
        c = jax.nn.sigmoid(f) * c + jax.nn.sigmoid(i) * jnp.tanh(g)
        h = jax.nn.sigmoid(o) * jnp.tanh(c)
        return (h, c), h
    (hn, cn), ys = jax.lax.scan(step, (h0, c0), x_tbf)
    return ys, hn, cn


def rnn_model_ref(params, x, state):
    B, T, F = x.shape
    h0, c0 = state
    H = h0.shape[-1]
    xn = _bn_ref(x.reshape(B * T, F), params['bn_in_w'], params['bn_in_b']).reshape(B, T, F)
    h = jnp.transpose(h0, (1, 0, 2))
    c = jnp.transpose(c0, (1, 0, 2))
    y = jnp.transpose(xn, (1, 0, 2))
    hs, cs = [], []
    for l in range(3):
        y, hn_l, cn_l = _lstm_layer_ref(y, params[f'w_ih_{l}'], params[f'w_hh_{l}'],
                                        params[f'b_ih_{l}'], params[f'b_hh_{l}'],
                                        h[l], c[l])
        hs.append(hn_l)
        cs.append(cn_l)
    hn = jnp.stack(hs, 0)
    cn = jnp.stack(cs, 0)
    y2 = jnp.transpose(y, (1, 0, 2)).reshape(B * T, H)
    hm = y2 @ params['mlp_w1'].T + params['mlp_b1']
    hm = jnp.maximum(_bn_ref(hm, params['mlp_bn_w'], params['mlp_bn_b']), 0.0)
    out = (hm @ params['mlp_w2'].T + params['mlp_b2']).reshape(B, T, -1)
    return out, (jnp.transpose(hn, (1, 0, 2)), jnp.transpose(cn, (1, 0, 2)))


# --------------------------- Main ---------------------------------------------

if __name__ == "__main__":
    B, T = 2, 8
    INPUT_SIZE, OUTPUT_SIZE, HIDDEN = 8, 4, 64

    params = init_params(jax.random.PRNGKey(42), INPUT_SIZE, OUTPUT_SIZE, HIDDEN)
    pp = prepare_params(params)   # one-time transpose / fuse / pad

    key = jax.random.PRNGKey(0)
    x = jax.random.normal(key, (B, T, INPUT_SIZE), jnp.float32)
    # zero_state(batch_size): (h0, c0) each [B, num_layers, hidden]
    h0 = jnp.zeros((B, 3, HIDDEN), jnp.float32)
    c0 = jnp.zeros((B, 3, HIDDEN), jnp.float32)

    out, (hn, cn) = rnn_model_forward(pp, x, (h0, c0), out_dim=OUTPUT_SIZE)
    jax.block_until_ready((out, hn, cn))

    out_r, (hn_r, cn_r) = rnn_model_ref(params, x, (h0, c0))
    assert out.shape == (B, T, OUTPUT_SIZE)
    assert hn.shape == (B, 3, HIDDEN) and cn.shape == (B, 3, HIDDEN)
    assert np.allclose(np.asarray(out), np.asarray(out_r), atol=1e-3, rtol=1e-3)
    assert np.allclose(np.asarray(hn), np.asarray(hn_r), atol=1e-3, rtol=1e-3)
    assert np.allclose(np.asarray(cn), np.asarray(cn_r), atol=1e-3, rtol=1e-3)

    print("KERNEL_OK")
</pallas_src>

<mosaic_0001>
module attributes {stable_mosaic.version = 11 : i64} {
  func.func @fused_forward_kernel(%arg0: memref<16x8xf32, #tpu.memory_space<vmem>>, %arg1: memref<1x8xf32, #tpu.memory_space<vmem>>, %arg2: memref<1x8xf32, #tpu.memory_space<vmem>>, %arg3: memref<4x8x64xf32, #tpu.memory_space<vmem>>, %arg4: memref<4x64x64xf32, #tpu.memory_space<vmem>>, %arg5: memref<4x1x64xf32, #tpu.memory_space<vmem>>, %arg6: memref<4x64x64xf32, #tpu.memory_space<vmem>>, %arg7: memref<4x64x64xf32, #tpu.memory_space<vmem>>, %arg8: memref<4x1x64xf32, #tpu.memory_space<vmem>>, %arg9: memref<4x64x64xf32, #tpu.memory_space<vmem>>, %arg10: memref<4x64x64xf32, #tpu.memory_space<vmem>>, %arg11: memref<4x1x64xf32, #tpu.memory_space<vmem>>, %arg12: memref<3x2x64xf32, #tpu.memory_space<vmem>>, %arg13: memref<3x2x64xf32, #tpu.memory_space<vmem>>, %arg14: memref<64x128xf32, #tpu.memory_space<vmem>>, %arg15: memref<1x128xf32, #tpu.memory_space<vmem>>, %arg16: memref<1x128xf32, #tpu.memory_space<vmem>>, %arg17: memref<1x128xf32, #tpu.memory_space<vmem>>, %arg18: memref<128x128xf32, #tpu.memory_space<vmem>>, %arg19: memref<1x128xf32, #tpu.memory_space<vmem>>, %arg20: memref<16x128xf32, #tpu.memory_space<vmem>>, %arg21: memref<3x2x64xf32, #tpu.memory_space<vmem>>, %arg22: memref<3x2x64xf32, #tpu.memory_space<vmem>>, %arg23: memref<16x64xf32, #tpu.memory_space<vmem>>) attributes {dimension_semantics = [], scalar_prefetch = 0 : i64, scratch_operands = 1 : i64, tpu.core_type = #tpu.core_type<tc>} {
    %c0 = arith.constant 0 : index
    %c0_0 = arith.constant 0 : index
    %0 = vector.load %arg0[%c0, %c0_0] : memref<16x8xf32, #tpu.memory_space<vmem>>, vector<16x8xf32>
    %cst = arith.constant dense<0.000000e+00> : vector<8xf32>
    %1 = vector.multi_reduction <add>, %0, %cst [0] : vector<16x8xf32> to vector<8xf32>
    %2 = vector.shape_cast %1 : vector<8xf32> to vector<1x8xf32>
    %cst_1 = arith.constant 1.600000e+01 : f32
    %3 = vector.broadcast %cst_1 : f32 to vector<1x8xf32>
    %4 = arith.divf %2, %3 : vector<1x8xf32>
    %5 = vector.broadcast %4 : vector<1x8xf32> to vector<16x8xf32>
    %6 = arith.subf %0, %5 : vector<16x8xf32>
    %7 = arith.mulf %6, %6 : vector<16x8xf32>
    %cst_2 = arith.constant dense<0.000000e+00> : vector<8xf32>
    %8 = vector.multi_reduction <add>, %7, %cst_2 [0] : vector<16x8xf32> to vector<8xf32>
    %9 = vector.shape_cast %8 : vector<8xf32> to vector<1x8xf32>
    %cst_3 = arith.constant 1.600000e+01 : f32
    %10 = vector.broadcast %cst_3 : f32 to vector<1x8xf32>
    %11 = arith.divf %9, %10 : vector<1x8xf32>
    %12 = vector.broadcast %4 : vector<1x8xf32> to vector<16x8xf32>
    %13 = arith.subf %0, %12 : vector<16x8xf32>
    %cst_4 = arith.constant 9.99999974E-6 : f32
    %14 = vector.broadcast %cst_4 : f32 to vector<1x8xf32>
    %15 = arith.addf %11, %14 : vector<1x8xf32>
    %16 = math.rsqrt %15 : vector<1x8xf32>
    %17 = vector.broadcast %16 : vector<1x8xf32> to vector<16x8xf32>
    %18 = arith.mulf %13, %17 : vector<16x8xf32>
    %c0_5 = arith.constant 0 : index
    %c0_6 = arith.constant 0 : index
    %19 = vector.load %arg1[%c0_5, %c0_6] : memref<1x8xf32, #tpu.memory_space<vmem>>, vector<1x8xf32>
    %20 = vector.broadcast %19 : vector<1x8xf32> to vector<16x8xf32>
    %21 = arith.mulf %18, %20 : vector<16x8xf32>
    %c0_7 = arith.constant 0 : index
    %c0_8 = arith.constant 0 : index
    %22 = vector.load %arg2[%c0_7, %c0_8] : memref<1x8xf32, #tpu.memory_space<vmem>>, vector<1x8xf32>
    %23 = vector.broadcast %22 : vector<1x8xf32> to vector<16x8xf32>
    %24 = arith.addf %21, %23 : vector<16x8xf32>
    %c0_9 = arith.constant 0 : index
    %c0_10 = arith.constant 0 : index
    %c0_11 = arith.constant 0 : index
    %25 = vector.load %arg3[%c0_9, %c0_10, %c0_11] : memref<4x8x64xf32, #tpu.memory_space<vmem>>, vector<1x8x64xf32>
    %26 = vector.shape_cast %25 : vector<1x8x64xf32> to vector<8x64xf32>
    %cst_12 = arith.constant dense<0.000000e+00> : vector<16x64xf32>
    %27 = tpu.matmul %24, %26, %cst_12 {dimension_numbers = #tpu.dot_dimension_numbers<[1], [0], [0], [1], [0, 0, 1, 1], [], []>} : vector<16x8xf32>, vector<8x64xf32>, vector<16x64xf32> -> vector<16x64xf32>
    %c0_13 = arith.constant 0 : index
    %c0_14 = arith.constant 0 : index
    %c0_15 = arith.constant 0 : index
    %28 = vector.load %arg5[%c0_13, %c0_14, %c0_15] : memref<4x1x64xf32, #tpu.memory_space<vmem>>, vector<1x1x64xf32>
    %29 = vector.shape_cast %28 : vector<1x1x64xf32> to vector<1x64xf32>
    %30 = vector.broadcast %29 : vector<1x64xf32> to vector<16x64xf32>
    %31 = arith.addf %27, %30 : vector<16x64xf32>
    %c1 = arith.constant 1 : index
    %c0_16 = arith.constant 0 : index
    %c0_17 = arith.constant 0 : index
    %32 = vector.load %arg3[%c1, %c0_16, %c0_17] : memref<4x8x64xf32, #tpu.memory_space<vmem>>, vector<1x8x64xf32>
    %33 = vector.shape_cast %32 : vector<1x8x64xf32> to vector<8x64xf32>
    %cst_18 = arith.constant dense<0.000000e+00> : vector<16x64xf32>
    %34 = tpu.matmul %24, %33, %cst_18 {dimension_numbers = #tpu.dot_dimension_numbers<[1], [0], [0], [1], [0, 0, 1, 1], [], []>} : vector<16x8xf32>, vector<8x64xf32>, vector<16x64xf32> -> vector<16x64xf32>
    %c1_19 = arith.constant 1 : index
    %c0_20 = arith.constant 0 : index
    %c0_21 = arith.constant 0 : index
    %35 = vector.load %arg5[%c1_19, %c0_20, %c0_21] : memref<4x1x64xf32, #tpu.memory_space<vmem>>, vector<1x1x64xf32>
    %36 = vector.shape_cast %35 : vector<1x1x64xf32> to vector<1x64xf32>
    %37 = vector.broadcast %36 : vector<1x64xf32> to vector<16x64xf32>
    %38 = arith.addf %34, %37 : vector<16x64xf32>
    %c2 = arith.constant 2 : index
    %c0_22 = arith.constant 0 : index
    %c0_23 = arith.constant 0 : index
    %39 = vector.load %arg3[%c2, %c0_22, %c0_23] : memref<4x8x64xf32, #tpu.memory_space<vmem>>, vector<1x8x64xf32>
    %40 = vector.shape_cast %39 : vector<1x8x64xf32> to vector<8x64xf32>
    %cst_24 = arith.constant dense<0.000000e+00> : vector<16x64xf32>
    %41 = tpu.matmul %24, %40, %cst_24 {dimension_numbers = #tpu.dot_dimension_numbers<[1], [0], [0], [1], [0, 0, 1, 1], [], []>} : vector<16x8xf32>, vector<8x64xf32>, vector<16x64xf32> -> vector<16x64xf32>
    %c2_25 = arith.constant 2 : index
    %c0_26 = arith.constant 0 : index
    %c0_27 = arith.constant 0 : index
    %42 = vector.load %arg5[%c2_25, %c0_26, %c0_27] : memref<4x1x64xf32, #tpu.memory_space<vmem>>, vector<1x1x64xf32>
    %43 = vector.shape_cast %42 : vector<1x1x64xf32> to vector<1x64xf32>
    %44 = vector.broadcast %43 : vector<1x64xf32> to vector<16x64xf32>
    %45 = arith.addf %41, %44 : vector<16x64xf32>
    %c3 = arith.constant 3 : index
    %c0_28 = arith.constant 0 : index
    %c0_29 = arith.constant 0 : index
    %46 = vector.load %arg3[%c3, %c0_28, %c0_29] : memref<4x8x64xf32, #tpu.memory_space<vmem>>, vector<1x8x64xf32>
    %47 = vector.shape_cast %46 : vector<1x8x64xf32> to vector<8x64xf32>
    %cst_30 = arith.constant dense<0.000000e+00> : vector<16x64xf32>
    %48 = tpu.matmul %24, %47, %cst_30 {dimension_numbers = #tpu.dot_dimension_numbers<[1], [0], [0], [1], [0, 0, 1, 1], [], []>} : vector<16x8xf32>, vector<8x64xf32>, vector<16x64xf32> -> vector<16x64xf32>
    %c3_31 = arith.constant 3 : index
    %c0_32 = arith.constant 0 : index
    %c0_33 = arith.constant 0 : index
    %49 = vector.load %arg5[%c3_31, %c0_32, %c0_33] : memref<4x1x64xf32, #tpu.memory_space<vmem>>, vector<1x1x64xf32>
    %50 = vector.shape_cast %49 : vector<1x1x64xf32> to vector<1x64xf32>
    %51 = vector.broadcast %50 : vector<1x64xf32> to vector<16x64xf32>
    %52 = arith.addf %48, %51 : vector<16x64xf32>
    %c0_34 = arith.constant 0 : index
    %c0_35 = arith.constant 0 : index
    %c0_36 = arith.constant 0 : index
    %53 = vector.load %arg4[%c0_34, %c0_35, %c0_36] : memref<4x64x64xf32, #tpu.memory_space<vmem>>, vector<1x64x64xf32>
    %54 = vector.shape_cast %53 : vector<1x64x64xf32> to vector<64x64xf32>
    %c1_37 = arith.constant 1 : index
    %c0_38 = arith.constant 0 : index
    %c0_39 = arith.constant 0 : index
    %55 = vector.load %arg4[%c1_37, %c0_38, %c0_39] : memref<4x64x64xf32, #tpu.memory_space<vmem>>, vector<1x64x64xf32>
    %56 = vector.shape_cast %55 : vector<1x64x64xf32> to vector<64x64xf32>
    %c2_40 = arith.constant 2 : index
    %c0_41 = arith.constant 0 : index
    %c0_42 = arith.constant 0 : index
    %57 = vector.load %arg4[%c2_40, %c0_41, %c0_42] : memref<4x64x64xf32, #tpu.memory_space<vmem>>, vector<1x64x64xf32>
    %58 = vector.shape_cast %57 : vector<1x64x64xf32> to vector<64x64xf32>
    %c3_43 = arith.constant 3 : index
    %c0_44 = arith.constant 0 : index
    %c0_45 = arith.constant 0 : index
    %59 = vector.load %arg4[%c3_43, %c0_44, %c0_45] : memref<4x64x64xf32, #tpu.memory_space<vmem>>, vector<1x64x64xf32>
    %60 = vector.shape_cast %59 : vector<1x64x64xf32> to vector<64x64xf32>
    %c0_46 = arith.constant 0 : index
    %c0_47 = arith.constant 0 : index
    %c0_48 = arith.constant 0 : index
    %61 = vector.load %arg12[%c0_46, %c0_47, %c0_48] : memref<3x2x64xf32, #tpu.memory_space<vmem>>, vector<1x2x64xf32>
    %62 = vector.shape_cast %61 : vector<1x2x64xf32> to vector<2x64xf32>
    %c0_49 = arith.constant 0 : index
    %c0_50 = arith.constant 0 : index
    %c0_51 = arith.constant 0 : index
    %63 = vector.load %arg13[%c0_49, %c0_50, %c0_51] : memref<3x2x64xf32, #tpu.memory_space<vmem>>, vector<1x2x64xf32>
    %64 = vector.shape_cast %63 : vector<1x2x64xf32> to vector<2x64xf32>
    %65 = vector.extract_strided_slice %31 {offsets = [0, 0], sizes = [2, 64], strides = [1, 1]} : vector<16x64xf32> to vector<2x64xf32>
    %cst_52 = arith.constant dense<0.000000e+00> : vector<2x64xf32>
    %66 = tpu.matmul %62, %54, %cst_52 {dimension_numbers = #tpu.dot_dimension_numbers<[1], [0], [0], [1], [0, 0, 1, 1], [], []>} : vector<2x64xf32>, vector<64x64xf32>, vector<2x64xf32> -> vector<2x64xf32>
    %67 = arith.addf %65, %66 : vector<2x64xf32>
    %68 = vector.extract_strided_slice %38 {offsets = [0, 0], sizes = [2, 64], strides = [1, 1]} : vector<16x64xf32> to vector<2x64xf32>
    %cst_53 = arith.constant dense<0.000000e+00> : vector<2x64xf32>
    %69 = tpu.matmul %62, %56, %cst_53 {dimension_numbers = #tpu.dot_dimension_numbers<[1], [0], [0], [1], [0, 0, 1, 1], [], []>} : vector<2x64xf32>, vector<64x64xf32>, vector<2x64xf32> -> vector<2x64xf32>
    %70 = arith.addf %68, %69 : vector<2x64xf32>
    %71 = vector.extract_strided_slice %45 {offsets = [0, 0], sizes = [2, 64], strides = [1, 1]} : vector<16x64xf32> to vector<2x64xf32>
    %cst_54 = arith.constant dense<0.000000e+00> : vector<2x64xf32>
    %72 = tpu.matmul %62, %58, %cst_54 {dimension_numbers = #tpu.dot_dimension_numbers<[1], [0], [0], [1], [0, 0, 1, 1], [], []>} : vector<2x64xf32>, vector<64x64xf32>, vector<2x64xf32> -> vector<2x64xf32>
    %73 = arith.addf %71, %72 : vector<2x64xf32>
    %74 = vector.extract_strided_slice %52 {offsets = [0, 0], sizes = [2, 64], strides = [1, 1]} : vector<16x64xf32> to vector<2x64xf32>
    %cst_55 = arith.constant dense<0.000000e+00> : vector<2x64xf32>
    %75 = tpu.matmul %62, %60, %cst_55 {dimension_numbers = #tpu.dot_dimension_numbers<[1], [0], [0], [1], [0, 0, 1, 1], [], []>} : vector<2x64xf32>, vector<64x64xf32>, vector<2x64xf32> -> vector<2x64xf32>
    %76 = arith.addf %74, %75 : vector<2x64xf32>
    %77 = arith.negf %70 : vector<2x64xf32>
    %78 = math.exp %77 : vector<2x64xf32>
    %cst_56 = arith.constant 1.000000e+00 : f32
    %79 = vector.broadcast %cst_56 : f32 to vector<2x64xf32>
    %80 = arith.addf %79, %78 : vector<2x64xf32>
    %81 = arith.divf %79, %80 : vector<2x64xf32>
    %82 = arith.mulf %81, %64 : vector<2x64xf32>
    %83 = arith.negf %67 : vector<2x64xf32>
    %84 = math.exp %83 : vector<2x64xf32>
    %cst_57 = arith.constant 1.000000e+00 : f32
    %85 = vector.broadcast %cst_57 : f32 to vector<2x64xf32>
    %86 = arith.addf %85, %84 : vector<2x64xf32>
    %87 = arith.divf %85, %86 : vector<2x64xf32>
    %88 = math.tanh %73 : vector<2x64xf32>
    %89 = arith.mulf %87, %88 : vector<2x64xf32>
    %90 = arith.addf %82, %89 : vector<2x64xf32>
    %91 = arith.negf %76 : vector<2x64xf32>
    %92 = math.exp %91 : vector<2x64xf32>
    %cst_58 = arith.constant 1.000000e+00 : f32
    %93 = vector.broadcast %cst_58 : f32 to vector<2x64xf32>
    %94 = arith.addf %93, %92 : vector<2x64xf32>
    %95 = arith.divf %93, %94 : vector<2x64xf32>
    %96 = math.tanh %90 : vector<2x64xf32>
    %97 = arith.mulf %95, %96 : vector<2x64xf32>
    %c0_59 = arith.constant 0 : index
    %c0_60 = arith.constant 0 : index
    %98 = vector.load %arg23[%c0_59, %c0_60] : memref<16x64xf32, #tpu.memory_space<vmem>>, vector<2x64xf32>
    tpu.vector_store %arg23[%c0_59, %c0_60], %97 {strides = array<i32>} : memref<16x64xf32, #tpu.memory_space<vmem>>, vector<2x64xf32>,
    %99 = vector.extract_strided_slice %31 {offsets = [2, 0], sizes = [2, 64], strides = [1, 1]} : vector<16x64xf32> to vector<2x64xf32>
    %cst_61 = arith.constant dense<0.000000e+00> : vector<2x64xf32>
    %100 = tpu.matmul %97, %54, %cst_61 {dimension_numbers = #tpu.dot_dimension_numbers<[1], [0], [0], [1], [0, 0, 1, 1], [], []>} : vector<2x64xf32>, vector<64x64xf32>, vector<2x64xf32> -> vector<2x64xf32>
    %101 = arith.addf %99, %100 : vector<2x64xf32>
    %102 = vector.extract_strided_slice %38 {offsets = [2, 0], sizes = [2, 64], strides = [1, 1]} : vector<16x64xf32> to vector<2x64xf32>
    %cst_62 = arith.constant dense<0.000000e+00> : vector<2x64xf32>
    %103 = tpu.matmul %97, %56, %cst_62 {dimension_numbers = #tpu.dot_dimension_numbers<[1], [0], [0], [1], [0, 0, 1, 1], [], []>} : vector<2x64xf32>, vector<64x64xf32>, vector<2x64xf32> -> vector<2x64xf32>
    %104 = arith.addf %102, %103 : vector<2x64xf32>
    %105 = vector.extract_strided_slice %45 {offsets = [2, 0], sizes = [2, 64], strides = [1, 1]} : vector<16x64xf32> to vector<2x64xf32>
    %cst_63 = arith.constant dense<0.000000e+00> : vector<2x64xf32>
    %106 = tpu.matmul %97, %58, %cst_63 {dimension_numbers = #tpu.dot_dimension_numbers<[1], [0], [0], [1], [0, 0, 1, 1], [], []>} : vector<2x64xf32>, vector<64x64xf32>, vector<2x64xf32> -> vector<2x64xf32>
    %107 = arith.addf %105, %106 : vector<2x64xf32>
    %108 = vector.extract_strided_slice %52 {offsets = [2, 0], sizes = [2, 64], strides = [1, 1]} : vector<16x64xf32> to vector<2x64xf32>
    %cst_64 = arith.constant dense<0.000000e+00> : vector<2x64xf32>
    %109 = tpu.matmul %97, %60, %cst_64 {dimension_numbers = #tpu.dot_dimension_numbers<[1], [0], [0], [1], [0, 0, 1, 1], [], []>} : vector<2x64xf32>, vector<64x64xf32>, vector<2x64xf32> -> vector<2x64xf32>
    %110 = arith.addf %108, %109 : vector<2x64xf32>
    %111 = arith.negf %104 : vector<2x64xf32>
    %112 = math.exp %111 : vector<2x64xf32>
    %cst_65 = arith.constant 1.000000e+00 : f32
    %113 = vector.broadcast %cst_65 : f32 to vector<2x64xf32>
    %114 = arith.addf %113, %112 : vector<2x64xf32>
    %115 = arith.divf %113, %114 : vector<2x64xf32>
    %116 = arith.mulf %115, %90 : vector<2x64xf32>
    %117 = arith.negf %101 : vector<2x64xf32>
    %118 = math.exp %117 : vector<2x64xf32>
    %cst_66 = arith.constant 1.000000e+00 : f32
    %119 = vector.broadcast %cst_66 : f32 to vector<2x64xf32>
    %120 = arith.addf %119, %118 : vector<2x64xf32>
    %121 = arith.divf %119, %120 : vector<2x64xf32>
    %122 = math.tanh %107 : vector<2x64xf32>
    %123 = arith.mulf %121, %122 : vector<2x64xf32>
    %124 = arith.addf %116, %123 : vector<2x64xf32>
    %125 = arith.negf %110 : vector<2x64xf32>
    %126 = math.exp %125 : vector<2x64xf32>
    %cst_67 = arith.constant 1.000000e+00 : f32
    %127 = vector.broadcast %cst_67 : f32 to vector<2x64xf32>
    %128 = arith.addf %127, %126 : vector<2x64xf32>
    %129 = arith.divf %127, %128 : vector<2x64xf32>
    %130 = math.tanh %124 : vector<2x64xf32>
    %131 = arith.mulf %129, %130 : vector<2x64xf32>
    %c2_68 = arith.constant 2 : index
    %c0_69 = arith.constant 0 : index
    %132 = vector.load %arg23[%c2_68, %c0_69] : memref<16x64xf32, #tpu.memory_space<vmem>>, vector<2x64xf32>
    tpu.vector_store %arg23[%c2_68, %c0_69], %131 {strides = array<i32>} : memref<16x64xf32, #tpu.memory_space<vmem>>, vector<2x64xf32>,
    %133 = vector.extract_strided_slice %31 {offsets = [4, 0], sizes = [2, 64], strides = [1, 1]} : vector<16x64xf32> to vector<2x64xf32>
    %cst_70 = arith.constant dense<0.000000e+00> : vector<2x64xf32>
    %134 = tpu.matmul %131, %54, %cst_70 {dimension_numbers = #tpu.dot_dimension_numbers<[1], [0], [0], [1], [0, 0, 1, 1], [], []>} : vector<2x64xf32>, vector<64x64xf32>, vector<2x64xf32> -> vector<2x64xf32>
    %135 = arith.addf %133, %134 : vector<2x64xf32>
    %136 = vector.extract_strided_slice %38 {offsets = [4, 0], sizes = [2, 64], strides = [1, 1]} : vector<16x64xf32> to vector<2x64xf32>
    %cst_71 = arith.constant dense<0.000000e+00> : vector<2x64xf32>
    %137 = tpu.matmul %131, %56, %cst_71 {dimension_numbers = #tpu.dot_dimension_numbers<[1], [0], [0], [1], [0, 0, 1, 1], [], []>} : vector<2x64xf32>, vector<64x64xf32>, vector<2x64xf32> -> vector<2x64xf32>
    %138 = arith.addf %136, %137 : vector<2x64xf32>
    %139 = vector.extract_strided_slice %45 {offsets = [4, 0], sizes = [2, 64], strides = [1, 1]} : vector<16x64xf32> to vector<2x64xf32>
    %cst_72 = arith.constant dense<0.000000e+00> : vector<2x64xf32>
    %140 = tpu.matmul %131, %58, %cst_72 {dimension_numbers = #tpu.dot_dimension_numbers<[1], [0], [0], [1], [0, 0, 1, 1], [], []>} : vector<2x64xf32>, vector<64x64xf32>, vector<2x64xf32> -> vector<2x64xf32>
    %141 = arith.addf %139, %140 : vector<2x64xf32>
    %142 = vector.extract_strided_slice %52 {offsets = [4, 0], sizes = [2, 64], strides = [1, 1]} : vector<16x64xf32> to vector<2x64xf32>
    %cst_73 = arith.constant dense<0.000000e+00> : vector<2x64xf32>
    %143 = tpu.matmul %131, %60, %cst_73 {dimension_numbers = #tpu.dot_dimension_numbers<[1], [0], [0], [1], [0, 0, 1, 1], [], []>} : vector<2x64xf32>, vector<64x64xf32>, vector<2x64xf32> -> vector<2x64xf32>
    %144 = arith.addf %142, %143 : vector<2x64xf32>
    %145 = arith.negf %138 : vector<2x64xf32>
    %146 = math.exp %145 : vector<2x64xf32>
    %cst_74 = arith.constant 1.000000e+00 : f32
    %147 = vector.broadcast %cst_74 : f32 to vector<2x64xf32>
    %148 = arith.addf %147, %146 : vector<2x64xf32>
    %149 = arith.divf %147, %148 : vector<2x64xf32>
    %150 = arith.mulf %149, %124 : vector<2x64xf32>
    %151 = arith.negf %135 : vector<2x64xf32>
    %152 = math.exp %151 : vector<2x64xf32>
    %cst_75 = arith.constant 1.000000e+00 : f32
    %153 = vector.broadcast %cst_75 : f32 to vector<2x64xf32>
    %154 = arith.addf %153, %152 : vector<2x64xf32>
    %155 = arith.divf %153, %154 : vector<2x64xf32>
    %156 = math.tanh %141 : vector<2x64xf32>
    %157 = arith.mulf %155, %156 : vector<2x64xf32>
    %158 = arith.addf %150, %157 : vector<2x64xf32>
    %159 = arith.negf %144 : vector<2x64xf32>
    %160 = math.exp %159 : vector<2x64xf32>
    %cst_76 = arith.constant 1.000000e+00 : f32
    %161 = vector.broadcast %cst_76 : f32 to vector<2x64xf32>
    %162 = arith.addf %161, %160 : vector<2x64xf32>
    %163 = arith.divf %161, %162 : vector<2x64xf32>
    %164 = math.tanh %158 : vector<2x64xf32>
    %165 = arith.mulf %163, %164 : vector<2x64xf32>
    %c4 = arith.constant 4 : index
    %c0_77 = arith.constant 0 : index
    %166 = vector.load %arg23[%c4, %c0_77] : memref<16x64xf32, #tpu.memory_space<vmem>>, vector<2x64xf32>
    tpu.vector_store %arg23[%c4, %c0_77], %165 {strides = array<i32>} : memref<16x64xf32, #tpu.memory_space<vmem>>, vector<2x64xf32>,
    %167 = vector.extract_strided_slice %31 {offsets = [6, 0], sizes = [2, 64], strides = [1, 1]} : vector<16x64xf32> to vector<2x64xf32>
    %cst_78 = arith.constant dense<0.000000e+00> : vector<2x64xf32>
    %168 = tpu.matmul %165, %54, %cst_78 {dimension_numbers = #tpu.dot_dimension_numbers<[1], [0], [0], [1], [0, 0, 1, 1], [], []>} : vector<2x64xf32>, vector<64x64xf32>, vector<2x64xf32> -> vector<2x64xf32>
    %169 = arith.addf %167, %168 : vector<2x64xf32>
    %170 = vector.extract_strided_slice %38 {offsets = [6, 0], sizes = [2, 64], strides = [1, 1]} : vector<16x64xf32> to vector<2x64xf32>
    %cst_79 = arith.constant dense<0.000000e+00> : vector<2x64xf32>
    %171 = tpu.matmul %165, %56, %cst_79 {dimension_numbers = #tpu.dot_dimension_numbers<[1], [0], [0], [1], [0, 0, 1, 1], [], []>} : vector<2x64xf32>, vector<64x64xf32>, vector<2x64xf32> -> vector<2x64xf32>
    %172 = arith.addf %170, %171 : vector<2x64xf32>
    %173 = vector.extract_strided_slice %45 {offsets = [6, 0], sizes = [2, 64], strides = [1, 1]} : vector<16x64xf32> to vector<2x64xf32>
    %cst_80 = arith.constant dense<0.000000e+00> : vector<2x64xf32>
    %174 = tpu.matmul %165, %58, %cst_80 {dimension_numbers = #tpu.dot_dimension_numbers<[1], [0], [0], [1], [0, 0, 1, 1], [], []>} : vector<2x64xf32>, vector<64x64xf32>, vector<2x64xf32> -> vector<2x64xf32>
    %175 = arith.addf %173, %174 : vector<2x64xf32>
    %176 = vector.extract_strided_slice %52 {offsets = [6, 0], sizes = [2, 64], strides = [1, 1]} : vector<16x64xf32> to vector<2x64xf32>
    %cst_81 = arith.constant dense<0.000000e+00> : vector<2x64xf32>
    %177 = tpu.matmul %165, %60, %cst_81 {dimension_numbers = #tpu.dot_dimension_numbers<[1], [0], [0], [1], [0, 0, 1, 1], [], []>} : vector<2x64xf32>, vector<64x64xf32>, vector<2x64xf32> -> vector<2x64xf32>
    %178 = arith.addf %176, %177 : vector<2x64xf32>
    %179 = arith.negf %172 : vector<2x64xf32>
    %180 = math.exp %179 : vector<2x64xf32>
    %cst_82 = arith.constant 1.000000e+00 : f32
    %181 = vector.broadcast %cst_82 : f32 to vector<2x64xf32>
    %182 = arith.addf %181, %180 : vector<2x64xf32>
    %183 = arith.divf %181, %182 : vector<2x64xf32>
    %184 = arith.mulf %183, %158 : vector<2x64xf32>
    %185 = arith.negf %169 : vector<2x64xf32>
    %186 = math.exp %185 : vector<2x64xf32>
    %cst_83 = arith.constant 1.000000e+00 : f32
    %187 = vector.broadcast %cst_83 : f32 to vector<2x64xf32>
    %188 = arith.addf %187, %186 : vector<2x64xf32>
    %189 = arith.divf %187, %188 : vector<2x64xf32>
    %190 = math.tanh %175 : vector<2x64xf32>
    %191 = arith.mulf %189, %190 : vector<2x64xf32>
    %192 = arith.addf %184, %191 : vector<2x64xf32>
    %193 = arith.negf %178 : vector<2x64xf32>
    %194 = math.exp %193 : vector<2x64xf32>
    %cst_84 = arith.constant 1.000000e+00 : f32
    %195 = vector.broadcast %cst_84 : f32 to vector<2x64xf32>
    %196 = arith.addf %195, %194 : vector<2x64xf32>
    %197 = arith.divf %195, %196 : vector<2x64xf32>
    %198 = math.tanh %192 : vector<2x64xf32>
    %199 = arith.mulf %197, %198 : vector<2x64xf32>
    %c6 = arith.constant 6 : index
    %c0_85 = arith.constant 0 : index
    %200 = vector.load %arg23[%c6, %c0_85] : memref<16x64xf32, #tpu.memory_space<vmem>>, vector<2x64xf32>
    tpu.vector_store %arg23[%c6, %c0_85], %199 {strides = array<i32>} : memref<16x64xf32, #tpu.memory_space<vmem>>, vector<2x64xf32>,
    %201 = vector.extract_strided_slice %31 {offsets = [8, 0], sizes = [2, 64], strides = [1, 1]} : vector<16x64xf32> to vector<2x64xf32>
    %cst_86 = arith.constant dense<0.000000e+00> : vector<2x64xf32>
    %202 = tpu.matmul %199, %54, %cst_86 {dimension_numbers = #tpu.dot_dimension_numbers<[1], [0], [0], [1], [0, 0, 1, 1], [], []>} : vector<2x64xf32>, vector<64x64xf32>, vector<2x64xf32> -> vector<2x64xf32>
    %203 = arith.addf %201, %202 : vector<2x64xf32>
    %204 = vector.extract_strided_slice %38 {offsets = [8, 0], sizes = [2, 64], strides = [1, 1]} : vector<16x64xf32> to vector<2x64xf32>
    %cst_87 = arith.constant dense<0.000000e+00> : vector<2x64xf32>
    %205 = tpu.matmul %199, %56, %cst_87 {dimension_numbers = #tpu.dot_dimension_numbers<[1], [0], [0], [1], [0, 0, 1, 1], [], []>} : vector<2x64xf32>, vector<64x64xf32>, vector<2x64xf32> -> vector<2x64xf32>
    %206 = arith.addf %204, %205 : vector<2x64xf32>
    %207 = vector.extract_strided_slice %45 {offsets = [8, 0], sizes = [2, 64], strides = [1, 1]} : vector<16x64xf32> to vector<2x64xf32>
    %cst_88 = arith.constant dense<0.000000e+00> : vector<2x64xf32>
    %208 = tpu.matmul %199, %58, %cst_88 {dimension_numbers = #tpu.dot_dimension_numbers<[1], [0], [0], [1], [0, 0, 1, 1], [], []>} : vector<2x64xf32>, vector<64x64xf32>, vector<2x64xf32> -> vector<2x64xf32>
    %209 = arith.addf %207, %208 : vector<2x64xf32>
    %210 = vector.extract_strided_slice %52 {offsets = [8, 0], sizes = [2, 64], strides = [1, 1]} : vector<16x64xf32> to vector<2x64xf32>
    %cst_89 = arith.constant dense<0.000000e+00> : vector<2x64xf32>
    %211 = tpu.matmul %199, %60, %cst_89 {dimension_numbers = #tpu.dot_dimension_numbers<[1], [0], [0], [1], [0, 0, 1, 1], [], []>} : vector<2x64xf32>, vector<64x64xf32>, vector<2x64xf32> -> vector<2x64xf32>
    %212 = arith.addf %210, %211 : vector<2x64xf32>
    %213 = arith.negf %206 : vector<2x64xf32>
    %214 = math.exp %213 : vector<2x64xf32>
    %cst_90 = arith.constant 1.000000e+00 : f32
    %215 = vector.broadcast %cst_90 : f32 to vector<2x64xf32>
    %216 = arith.addf %215, %214 : vector<2x64xf32>
    %217 = arith.divf %215, %216 : vector<2x64xf32>
    %218 = arith.mulf %217, %192 : vector<2x64xf32>
    %219 = arith.negf %203 : vector<2x64xf32>
    %220 = math.exp %219 : vector<2x64xf32>
    %cst_91 = arith.constant 1.000000e+00 : f32
    %221 = vector.broadcast %cst_91 : f32 to vector<2x64xf32>
    %222 = arith.addf %221, %220 : vector<2x64xf32>
    %223 = arith.divf %221, %222 : vector<2x64xf32>
    %224 = math.tanh %209 : vector<2x64xf32>
    %225 = arith.mulf %223, %224 : vector<2x64xf32>
    %226 = arith.addf %218, %225 : vector<2x64xf32>
    %227 = arith.negf %212 : vector<2x64xf32>
    %228 = math.exp %227 : vector<2x64xf32>
    %cst_92 = arith.constant 1.000000e+00 : f32
    %229 = vector.broadcast %cst_92 : f32 to vector<2x64xf32>
    %230 = arith.addf %229, %228 : vector<2x64xf32>
    %231 = arith.divf %229, %230 : vector<2x64xf32>
    %232 = math.tanh %226 : vector<2x64xf32>
    %233 = arith.mulf %231, %232 : vector<2x64xf32>
    %c8 = arith.constant 8 : index
    %c0_93 = arith.constant 0 : index
    %234 = vector.load %arg23[%c8, %c0_93] : memref<16x64xf32, #tpu.memory_space<vmem>>, vector<2x64xf32>
    tpu.vector_store %arg23[%c8, %c0_93], %233 {strides = array<i32>} : memref<16x64xf32, #tpu.memory_space<vmem>>, vector<2x64xf32>,
    %235 = vector.extract_strided_slice %31 {offsets = [10, 0], sizes = [2, 64], strides = [1, 1]} : vector<16x64xf32> to vector<2x64xf32>
    %cst_94 = arith.constant dense<0.000000e+00> : vector<2x64xf32>
    %236 = tpu.matmul %233, %54, %cst_94 {dimension_numbers = #tpu.dot_dimension_numbers<[1], [0], [0], [1], [0, 0, 1, 1], [], []>} : vector<2x64xf32>, vector<64x64xf32>, vector<2x64xf32> -> vector<2x64xf32>
    %237 = arith.addf %235, %236 : vector<2x64xf32>
    %238 = vector.extract_strided_slice %38 {offsets = [10, 0], sizes = [2, 64], strides = [1, 1]} : vector<16x64xf32> to vector<2x64xf32>
    %cst_95 = arith.constant dense<0.000000e+00> : vector<2x64xf32>
    %239 = tpu.matmul %233, %56, %cst_95 {dimension_numbers = #tpu.dot_dimension_numbers<[1], [0], [0], [1], [0, 0, 1, 1], [], []>} : vector<2x64xf32>, vector<64x64xf32>, vector<2x64xf32> -> vector<2x64xf32>
    %240 = arith.addf %238, %239 : vector<2x64xf32>
    %241 = vector.extract_strided_slice %45 {offsets = [10, 0], sizes = [2, 64], strides = [1, 1]} : vector<16x64xf32> to vector<2x64xf32>
    %cst_96 = arith.constant dense<0.000000e+00> : vector<2x64xf32>
    %242 = tpu.matmul %233, %58, %cst_96 {dimension_numbers = #tpu.dot_dimension_numbers<[1], [0], [0], [1], [0, 0, 1, 1], [], []>} : vector<2x64xf32>, vector<64x64xf32>, vector<2x64xf32> -> vector<2x64xf32>
    %243 = arith.addf %241, %242 : vector<2x64xf32>
    %244 = vector.extract_strided_slice %52 {offsets = [10, 0], sizes = [2, 64], strides = [1, 1]} : vector<16x64xf32> to vector<2x64xf32>
    %cst_97 = arith.constant dense<0.000000e+00> : vector<2x64xf32>
    %245 = tpu.matmul %233, %60, %cst_97 {dimension_numbers = #tpu.dot_dimension_numbers<[1], [0], [0], [1], [0, 0, 1, 1], [], []>} : vector<2x64xf32>, vector<64x64xf32>, vector<2x64xf32> -> vector<2x64xf32>
    %246 = arith.addf %244, %245 : vector<2x64xf32>
    %247 = arith.negf %240 : vector<2x64xf32>
    %248 = math.exp %247 : vector<2x64xf32>
    %cst_98 = arith.constant 1.000000e+00 : f32
    %249 = vector.broadcast %cst_98 : f32 to vector<2x64xf32>
    %250 = arith.addf %249, %248 : vector<2x64xf32>
    %251 = arith.divf %249, %250 : vector<2x64xf32>
    %252 = arith.mulf %251, %226 : vector<2x64xf32>
    %253 = arith.negf %237 : vector<2x64xf32>
    %254 = math.exp %253 : vector<2x64xf32>
    %cst_99 = arith.constant 1.000000e+00 : f32
    %255 = vector.broadcast %cst_99 : f32 to vector<2x64xf32>
    %256 = arith.addf %255, %254 : vector<2x64xf32>
    %257 = arith.divf %255, %256 : vector<2x64xf32>
    %258 = math.tanh %243 : vector<2x64xf32>
    %259 = arith.mulf %257, %258 : vector<2x64xf32>
    %260 = arith.addf %252, %259 : vector<2x64xf32>
    %261 = arith.negf %246 : vector<2x64xf32>
    %262 = math.exp %261 : vector<2x64xf32>
    %cst_100 = arith.constant 1.000000e+00 : f32
    %263 = vector.broadcast %cst_100 : f32 to vector<2x64xf32>
    %264 = arith.addf %263, %262 : vector<2x64xf32>
    %265 = arith.divf %263, %264 : vector<2x64xf32>
    %266 = math.tanh %260 : vector<2x64xf32>
    %267 = arith.mulf %265, %266 : vector<2x64xf32>
    %c10 = arith.constant 10 : index
    %c0_101 = arith.constant 0 : index
    %268 = vector.load %arg23[%c10, %c0_101] : memref<16x64xf32, #tpu.memory_space<vmem>>, vector<2x64xf32>
    tpu.vector_store %arg23[%c10, %c0_101], %267 {strides = array<i32>} : memref<16x64xf32, #tpu.memory_space<vmem>>, vector<2x64xf32>,
    %269 = vector.extract_strided_slice %31 {offsets = [12, 0], sizes = [2, 64], strides = [1, 1]} : vector<16x64xf32> to vector<2x64xf32>
    %cst_102 = arith.constant dense<0.000000e+00> : vector<2x64xf32>
    %270 = tpu.matmul %267, %54, %cst_102 {dimension_numbers = #tpu.dot_dimension_numbers<[1], [0], [0], [1], [0, 0, 1, 1], [], []>} : vector<2x64xf32>, vector<64x64xf32>, vector<2x64xf32> -> vector<2x64xf32>
    %271 = arith.addf %269, %270 : vector<2x64xf32>
    %272 = vector.extract_strided_slice %38 {offsets = [12, 0], sizes = [2, 64], strides = [1, 1]} : vector<16x64xf32> to vector<2x64xf32>
    %cst_103 = arith.constant dense<0.000000e+00> : vector<2x64xf32>
    %273 = tpu.matmul %267, %56, %cst_103 {dimension_numbers = #tpu.dot_dimension_numbers<[1], [0], [0], [1], [0, 0, 1, 1], [], []>} : vector<2x64xf32>, vector<64x64xf32>, vector<2x64xf32> -> vector<2x64xf32>
    %274 = arith.addf %272, %273 : vector<2x64xf32>
    %275 = vector.extract_strided_slice %45 {offsets = [12, 0], sizes = [2, 64], strides = [1, 1]} : vector<16x64xf32> to vector<2x64xf32>
    %cst_104 = arith.constant dense<0.000000e+00> : vector<2x64xf32>
    %276 = tpu.matmul %267, %58, %cst_104 {dimension_numbers = #tpu.dot_dimension_numbers<[1], [0], [0], [1], [0, 0, 1, 1], [], []>} : vector<2x64xf32>, vector<64x64xf32>, vector<2x64xf32> -> vector<2x64xf32>
    %277 = arith.addf %275, %276 : vector<2x64xf32>
    %278 = vector.extract_strided_slice %52 {offsets = [12, 0], sizes = [2, 64], strides = [1, 1]} : vector<16x64xf32> to vector<2x64xf32>
    %cst_105 = arith.constant dense<0.000000e+00> : vector<2x64xf32>
    %279 = tpu.matmul %267, %60, %cst_105 {dimension_numbers = #tpu.dot_dimension_numbers<[1], [0], [0], [1], [0, 0, 1, 1], [], []>} : vector<2x64xf32>, vector<64x64xf32>, vector<2x64xf32> -> vector<2x64xf32>
    %280 = arith.addf %278, %279 : vector<2x64xf32>
    %281 = arith.negf %274 : vector<2x64xf32>
    %282 = math.exp %281 : vector<2x64xf32>
    %cst_106 = arith.constant 1.000000e+00 : f32
    %283 = vector.broadcast %cst_106 : f32 to vector<2x64xf32>
    %284 = arith.addf %283, %282 : vector<2x64xf32>
    %285 = arith.divf %283, %284 : vector<2x64xf32>
    %286 = arith.mulf %285, %260 : vector<2x64xf32>
    %287 = arith.negf %271 : vector<2x64xf32>
    %288 = math.exp %287 : vector<2x64xf32>
    %cst_107 = arith.constant 1.000000e+00 : f32
    %289 = vector.broadcast %cst_107 : f32 to vector<2x64xf32>
    %290 = arith.addf %289, %288 : vector<2x64xf32>
    %291 = arith.divf %289, %290 : vector<2x64xf32>
    %292 = math.tanh %277 : vector<2x64xf32>
    %293 = arith.mulf %291, %292 : vector<2x64xf32>
    %294 = arith.addf %286, %293 : vector<2x64xf32>
    %295 = arith.negf %280 : vector<2x64xf32>
    %296 = math.exp %295 : vector<2x64xf32>
    %cst_108 = arith.constant 1.000000e+00 : f32
    %297 = vector.broadcast %cst_108 : f32 to vector<2x64xf32>
    %298 = arith.addf %297, %296 : vector<2x64xf32>
    %299 = arith.divf %297, %298 : vector<2x64xf32>
    %300 = math.tanh %294 : vector<2x64xf32>
    %301 = arith.mulf %299, %300 : vector<2x64xf32>
    %c12 = arith.constant 12 : index
    %c0_109 = arith.constant 0 : index
    %302 = vector.load %arg23[%c12, %c0_109] : memref<16x64xf32, #tpu.memory_space<vmem>>, vector<2x64xf32>
    tpu.vector_store %arg23[%c12, %c0_109], %301 {strides = array<i32>} : memref<16x64xf32, #tpu.memory_space<vmem>>, vector<2x64xf32>,
    %303 = vector.extract_strided_slice %31 {offsets = [14, 0], sizes = [2, 64], strides = [1, 1]} : vector<16x64xf32> to vector<2x64xf32>
    %cst_110 = arith.constant dense<0.000000e+00> : vector<2x64xf32>
    %304 = tpu.matmul %301, %54, %cst_110 {dimension_numbers = #tpu.dot_dimension_numbers<[1], [0], [0], [1], [0, 0, 1, 1], [], []>} : vector<2x64xf32>, vector<64x64xf32>, vector<2x64xf32> -> vector<2x64xf32>
    %305 = arith.addf %303, %304 : vector<2x64xf32>
    %306 = vector.extract_strided_slice %38 {offsets = [14, 0], sizes = [2, 64], strides = [1, 1]} : vector<16x64xf32> to vector<2x64xf32>
    %cst_111 = arith.constant dense<0.000000e+00> : vector<2x64xf32>
    %307 = tpu.matmul %301, %56, %cst_111 {dimension_numbers = #tpu.dot_dimension_numbers<[1], [0], [0], [1], [0, 0, 1, 1], [], []>} : vector<2x64xf32>, vector<64x64xf32>, vector<2x64xf32> -> vector<2x64xf32>
    %308 = arith.addf %306, %307 : vector<2x64xf32>
    %309 = vector.extract_strided_slice %45 {offsets = [14, 0], sizes = [2, 64], strides = [1, 1]} : vector<16x64xf32> to vector<2x64xf32>
    %cst_112 = arith.constant dense<0.000000e+00> : vector<2x64xf32>
    %310 = tpu.matmul %301, %58, %cst_112 {dimension_numbers = #tpu.dot_dimension_numbers<[1], [0], [0], [1], [0, 0, 1, 1], [], []>} : vector<2x64xf32>, vector<64x64xf32>, vector<2x64xf32> -> vector<2x64xf32>
    %311 = arith.addf %309, %310 : vector<2x64xf32>
    %312 = vector.extract_strided_slice %52 {offsets = [14, 0], sizes = [2, 64], strides = [1, 1]} : vector<16x64xf32> to vector<2x64xf32>
    %cst_113 = arith.constant dense<0.000000e+00> : vector<2x64xf32>
    %313 = tpu.matmul %301, %60, %cst_113 {dimension_numbers = #tpu.dot_dimension_numbers<[1], [0], [0], [1], [0, 0, 1, 1], [], []>} : vector<2x64xf32>, vector<64x64xf32>, vector<2x64xf32> -> vector<2x64xf32>
    %314 = arith.addf %312, %313 : vector<2x64xf32>
    %315 = arith.negf %308 : vector<2x64xf32>
    %316 = math.exp %315 : vector<2x64xf32>
    %cst_114 = arith.constant 1.000000e+00 : f32
    %317 = vector.broadcast %cst_114 : f32 to vector<2x64xf32>
    %318 = arith.addf %317, %316 : vector<2x64xf32>
    %319 = arith.divf %317, %318 : vector<2x64xf32>
    %320 = arith.mulf %319, %294 : vector<2x64xf32>
    %321 = arith.negf %305 : vector<2x64xf32>
    %322 = math.exp %321 : vector<2x64xf32>
    %cst_115 = arith.constant 1.000000e+00 : f32
    %323 = vector.broadcast %cst_115 : f32 to vector<2x64xf32>
    %324 = arith.addf %323, %322 : vector<2x64xf32>
    %325 = arith.divf %323, %324 : vector<2x64xf32>
    %326 = math.tanh %311 : vector<2x64xf32>
    %327 = arith.mulf %325, %326 : vector<2x64xf32>
    %328 = arith.addf %320, %327 : vector<2x64xf32>
    %329 = arith.negf %314 : vector<2x64xf32>
    %330 = math.exp %329 : vector<2x64xf32>
    %cst_116 = arith.constant 1.000000e+00 : f32
    %331 = vector.broadcast %cst_116 : f32 to vector<2x64xf32>
    %332 = arith.addf %331, %330 : vector<2x64xf32>
    %333 = arith.divf %331, %332 : vector<2x64xf32>
    %334 = math.tanh %328 : vector<2x64xf32>
    %335 = arith.mulf %333, %334 : vector<2x64xf32>
    %c14 = arith.constant 14 : index
    %c0_117 = arith.constant 0 : index
    %336 = vector.load %arg23[%c14, %c0_117] : memref<16x64xf32, #tpu.memory_space<vmem>>, vector<2x64xf32>
    tpu.vector_store %arg23[%c14, %c0_117], %335 {strides = array<i32>} : memref<16x64xf32, #tpu.memory_space<vmem>>, vector<2x64xf32>,
    %c0_118 = arith.constant 0 : index
    %c0_119 = arith.constant 0 : index
    %c0_120 = arith.constant 0 : index
    %337 = vector.load %arg21[%c0_118, %c0_119, %c0_120] : memref<3x2x64xf32, #tpu.memory_space<vmem>>, vector<1x2x64xf32>
    %338 = vector.shape_cast %337 : vector<1x2x64xf32> to vector<2x64xf32>
    %339 = vector.shape_cast %335 : vector<2x64xf32> to vector<1x2x64xf32>
    tpu.vector_store %arg21[%c0_118, %c0_119, %c0_120], %339 {strides = array<i32>} : memref<3x2x64xf32, #tpu.memory_space<vmem>>, vector<1x2x64xf32>,
    %c0_121 = arith.constant 0 : index
    %c0_122 = arith.constant 0 : index
    %c0_123 = arith.constant 0 : index
    %340 = vector.load %arg22[%c0_121, %c0_122, %c0_123] : memref<3x2x64xf32, #tpu.memory_space<vmem>>, vector<1x2x64xf32>
    %341 = vector.shape_cast %340 : vector<1x2x64xf32> to vector<2x64xf32>
    %342 = vector.shape_cast %328 : vector<2x64xf32> to vector<1x2x64xf32>
    tpu.vector_store %arg22[%c0_121, %c0_122, %c0_123], %342 {strides = array<i32>} : memref<3x2x64xf32, #tpu.memory_space<vmem>>, vector<1x2x64xf32>,
    %c0_124 = arith.constant 0 : index
    %c0_125 = arith.constant 0 : index
    %343 = vector.load %arg23[%c0_124, %c0_125] : memref<16x64xf32, #tpu.memory_space<vmem>>, vector<16x64xf32>
    %c0_126 = arith.constant 0 : index
    %c0_127 = arith.constant 0 : index
    %c0_128 = arith.constant 0 : index
    %344 = vector.load %arg6[%c0_126, %c0_127, %c0_128] : memref<4x64x64xf32, #tpu.memory_space<vmem>>, vector<1x64x64xf32>
    %345 = vector.shape_cast %344 : vector<1x64x64xf32> to vector<64x64xf32>
    %cst_129 = arith.constant dense<0.000000e+00> : vector<16x64xf32>
    %346 = tpu.matmul %343, %345, %cst_129 {dimension_numbers = #tpu.dot_dimension_numbers<[1], [0], [0], [1], [0, 0, 1, 1], [], []>} : vector<16x64xf32>, vector<64x64xf32>, vector<16x64xf32> -> vector<16x64xf32>
    %c0_130 = arith.constant 0 : index
    %c0_131 = arith.constant 0 : index
    %c0_132 = arith.constant 0 : index
    %347 = vector.load %arg8[%c0_130, %c0_131, %c0_132] : memref<4x1x64xf32, #tpu.memory_space<vmem>>, vector<1x1x64xf32>
    %348 = vector.shape_cast %347 : vector<1x1x64xf32> to vector<1x64xf32>
    %349 = vector.broadcast %348 : vector<1x64xf32> to vector<16x64xf32>
    %350 = arith.addf %346, %349 : vector<16x64xf32>
    %c1_133 = arith.constant 1 : index
    %c0_134 = arith.constant 0 : index
    %c0_135 = arith.constant 0 : index
    %351 = vector.load %arg6[%c1_133, %c0_134, %c0_135] : memref<4x64x64xf32, #tpu.memory_space<vmem>>, vector<1x64x64xf32>
    %352 = vector.shape_cast %351 : vector<1x64x64xf32> to vector<64x64xf32>
    %cst_136 = arith.constant dense<0.000000e+00> : vector<16x64xf32>
    %353 = tpu.matmul %343, %352, %cst_136 {dimension_numbers = #tpu.dot_dimension_numbers<[1], [0], [0], [1], [0, 0, 1, 1], [], []>} : vector<16x64xf32>, vector<64x64xf32>, vector<16x64xf32> -> vector<16x64xf32>
    %c1_137 = arith.constant 1 : index
    %c0_138 = arith.constant 0 : index
    %c0_139 = arith.constant 0 : index
    %354 = vector.load %arg8[%c1_137, %c0_138, %c0_139] : memref<4x1x64xf32, #tpu.memory_space<vmem>>, vector<1x1x64xf32>
    %355 = vector.shape_cast %354 : vector<1x1x64xf32> to vector<1x64xf32>
    %356 = vector.broadcast %355 : vector<1x64xf32> to vector<16x64xf32>
    %357 = arith.addf %353, %356 : vector<16x64xf32>
    %c2_140 = arith.constant 2 : index
    %c0_141 = arith.constant 0 : index
    %c0_142 = arith.constant 0 : index
    %358 = vector.load %arg6[%c2_140, %c0_141, %c0_142] : memref<4x64x64xf32, #tpu.memory_space<vmem>>, vector<1x64x64xf32>
    %359 = vector.shape_cast %358 : vector<1x64x64xf32> to vector<64x64xf32>
    %cst_143 = arith.constant dense<0.000000e+00> : vector<16x64xf32>
    %360 = tpu.matmul %343, %359, %cst_143 {dimension_numbers = #tpu.dot_dimension_numbers<[1], [0], [0], [1], [0, 0, 1, 1], [], []>} : vector<16x64xf32>, vector<64x64xf32>, vector<16x64xf32> -> vector<16x64xf32>
    %c2_144 = arith.constant 2 : index
    %c0_145 = arith.constant 0 : index
    %c0_146 = arith.constant 0 : index
    %361 = vector.load %arg8[%c2_144, %c0_145, %c0_146] : memref<4x1x64xf32, #tpu.memory_space<vmem>>, vector<1x1x64xf32>
    %362 = vector.shape_cast %361 : vector<1x1x64xf32> to vector<1x64xf32>
    %363 = vector.broadcast %362 : vector<1x64xf32> to vector<16x64xf32>
    %364 = arith.addf %360, %363 : vector<16x64xf32>
    %c3_147 = arith.constant 3 : index
    %c0_148 = arith.constant 0 : index
    %c0_149 = arith.constant 0 : index
    %365 = vector.load %arg6[%c3_147, %c0_148, %c0_149] : memref<4x64x64xf32, #tpu.memory_space<vmem>>, vector<1x64x64xf32>
    %366 = vector.shape_cast %365 : vector<1x64x64xf32> to vector<64x64xf32>
    %cst_150 = arith.constant dense<0.000000e+00> : vector<16x64xf32>
    %367 = tpu.matmul %343, %366, %cst_150 {dimension_numbers = #tpu.dot_dimension_numbers<[1], [0], [0], [1], [0, 0, 1, 1], [], []>} : vector<16x64xf32>, vector<64x64xf32>, vector<16x64xf32> -> vector<16x64xf32>
    %c3_151 = arith.constant 3 : index
    %c0_152 = arith.constant 0 : index
    %c0_153 = arith.constant 0 : index
    %368 = vector.load %arg8[%c3_151, %c0_152, %c0_153] : memref<4x1x64xf32, #tpu.memory_space<vmem>>, vector<1x1x64xf32>
    %369 = vector.shape_cast %368 : vector<1x1x64xf32> to vector<1x64xf32>
    %370 = vector.broadcast %369 : vector<1x64xf32> to vector<16x64xf32>
    %371 = arith.addf %367, %370 : vector<16x64xf32>
    %c0_154 = arith.constant 0 : index
    %c0_155 = arith.constant 0 : index
    %c0_156 = arith.constant 0 : index
    %372 = vector.load %arg7[%c0_154, %c0_155, %c0_156] : memref<4x64x64xf32, #tpu.memory_space<vmem>>, vector<1x64x64xf32>
    %373 = vector.shape_cast %372 : vector<1x64x64xf32> to vector<64x64xf32>
    %c1_157 = arith.constant 1 : index
    %c0_158 = arith.constant 0 : index
    %c0_159 = arith.constant 0 : index
    %374 = vector.load %arg7[%c1_157, %c0_158, %c0_159] : memref<4x64x64xf32, #tpu.memory_space<vmem>>, vector<1x64x64xf32>
    %375 = vector.shape_cast %374 : vector<1x64x64xf32> to vector<64x64xf32>
    %c2_160 = arith.constant 2 : index
    %c0_161 = arith.constant 0 : index
    %c0_162 = arith.constant 0 : index
    %376 = vector.load %arg7[%c2_160, %c0_161, %c0_162] : memref<4x64x64xf32, #tpu.memory_space<vmem>>, vector<1x64x64xf32>
    %377 = vector.shape_cast %376 : vector<1x64x64xf32> to vector<64x64xf32>
    %c3_163 = arith.constant 3 : index
    %c0_164 = arith.constant 0 : index
    %c0_165 = arith.constant 0 : index
    %378 = vector.load %arg7[%c3_163, %c0_164, %c0_165] : memref<4x64x64xf32, #tpu.memory_space<vmem>>, vector<1x64x64xf32>
    %379 = vector.shape_cast %378 : vector<1x64x64xf32> to vector<64x64xf32>
    %c1_166 = arith.constant 1 : index
    %c0_167 = arith.constant 0 : index
    %c0_168 = arith.constant 0 : index
    %380 = vector.load %arg12[%c1_166, %c0_167, %c0_168] : memref<3x2x64xf32, #tpu.memory_space<vmem>>, vector<1x2x64xf32>
    %381 = vector.shape_cast %380 : vector<1x2x64xf32> to vector<2x64xf32>
    %c1_169 = arith.constant 1 : index
    %c0_170 = arith.constant 0 : index
    %c0_171 = arith.constant 0 : index
    %382 = vector.load %arg13[%c1_169, %c0_170, %c0_171] : memref<3x2x64xf32, #tpu.memory_space<vmem>>, vector<1x2x64xf32>
    %383 = vector.shape_cast %382 : vector<1x2x64xf32> to vector<2x64xf32>
    %384 = vector.extract_strided_slice %350 {offsets = [0, 0], sizes = [2, 64], strides = [1, 1]} : vector<16x64xf32> to vector<2x64xf32>
    %cst_172 = arith.constant dense<0.000000e+00> : vector<2x64xf32>
    %385 = tpu.matmul %381, %373, %cst_172 {dimension_numbers = #tpu.dot_dimension_numbers<[1], [0], [0], [1], [0, 0, 1, 1], [], []>} : vector<2x64xf32>, vector<64x64xf32>, vector<2x64xf32> -> vector<2x64xf32>
    %386 = arith.addf %384, %385 : vector<2x64xf32>
    %387 = vector.extract_strided_slice %357 {offsets = [0, 0], sizes = [2, 64], strides = [1, 1]} : vector<16x64xf32> to vector<2x64xf32>
    %cst_173 = arith.constant dense<0.000000e+00> : vector<2x64xf32>
    %388 = tpu.matmul %381, %375, %cst_173 {dimension_numbers = #tpu.dot_dimension_numbers<[1], [0], [0], [1], [0, 0, 1, 1], [], []>} : vector<2x64xf32>, vector<64x64xf32>, vector<2x64xf32> -> vector<2x64xf32>
    %389 = arith.addf %387, %388 : vector<2x64xf32>
    %390 = vector.extract_strided_slice %364 {offsets = [0, 0], sizes = [2, 64], strides = [1, 1]} : vector<16x64xf32> to vector<2x64xf32>
    %cst_174 = arith.constant dense<0.000000e+00> : vector<2x64xf32>
    %391 = tpu.matmul %381, %377, %cst_174 {dimension_numbers = #tpu.dot_dimension_numbers<[1], [0], [0], [1], [0, 0, 1, 1], [], []>} : vector<2x64xf32>, vector<64x64xf32>, vector<2x64xf32> -> vector<2x64xf32>
    %392 = arith.addf %390, %391 : vector<2x64xf32>
    %393 = vector.extract_strided_slice %371 {offsets = [0, 0], sizes = [2, 64], strides = [1, 1]} : vector<16x64xf32> to vector<2x64xf32>
    %cst_175 = arith.constant dense<0.000000e+00> : vector<2x64xf32>
    %394 = tpu.matmul %381, %379, %cst_175 {dimension_numbers = #tpu.dot_dimension_numbers<[1], [0], [0], [1], [0, 0, 1, 1], [], []>} : vector<2x64xf32>, vector<64x64xf32>, vector<2x64xf32> -> vector<2x64xf32>
    %395 = arith.addf %393, %394 : vector<2x64xf32>
    %396 = arith.negf %389 : vector<2x64xf32>
    %397 = math.exp %396 : vector<2x64xf32>
    %cst_176 = arith.constant 1.000000e+00 : f32
    %398 = vector.broadcast %cst_176 : f32 to vector<2x64xf32>
    %399 = arith.addf %398, %397 : vector<2x64xf32>
    %400 = arith.divf %398, %399 : vector<2x64xf32>
    %401 = arith.mulf %400, %383 : vector<2x64xf32>
    %402 = arith.negf %386 : vector<2x64xf32>
    %403 = math.exp %402 : vector<2x64xf32>
    %cst_177 = arith.constant 1.000000e+00 : f32
    %404 = vector.broadcast %cst_177 : f32 to vector<2x64xf32>
    %405 = arith.addf %404, %403 : vector<2x64xf32>
    %406 = arith.divf %404, %405 : vector<2x64xf32>
    %407 = math.tanh %392 : vector<2x64xf32>
    %408 = arith.mulf %406, %407 : vector<2x64xf32>
    %409 = arith.addf %401, %408 : vector<2x64xf32>
    %410 = arith.negf %395 : vector<2x64xf32>
    %411 = math.exp %410 : vector<2x64xf32>
    %cst_178 = arith.constant 1.000000e+00 : f32
    %412 = vector.broadcast %cst_178 : f32 to vector<2x64xf32>
    %413 = arith.addf %412, %411 : vector<2x64xf32>
    %414 = arith.divf %412, %413 : vector<2x64xf32>
    %415 = math.tanh %409 : vector<2x64xf32>
    %416 = arith.mulf %414, %415 : vector<2x64xf32>
    %c0_179 = arith.constant 0 : index
    %c0_180 = arith.constant 0 : index
    %417 = vector.load %arg23[%c0_179, %c0_180] : memref<16x64xf32, #tpu.memory_space<vmem>>, vector<2x64xf32>
    tpu.vector_store %arg23[%c0_179, %c0_180], %416 {strides = array<i32>} : memref<16x64xf32, #tpu.memory_space<vmem>>, vector<2x64xf32>,
    %418 = vector.extract_strided_slice %350 {offsets = [2, 0], sizes = [2, 64], strides = [1, 1]} : vector<16x64xf32> to vector<2x64xf32>
    %cst_181 = arith.constant dense<0.000000e+00> : vector<2x64xf32>
    %419 = tpu.matmul %416, %373, %cst_181 {dimension_numbers = #tpu.dot_dimension_numbers<[1], [0], [0], [1], [0, 0, 1, 1], [], []>} : vector<2x64xf32>, vector<64x64xf32>, vector<2x64xf32> -> vector<2x64xf32>
    %420 = arith.addf %418, %419 : vector<2x64xf32>
    %421 = vector.extract_strided_slice %357 {offsets = [2, 0], sizes = [2, 64], strides = [1, 1]} : vector<16x64xf32> to vector<2x64xf32>
    %cst_182 = arith.constant dense<0.000000e+00> : vector<2x64xf32>
    %422 = tpu.matmul %416, %375, %cst_182 {dimension_numbers = #tpu.dot_dimension_numbers<[1], [0], [0], [1], [0, 0, 1, 1], [], []>} : vector<2x64xf32>, vector<64x64xf32>, vector<2x64xf32> -> vector<2x64xf32>
    %423 = arith.addf %421, %422 : vector<2x64xf32>
    %424 = vector.extract_strided_slice %364 {offsets = [2, 0], sizes = [2, 64], strides = [1, 1]} : vector<16x64xf32> to vector<2x64xf32>
    %cst_183 = arith.constant dense<0.000000e+00> : vector<2x64xf32>
    %425 = tpu.matmul %416, %377, %cst_183 {dimension_numbers = #tpu.dot_dimension_numbers<[1], [0], [0], [1], [0, 0, 1, 1], [], []>} : vector<2x64xf32>, vector<64x64xf32>, vector<2x64xf32> -> vector<2x64xf32>
    %426 = arith.addf %424, %425 : vector<2x64xf32>
    %427 = vector.extract_strided_slice %371 {offsets = [2, 0], sizes = [2, 64], strides = [1, 1]} : vector<16x64xf32> to vector<2x64xf32>
    %cst_184 = arith.constant dense<0.000000e+00> : vector<2x64xf32>
    %428 = tpu.matmul %416, %379, %cst_184 {dimension_numbers = #tpu.dot_dimension_numbers<[1], [0], [0], [1], [0, 0, 1, 1], [], []>} : vector<2x64xf32>, vector<64x64xf32>, vector<2x64xf32> -> vector<2x64xf32>
    %429 = arith.addf %427, %428 : vector<2x64xf32>
    %430 = arith.negf %423 : vector<2x64xf32>
    %431 = math.exp %430 : vector<2x64xf32>
    %cst_185 = arith.constant 1.000000e+00 : f32
    %432 = vector.broadcast %cst_185 : f32 to vector<2x64xf32>
    %433 = arith.addf %432, %431 : vector<2x64xf32>
    %434 = arith.divf %432, %433 : vector<2x64xf32>
    %435 = arith.mulf %434, %409 : vector<2x64xf32>
    %436 = arith.negf %420 : vector<2x64xf32>
    %437 = math.exp %436 : vector<2x64xf32>
    %cst_186 = arith.constant 1.000000e+00 : f32
    %438 = vector.broadcast %cst_186 : f32 to vector<2x64xf32>
    %439 = arith.addf %438, %437 : vector<2x64xf32>
    %440 = arith.divf %438, %439 : vector<2x64xf32>
    %441 = math.tanh %426 : vector<2x64xf32>
    %442 = arith.mulf %440, %441 : vector<2x64xf32>
    %443 = arith.addf %435, %442 : vector<2x64xf32>
    %444 = arith.negf %429 : vector<2x64xf32>
    %445 = math.exp %444 : vector<2x64xf32>
    %cst_187 = arith.constant 1.000000e+00 : f32
    %446 = vector.broadcast %cst_187 : f32 to vector<2x64xf32>
    %447 = arith.addf %446, %445 : vector<2x64xf32>
    %448 = arith.divf %446, %447 : vector<2x64xf32>
    %449 = math.tanh %443 : vector<2x64xf32>
    %450 = arith.mulf %448, %449 : vector<2x64xf32>
    %c2_188 = arith.constant 2 : index
    %c0_189 = arith.constant 0 : index
    %451 = vector.load %arg23[%c2_188, %c0_189] : memref<16x64xf32, #tpu.memory_space<vmem>>, vector<2x64xf32>
    tpu.vector_store %arg23[%c2_188, %c0_189], %450 {strides = array<i32>} : memref<16x64xf32, #tpu.memory_space<vmem>>, vector<2x64xf32>,
    %452 = vector.extract_strided_slice %350 {offsets = [4, 0], sizes = [2, 64], strides = [1, 1]} : vector<16x64xf32> to vector<2x64xf32>
    %cst_190 = arith.constant dense<0.000000e+00> : vector<2x64xf32>
    %453 = tpu.matmul %450, %373, %cst_190 {dimension_numbers = #tpu.dot_dimension_numbers<[1], [0], [0], [1], [0, 0, 1, 1], [], []>} : vector<2x64xf32>, vector<64x64xf32>, vector<2x64xf32> -> vector<2x64xf32>
    %454 = arith.addf %452, %453 : vector<2x64xf32>
    %455 = vector.extract_strided_slice %357 {offsets = [4, 0], sizes = [2, 64], strides = [1, 1]} : vector<16x64xf32> to vector<2x64xf32>
    %cst_191 = arith.constant dense<0.000000e+00> : vector<2x64xf32>
    %456 = tpu.matmul %450, %375, %cst_191 {dimension_numbers = #tpu.dot_dimension_numbers<[1], [0], [0], [1], [0, 0, 1, 1], [], []>} : vector<2x64xf32>, vector<64x64xf32>, vector<2x64xf32> -> vector<2x64xf32>
    %457 = arith.addf %455, %456 : vector<2x64xf32>
    %458 = vector.extract_strided_slice %364 {offsets = [4, 0], sizes = [2, 64], strides = [1, 1]} : vector<16x64xf32> to vector<2x64xf32>
    %cst_192 = arith.constant dense<0.000000e+00> : vector<2x64xf32>
    %459 = tpu.matmul %450, %377, %cst_192 {dimension_numbers = #tpu.dot_dimension_numbers<[1], [0], [0], [1], [0, 0, 1, 1], [], []>} : vector<2x64xf32>, vector<64x64xf32>, vector<2x64xf32> -> vector<2x64xf32>
    %460 = arith.addf %458, %459 : vector<2x64xf32>
    %461 = vector.extract_strided_slice %371 {offsets = [4, 0], sizes = [2, 64], strides = [1, 1]} : vector<16x64xf32> to vector<2x64xf32>
    %cst_193 = arith.constant dense<0.000000e+00> : vector<2x64xf32>
    %462 = tpu.matmul %450, %379, %cst_193 {dimension_numbers = #tpu.dot_dimension_numbers<[1], [0], [0], [1], [0, 0, 1, 1], [], []>} : vector<2x64xf32>, vector<64x64xf32>, vector<2x64xf32> -> vector<2x64xf32>
    %463 = arith.addf %461, %462 : vector<2x64xf32>
    %464 = arith.negf %457 : vector<2x64xf32>
    %465 = math.exp %464 : vector<2x64xf32>
    %cst_194 = arith.constant 1.000000e+00 : f32
    %466 = vector.broadcast %cst_194 : f32 to vector<2x64xf32>
    %467 = arith.addf %466, %465 : vector<2x64xf32>
    %468 = arith.divf %466, %467 : vector<2x64xf32>
    %469 = arith.mulf %468, %443 : vector<2x64xf32>
    %470 = arith.negf %454 : vector<2x64xf32>
    %471 = math.exp %470 : vector<2x64xf32>
    %cst_195 = arith.constant 1.000000e+00 : f32
    %472 = vector.broadcast %cst_195 : f32 to vector<2x64xf32>
    %473 = arith.addf %472, %471 : vector<2x64xf32>
    %474 = arith.divf %472, %473 : vector<2x64xf32>
    %475 = math.tanh %460 : vector<2x64xf32>
    %476 = arith.mulf %474, %475 : vector<2x64xf32>
    %477 = arith.addf %469, %476 : vector<2x64xf32>
    %478 = arith.negf %463 : vector<2x64xf32>
    %479 = math.exp %478 : vector<2x64xf32>
    %cst_196 = arith.constant 1.000000e+00 : f32
    %480 = vector.broadcast %cst_196 : f32 to vector<2x64xf32>
    %481 = arith.addf %480, %479 : vector<2x64xf32>
    %482 = arith.divf %480, %481 : vector<2x64xf32>
    %483 = math.tanh %477 : vector<2x64xf32>
    %484 = arith.mulf %482, %483 : vector<2x64xf32>
    %c4_197 = arith.constant 4 : index
    %c0_198 = arith.constant 0 : index
    %485 = vector.load %arg23[%c4_197, %c0_198] : memref<16x64xf32, #tpu.memory_space<vmem>>, vector<2x64xf32>
    tpu.vector_store %arg23[%c4_197, %c0_198], %484 {strides = array<i32>} : memref<16x64xf32, #tpu.memory_space<vmem>>, vector<2x64xf32>,
    %486 = vector.extract_strided_slice %350 {offsets = [6, 0], sizes = [2, 64], strides = [1, 1]} : vector<16x64xf32> to vector<2x64xf32>
    %cst_199 = arith.constant dense<0.000000e+00> : vector<2x64xf32>
    %487 = tpu.matmul %484, %373, %cst_199 {dimension_numbers = #tpu.dot_dimension_numbers<[1], [0], [0], [1], [0, 0, 1, 1], [], []>} : vector<2x64xf32>, vector<64x64xf32>, vector<2x64xf32> -> vector<2x64xf32>
    %488 = arith.addf %486, %487 : vector<2x64xf32>
    %489 = vector.extract_strided_slice %357 {offsets = [6, 0], sizes = [2, 64], strides = [1, 1]} : vector<16x64xf32> to vector<2x64xf32>
    %cst_200 = arith.constant dense<0.000000e+00> : vector<2x64xf32>
    %490 = tpu.matmul %484, %375, %cst_200 {dimension_numbers = #tpu.dot_dimension_numbers<[1], [0], [0], [1], [0, 0, 1, 1], [], []>} : vector<2x64xf32>, vector<64x64xf32>, vector<2x64xf32> -> vector<2x64xf32>
    %491 = arith.addf %489, %490 : vector<2x64xf32>
    %492 = vector.extract_strided_slice %364 {offsets = [6, 0], sizes = [2, 64], strides = [1, 1]} : vector<16x64xf32> to vector<2x64xf32>
    %cst_201 = arith.constant dense<0.000000e+00> : vector<2x64xf32>
    %493 = tpu.matmul %484, %377, %cst_201 {dimension_numbers = #tpu.dot_dimension_numbers<[1], [0], [0], [1], [0, 0, 1, 1], [], []>} : vector<2x64xf32>, vector<64x64xf32>, vector<2x64xf32> -> vector<2x64xf32>
    %494 = arith.addf %492, %493 : vector<2x64xf32>
    %495 = vector.extract_strided_slice %371 {offsets = [6, 0], sizes = [2, 64], strides = [1, 1]} : vector<16x64xf32> to vector<2x64xf32>
    %cst_202 = arith.constant dense<0.000000e+00> : vector<2x64xf32>
    %496 = tpu.matmul %484, %379, %cst_202 {dimension_numbers = #tpu.dot_dimension_numbers<[1], [0], [0], [1], [0, 0, 1, 1], [], []>} : vector<2x64xf32>, vector<64x64xf32>, vector<2x64xf32> -> vector<2x64xf32>
    %497 = arith.addf %495, %496 : vector<2x64xf32>
    %498 = arith.negf %491 : vector<2x64xf32>
    %499 = math.exp %498 : vector<2x64xf32>
    %cst_203 = arith.constant 1.000000e+00 : f32
    %500 = vector.broadcast %cst_203 : f32 to vector<2x64xf32>
    %501 = arith.addf %500, %499 : vector<2x64xf32>
    %502 = arith.divf %500, %501 : vector<2x64xf32>
    %503 = arith.mulf %502, %477 : vector<2x64xf32>
    %504 = arith.negf %488 : vector<2x64xf32>
    %505 = math.exp %504 : vector<2x64xf32>
    %cst_204 = arith.constant 1.000000e+00 : f32
    %506 = vector.broadcast %cst_204 : f32 to vector<2x64xf32>
    %507 = arith.addf %506, %505 : vector<2x64xf32>
    %508 = arith.divf %506, %507 : vector<2x64xf32>
    %509 = math.tanh %494 : vector<2x64xf32>
    %510 = arith.mulf %508, %509 : vector<2x64xf32>
    %511 = arith.addf %503, %510 : vector<2x64xf32>
    %512 = arith.negf %497 : vector<2x64xf32>
    %513 = math.exp %512 : vector<2x64xf32>
    %cst_205 = arith.constant 1.000000e+00 : f32
    %514 = vector.broadcast %cst_205 : f32 to vector<2x64xf32>
    %515 = arith.addf %514, %513 : vector<2x64xf32>
    %516 = arith.divf %514, %515 : vector<2x64xf32>
    %517 = math.tanh %511 : vector<2x64xf32>
    %518 = arith.mulf %516, %517 : vector<2x64xf32>
    %c6_206 = arith.constant 6 : index
    %c0_207 = arith.constant 0 : index
    %519 = vector.load %arg23[%c6_206, %c0_207] : memref<16x64xf32, #tpu.memory_space<vmem>>, vector<2x64xf32>
    tpu.vector_store %arg23[%c6_206, %c0_207], %518 {strides = array<i32>} : memref<16x64xf32, #tpu.memory_space<vmem>>, vector<2x64xf32>,
    %520 = vector.extract_strided_slice %350 {offsets = [8, 0], sizes = [2, 64], strides = [1, 1]} : vector<16x64xf32> to vector<2x64xf32>
    %cst_208 = arith.constant dense<0.000000e+00> : vector<2x64xf32>
    %521 = tpu.matmul %518, %373, %cst_208 {dimension_numbers = #tpu.dot_dimension_numbers<[1], [0], [0], [1], [0, 0, 1, 1], [], []>} : vector<2x64xf32>, vector<64x64xf32>, vector<2x64xf32> -> vector<2x64xf32>
    %522 = arith.addf %520, %521 : vector<2x64xf32>
    %523 = vector.extract_strided_slice %357 {offsets = [8, 0], sizes = [2, 64], strides = [1, 1]} : vector<16x64xf32> to vector<2x64xf32>
    %cst_209 = arith.constant dense<0.000000e+00> : vector<2x64xf32>
    %524 = tpu.matmul %518, %375, %cst_209 {dimension_numbers = #tpu.dot_dimension_numbers<[1], [0], [0], [1], [0, 0, 1, 1], [], []>} : vector<2x64xf32>, vector<64x64xf32>, vector<2x64xf32> -> vector<2x64xf32>
    %525 = arith.addf %523, %524 : vector<2x64xf32>
    %526 = vector.extract_strided_slice %364 {offsets = [8, 0], sizes = [2, 64], strides = [1, 1]} : vector<16x64xf32> to vector<2x64xf32>
    %cst_210 = arith.constant dense<0.000000e+00> : vector<2x64xf32>
    %527 = tpu.matmul %518, %377, %cst_210 {dimension_numbers = #tpu.dot_dimension_numbers<[1], [0], [0], [1], [0, 0, 1, 1], [], []>} : vector<2x64xf32>, vector<64x64xf32>, vector<2x64xf32> -> vector<2x64xf32>
    %528 = arith.addf %526, %527 : vector<2x64xf32>
    %529 = vector.extract_strided_slice %371 {offsets = [8, 0], sizes = [2, 64], strides = [1, 1]} : vector<16x64xf32> to vector<2x64xf32>
    %cst_211 = arith.constant dense<0.000000e+00> : vector<2x64xf32>
    %530 = tpu.matmul %518, %379, %cst_211 {dimension_numbers = #tpu.dot_dimension_numbers<[1], [0], [0], [1], [0, 0, 1, 1], [], []>} : vector<2x64xf32>, vector<64x64xf32>, vector<2x64xf32> -> vector<2x64xf32>
    %531 = arith.addf %529, %530 : vector<2x64xf32>
    %532 = arith.negf %525 : vector<2x64xf32>
    %533 = math.exp %532 : vector<2x64xf32>
    %cst_212 = arith.constant 1.000000e+00 : f32
    %534 = vector.broadcast %cst_212 : f32 to vector<2x64xf32>
    %535 = arith.addf %534, %533 : vector<2x64xf32>
    %536 = arith.divf %534, %535 : vector<2x64xf32>
    %537 = arith.mulf %536, %511 : vector<2x64xf32>
    %538 = arith.negf %522 : vector<2x64xf32>
    %539 = math.exp %538 : vector<2x64xf32>
    %cst_213 = arith.constant 1.000000e+00 : f32
    %540 = vector.broadcast %cst_213 : f32 to vector<2x64xf32>
    %541 = arith.addf %540, %539 : vector<2x64xf32>
    %542 = arith.divf %540, %541 : vector<2x64xf32>
    %543 = math.tanh %528 : vector<2x64xf32>
    %544 = arith.mulf %542, %543 : vector<2x64xf32>
    %545 = arith.addf %537, %544 : vector<2x64xf32>
    %546 = arith.negf %531 : vector<2x64xf32>
    %547 = math.exp %546 : vector<2x64xf32>
    %cst_214 = arith.constant 1.000000e+00 : f32
    %548 = vector.broadcast %cst_214 : f32 to vector<2x64xf32>
    %549 = arith.addf %548, %547 : vector<2x64xf32>
    %550 = arith.divf %548, %549 : vector<2x64xf32>
    %551 = math.tanh %545 : vector<2x64xf32>
    %552 = arith.mulf %550, %551 : vector<2x64xf32>
    %c8_215 = arith.constant 8 : index
    %c0_216 = arith.constant 0 : index
    %553 = vector.load %arg23[%c8_215, %c0_216] : memref<16x64xf32, #tpu.memory_space<vmem>>, vector<2x64xf32>
    tpu.vector_store %arg23[%c8_215, %c0_216], %552 {strides = array<i32>} : memref<16x64xf32, #tpu.memory_space<vmem>>, vector<2x64xf32>,
    %554 = vector.extract_strided_slice %350 {offsets = [10, 0], sizes = [2, 64], strides = [1, 1]} : vector<16x64xf32> to vector<2x64xf32>
    %cst_217 = arith.constant dense<0.000000e+00> : vector<2x64xf32>
    %555 = tpu.matmul %552, %373, %cst_217 {dimension_numbers = #tpu.dot_dimension_numbers<[1], [0], [0], [1], [0, 0, 1, 1], [], []>} : vector<2x64xf32>, vector<64x64xf32>, vector<2x64xf32> -> vector<2x64xf32>
    %556 = arith.addf %554, %555 : vector<2x64xf32>
    %557 = vector.extract_strided_slice %357 {offsets = [10, 0], sizes = [2, 64], strides = [1, 1]} : vector<16x64xf32> to vector<2x64xf32>
    %cst_218 = arith.constant dense<0.000000e+00> : vector<2x64xf32>
    %558 = tpu.matmul %552, %375, %cst_218 {dimension_numbers = #tpu.dot_dimension_numbers<[1], [0], [0], [1], [0, 0, 1, 1], [], []>} : vector<2x64xf32>, vector<64x64xf32>, vector<2x64xf32> -> vector<2x64xf32>
    %559 = arith.addf %557, %558 : vector<2x64xf32>
    %560 = vector.extract_strided_slice %364 {offsets = [10, 0], sizes = [2, 64], strides = [1, 1]} : vector<16x64xf32> to vector<2x64xf32>
    %cst_219 = arith.constant dense<0.000000e+00> : vector<2x64xf32>
    %561 = tpu.matmul %552, %377, %cst_219 {dimension_numbers = #tpu.dot_dimension_numbers<[1], [0], [0], [1], [0, 0, 1, 1], [], []>} : vector<2x64xf32>, vector<64x64xf32>, vector<2x64xf32> -> vector<2x64xf32>
    %562 = arith.addf %560, %561 : vector<2x64xf32>
    %563 = vector.extract_strided_slice %371 {offsets = [10, 0], sizes = [2, 64], strides = [1, 1]} : vector<16x64xf32> to vector<2x64xf32>
    %cst_220 = arith.constant dense<0.000000e+00> : vector<2x64xf32>
    %564 = tpu.matmul %552, %379, %cst_220 {dimension_numbers = #tpu.dot_dimension_numbers<[1], [0], [0], [1], [0, 0, 1, 1], [], []>} : vector<2x64xf32>, vector<64x64xf32>, vector<2x64xf32> -> vector<2x64xf32>
    %565 = arith.addf %563, %564 : vector<2x64xf32>
    %566 = arith.negf %559 : vector<2x64xf32>
    %567 = math.exp %566 : vector<2x64xf32>
    %cst_221 = arith.constant 1.000000e+00 : f32
    %568 = vector.broadcast %cst_221 : f32 to vector<2x64xf32>
    %569 = arith.addf %568, %567 : vector<2x64xf32>
    %570 = arith.divf %568, %569 : vector<2x64xf32>
    %571 = arith.mulf %570, %545 : vector<2x64xf32>
    %572 = arith.negf %556 : vector<2x64xf32>
    %573 = math.exp %572 : vector<2x64xf32>
    %cst_222 = arith.constant 1.000000e+00 : f32
    %574 = vector.broadcast %cst_222 : f32 to vector<2x64xf32>
    %575 = arith.addf %574, %573 : vector<2x64xf32>
    %576 = arith.divf %574, %575 : vector<2x64xf32>
    %577 = math.tanh %562 : vector<2x64xf32>
    %578 = arith.mulf %576, %577 : vector<2x64xf32>
    %579 = arith.addf %571, %578 : vector<2x64xf32>
    %580 = arith.negf %565 : vector<2x64xf32>
    %581 = math.exp %580 : vector<2x64xf32>
    %cst_223 = arith.constant 1.000000e+00 : f32
    %582 = vector.broadcast %cst_223 : f32 to vector<2x64xf32>
    %583 = arith.addf %582, %581 : vector<2x64xf32>
    %584 = arith.divf %582, %583 : vector<2x64xf32>
    %585 = math.tanh %579 : vector<2x64xf32>
    %586 = arith.mulf %584, %585 : vector<2x64xf32>
    %c10_224 = arith.constant 10 : index
    %c0_225 = arith.constant 0 : index
    %587 = vector.load %arg23[%c10_224, %c0_225] : memref<16x64xf32, #tpu.memory_space<vmem>>, vector<2x64xf32>
    tpu.vector_store %arg23[%c10_224, %c0_225], %586 {strides = array<i32>} : memref<16x64xf32, #tpu.memory_space<vmem>>, vector<2x64xf32>,
    %588 = vector.extract_strided_slice %350 {offsets = [12, 0], sizes = [2, 64], strides = [1, 1]} : vector<16x64xf32> to vector<2x64xf32>
    %cst_226 = arith.constant dense<0.000000e+00> : vector<2x64xf32>
    %589 = tpu.matmul %586, %373, %cst_226 {dimension_numbers = #tpu.dot_dimension_numbers<[1], [0], [0], [1], [0, 0, 1, 1], [], []>} : vector<2x64xf32>, vector<64x64xf32>, vector<2x64xf32> -> vector<2x64xf32>
    %590 = arith.addf %588, %589 : vector<2x64xf32>
    %591 = vector.extract_strided_slice %357 {offsets = [12, 0], sizes = [2, 64], strides = [1, 1]} : vector<16x64xf32> to vector<2x64xf32>
    %cst_227 = arith.constant dense<0.000000e+00> : vector<2x64xf32>
    %592 = tpu.matmul %586, %375, %cst_227 {dimension_numbers = #tpu.dot_dimension_numbers<[1], [0], [0], [1], [0, 0, 1, 1], [], []>} : vector<2x64xf32>, vector<64x64xf32>, vector<2x64xf32> -> vector<2x64xf32>
    %593 = arith.addf %591, %592 : vector<2x64xf32>
    %594 = vector.extract_strided_slice %364 {offsets = [12, 0], sizes = [2, 64], strides = [1, 1]} : vector<16x64xf32> to vector<2x64xf32>
    %cst_228 = arith.constant dense<0.000000e+00> : vector<2x64xf32>
    %595 = tpu.matmul %586, %377, %cst_228 {dimension_numbers = #tpu.dot_dimension_numbers<[1], [0], [0], [1], [0, 0, 1, 1], [], []>} : vector<2x64xf32>, vector<64x64xf32>, vector<2x64xf32> -> vector<2x64xf32>
    %596 = arith.addf %594, %595 : vector<2x64xf32>
    %597 = vector.extract_strided_slice %371 {offsets = [12, 0], sizes = [2, 64], strides = [1, 1]} : vector<16x64xf32> to vector<2x64xf32>
    %cst_229 = arith.constant dense<0.000000e+00> : vector<2x64xf32>
    %598 = tpu.matmul %586, %379, %cst_229 {dimension_numbers = #tpu.dot_dimension_numbers<[1], [0], [0], [1], [0, 0, 1, 1], [], []>} : vector<2x64xf32>, vector<64x64xf32>, vector<2x64xf32> -> vector<2x64xf32>
    %599 = arith.addf %597, %598 : vector<2x64xf32>
    %600 = arith.negf %593 : vector<2x64xf32>
    %601 = math.exp %600 : vector<2x64xf32>
    %cst_230 = arith.constant 1.000000e+00 : f32
    %602 = vector.broadcast %cst_230 : f32 to vector<2x64xf32>
    %603 = arith.addf %602, %601 : vector<2x64xf32>
    %604 = arith.divf %602, %603 : vector<2x64xf32>
    %605 = arith.mulf %604, %579 : vector<2x64xf32>
    %606 = arith.negf %590 : vector<2x64xf32>
    %607 = math.exp %606 : vector<2x64xf32>
    %cst_231 = arith.constant 1.000000e+00 : f32
    %608 = vector.broadcast %cst_231 : f32 to vector<2x64xf32>
    %609 = arith.addf %608, %607 : vector<2x64xf32>
    %610 = arith.divf %608, %609 : vector<2x64xf32>
    %611 = math.tanh %596 : vector<2x64xf32>
    %612 = arith.mulf %610, %611 : vector<2x64xf32>
    %613 = arith.addf %605, %612 : vector<2x64xf32>
    %614 = arith.negf %599 : vector<2x64xf32>
    %615 = math.exp %614 : vector<2x64xf32>
    %cst_232 = arith.constant 1.000000e+00 : f32
    %616 = vector.broadcast %cst_232 : f32 to vector<2x64xf32>
    %617 = arith.addf %616, %615 : vector<2x64xf32>
    %618 = arith.divf %616, %617 : vector<2x64xf32>
    %619 = math.tanh %613 : vector<2x64xf32>
    %620 = arith.mulf %618, %619 : vector<2x64xf32>
    %c12_233 = arith.constant 12 : index
    %c0_234 = arith.constant 0 : index
    %621 = vector.load %arg23[%c12_233, %c0_234] : memref<16x64xf32, #tpu.memory_space<vmem>>, vector<2x64xf32>
    tpu.vector_store %arg23[%c12_233, %c0_234], %620 {strides = array<i32>} : memref<16x64xf32, #tpu.memory_space<vmem>>, vector<2x64xf32>,
    %622 = vector.extract_strided_slice %350 {offsets = [14, 0], sizes = [2, 64], strides = [1, 1]} : vector<16x64xf32> to vector<2x64xf32>
    %cst_235 = arith.constant dense<0.000000e+00> : vector<2x64xf32>
    %623 = tpu.matmul %620, %373, %cst_235 {dimension_numbers = #tpu.dot_dimension_numbers<[1], [0], [0], [1], [0, 0, 1, 1], [], []>} : vector<2x64xf32>, vector<64x64xf32>, vector<2x64xf32> -> vector<2x64xf32>
    %624 = arith.addf %622, %623 : vector<2x64xf32>
    %625 = vector.extract_strided_slice %357 {offsets = [14, 0], sizes = [2, 64], strides = [1, 1]} : vector<16x64xf32> to vector<2x64xf32>
    %cst_236 = arith.constant dense<0.000000e+00> : vector<2x64xf32>
    %626 = tpu.matmul %620, %375, %cst_236 {dimension_numbers = #tpu.dot_dimension_numbers<[1], [0], [0], [1], [0, 0, 1, 1], [], []>} : vector<2x64xf32>, vector<64x64xf32>, vector<2x64xf32> -> vector<2x64xf32>
    %627 = arith.addf %625, %626 : vector<2x64xf32>
    %628 = vector.extract_strided_slice %364 {offsets = [14, 0], sizes = [2, 64], strides = [1, 1]} : vector<16x64xf32> to vector<2x64xf32>
    %cst_237 = arith.constant dense<0.000000e+00> : vector<2x64xf32>
    %629 = tpu.matmul %620, %377, %cst_237 {dimension_numbers = #tpu.dot_dimension_numbers<[1], [0], [0], [1], [0, 0, 1, 1], [], []>} : vector<2x64xf32>, vector<64x64xf32>, vector<2x64xf32> -> vector<2x64xf32>
    %630 = arith.addf %628, %629 : vector<2x64xf32>
    %631 = vector.extract_strided_slice %371 {offsets = [14, 0], sizes = [2, 64], strides = [1, 1]} : vector<16x64xf32> to vector<2x64xf32>
    %cst_238 = arith.constant dense<0.000000e+00> : vector<2x64xf32>
    %632 = tpu.matmul %620, %379, %cst_238 {dimension_numbers = #tpu.dot_dimension_numbers<[1], [0], [0], [1], [0, 0, 1, 1], [], []>} : vector<2x64xf32>, vector<64x64xf32>, vector<2x64xf32> -> vector<2x64xf32>
    %633 = arith.addf %631, %632 : vector<2x64xf32>
    %634 = arith.negf %627 : vector<2x64xf32>
    %635 = math.exp %634 : vector<2x64xf32>
    %cst_239 = arith.constant 1.000000e+00 : f32
    %636 = vector.broadcast %cst_239 : f32 to vector<2x64xf32>
    %637 = arith.addf %636, %635 : vector<2x64xf32>
    %638 = arith.divf %636, %637 : vector<2x64xf32>
    %639 = arith.mulf %638, %613 : vector<2x64xf32>
    %640 = arith.negf %624 : vector<2x64xf32>
    %641 = math.exp %640 : vector<2x64xf32>
    %cst_240 = arith.constant 1.000000e+00 : f32
    %642 = vector.broadcast %cst_240 : f32 to vector<2x64xf32>
    %643 = arith.addf %642, %641 : vector<2x64xf32>
    %644 = arith.divf %642, %643 : vector<2x64xf32>
    %645 = math.tanh %630 : vector<2x64xf32>
    %646 = arith.mulf %644, %645 : vector<2x64xf32>
    %647 = arith.addf %639, %646 : vector<2x64xf32>
    %648 = arith.negf %633 : vector<2x64xf32>
    %649 = math.exp %648 : vector<2x64xf32>
    %cst_241 = arith.constant 1.000000e+00 : f32
    %650 = vector.broadcast %cst_241 : f32 to vector<2x64xf32>
    %651 = arith.addf %650, %649 : vector<2x64xf32>
    %652 = arith.divf %650, %651 : vector<2x64xf32>
    %653 = math.tanh %647 : vector<2x64xf32>
    %654 = arith.mulf %652, %653 : vector<2x64xf32>
    %c14_242 = arith.constant 14 : index
    %c0_243 = arith.constant 0 : index
    %655 = vector.load %arg23[%c14_242, %c0_243] : memref<16x64xf32, #tpu.memory_space<vmem>>, vector<2x64xf32>
    tpu.vector_store %arg23[%c14_242, %c0_243], %654 {strides = array<i32>} : memref<16x64xf32, #tpu.memory_space<vmem>>, vector<2x64xf32>,
    %c1_244 = arith.constant 1 : index
    %c0_245 = arith.constant 0 : index
    %c0_246 = arith.constant 0 : index
    %656 = vector.load %arg21[%c1_244, %c0_245, %c0_246] : memref<3x2x64xf32, #tpu.memory_space<vmem>>, vector<1x2x64xf32>
    %657 = vector.shape_cast %656 : vector<1x2x64xf32> to vector<2x64xf32>
    %658 = vector.shape_cast %654 : vector<2x64xf32> to vector<1x2x64xf32>
    tpu.vector_store %arg21[%c1_244, %c0_245, %c0_246], %658 {strides = array<i32>} : memref<3x2x64xf32, #tpu.memory_space<vmem>>, vector<1x2x64xf32>,
    %c1_247 = arith.constant 1 : index
    %c0_248 = arith.constant 0 : index
    %c0_249 = arith.constant 0 : index
    %659 = vector.load %arg22[%c1_247, %c0_248, %c0_249] : memref<3x2x64xf32, #tpu.memory_space<vmem>>, vector<1x2x64xf32>
    %660 = vector.shape_cast %659 : vector<1x2x64xf32> to vector<2x64xf32>
    %661 = vector.shape_cast %647 : vector<2x64xf32> to vector<1x2x64xf32>
    tpu.vector_store %arg22[%c1_247, %c0_248, %c0_249], %661 {strides = array<i32>} : memref<3x2x64xf32, #tpu.memory_space<vmem>>, vector<1x2x64xf32>,
    %c0_250 = arith.constant 0 : index
    %c0_251 = arith.constant 0 : index
    %662 = vector.load %arg23[%c0_250, %c0_251] : memref<16x64xf32, #tpu.memory_space<vmem>>, vector<16x64xf32>
    %c0_252 = arith.constant 0 : index
    %c0_253 = arith.constant 0 : index
    %c0_254 = arith.constant 0 : index
    %663 = vector.load %arg9[%c0_252, %c0_253, %c0_254] : memref<4x64x64xf32, #tpu.memory_space<vmem>>, vector<1x64x64xf32>
    %664 = vector.shape_cast %663 : vector<1x64x64xf32> to vector<64x64xf32>
    %cst_255 = arith.constant dense<0.000000e+00> : vector<16x64xf32>
    %665 = tpu.matmul %662, %664, %cst_255 {dimension_numbers = #tpu.dot_dimension_numbers<[1], [0], [0], [1], [0, 0, 1, 1], [], []>} : vector<16x64xf32>, vector<64x64xf32>, vector<16x64xf32> -> vector<16x64xf32>
    %c0_256 = arith.constant 0 : index
    %c0_257 = arith.constant 0 : index
    %c0_258 = arith.constant 0 : index
    %666 = vector.load %arg11[%c0_256, %c0_257, %c0_258] : memref<4x1x64xf32, #tpu.memory_space<vmem>>, vector<1x1x64xf32>
    %667 = vector.shape_cast %666 : vector<1x1x64xf32> to vector<1x64xf32>
    %668 = vector.broadcast %667 : vector<1x64xf32> to vector<16x64xf32>
    %669 = arith.addf %665, %668 : vector<16x64xf32>
    %c1_259 = arith.constant 1 : index
    %c0_260 = arith.constant 0 : index
    %c0_261 = arith.constant 0 : index
    %670 = vector.load %arg9[%c1_259, %c0_260, %c0_261] : memref<4x64x64xf32, #tpu.memory_space<vmem>>, vector<1x64x64xf32>
    %671 = vector.shape_cast %670 : vector<1x64x64xf32> to vector<64x64xf32>
    %cst_262 = arith.constant dense<0.000000e+00> : vector<16x64xf32>
    %672 = tpu.matmul %662, %671, %cst_262 {dimension_numbers = #tpu.dot_dimension_numbers<[1], [0], [0], [1], [0, 0, 1, 1], [], []>} : vector<16x64xf32>, vector<64x64xf32>, vector<16x64xf32> -> vector<16x64xf32>
    %c1_263 = arith.constant 1 : index
    %c0_264 = arith.constant 0 : index
    %c0_265 = arith.constant 0 : index
    %673 = vector.load %arg11[%c1_263, %c0_264, %c0_265] : memref<4x1x64xf32, #tpu.memory_space<vmem>>, vector<1x1x64xf32>
    %674 = vector.shape_cast %673 : vector<1x1x64xf32> to vector<1x64xf32>
    %675 = vector.broadcast %674 : vector<1x64xf32> to vector<16x64xf32>
    %676 = arith.addf %672, %675 : vector<16x64xf32>
    %c2_266 = arith.constant 2 : index
    %c0_267 = arith.constant 0 : index
    %c0_268 = arith.constant 0 : index
    %677 = vector.load %arg9[%c2_266, %c0_267, %c0_268] : memref<4x64x64xf32, #tpu.memory_space<vmem>>, vector<1x64x64xf32>
    %678 = vector.shape_cast %677 : vector<1x64x64xf32> to vector<64x64xf32>
    %cst_269 = arith.constant dense<0.000000e+00> : vector<16x64xf32>
    %679 = tpu.matmul %662, %678, %cst_269 {dimension_numbers = #tpu.dot_dimension_numbers<[1], [0], [0], [1], [0, 0, 1, 1], [], []>} : vector<16x64xf32>, vector<64x64xf32>, vector<16x64xf32> -> vector<16x64xf32>
    %c2_270 = arith.constant 2 : index
    %c0_271 = arith.constant 0 : index
    %c0_272 = arith.constant 0 : index
    %680 = vector.load %arg11[%c2_270, %c0_271, %c0_272] : memref<4x1x64xf32, #tpu.memory_space<vmem>>, vector<1x1x64xf32>
    %681 = vector.shape_cast %680 : vector<1x1x64xf32> to vector<1x64xf32>
    %682 = vector.broadcast %681 : vector<1x64xf32> to vector<16x64xf32>
    %683 = arith.addf %679, %682 : vector<16x64xf32>
    %c3_273 = arith.constant 3 : index
    %c0_274 = arith.constant 0 : index
    %c0_275 = arith.constant 0 : index
    %684 = vector.load %arg9[%c3_273, %c0_274, %c0_275] : memref<4x64x64xf32, #tpu.memory_space<vmem>>, vector<1x64x64xf32>
    %685 = vector.shape_cast %684 : vector<1x64x64xf32> to vector<64x64xf32>
    %cst_276 = arith.constant dense<0.000000e+00> : vector<16x64xf32>
    %686 = tpu.matmul %662, %685, %cst_276 {dimension_numbers = #tpu.dot_dimension_numbers<[1], [0], [0], [1], [0, 0, 1, 1], [], []>} : vector<16x64xf32>, vector<64x64xf32>, vector<16x64xf32> -> vector<16x64xf32>
    %c3_277 = arith.constant 3 : index
    %c0_278 = arith.constant 0 : index
    %c0_279 = arith.constant 0 : index
    %687 = vector.load %arg11[%c3_277, %c0_278, %c0_279] : memref<4x1x64xf32, #tpu.memory_space<vmem>>, vector<1x1x64xf32>
    %688 = vector.shape_cast %687 : vector<1x1x64xf32> to vector<1x64xf32>
    %689 = vector.broadcast %688 : vector<1x64xf32> to vector<16x64xf32>
    %690 = arith.addf %686, %689 : vector<16x64xf32>
    %c0_280 = arith.constant 0 : index
    %c0_281 = arith.constant 0 : index
    %c0_282 = arith.constant 0 : index
    %691 = vector.load %arg10[%c0_280, %c0_281, %c0_282] : memref<4x64x64xf32, #tpu.memory_space<vmem>>, vector<1x64x64xf32>
    %692 = vector.shape_cast %691 : vector<1x64x64xf32> to vector<64x64xf32>
    %c1_283 = arith.constant 1 : index
    %c0_284 = arith.constant 0 : index
    %c0_285 = arith.constant 0 : index
    %693 = vector.load %arg10[%c1_283, %c0_284, %c0_285] : memref<4x64x64xf32, #tpu.memory_space<vmem>>, vector<1x64x64xf32>
    %694 = vector.shape_cast %693 : vector<1x64x64xf32> to vector<64x64xf32>
    %c2_286 = arith.constant 2 : index
    %c0_287 = arith.constant 0 : index
    %c0_288 = arith.constant 0 : index
    %695 = vector.load %arg10[%c2_286, %c0_287, %c0_288] : memref<4x64x64xf32, #tpu.memory_space<vmem>>, vector<1x64x64xf32>
    %696 = vector.shape_cast %695 : vector<1x64x64xf32> to vector<64x64xf32>
    %c3_289 = arith.constant 3 : index
    %c0_290 = arith.constant 0 : index
    %c0_291 = arith.constant 0 : index
    %697 = vector.load %arg10[%c3_289, %c0_290, %c0_291] : memref<4x64x64xf32, #tpu.memory_space<vmem>>, vector<1x64x64xf32>
    %698 = vector.shape_cast %697 : vector<1x64x64xf32> to vector<64x64xf32>
    %c2_292 = arith.constant 2 : index
    %c0_293 = arith.constant 0 : index
    %c0_294 = arith.constant 0 : index
    %699 = vector.load %arg12[%c2_292, %c0_293, %c0_294] : memref<3x2x64xf32, #tpu.memory_space<vmem>>, vector<1x2x64xf32>
    %700 = vector.shape_cast %699 : vector<1x2x64xf32> to vector<2x64xf32>
    %c2_295 = arith.constant 2 : index
    %c0_296 = arith.constant 0 : index
    %c0_297 = arith.constant 0 : index
    %701 = vector.load %arg13[%c2_295, %c0_296, %c0_297] : memref<3x2x64xf32, #tpu.memory_space<vmem>>, vector<1x2x64xf32>
    %702 = vector.shape_cast %701 : vector<1x2x64xf32> to vector<2x64xf32>
    %703 = vector.extract_strided_slice %669 {offsets = [0, 0], sizes = [2, 64], strides = [1, 1]} : vector<16x64xf32> to vector<2x64xf32>
    %cst_298 = arith.constant dense<0.000000e+00> : vector<2x64xf32>
    %704 = tpu.matmul %700, %692, %cst_298 {dimension_numbers = #tpu.dot_dimension_numbers<[1], [0], [0], [1], [0, 0, 1, 1], [], []>} : vector<2x64xf32>, vector<64x64xf32>, vector<2x64xf32> -> vector<2x64xf32>
    %705 = arith.addf %703, %704 : vector<2x64xf32>
    %706 = vector.extract_strided_slice %676 {offsets = [0, 0], sizes = [2, 64], strides = [1, 1]} : vector<16x64xf32> to vector<2x64xf32>
    %cst_299 = arith.constant dense<0.000000e+00> : vector<2x64xf32>
    %707 = tpu.matmul %700, %694, %cst_299 {dimension_numbers = #tpu.dot_dimension_numbers<[1], [0], [0], [1], [0, 0, 1, 1], [], []>} : vector<2x64xf32>, vector<64x64xf32>, vector<2x64xf32> -> vector<2x64xf32>
    %708 = arith.addf %706, %707 : vector<2x64xf32>
    %709 = vector.extract_strided_slice %683 {offsets = [0, 0], sizes = [2, 64], strides = [1, 1]} : vector<16x64xf32> to vector<2x64xf32>
    %cst_300 = arith.constant dense<0.000000e+00> : vector<2x64xf32>
    %710 = tpu.matmul %700, %696, %cst_300 {dimension_numbers = #tpu.dot_dimension_numbers<[1], [0], [0], [1], [0, 0, 1, 1], [], []>} : vector<2x64xf32>, vector<64x64xf32>, vector<2x64xf32> -> vector<2x64xf32>
    %711 = arith.addf %709, %710 : vector<2x64xf32>
    %712 = vector.extract_strided_slice %690 {offsets = [0, 0], sizes = [2, 64], strides = [1, 1]} : vector<16x64xf32> to vector<2x64xf32>
    %cst_301 = arith.constant dense<0.000000e+00> : vector<2x64xf32>
    %713 = tpu.matmul %700, %698, %cst_301 {dimension_numbers = #tpu.dot_dimension_numbers<[1], [0], [0], [1], [0, 0, 1, 1], [], []>} : vector<2x64xf32>, vector<64x64xf32>, vector<2x64xf32> -> vector<2x64xf32>
    %714 = arith.addf %712, %713 : vector<2x64xf32>
    %715 = arith.negf %708 : vector<2x64xf32>
    %716 = math.exp %715 : vector<2x64xf32>
    %cst_302 = arith.constant 1.000000e+00 : f32
    %717 = vector.broadcast %cst_302 : f32 to vector<2x64xf32>
    %718 = arith.addf %717, %716 : vector<2x64xf32>
    %719 = arith.divf %717, %718 : vector<2x64xf32>
    %720 = arith.mulf %719, %702 : vector<2x64xf32>
    %721 = arith.negf %705 : vector<2x64xf32>
    %722 = math.exp %721 : vector<2x64xf32>
    %cst_303 = arith.constant 1.000000e+00 : f32
    %723 = vector.broadcast %cst_303 : f32 to vector<2x64xf32>
    %724 = arith.addf %723, %722 : vector<2x64xf32>
    %725 = arith.divf %723, %724 : vector<2x64xf32>
    %726 = math.tanh %711 : vector<2x64xf32>
    %727 = arith.mulf %725, %726 : vector<2x64xf32>
    %728 = arith.addf %720, %727 : vector<2x64xf32>
    %729 = arith.negf %714 : vector<2x64xf32>
    %730 = math.exp %729 : vector<2x64xf32>
    %cst_304 = arith.constant 1.000000e+00 : f32
    %731 = vector.broadcast %cst_304 : f32 to vector<2x64xf32>
    %732 = arith.addf %731, %730 : vector<2x64xf32>
    %733 = arith.divf %731, %732 : vector<2x64xf32>
    %734 = math.tanh %728 : vector<2x64xf32>
    %735 = arith.mulf %733, %734 : vector<2x64xf32>
    %c0_305 = arith.constant 0 : index
    %c0_306 = arith.constant 0 : index
    %736 = vector.load %arg23[%c0_305, %c0_306] : memref<16x64xf32, #tpu.memory_space<vmem>>, vector<2x64xf32>
    tpu.vector_store %arg23[%c0_305, %c0_306], %735 {strides = array<i32>} : memref<16x64xf32, #tpu.memory_space<vmem>>, vector<2x64xf32>,
    %737 = vector.extract_strided_slice %669 {offsets = [2, 0], sizes = [2, 64], strides = [1, 1]} : vector<16x64xf32> to vector<2x64xf32>
    %cst_307 = arith.constant dense<0.000000e+00> : vector<2x64xf32>
    %738 = tpu.matmul %735, %692, %cst_307 {dimension_numbers = #tpu.dot_dimension_numbers<[1], [0], [0], [1], [0, 0, 1, 1], [], []>} : vector<2x64xf32>, vector<64x64xf32>, vector<2x64xf32> -> vector<2x64xf32>
    %739 = arith.addf %737, %738 : vector<2x64xf32>
    %740 = vector.extract_strided_slice %676 {offsets = [2, 0], sizes = [2, 64], strides = [1, 1]} : vector<16x64xf32> to vector<2x64xf32>
    %cst_308 = arith.constant dense<0.000000e+00> : vector<2x64xf32>
    %741 = tpu.matmul %735, %694, %cst_308 {dimension_numbers = #tpu.dot_dimension_numbers<[1], [0], [0], [1], [0, 0, 1, 1], [], []>} : vector<2x64xf32>, vector<64x64xf32>, vector<2x64xf32> -> vector<2x64xf32>
    %742 = arith.addf %740, %741 : vector<2x64xf32>
    %743 = vector.extract_strided_slice %683 {offsets = [2, 0], sizes = [2, 64], strides = [1, 1]} : vector<16x64xf32> to vector<2x64xf32>
    %cst_309 = arith.constant dense<0.000000e+00> : vector<2x64xf32>
    %744 = tpu.matmul %735, %696, %cst_309 {dimension_numbers = #tpu.dot_dimension_numbers<[1], [0], [0], [1], [0, 0, 1, 1], [], []>} : vector<2x64xf32>, vector<64x64xf32>, vector<2x64xf32> -> vector<2x64xf32>
    %745 = arith.addf %743, %744 : vector<2x64xf32>
    %746 = vector.extract_strided_slice %690 {offsets = [2, 0], sizes = [2, 64], strides = [1, 1]} : vector<16x64xf32> to vector<2x64xf32>
    %cst_310 = arith.constant dense<0.000000e+00> : vector<2x64xf32>
    %747 = tpu.matmul %735, %698, %cst_310 {dimension_numbers = #tpu.dot_dimension_numbers<[1], [0], [0], [1], [0, 0, 1, 1], [], []>} : vector<2x64xf32>, vector<64x64xf32>, vector<2x64xf32> -> vector<2x64xf32>
    %748 = arith.addf %746, %747 : vector<2x64xf32>
    %749 = arith.negf %742 : vector<2x64xf32>
    %750 = math.exp %749 : vector<2x64xf32>
    %cst_311 = arith.constant 1.000000e+00 : f32
    %751 = vector.broadcast %cst_311 : f32 to vector<2x64xf32>
    %752 = arith.addf %751, %750 : vector<2x64xf32>
    %753 = arith.divf %751, %752 : vector<2x64xf32>
    %754 = arith.mulf %753, %728 : vector<2x64xf32>
    %755 = arith.negf %739 : vector<2x64xf32>
    %756 = math.exp %755 : vector<2x64xf32>
    %cst_312 = arith.constant 1.000000e+00 : f32
    %757 = vector.broadcast %cst_312 : f32 to vector<2x64xf32>
    %758 = arith.addf %757, %756 : vector<2x64xf32>
    %759 = arith.divf %757, %758 : vector<2x64xf32>
    %760 = math.tanh %745 : vector<2x64xf32>
    %761 = arith.mulf %759, %760 : vector<2x64xf32>
    %762 = arith.addf %754, %761 : vector<2x64xf32>
    %763 = arith.negf %748 : vector<2x64xf32>
    %764 = math.exp %763 : vector<2x64xf32>
    %cst_313 = arith.constant 1.000000e+00 : f32
    %765 = vector.broadcast %cst_313 : f32 to vector<2x64xf32>
    %766 = arith.addf %765, %764 : vector<2x64xf32>
    %767 = arith.divf %765, %766 : vector<2x64xf32>
    %768 = math.tanh %762 : vector<2x64xf32>
    %769 = arith.mulf %767, %768 : vector<2x64xf32>
    %c2_314 = arith.constant 2 : index
    %c0_315 = arith.constant 0 : index
    %770 = vector.load %arg23[%c2_314, %c0_315] : memref<16x64xf32, #tpu.memory_space<vmem>>, vector<2x64xf32>
    tpu.vector_store %arg23[%c2_314, %c0_315], %769 {strides = array<i32>} : memref<16x64xf32, #tpu.memory_space<vmem>>, vector<2x64xf32>,
    %771 = vector.extract_strided_slice %669 {offsets = [4, 0], sizes = [2, 64], strides = [1, 1]} : vector<16x64xf32> to vector<2x64xf32>
    %cst_316 = arith.constant dense<0.000000e+00> : vector<2x64xf32>
    %772 = tpu.matmul %769, %692, %cst_316 {dimension_numbers = #tpu.dot_dimension_numbers<[1], [0], [0], [1], [0, 0, 1, 1], [], []>} : vector<2x64xf32>, vector<64x64xf32>, vector<2x64xf32> -> vector<2x64xf32>
    %773 = arith.addf %771, %772 : vector<2x64xf32>
    %774 = vector.extract_strided_slice %676 {offsets = [4, 0], sizes = [2, 64], strides = [1, 1]} : vector<16x64xf32> to vector<2x64xf32>
    %cst_317 = arith.constant dense<0.000000e+00> : vector<2x64xf32>
    %775 = tpu.matmul %769, %694, %cst_317 {dimension_numbers = #tpu.dot_dimension_numbers<[1], [0], [0], [1], [0, 0, 1, 1], [], []>} : vector<2x64xf32>, vector<64x64xf32>, vector<2x64xf32> -> vector<2x64xf32>
    %776 = arith.addf %774, %775 : vector<2x64xf32>
    %777 = vector.extract_strided_slice %683 {offsets = [4, 0], sizes = [2, 64], strides = [1, 1]} : vector<16x64xf32> to vector<2x64xf32>
    %cst_318 = arith.constant dense<0.000000e+00> : vector<2x64xf32>
    %778 = tpu.matmul %769, %696, %cst_318 {dimension_numbers = #tpu.dot_dimension_numbers<[1], [0], [0], [1], [0, 0, 1, 1], [], []>} : vector<2x64xf32>, vector<64x64xf32>, vector<2x64xf32> -> vector<2x64xf32>
    %779 = arith.addf %777, %778 : vector<2x64xf32>
    %780 = vector.extract_strided_slice %690 {offsets = [4, 0], sizes = [2, 64], strides = [1, 1]} : vector<16x64xf32> to vector<2x64xf32>
    %cst_319 = arith.constant dense<0.000000e+00> : vector<2x64xf32>
    %781 = tpu.matmul %769, %698, %cst_319 {dimension_numbers = #tpu.dot_dimension_numbers<[1], [0], [0], [1], [0, 0, 1, 1], [], []>} : vector<2x64xf32>, vector<64x64xf32>, vector<2x64xf32> -> vector<2x64xf32>
    %782 = arith.addf %780, %781 : vector<2x64xf32>
    %783 = arith.negf %776 : vector<2x64xf32>
    %784 = math.exp %783 : vector<2x64xf32>
    %cst_320 = arith.constant 1.000000e+00 : f32
    %785 = vector.broadcast %cst_320 : f32 to vector<2x64xf32>
    %786 = arith.addf %785, %784 : vector<2x64xf32>
    %787 = arith.divf %785, %786 : vector<2x64xf32>
    %788 = arith.mulf %787, %762 : vector<2x64xf32>
    %789 = arith.negf %773 : vector<2x64xf32>
    %790 = math.exp %789 : vector<2x64xf32>
    %cst_321 = arith.constant 1.000000e+00 : f32
    %791 = vector.broadcast %cst_321 : f32 to vector<2x64xf32>
    %792 = arith.addf %791, %790 : vector<2x64xf32>
    %793 = arith.divf %791, %792 : vector<2x64xf32>
    %794 = math.tanh %779 : vector<2x64xf32>
    %795 = arith.mulf %793, %794 : vector<2x64xf32>
    %796 = arith.addf %788, %795 : vector<2x64xf32>
    %797 = arith.negf %782 : vector<2x64xf32>
    %798 = math.exp %797 : vector<2x64xf32>
    %cst_322 = arith.constant 1.000000e+00 : f32
    %799 = vector.broadcast %cst_322 : f32 to vector<2x64xf32>
    %800 = arith.addf %799, %798 : vector<2x64xf32>
    %801 = arith.divf %799, %800 : vector<2x64xf32>
    %802 = math.tanh %796 : vector<2x64xf32>
    %803 = arith.mulf %801, %802 : vector<2x64xf32>
    %c4_323 = arith.constant 4 : index
    %c0_324 = arith.constant 0 : index
    %804 = vector.load %arg23[%c4_323, %c0_324] : memref<16x64xf32, #tpu.memory_space<vmem>>, vector<2x64xf32>
    tpu.vector_store %arg23[%c4_323, %c0_324], %803 {strides = array<i32>} : memref<16x64xf32, #tpu.memory_space<vmem>>, vector<2x64xf32>,
    %805 = vector.extract_strided_slice %669 {offsets = [6, 0], sizes = [2, 64], strides = [1, 1]} : vector<16x64xf32> to vector<2x64xf32>
    %cst_325 = arith.constant dense<0.000000e+00> : vector<2x64xf32>
    %806 = tpu.matmul %803, %692, %cst_325 {dimension_numbers = #tpu.dot_dimension_numbers<[1], [0], [0], [1], [0, 0, 1, 1], [], []>} : vector<2x64xf32>, vector<64x64xf32>, vector<2x64xf32> -> vector<2x64xf32>
    %807 = arith.addf %805, %806 : vector<2x64xf32>
    %808 = vector.extract_strided_slice %676 {offsets = [6, 0], sizes = [2, 64], strides = [1, 1]} : vector<16x64xf32> to vector<2x64xf32>
    %cst_326 = arith.constant dense<0.000000e+00> : vector<2x64xf32>
    %809 = tpu.matmul %803, %694, %cst_326 {dimension_numbers = #tpu.dot_dimension_numbers<[1], [0], [0], [1], [0, 0, 1, 1], [], []>} : vector<2x64xf32>, vector<64x64xf32>, vector<2x64xf32> -> vector<2x64xf32>
    %810 = arith.addf %808, %809 : vector<2x64xf32>
    %811 = vector.extract_strided_slice %683 {offsets = [6, 0], sizes = [2, 64], strides = [1, 1]} : vector<16x64xf32> to vector<2x64xf32>
    %cst_327 = arith.constant dense<0.000000e+00> : vector<2x64xf32>
    %812 = tpu.matmul %803, %696, %cst_327 {dimension_numbers = #tpu.dot_dimension_numbers<[1], [0], [0], [1], [0, 0, 1, 1], [], []>} : vector<2x64xf32>, vector<64x64xf32>, vector<2x64xf32> -> vector<2x64xf32>
    %813 = arith.addf %811, %812 : vector<2x64xf32>
    %814 = vector.extract_strided_slice %690 {offsets = [6, 0], sizes = [2, 64], strides = [1, 1]} : vector<16x64xf32> to vector<2x64xf32>
    %cst_328 = arith.constant dense<0.000000e+00> : vector<2x64xf32>
    %815 = tpu.matmul %803, %698, %cst_328 {dimension_numbers = #tpu.dot_dimension_numbers<[1], [0], [0], [1], [0, 0, 1, 1], [], []>} : vector<2x64xf32>, vector<64x64xf32>, vector<2x64xf32> -> vector<2x64xf32>
    %816 = arith.addf %814, %815 : vector<2x64xf32>
    %817 = arith.negf %810 : vector<2x64xf32>
    %818 = math.exp %817 : vector<2x64xf32>
    %cst_329 = arith.constant 1.000000e+00 : f32
    %819 = vector.broadcast %cst_329 : f32 to vector<2x64xf32>
    %820 = arith.addf %819, %818 : vector<2x64xf32>
    %821 = arith.divf %819, %820 : vector<2x64xf32>
    %822 = arith.mulf %821, %796 : vector<2x64xf32>
    %823 = arith.negf %807 : vector<2x64xf32>
    %824 = math.exp %823 : vector<2x64xf32>
    %cst_330 = arith.constant 1.000000e+00 : f32
    %825 = vector.broadcast %cst_330 : f32 to vector<2x64xf32>
    %826 = arith.addf %825, %824 : vector<2x64xf32>
    %827 = arith.divf %825, %826 : vector<2x64xf32>
    %828 = math.tanh %813 : vector<2x64xf32>
    %829 = arith.mulf %827, %828 : vector<2x64xf32>
    %830 = arith.addf %822, %829 : vector<2x64xf32>
    %831 = arith.negf %816 : vector<2x64xf32>
    %832 = math.exp %831 : vector<2x64xf32>
    %cst_331 = arith.constant 1.000000e+00 : f32
    %833 = vector.broadcast %cst_331 : f32 to vector<2x64xf32>
    %834 = arith.addf %833, %832 : vector<2x64xf32>
    %835 = arith.divf %833, %834 : vector<2x64xf32>
    %836 = math.tanh %830 : vector<2x64xf32>
    %837 = arith.mulf %835, %836 : vector<2x64xf32>
    %c6_332 = arith.constant 6 : index
    %c0_333 = arith.constant 0 : index
    %838 = vector.load %arg23[%c6_332, %c0_333] : memref<16x64xf32, #tpu.memory_space<vmem>>, vector<2x64xf32>
    tpu.vector_store %arg23[%c6_332, %c0_333], %837 {strides = array<i32>} : memref<16x64xf32, #tpu.memory_space<vmem>>, vector<2x64xf32>,
    %839 = vector.extract_strided_slice %669 {offsets = [8, 0], sizes = [2, 64], strides = [1, 1]} : vector<16x64xf32> to vector<2x64xf32>
    %cst_334 = arith.constant dense<0.000000e+00> : vector<2x64xf32>
    %840 = tpu.matmul %837, %692, %cst_334 {dimension_numbers = #tpu.dot_dimension_numbers<[1], [0], [0], [1], [0, 0, 1, 1], [], []>} : vector<2x64xf32>, vector<64x64xf32>, vector<2x64xf32> -> vector<2x64xf32>
    %841 = arith.addf %839, %840 : vector<2x64xf32>
    %842 = vector.extract_strided_slice %676 {offsets = [8, 0], sizes = [2, 64], strides = [1, 1]} : vector<16x64xf32> to vector<2x64xf32>
    %cst_335 = arith.constant dense<0.000000e+00> : vector<2x64xf32>
    %843 = tpu.matmul %837, %694, %cst_335 {dimension_numbers = #tpu.dot_dimension_numbers<[1], [0], [0], [1], [0, 0, 1, 1], [], []>} : vector<2x64xf32>, vector<64x64xf32>, vector<2x64xf32> -> vector<2x64xf32>
    %844 = arith.addf %842, %843 : vector<2x64xf32>
    %845 = vector.extract_strided_slice %683 {offsets = [8, 0], sizes = [2, 64], strides = [1, 1]} : vector<16x64xf32> to vector<2x64xf32>
    %cst_336 = arith.constant dense<0.000000e+00> : vector<2x64xf32>
    %846 = tpu.matmul %837, %696, %cst_336 {dimension_numbers = #tpu.dot_dimension_numbers<[1], [0], [0], [1], [0, 0, 1, 1], [], []>} : vector<2x64xf32>, vector<64x64xf32>, vector<2x64xf32> -> vector<2x64xf32>
    %847 = arith.addf %845, %846 : vector<2x64xf32>
    %848 = vector.extract_strided_slice %690 {offsets = [8, 0], sizes = [2, 64], strides = [1, 1]} : vector<16x64xf32> to vector<2x64xf32>
    %cst_337 = arith.constant dense<0.000000e+00> : vector<2x64xf32>
    %849 = tpu.matmul %837, %698, %cst_337 {dimension_numbers = #tpu.dot_dimension_numbers<[1], [0], [0], [1], [0, 0, 1, 1], [], []>} : vector<2x64xf32>, vector<64x64xf32>, vector<2x64xf32> -> vector<2x64xf32>
    %850 = arith.addf %848, %849 : vector<2x64xf32>
    %851 = arith.negf %844 : vector<2x64xf32>
    %852 = math.exp %851 : vector<2x64xf32>
    %cst_338 = arith.constant 1.000000e+00 : f32
    %853 = vector.broadcast %cst_338 : f32 to vector<2x64xf32>
    %854 = arith.addf %853, %852 : vector<2x64xf32>
    %855 = arith.divf %853, %854 : vector<2x64xf32>
    %856 = arith.mulf %855, %830 : vector<2x64xf32>
    %857 = arith.negf %841 : vector<2x64xf32>
    %858 = math.exp %857 : vector<2x64xf32>
    %cst_339 = arith.constant 1.000000e+00 : f32
    %859 = vector.broadcast %cst_339 : f32 to vector<2x64xf32>
    %860 = arith.addf %859, %858 : vector<2x64xf32>
    %861 = arith.divf %859, %860 : vector<2x64xf32>
    %862 = math.tanh %847 : vector<2x64xf32>
    %863 = arith.mulf %861, %862 : vector<2x64xf32>
    %864 = arith.addf %856, %863 : vector<2x64xf32>
    %865 = arith.negf %850 : vector<2x64xf32>
    %866 = math.exp %865 : vector<2x64xf32>
    %cst_340 = arith.constant 1.000000e+00 : f32
    %867 = vector.broadcast %cst_340 : f32 to vector<2x64xf32>
    %868 = arith.addf %867, %866 : vector<2x64xf32>
    %869 = arith.divf %867, %868 : vector<2x64xf32>
    %870 = math.tanh %864 : vector<2x64xf32>
    %871 = arith.mulf %869, %870 : vector<2x64xf32>
    %c8_341 = arith.constant 8 : index
    %c0_342 = arith.constant 0 : index
    %872 = vector.load %arg23[%c8_341, %c0_342] : memref<16x64xf32, #tpu.memory_space<vmem>>, vector<2x64xf32>
    tpu.vector_store %arg23[%c8_341, %c0_342], %871 {strides = array<i32>} : memref<16x64xf32, #tpu.memory_space<vmem>>, vector<2x64xf32>,
    %873 = vector.extract_strided_slice %669 {offsets = [10, 0], sizes = [2, 64], strides = [1, 1]} : vector<16x64xf32> to vector<2x64xf32>
    %cst_343 = arith.constant dense<0.000000e+00> : vector<2x64xf32>
    %874 = tpu.matmul %871, %692, %cst_343 {dimension_numbers = #tpu.dot_dimension_numbers<[1], [0], [0], [1], [0, 0, 1, 1], [], []>} : vector<2x64xf32>, vector<64x64xf32>, vector<2x64xf32> -> vector<2x64xf32>
    %875 = arith.addf %873, %874 : vector<2x64xf32>
    %876 = vector.extract_strided_slice %676 {offsets = [10, 0], sizes = [2, 64], strides = [1, 1]} : vector<16x64xf32> to vector<2x64xf32>
    %cst_344 = arith.constant dense<0.000000e+00> : vector<2x64xf32>
    %877 = tpu.matmul %871, %694, %cst_344 {dimension_numbers = #tpu.dot_dimension_numbers<[1], [0], [0], [1], [0, 0, 1, 1], [], []>} : vector<2x64xf32>, vector<64x64xf32>, vector<2x64xf32> -> vector<2x64xf32>
    %878 = arith.addf %876, %877 : vector<2x64xf32>
    %879 = vector.extract_strided_slice %683 {offsets = [10, 0], sizes = [2, 64], strides = [1, 1]} : vector<16x64xf32> to vector<2x64xf32>
    %cst_345 = arith.constant dense<0.000000e+00> : vector<2x64xf32>
    %880 = tpu.matmul %871, %696, %cst_345 {dimension_numbers = #tpu.dot_dimension_numbers<[1], [0], [0], [1], [0, 0, 1, 1], [], []>} : vector<2x64xf32>, vector<64x64xf32>, vector<2x64xf32> -> vector<2x64xf32>
    %881 = arith.addf %879, %880 : vector<2x64xf32>
    %882 = vector.extract_strided_slice %690 {offsets = [10, 0], sizes = [2, 64], strides = [1, 1]} : vector<16x64xf32> to vector<2x64xf32>
    %cst_346 = arith.constant dense<0.000000e+00> : vector<2x64xf32>
    %883 = tpu.matmul %871, %698, %cst_346 {dimension_numbers = #tpu.dot_dimension_numbers<[1], [0], [0], [1], [0, 0, 1, 1], [], []>} : vector<2x64xf32>, vector<64x64xf32>, vector<2x64xf32> -> vector<2x64xf32>
    %884 = arith.addf %882, %883 : vector<2x64xf32>
    %885 = arith.negf %878 : vector<2x64xf32>
    %886 = math.exp %885 : vector<2x64xf32>
    %cst_347 = arith.constant 1.000000e+00 : f32
    %887 = vector.broadcast %cst_347 : f32 to vector<2x64xf32>
    %888 = arith.addf %887, %886 : vector<2x64xf32>
    %889 = arith.divf %887, %888 : vector<2x64xf32>
    %890 = arith.mulf %889, %864 : vector<2x64xf32>
    %891 = arith.negf %875 : vector<2x64xf32>
    %892 = math.exp %891 : vector<2x64xf32>
    %cst_348 = arith.constant 1.000000e+00 : f32
    %893 = vector.broadcast %cst_348 : f32 to vector<2x64xf32>
    %894 = arith.addf %893, %892 : vector<2x64xf32>
    %895 = arith.divf %893, %894 : vector<2x64xf32>
    %896 = math.tanh %881 : vector<2x64xf32>
    %897 = arith.mulf %895, %896 : vector<2x64xf32>
    %898 = arith.addf %890, %897 : vector<2x64xf32>
    %899 = arith.negf %884 : vector<2x64xf32>
    %900 = math.exp %899 : vector<2x64xf32>
    %cst_349 = arith.constant 1.000000e+00 : f32
    %901 = vector.broadcast %cst_349 : f32 to vector<2x64xf32>
    %902 = arith.addf %901, %900 : vector<2x64xf32>
    %903 = arith.divf %901, %902 : vector<2x64xf32>
    %904 = math.tanh %898 : vector<2x64xf32>
    %905 = arith.mulf %903, %904 : vector<2x64xf32>
    %c10_350 = arith.constant 10 : index
    %c0_351 = arith.constant 0 : index
    %906 = vector.load %arg23[%c10_350, %c0_351] : memref<16x64xf32, #tpu.memory_space<vmem>>, vector<2x64xf32>
    tpu.vector_store %arg23[%c10_350, %c0_351], %905 {strides = array<i32>} : memref<16x64xf32, #tpu.memory_space<vmem>>, vector<2x64xf32>,
    %907 = vector.extract_strided_slice %669 {offsets = [12, 0], sizes = [2, 64], strides = [1, 1]} : vector<16x64xf32> to vector<2x64xf32>
    %cst_352 = arith.constant dense<0.000000e+00> : vector<2x64xf32>
    %908 = tpu.matmul %905, %692, %cst_352 {dimension_numbers = #tpu.dot_dimension_numbers<[1], [0], [0], [1], [0, 0, 1, 1], [], []>} : vector<2x64xf32>, vector<64x64xf32>, vector<2x64xf32> -> vector<2x64xf32>
    %909 = arith.addf %907, %908 : vector<2x64xf32>
    %910 = vector.extract_strided_slice %676 {offsets = [12, 0], sizes = [2, 64], strides = [1, 1]} : vector<16x64xf32> to vector<2x64xf32>
    %cst_353 = arith.constant dense<0.000000e+00> : vector<2x64xf32>
    %911 = tpu.matmul %905, %694, %cst_353 {dimension_numbers = #tpu.dot_dimension_numbers<[1], [0], [0], [1], [0, 0, 1, 1], [], []>} : vector<2x64xf32>, vector<64x64xf32>, vector<2x64xf32> -> vector<2x64xf32>
    %912 = arith.addf %910, %911 : vector<2x64xf32>
    %913 = vector.extract_strided_slice %683 {offsets = [12, 0], sizes = [2, 64], strides = [1, 1]} : vector<16x64xf32> to vector<2x64xf32>
    %cst_354 = arith.constant dense<0.000000e+00> : vector<2x64xf32>
    %914 = tpu.matmul %905, %696, %cst_354 {dimension_numbers = #tpu.dot_dimension_numbers<[1], [0], [0], [1], [0, 0, 1, 1], [], []>} : vector<2x64xf32>, vector<64x64xf32>, vector<2x64xf32> -> vector<2x64xf32>
    %915 = arith.addf %913, %914 : vector<2x64xf32>
    %916 = vector.extract_strided_slice %690 {offsets = [12, 0], sizes = [2, 64], strides = [1, 1]} : vector<16x64xf32> to vector<2x64xf32>
    %cst_355 = arith.constant dense<0.000000e+00> : vector<2x64xf32>
    %917 = tpu.matmul %905, %698, %cst_355 {dimension_numbers = #tpu.dot_dimension_numbers<[1], [0], [0], [1], [0, 0, 1, 1], [], []>} : vector<2x64xf32>, vector<64x64xf32>, vector<2x64xf32> -> vector<2x64xf32>
    %918 = arith.addf %916, %917 : vector<2x64xf32>
    %919 = arith.negf %912 : vector<2x64xf32>
    %920 = math.exp %919 : vector<2x64xf32>
    %cst_356 = arith.constant 1.000000e+00 : f32
    %921 = vector.broadcast %cst_356 : f32 to vector<2x64xf32>
    %922 = arith.addf %921, %920 : vector<2x64xf32>
    %923 = arith.divf %921, %922 : vector<2x64xf32>
    %924 = arith.mulf %923, %898 : vector<2x64xf32>
    %925 = arith.negf %909 : vector<2x64xf32>
    %926 = math.exp %925 : vector<2x64xf32>
    %cst_357 = arith.constant 1.000000e+00 : f32
    %927 = vector.broadcast %cst_357 : f32 to vector<2x64xf32>
    %928 = arith.addf %927, %926 : vector<2x64xf32>
    %929 = arith.divf %927, %928 : vector<2x64xf32>
    %930 = math.tanh %915 : vector<2x64xf32>
    %931 = arith.mulf %929, %930 : vector<2x64xf32>
    %932 = arith.addf %924, %931 : vector<2x64xf32>
    %933 = arith.negf %918 : vector<2x64xf32>
    %934 = math.exp %933 : vector<2x64xf32>
    %cst_358 = arith.constant 1.000000e+00 : f32
    %935 = vector.broadcast %cst_358 : f32 to vector<2x64xf32>
    %936 = arith.addf %935, %934 : vector<2x64xf32>
    %937 = arith.divf %935, %936 : vector<2x64xf32>
    %938 = math.tanh %932 : vector<2x64xf32>
    %939 = arith.mulf %937, %938 : vector<2x64xf32>
    %c12_359 = arith.constant 12 : index
    %c0_360 = arith.constant 0 : index
    %940 = vector.load %arg23[%c12_359, %c0_360] : memref<16x64xf32, #tpu.memory_space<vmem>>, vector<2x64xf32>
    tpu.vector_store %arg23[%c12_359, %c0_360], %939 {strides = array<i32>} : memref<16x64xf32, #tpu.memory_space<vmem>>, vector<2x64xf32>,
    %941 = vector.extract_strided_slice %669 {offsets = [14, 0], sizes = [2, 64], strides = [1, 1]} : vector<16x64xf32> to vector<2x64xf32>
    %cst_361 = arith.constant dense<0.000000e+00> : vector<2x64xf32>
    %942 = tpu.matmul %939, %692, %cst_361 {dimension_numbers = #tpu.dot_dimension_numbers<[1], [0], [0], [1], [0, 0, 1, 1], [], []>} : vector<2x64xf32>, vector<64x64xf32>, vector<2x64xf32> -> vector<2x64xf32>
    %943 = arith.addf %941, %942 : vector<2x64xf32>
    %944 = vector.extract_strided_slice %676 {offsets = [14, 0], sizes = [2, 64], strides = [1, 1]} : vector<16x64xf32> to vector<2x64xf32>
    %cst_362 = arith.constant dense<0.000000e+00> : vector<2x64xf32>
    %945 = tpu.matmul %939, %694, %cst_362 {dimension_numbers = #tpu.dot_dimension_numbers<[1], [0], [0], [1], [0, 0, 1, 1], [], []>} : vector<2x64xf32>, vector<64x64xf32>, vector<2x64xf32> -> vector<2x64xf32>
    %946 = arith.addf %944, %945 : vector<2x64xf32>
    %947 = vector.extract_strided_slice %683 {offsets = [14, 0], sizes = [2, 64], strides = [1, 1]} : vector<16x64xf32> to vector<2x64xf32>
    %cst_363 = arith.constant dense<0.000000e+00> : vector<2x64xf32>
    %948 = tpu.matmul %939, %696, %cst_363 {dimension_numbers = #tpu.dot_dimension_numbers<[1], [0], [0], [1], [0, 0, 1, 1], [], []>} : vector<2x64xf32>, vector<64x64xf32>, vector<2x64xf32> -> vector<2x64xf32>
    %949 = arith.addf %947, %948 : vector<2x64xf32>
    %950 = vector.extract_strided_slice %690 {offsets = [14, 0], sizes = [2, 64], strides = [1, 1]} : vector<16x64xf32> to vector<2x64xf32>
    %cst_364 = arith.constant dense<0.000000e+00> : vector<2x64xf32>
    %951 = tpu.matmul %939, %698, %cst_364 {dimension_numbers = #tpu.dot_dimension_numbers<[1], [0], [0], [1], [0, 0, 1, 1], [], []>} : vector<2x64xf32>, vector<64x64xf32>, vector<2x64xf32> -> vector<2x64xf32>
    %952 = arith.addf %950, %951 : vector<2x64xf32>
    %953 = arith.negf %946 : vector<2x64xf32>
    %954 = math.exp %953 : vector<2x64xf32>
    %cst_365 = arith.constant 1.000000e+00 : f32
    %955 = vector.broadcast %cst_365 : f32 to vector<2x64xf32>
    %956 = arith.addf %955, %954 : vector<2x64xf32>
    %957 = arith.divf %955, %956 : vector<2x64xf32>
    %958 = arith.mulf %957, %932 : vector<2x64xf32>
    %959 = arith.negf %943 : vector<2x64xf32>
    %960 = math.exp %959 : vector<2x64xf32>
    %cst_366 = arith.constant 1.000000e+00 : f32
    %961 = vector.broadcast %cst_366 : f32 to vector<2x64xf32>
    %962 = arith.addf %961, %960 : vector<2x64xf32>
    %963 = arith.divf %961, %962 : vector<2x64xf32>
    %964 = math.tanh %949 : vector<2x64xf32>
    %965 = arith.mulf %963, %964 : vector<2x64xf32>
    %966 = arith.addf %958, %965 : vector<2x64xf32>
    %967 = arith.negf %952 : vector<2x64xf32>
    %968 = math.exp %967 : vector<2x64xf32>
    %cst_367 = arith.constant 1.000000e+00 : f32
    %969 = vector.broadcast %cst_367 : f32 to vector<2x64xf32>
    %970 = arith.addf %969, %968 : vector<2x64xf32>
    %971 = arith.divf %969, %970 : vector<2x64xf32>
    %972 = math.tanh %966 : vector<2x64xf32>
    %973 = arith.mulf %971, %972 : vector<2x64xf32>
    %c14_368 = arith.constant 14 : index
    %c0_369 = arith.constant 0 : index
    %974 = vector.load %arg23[%c14_368, %c0_369] : memref<16x64xf32, #tpu.memory_space<vmem>>, vector<2x64xf32>
    tpu.vector_store %arg23[%c14_368, %c0_369], %973 {strides = array<i32>} : memref<16x64xf32, #tpu.memory_space<vmem>>, vector<2x64xf32>,
    %c2_370 = arith.constant 2 : index
    %c0_371 = arith.constant 0 : index
    %c0_372 = arith.constant 0 : index
    %975 = vector.load %arg21[%c2_370, %c0_371, %c0_372] : memref<3x2x64xf32, #tpu.memory_space<vmem>>, vector<1x2x64xf32>
    %976 = vector.shape_cast %975 : vector<1x2x64xf32> to vector<2x64xf32>
    %977 = vector.shape_cast %973 : vector<2x64xf32> to vector<1x2x64xf32>
    tpu.vector_store %arg21[%c2_370, %c0_371, %c0_372], %977 {strides = array<i32>} : memref<3x2x64xf32, #tpu.memory_space<vmem>>, vector<1x2x64xf32>,
    %c2_373 = arith.constant 2 : index
    %c0_374 = arith.constant 0 : index
    %c0_375 = arith.constant 0 : index
    %978 = vector.load %arg22[%c2_373, %c0_374, %c0_375] : memref<3x2x64xf32, #tpu.memory_space<vmem>>, vector<1x2x64xf32>
    %979 = vector.shape_cast %978 : vector<1x2x64xf32> to vector<2x64xf32>
    %980 = vector.shape_cast %966 : vector<2x64xf32> to vector<1x2x64xf32>
    tpu.vector_store %arg22[%c2_373, %c0_374, %c0_375], %980 {strides = array<i32>} : memref<3x2x64xf32, #tpu.memory_space<vmem>>, vector<1x2x64xf32>,
    %c0_376 = arith.constant 0 : index
    %c0_377 = arith.constant 0 : index
    %981 = vector.load %arg23[%c0_376, %c0_377] : memref<16x64xf32, #tpu.memory_space<vmem>>, vector<16x64xf32>
    %c0_378 = arith.constant 0 : index
    %c0_379 = arith.constant 0 : index
    %982 = vector.load %arg14[%c0_378, %c0_379] : memref<64x128xf32, #tpu.memory_space<vmem>>, vector<64x128xf32>
    %cst_380 = arith.constant dense<0.000000e+00> : vector<16x128xf32>
    %983 = tpu.matmul %981, %982, %cst_380 {dimension_numbers = #tpu.dot_dimension_numbers<[1], [0], [0], [1], [0, 0, 1, 1], [], []>} : vector<16x64xf32>, vector<64x128xf32>, vector<16x128xf32> -> vector<16x128xf32>
    %c0_381 = arith.constant 0 : index
    %c0_382 = arith.constant 0 : index
    %984 = vector.load %arg15[%c0_381, %c0_382] : memref<1x128xf32, #tpu.memory_space<vmem>>, vector<1x128xf32>
    %985 = vector.broadcast %984 : vector<1x128xf32> to vector<16x128xf32>
    %986 = arith.addf %983, %985 : vector<16x128xf32>
    %cst_383 = arith.constant dense<0.000000e+00> : vector<128xf32>
    %987 = vector.multi_reduction <add>, %986, %cst_383 [0] : vector<16x128xf32> to vector<128xf32>
    %988 = vector.shape_cast %987 : vector<128xf32> to vector<1x128xf32>
    %cst_384 = arith.constant 1.600000e+01 : f32
    %989 = vector.broadcast %cst_384 : f32 to vector<1x128xf32>
    %990 = arith.divf %988, %989 : vector<1x128xf32>
    %991 = vector.broadcast %990 : vector<1x128xf32> to vector<16x128xf32>
    %992 = arith.subf %986, %991 : vector<16x128xf32>
    %993 = arith.mulf %992, %992 : vector<16x128xf32>
    %cst_385 = arith.constant dense<0.000000e+00> : vector<128xf32>
    %994 = vector.multi_reduction <add>, %993, %cst_385 [0] : vector<16x128xf32> to vector<128xf32>
    %995 = vector.shape_cast %994 : vector<128xf32> to vector<1x128xf32>
    %cst_386 = arith.constant 1.600000e+01 : f32
    %996 = vector.broadcast %cst_386 : f32 to vector<1x128xf32>
    %997 = arith.divf %995, %996 : vector<1x128xf32>
    %998 = vector.broadcast %990 : vector<1x128xf32> to vector<16x128xf32>
    %999 = arith.subf %986, %998 : vector<16x128xf32>
    %cst_387 = arith.constant 9.99999974E-6 : f32
    %1000 = vector.broadcast %cst_387 : f32 to vector<1x128xf32>
    %1001 = arith.addf %997, %1000 : vector<1x128xf32>
    %1002 = math.rsqrt %1001 : vector<1x128xf32>
    %1003 = vector.broadcast %1002 : vector<1x128xf32> to vector<16x128xf32>
    %1004 = arith.mulf %999, %1003 : vector<16x128xf32>
    %c0_388 = arith.constant 0 : index
    %c0_389 = arith.constant 0 : index
    %1005 = vector.load %arg16[%c0_388, %c0_389] : memref<1x128xf32, #tpu.memory_space<vmem>>, vector<1x128xf32>
    %1006 = vector.broadcast %1005 : vector<1x128xf32> to vector<16x128xf32>
    %1007 = arith.mulf %1004, %1006 : vector<16x128xf32>
    %c0_390 = arith.constant 0 : index
    %c0_391 = arith.constant 0 : index
    %1008 = vector.load %arg17[%c0_390, %c0_391] : memref<1x128xf32, #tpu.memory_space<vmem>>, vector<1x128xf32>
    %1009 = vector.broadcast %1008 : vector<1x128xf32> to vector<16x128xf32>
    %1010 = arith.addf %1007, %1009 : vector<16x128xf32>
    %cst_392 = arith.constant 0.000000e+00 : f32
    %1011 = vector.broadcast %cst_392 : f32 to vector<16x128xf32>
    %1012 = arith.maximumf %1010, %1011 : vector<16x128xf32>
    %c0_393 = arith.constant 0 : index
    %c0_394 = arith.constant 0 : index
    %1013 = vector.load %arg18[%c0_393, %c0_394] : memref<128x128xf32, #tpu.memory_space<vmem>>, vector<128x128xf32>
    %cst_395 = arith.constant dense<0.000000e+00> : vector<16x128xf32>
    %1014 = tpu.matmul %1012, %1013, %cst_395 {dimension_numbers = #tpu.dot_dimension_numbers<[1], [0], [0], [1], [0, 0, 1, 1], [], []>} : vector<16x128xf32>, vector<128x128xf32>, vector<16x128xf32> -> vector<16x128xf32>
    %c0_396 = arith.constant 0 : index
    %c0_397 = arith.constant 0 : index
    %1015 = vector.load %arg19[%c0_396, %c0_397] : memref<1x128xf32, #tpu.memory_space<vmem>>, vector<1x128xf32>
    %1016 = vector.broadcast %1015 : vector<1x128xf32> to vector<16x128xf32>
    %1017 = arith.addf %1014, %1016 : vector<16x128xf32>
    %c0_398 = arith.constant 0 : index
    %c0_399 = arith.constant 0 : index
    %1018 = vector.load %arg20[%c0_398, %c0_399] : memref<16x128xf32, #tpu.memory_space<vmem>>, vector<16x128xf32>
    tpu.vector_store %arg20[%c0_398, %c0_399], %1017 {strides = array<i32>} : memref<16x128xf32, #tpu.memory_space<vmem>>, vector<16x128xf32>,
    return
  }
}

</mosaic_0001>

<bundles_post_ra>
// kernel: rnn_model_forward.1
= control target key start
LH: loop header
LB: loop body
LE: loop exit
PB: predicated region body
PF: predicated region fallthrough
CT: control target
= control target key end

     0   :  { %s8303_s0 = inlined_call_operand.vmem [shape: f32[16,8], index: 0, kind: input, shape index: {}]   ;;  %s8304_s1 = inlined_call_operand.hbm [shape: f32[1,8], index: 1, kind: input, shape index: {}]   ;;  %s8305_s2 = inlined_call_operand.hbm [shape: f32[1,8], index: 2, kind: input, shape index: {}]   ;;  %s8306_s3 = inlined_call_operand.vmem [shape: f32[4,8,64], index: 3, kind: input, shape index: {}]   ;;  %s8307_s4 = inlined_call_operand.hbm [shape: f32[4,64,64], index: 4, kind: input, shape index: {}]   ;;  %s8308_s5 = inlined_call_operand.vmem [shape: f32[4,1,64], index: 5, kind: input, shape index: {}]   ;;  %s8309_s6 = inlined_call_operand.hbm [shape: f32[4,64,64], index: 6, kind: input, shape index: {}]   ;;  %s8310_s7 = inlined_call_operand.hbm [shape: f32[4,64,64], index: 7, kind: input, shape index: {}]   ;;  %s8311_s8 = inlined_call_operand.hbm [shape: f32[4,1,64], index: 8, kind: input, shape index: {}]   ;;  %s8312_s9 = inlined_call_operand.hbm [shape: f32[4,64,64], index: 9, kind: input, shape index: {}]   ;;  %s8313_s10 = inlined_call_operand.hbm [shape: f32[4,64,64], index: 10, kind: input, shape index: {}]   ;;  %s8314_s11 = inlined_call_operand.hbm [shape: f32[4,1,64], index: 11, kind: input, shape index: {}]   ;;  %s8315_s12 = inlined_call_operand.hbm [shape: f32[3,2,64], index: 12, kind: input, shape index: {}]   ;;  %s8316_s13 = inlined_call_operand.hbm [shape: f32[3,2,64], index: 13, kind: input, shape index: {}]   ;;  %s8317_s14 = inlined_call_operand.hbm [shape: f32[64,128], index: 14, kind: input, shape index: {}]   ;;  %s8318_s15 = inlined_call_operand.hbm [shape: f32[1,128], index: 15, kind: input, shape index: {}]   ;;  %s8319_s16 = inlined_call_operand.hbm [shape: f32[1,128], index: 16, kind: input, shape index: {}]   ;;  %s8320_s17 = inlined_call_operand.hbm [shape: f32[1,128], index: 17, kind: input, shape index: {}]   ;;  %s8321_s18 = inlined_call_operand.hbm [shape: f32[128,128], index: 18, kind: input, shape index: {}]   ;;  %s8322_s19 = inlined_call_operand.hbm [shape: f32[1,128], index: 19, kind: input, shape index: {}]   ;;  %s8323_s20 = inlined_call_operand.vmem [shape: f32[16,128], index: 20, kind: output, shape index: {0}]   ;;  %s8324_s21 = inlined_call_operand.hbm [shape: f32[3,2,64], index: 21, kind: output, shape index: {1}]   ;;  %s8325_s22 = inlined_call_operand.hbm [shape: f32[3,2,64], index: 22, kind: output, shape index: {2}]  }
   0x1   :  { %8340 = sst [smem:[#allocation51_spill]] %s8303_s0 }
   0x2   :  { %8341 = sst [smem:[#allocation52_spill]] %s8304_s1 }
   0x3   :  { %8342 = sst [smem:[#allocation53_spill]] %s8305_s2 }
   0x4   :  { %8343 = sst [smem:[#allocation54_spill]] %s8306_s3 }
   0x5   :  { %8344 = sst [smem:[#allocation55_spill]] %s8307_s4 }
   0x6   :  { %8345 = sst [smem:[#allocation56_spill]] %s8308_s5 }
   0x7   :  { %8346 = sst [smem:[#allocation57_spill]] %s8309_s6 }
   0x8   :  { %28 = vsyncpa [#allocation4], 0 }
   0x9   :  { %29 = vsyncpa [#allocation7], 0 }
   0xa   :  { %30 = vsyncpa [#allocation10], 0 }
   0xb   :  { %31 = vsyncpa [#allocation13], 0 }
   0xc   :  { %32 = vsyncpa [#allocation16], 0 }
   0xd   :  { %33 = vsyncpa [#allocation19], 0 }
   0xe   :  { %34 = vsyncpa [#allocation22], 0 }
   0xf   :  { %35 = vsyncpa [#allocation25], 0 }
  0x10   :  { %36 = vsyncpa [#allocation28], 0 }
  0x11   :  { %37 = vsyncpa [#allocation5], 0  ;;  %s8347_s29 = sld [smem:[#allocation53_spill]] }
  0x17   :  { %s57_s30 = sshll.u32 %s8347_s29, 4  ;;  %s58_s30 = int_to_ptr.hbm [resolvable:$true] %s57_s30 }
  0x18   :  { %38 = vsyncpa [#allocation32], 0  ;;  %s6253_s4 = smov [#allocation6]   ;;  %s8348_s5 = sld [smem:[#allocation57_spill]] }
  0x19   :  { %s59_s0 = sshll.u32 %s6253_s4, 4  ;;  %s6254_s6 = smov [#allocation9]   ;;  %s60_s0 = int_to_ptr.vmem [resolvable:$true] %s59_s0 }
  0x1a   :  { %62 = dma.hbm_to_vmem [thread:$0]  %s58_s30, 16, %s60_s0, [#allocation7]  }
  0x1b   :  { %s86_s25 = sshll.u32 %s6254_s6, 4  ;;  %s110_s27 = sshll.u32 %s8311_s8, 4  ;;  %s87_s25 = int_to_ptr.vmem [resolvable:$true] %s86_s25  ;;  %s111_s27 = int_to_ptr.hbm [resolvable:$true] %s110_s27 }
  0x1c   :  { %s6255_s3 = smov 128   ;;  %s6256_s28 = smov 8  }
  0x1d   :  { %s6257_s29 = smov [#allocation12]   ;;  %s136_s23 = sshll.u32 %s8313_s10, 4  ;;  %s137_s23 = int_to_ptr.hbm [resolvable:$true] %s136_s23 }
  0x1e   :  { %s84_s24 = sshll.u32 %s8348_s5, 4  ;;  %s112_s30 = sshll.u32 %s6257_s29, 4  ;;  %s85_s24 = int_to_ptr.hbm [resolvable:$true] %s84_s24  ;;  %s113_s30 = int_to_ptr.vmem [resolvable:$true] %s112_s30 }
  0x1f   :  { %92 = dma.hbm_to_vmem [thread:$0]  %s85_s24, 4096, %s87_s25, [#allocation10], %s6255_s3, %s6255_s3, %s6256_s28  }
  0x20   :  { %s6258_s1 = smov 16   ;;  %s6259_s5 = smov 1  }
  0x21   :  { %118 = dma.hbm_to_vmem [thread:$0]  %s111_s27, 64, %s113_s30, [#allocation13], %s6258_s1, %s6258_s1, %s6259_s5  }
  0x22   :  { %s6260_s8 = smov [#allocation15]   ;;  %s162_s24 = sshll.u32 %s8315_s12, 4  ;;  %s163_s24 = int_to_ptr.hbm [resolvable:$true] %s162_s24 }
  0x23   :  { %s138_s6 = sshll.u32 %s6260_s8, 4  ;;  %s6261_s10 = smov [#allocation18]   ;;  %s139_s6 = int_to_ptr.vmem [resolvable:$true] %s138_s6 }
  0x24   :  { %144 = dma.hbm_to_vmem [thread:$0]  %s137_s23, 4096, %s139_s6, [#allocation16], %s6255_s3, %s6255_s3, %s6256_s28  }
  0x25   :  { %s164_s25 = sshll.u32 %s6261_s10, 4  ;;  %s188_s27 = sshll.u32 %s8317_s14, 4  ;;  %s165_s25 = int_to_ptr.vmem [resolvable:$true] %s164_s25  ;;  %s189_s27 = int_to_ptr.hbm [resolvable:$true] %s188_s27 }
  0x26   :  { %s6262_s30 = smov 32   ;;  %s6263_s0 = smov 2  }
  0x27   :  { %170 = dma.hbm_to_vmem [thread:$0]  %s163_s24, 96, %s165_s25, [#allocation19], %s6262_s30, %s6262_s30, %s6263_s0  }
  0x28   :  { %s6264_s12 = smov [#allocation21]   ;;  %s213_s23 = sshll.u32 %s8319_s16, 4  ;;  %s214_s23 = int_to_ptr.hbm [resolvable:$true] %s213_s23 }
  0x29   :  { %s190_s8 = sshll.u32 %s6264_s12, 4  ;;  %s234_s10 = sshll.u32 %s8321_s18, 4  ;;  %s191_s8 = int_to_ptr.vmem [resolvable:$true] %s190_s8  ;;  %s235_s10 = int_to_ptr.hbm [resolvable:$true] %s234_s10 }
  0x2a   :  { %196 = dma.hbm_to_vmem [thread:$0]  %s189_s27, 1024, %s191_s8, [#allocation22], %s6255_s3, %s6255_s3, %s6256_s28  }
  0x2b   :  { %s6265_s29 = smov [#allocation24]   ;;  %s6266_s24 = smov [#allocation27]  }
  0x2c   :  { %s215_s4 = sshll.u32 %s6265_s29, 4  ;;  %s236_s25 = sshll.u32 %s6266_s24, 4  ;;  %s216_s4 = int_to_ptr.vmem [resolvable:$true] %s215_s4  ;;  %s237_s25 = int_to_ptr.vmem [resolvable:$true] %s236_s25 }
  0x2d   :  { %218 = dma.hbm_to_vmem [thread:$0]  %s214_s23, 16, %s216_s4, [#allocation25]  }
  0x2e   :  { %s8349_s16 = sld [smem:[#allocation52_spill]]  ;;  %s6267_s6 = smov [#allocation3]  }
  0x2f   :  { %242 = dma.hbm_to_vmem [thread:$0]  %s235_s10, 2048, %s237_s25, [#allocation28], %s6255_s3, %s6255_s3, %s6256_s28  }
  0x30   :  { %s8350_s18 = sld [smem:[#allocation55_spill]]  ;;  %s48_s29 = sshll.u32 %s6267_s6, 4  ;;  %s49_s29 = int_to_ptr.vmem [resolvable:$true] %s48_s29 }
  0x31   :  { %s6268_s23 = smov [#allocation8]   ;;  %s97_s26 = sshll.u32 %s8310_s7, 4  ;;  %s98_s26 = int_to_ptr.hbm [resolvable:$true] %s97_s26 }
  0x32   :  { %s71_s4 = sshll.u32 %s6268_s23, 4  ;;  %s6269_s27 = smov [#allocation11]   ;;  %s72_s4 = int_to_ptr.vmem [resolvable:$true] %s71_s4 }
  0x33   :  { %s99_s8 = sshll.u32 %s6269_s27, 4  ;;  %s175_s23 = sshll.u32 %s8316_s13, 4  ;;  %s100_s8 = int_to_ptr.vmem [resolvable:$true] %s99_s8  ;;  %s176_s23 = int_to_ptr.hbm [resolvable:$true] %s175_s23 }
  0x34   :  { %s46_s2 = sshll.u32 %s8349_s16, 4  ;;  %s123_s16 = sshll.u32 %s8312_s9, 4  ;;  %s47_s2 = int_to_ptr.hbm [resolvable:$true] %s46_s2  ;;  %s124_s16 = int_to_ptr.hbm [resolvable:$true] %s123_s16 }
  0x35   :  { %51 = dma.hbm_to_vmem [thread:$0]  %s47_s2, 16, %s49_s29, [#allocation4]  }
  0x36   :  { %s69_s14 = sshll.u32 %s8350_s18, 4  ;;  %s6270_s2 = smov [#allocation14]   ;;  %s70_s14 = int_to_ptr.hbm [resolvable:$true] %s69_s14 }
  0x37   :  { %77 = dma.hbm_to_vmem [thread:$0]  %s70_s14, 4096, %s72_s4, [#allocation7], %s6255_s3, %s6255_s3, %s6256_s28  }
  0x38   :  { %105 = dma.hbm_to_vmem [thread:$0]  %s98_s26, 4096, %s100_s8, [#allocation10], %s6255_s3, %s6255_s3, %s6256_s28  }
  0x39   :  { %s125_s7 = sshll.u32 %s6270_s2, 4  ;;  %s149_s29 = sshll.u32 %s8314_s11, 4  ;;  %s126_s7 = int_to_ptr.vmem [resolvable:$true] %s125_s7  ;;  %s150_s29 = int_to_ptr.hbm [resolvable:$true] %s149_s29 }
  0x3a   :  { %131 = dma.hbm_to_vmem [thread:$0]  %s124_s16, 4096, %s126_s7, [#allocation13], %s6255_s3, %s6255_s3, %s6256_s28  }
  0x3b   :  { %s6271_s4 = smov [#allocation17]   ;;  %s6272_s12 = smov [#allocation20]  }
  0x3c   :  { %s151_s24 = sshll.u32 %s6271_s4, 4  ;;  %s177_s11 = sshll.u32 %s6272_s12, 4  ;;  %s152_s24 = int_to_ptr.vmem [resolvable:$true] %s151_s24  ;;  %s178_s11 = int_to_ptr.vmem [resolvable:$true] %s177_s11 }
  0x3d   :  { %157 = dma.hbm_to_vmem [thread:$0]  %s150_s29, 64, %s152_s24, [#allocation16], %s6258_s1, %s6258_s1, %s6259_s5  }
  0x3e   :  { %s202_s25 = sshll.u32 %s8318_s15, 4  ;;  %s224_s28 = sshll.u32 %s8320_s17, 4  ;;  %s203_s25 = int_to_ptr.hbm [resolvable:$true] %s202_s25  ;;  %s225_s28 = int_to_ptr.hbm [resolvable:$true] %s224_s28 }
  0x3f   :  { %183 = dma.hbm_to_vmem [thread:$0]  %s176_s23, 96, %s178_s11, [#allocation19], %s6262_s30, %s6262_s30, %s6263_s0  }
  0x40   :  { %s6273_s16 = smov [#allocation23]   ;;  %s6274_s1 = smov [#allocation26]  }
  0x41   :  { %s204_s27 = sshll.u32 %s6273_s16, 4  ;;  %s226_s5 = sshll.u32 %s6274_s1, 4  ;;  %s205_s27 = int_to_ptr.vmem [resolvable:$true] %s204_s27  ;;  %s227_s5 = int_to_ptr.vmem [resolvable:$true] %s226_s5 }
  0x42   :  { %207 = dma.hbm_to_vmem [thread:$0]  %s203_s25, 16, %s205_s27, [#allocation22]  }
  0x43   :  { %s248_s15 = sshll.u32 %s8322_s19, 4  ;;  %s6275_s7 = smov [#allocation29]   ;;  %s249_s15 = int_to_ptr.hbm [resolvable:$true] %s248_s15 }
  0x44   :  { %229 = dma.hbm_to_vmem [thread:$0]  %s225_s28, 16, %s227_s5, [#allocation25]  }
  0x45   :  { %s250_s18 = sshll.u32 %s6275_s7, 4  ;;  %s251_s18 = int_to_ptr.vmem [resolvable:$true] %s250_s18 }
  0x46   :  { %253 = dma.hbm_to_vmem [thread:$0]  %s249_s15, 16, %s251_s18, [#allocation28]  }
  0x47   :  { %6231 = dma.done.wait [#allocation4], 16  }
  0x48   :  { %6232 = vsyncadd [#allocation4], 4294967280 }
  0x49   :  { %6233 = dma.done.wait [#allocation7], 4112  }
  0x4a   :  { %6234 = vsyncadd [#allocation7], 4294963184 }
  0x4b   :  { %6235 = dma.done.wait [#allocation10], 8192  }
  0x4c   :  { %6236 = vsyncadd [#allocation10], 4294959104 }
  0x4d   :  { %6237 = dma.done.wait [#allocation13], 4160  }
  0x4e   :  { %6238 = vsyncadd [#allocation13], 4294963136 }
  0x4f   :  { %6239 = dma.done.wait [#allocation16], 4160  }
  0x50   :  { %6240 = vsyncadd [#allocation16], 4294963136 }
  0x51   :  { %6241 = dma.done.wait [#allocation19], 192  }
  0x52   :  { %6242 = vsyncadd [#allocation19], 4294967104 }
  0x53   :  { %6243 = dma.done.wait [#allocation22], 1040  }
  0x54   :  { %6244 = vsyncadd [#allocation22], 4294966256 }
  0x55   :  { %6245 = dma.done.wait [#allocation25], 32  }
  0x56   :  { %6246 = vsyncadd [#allocation25], 4294967264 }
  0x57   :  { %6247 = dma.done.wait [#allocation28], 2064  }
  0x58   :  { %6248 = vsyncadd [#allocation28], 4294965232  ;;  %v6276_v0 = vmov 16.0   ;;  %s8351_s6 = sld [smem:[#allocation54_spill]]  ;;  %v6484_v4 = vld [vmem:[#allocation8 + $0x38] sm:$0xff]  ;;  %vm324_vm0 = vcmask 64512  }
  0x59   :  { %5289 = vrcp.f32 %v6276_v0  ;;  %v6486_v5 = vld [vmem:[#allocation8 + $0x78] sm:$0xff]  ;;  %v6488_v6 = vld [vmem:[#allocation8 + $0x30] sm:$0xff]  ;;  %v6494_v9 = vld [vmem:[#allocation8 + $0x28] sm:$0xff]  ;;  %s8352_s4 = sld [smem:[#allocation51_spill]]  ;;  %vm542_vm5 = vcmask 523264   ;;  %s6277_s15 = smov [#allocation30]  }
  0x5a   :  { %v6490_v7 = vld [vmem:[#allocation8 + $0x70] sm:$0xff]  ;;  %v6499_v11 = vld [vmem:[#allocation8 + $0x68] sm:$0xff]  ;;  %v6519_v38 = vld [vmem:[#allocation8 + $0x20] sm:$0xff]  ;;  %s8356_s28 = sld [smem:[#allocation56_spill]]  ;;  %s5002_s7 = sshll.u32 %s6277_s15, 4  ;;  %s5003_s7 = int_to_ptr.vmem [resolvable:$true] %s5002_s7 }
  0x5b   :  { %v6521_v39 = vld [vmem:[#allocation8 + $0x60] sm:$0xff]  ;;  %v6525_v41 = vld [vmem:[#allocation8 + $0x18] sm:$0xff]  ;;  %v6529_v43 = vld [vmem:[#allocation8 + $0x10] sm:$0xff]  ;;  %s5004_s19 = sshll.u32 %s8324_s21, 4  ;;  %s5017_s23 = sshll.u32 %s8325_s22, 4  ;;  %s5005_s19 = int_to_ptr.hbm [resolvable:$true] %s5004_s19  ;;  %s5018_s23 = int_to_ptr.hbm [resolvable:$true] %s5017_s23 }
  0x5c   :  { %v6527_v42 = vld [vmem:[#allocation8 + $0x58] sm:$0xff]  ;;  %v6531_v44 = vld [vmem:[#allocation8 + $0x50] sm:$0xff]  ;;  %v6535_v46 = vld [vmem:[#allocation8 + $0x8] sm:$0xff] }
  0x5d   :  { %v6537_v47 = vld [vmem:[#allocation8 + $0x48] sm:$0xff]  ;;  %v6544_v50 = vld [vmem:[#allocation8] sm:$0xff]  ;;  %v5271_v60 = vld [vmem:[#allocation3] ss:$0 sm:$0xff] }
  0x5e   :  { %v5051_v2 = vld [vmem:[%s8351_s6 + $0x10] sm:$0xff]  ;;  %v5055_v3 = vld [vmem:[%s8351_s6 + $0x18] sm:$0xff]  ;;  %v381_v55 = vld [vmem:[%s8351_s6] sm:$0xff] }
  0x5f   :  { %v5290_v1 = vpop.eup %5289  ;;  %467 = vmatpush.msra.mxu2 %v5051_v2  ;;  %497 = vmatpush.msra.mxu3 %v5055_v3  ;;  %v322_v10 = vld [vmem:[%s8352_s4] sm:$0xff]  ;;  %v323_v12 = vld [vmem:[%s8352_s4 + $0x8] sm:$0xff]  ;;  %v6546_v51 = vld [vmem:[#allocation8 + $0x40] sm:$0xff] }
  0x60   :  { %v335_v8 = vmul.f32 16.0, %v5290_v1  ;;  %v325_v13 = vsel %vm324_vm0, %v322_v10, 0.0  ;;  %v326_v14 = vsel %vm324_vm0, %v323_v12, 0.0  ;;  %vm339_vm1 = vweird.f32 %v5290_v1  ;;  %v5047_v56 = vld [vmem:[%s8351_s6 + $0x8] sm:$0xff]  ;;  %407 = vmatpush.msra.mxu0 %v381_v55  ;;  %v5272_v63 = vld [vmem:[#allocation6] ss:$0 sm:$0xff] }
  0x61   :  { %554 = vmatpush.msrb.mxu3 %v6484_v4  ;;  %575 = vmatpush.msrb.mxu2 %v6486_v5  ;;  %v327_v16 = vadd.f32 %v326_v14, %v325_v13  ;;  %v6569_v3 = vld [vmem:[#allocation8 + $0xb8] sm:$0xff]  ;;  %v6579_v13 = vld [vmem:[#allocation8 + $0xf0] sm:$0xff]  ;;  %v6583_v14 = vld [vmem:[#allocation8 + $0xa8] sm:$0xff]  ;;  %s6278_s6 = smov [#allocation31]  }
  0x62   :  { %v336_v15 = vsub.f32 1.0, %v335_v8  ;;  %437 = vmatpush.msra.mxu1 %v5047_v56  ;;  %706 = vmatpush.msrb.mxu0 %v6484_v4  ;;  %v6571_v8 = vld [vmem:[#allocation8 + $0xf8] sm:$0xff]  ;;  %s5015_s29 = sshll.u32 %s6278_s6, 4  ;;  %s5016_s29 = int_to_ptr.vmem [resolvable:$true] %s5015_s29 }
  0x63   :  { %555 = vmatpush.msrb.mxu3 %v6488_v6  ;;  %576 = vmatpush.msrb.mxu2 %v6490_v7  ;;  %v328_v17 = vrot.slane %v327_v16, 4 }
  0x64   :  { %v337_v18 = vmul.f32 %v5290_v1, %v336_v15  ;;  %730 = vmatpush.msrb.mxu1 %v6486_v5  ;;  %707 = vmatpush.msrb.mxu0 %v6488_v6  ;;  %v6585_v15 = vld [vmem:[#allocation8 + $0xe8] sm:$0xff] }
  0x65   :  { %556 = vmatpush.msrb.mxu3 %v6494_v9  ;;  %577 = vmatpush.msrb.mxu2 %v6499_v11  ;;  %v329_v19 = vadd.f32 %v328_v17, %v327_v16  ;;  %v6591_v17 = vld [vmem:[#allocation8 + $0xa0] sm:$0xff] }
  0x66   :  { %v338_v21 = vadd.f32 %v5290_v1, %v337_v18  ;;  %731 = vmatpush.msrb.mxu1 %v6490_v7  ;;  %708 = vmatpush.msrb.mxu0 %v6494_v9  ;;  %v6593_v18 = vld [vmem:[#allocation8 + $0xe0] sm:$0xff] }
  0x67   :  { %v330_v20 = vrot.slane %v329_v19, 2  ;;  %557 = vmatpush.msrb.mxu3 %v6519_v38  ;;  %578 = vmatpush.msrb.mxu2 %v6521_v39 }
  0x68   :  { %v6510_v24 = vsel %vm339_vm1, %v5290_v1, %v338_v21  ;;  %732 = vmatpush.msrb.mxu1 %v6499_v11  ;;  %709 = vmatpush.msrb.mxu0 %v6519_v38  ;;  %v6609_v21 = vld [vmem:[#allocation8 + $0x90] sm:$0xff] }
  0x69   :  { %v331_v22 = vadd.f32 %v330_v20, %v329_v19  ;;  %8353 = vst [vmem:[#allocation44_spill] sm:$0xff] %v6510_v24  ;;  %558 = vmatpush.msrb.mxu3 %v6525_v41  ;;  %579 = vmatpush.msrb.mxu2 %v6527_v42  ;;  %v6599_v19 = vld [vmem:[#allocation8 + $0x98] sm:$0xff] }
  0x6a   :  { %733 = vmatpush.msrb.mxu1 %v6521_v39  ;;  %710 = vmatpush.msrb.mxu0 %v6525_v41  ;;  %v6601_v20 = vld [vmem:[#allocation8 + $0xd8] sm:$0xff] }
  0x6b   :  { %v332_v23 = vrot.slane %v331_v22, 1  ;;  %559 = vmatpush.msrb.mxu3 %v6529_v43  ;;  %580 = vmatpush.msrb.mxu2 %v6531_v44 }
  0x6c   :  { %734 = vmatpush.msrb.mxu1 %v6527_v42  ;;  %711 = vmatpush.msrb.mxu0 %v6529_v43 }
  0x6d   :  { %v333_v25 = vadd.f32 %v332_v23, %v331_v22  ;;  %560 = vmatpush.msrb.mxu3 %v6535_v46  ;;  %581 = vmatpush.msrb.mxu2 %v6537_v47  ;;  %v6611_v22 = vld [vmem:[#allocation8 + $0xd0] sm:$0xff]  ;;  %v6615_v23 = vld [vmem:[#allocation8 + $0x88] sm:$0xff] }
  0x6e   :  { %735 = vmatpush.msrb.mxu1 %v6531_v44  ;;  %712 = vmatpush.msrb.mxu0 %v6535_v46 }
  0x6f   :  { %v341_v26 = vmul.f32 %v6510_v24, %v333_v25  ;;  %561 = vmatpush.msrb.mxu3 %v6544_v50  ;;  %582 = vmatpush.msrb.mxu2 %v6546_v51  ;;  %v6617_v25 = vld [vmem:[#allocation8 + $0xc8] sm:$0xff] }
  0x70   :  { %736 = vmatpush.msrb.mxu1 %v6537_v47  ;;  %713 = vmatpush.msrb.mxu0 %v6544_v50 }
  0x71   :  { %v342_v27 = vsub.f32 %v322_v10, %v341_v26  ;;  %v6513_v28 = vsub.f32 %v323_v12, %v341_v26  ;;  %v6577_v12 = vld [vmem:[#allocation8 + $0xb0] sm:$0xff]  ;;  %v6623_v26 = vld [vmem:[#allocation8 + $0x80] sm:$0xff] }
  0x72   :  { %737 = vmatpush.msrb.mxu1 %v6546_v51 }
  0x73   :  { %v344_v29 = vmul.f32 %v342_v27, %v342_v27  ;;  %v345_v30 = vmul.f32 %v6513_v28, %v6513_v28 }
  0x75   :  { %v346_v31 = vsel %vm324_vm0, %v344_v29, 0.0  ;;  %v347_v32 = vsel %vm324_vm0, %v345_v30, 0.0 }
  0x76   :  { %v348_v33 = vadd.f32 %v347_v32, %v346_v31 }
  0x78   :  { %v349_v34 = vrot.slane %v348_v33, 4 }
  0x7a   :  { %v350_v35 = vadd.f32 %v349_v34, %v348_v33  ;;  %v6688_v33 = vld [vmem:[%s8356_s28] ss:$0 sm:$0xff]  ;;  %v6693_v34 = vld [vmem:[%s8356_s28 + $0x1] ss:$0 sm:$0xff] }
  0x7b   :  { %8357 = vst [vmem:[#allocation47_spill] sm:$0xff] %v6693_v34 }
  0x7c   :  { %v351_v36 = vrot.slane %v350_v35, 2 }
  0x7e   :  { %v352_v37 = vadd.f32 %v351_v36, %v350_v35 }
  0x80   :  { %v353_v40 = vrot.slane %v352_v37, 1 }
  0x82   :  { %v354_v45 = vadd.f32 %v353_v40, %v352_v37 }
  0x84   :  { %v355_v48 = vmul.f32 %v354_v45, %v6510_v24 }
  0x86   :  { %v356_v49 = vadd.f32 1e-05, %v355_v48 }
  0x88   :  { %5291 = vrsqrt.f32 %v356_v49  ;;  %vm363_vm2 = vweird.f32 %v356_v49 }
  0x8e   :  { %v5292_v52 = vpop.eup %5291 }
  0x8f   :  { %v358_v53 = vmul.f32 %v5292_v52, %v356_v49  ;;  %vm364_vm3 = vweird.f32 %v5292_v52 }
  0x90   :  { %vm365_vm4 = vmor %vm363_vm2, %vm364_vm3  ;;  %vm693_vm2 = vcmask 517120  }
  0x91   :  { %v359_v54 = vmul.f32 %v5292_v52, %v358_v53  ;;  %v6706_v53 = vld [vmem:[%s8356_s28 + $0x3] ss:$0 sm:$0xff] }
  0x92   :  { %8358 = vst [vmem:[#allocation48_spill] sm:$0xff] %v6706_v53 }
  0x93   :  { %v360_v57 = vmul.f32 0.5, %v359_v54 }
  0x95   :  { %v361_v58 = vsub.f32 1.5, %v360_v57 }
  0x97   :  { %v362_v59 = vmul.f32 %v5292_v52, %v361_v58 }
  0x99   :  { %v366_v61 = vsel %vm365_vm4, %v5292_v52, %v362_v59 }
  0x9a   :  { %v367_v62 = vmul.f32 %v366_v61, %v342_v27  ;;  %v368_v1 = vmul.f32 %v366_v61, %v6513_v28  ;;  %v6625_v27 = vld [vmem:[#allocation8 + $0xc0] sm:$0xff]  ;;  %v540_v28 = vld [vmem:[#allocation18] sm:$0x3] }
  0x9c   :  { %v373_v0 = vmul.f32 %v5271_v60, %v367_v62  ;;  %v374_v10 = vmul.f32 %v5271_v60, %v368_v1 }
  0x9e   :  { %v379_v2 = vadd.f32 %v5272_v63, %v373_v0  ;;  %v380_v16 = vadd.f32 %v5272_v63, %v374_v10  ;;  %v6715_v0 = vld [vmem:[%s8356_s28 + $0x2] ss:$0 sm:$0xff] }
  0x9f   :  { %8359 = vst [vmem:[#allocation49_spill] sm:$0xff] %v6715_v0 }
  0xa0   :  { %5053 = vmatmul.msk.f32.vlgmr.msra.gmra.mxu2 %vm324_vm0, %v379_v2  ;;  %5057 = vmatmul.msk.f32.vlgmr.msra.gmra.mxu3 %vm324_vm0, %v379_v2 }
  0xa1   :  { %596 = vmatpush.msra.mxu2 %v6569_v3  ;;  %617 = vmatpush.msra.mxu3 %v6571_v8 }
  0xa2   :  { %5045 = vmatmul.msk.f32.vlgmr.msra.gmra.mxu0 %vm324_vm0, %v379_v2  ;;  %5049 = vmatmul.msk.f32.vlgmr.msra.gmra.mxu1 %vm324_vm0, %v379_v2 }
  0xa3   :  { %597 = vmatpush.msra.mxu2 %v6577_v12  ;;  %618 = vmatpush.msra.mxu3 %v6579_v13 }
  0xa4   :  { %874 = vmatpush.msra.mxu0 %v6484_v4  ;;  %898 = vmatpush.msra.mxu1 %v6486_v5 }
  0xa5   :  { %598 = vmatpush.msra.mxu2 %v6583_v14  ;;  %619 = vmatpush.msra.mxu3 %v6585_v15 }
  0xa6   :  { %875 = vmatpush.msra.mxu0 %v6488_v6  ;;  %899 = vmatpush.msra.mxu1 %v6490_v7 }
  0xa7   :  { %599 = vmatpush.msra.mxu2 %v6591_v17  ;;  %620 = vmatpush.msra.mxu3 %v6593_v18 }
  0xa8   :  { %5054 = vmatmul.msk.f32.gmra.mxu2 %vm324_vm0, %v380_v16  ;;  %5058 = vmatmul.msk.f32.gmra.mxu3 %vm324_vm0, %v380_v16 }
  0xa9   :  { %600 = vmatpush.msra.mxu2 %v6599_v19  ;;  %621 = vmatpush.msra.mxu3 %v6601_v20 }
  0xaa   :  { %5046 = vmatmul.msk.f32.gmra.mxu0 %vm324_vm0, %v380_v16  ;;  %5050 = vmatmul.msk.f32.gmra.mxu1 %vm324_vm0, %v380_v16 }
  0xab   :  { %601 = vmatpush.msra.mxu2 %v6609_v21  ;;  %622 = vmatpush.msra.mxu3 %v6611_v22 }
  0xac   :  { %876 = vmatpush.msra.mxu0 %v6494_v9  ;;  %900 = vmatpush.msra.mxu1 %v6499_v11 }
  0xad   :  { %602 = vmatpush.msra.mxu2 %v6615_v23  ;;  %623 = vmatpush.msra.mxu3 %v6617_v25 }
  0xae   :  { %877 = vmatpush.msra.mxu0 %v6519_v38  ;;  %901 = vmatpush.msra.mxu1 %v6521_v39 }
  0xaf   :  { %603 = vmatpush.msra.mxu2 %v6623_v26  ;;  %624 = vmatpush.msra.mxu3 %v6625_v27 }
  0xb0   :  { %5059 = vmatmul.msk.f32.vlgmr.msrb.gmra.mxu3 %vm542_vm5, %v540_v28  ;;  %5060 = vmatmul.msk.f32.vlgmr.msrb.gmra.mxu2 %vm542_vm5, %v540_v28 }
  0xb1   :  { %754 = vmatpush.msrb.mxu2 %v6569_v3  ;;  %778 = vmatpush.msrb.mxu3 %v6571_v8 }
  0xb2   :  { %878 = vmatpush.msra.mxu0 %v6525_v41  ;;  %902 = vmatpush.msra.mxu1 %v6527_v42 }
  0xb3   :  { %755 = vmatpush.msrb.mxu2 %v6577_v12  ;;  %779 = vmatpush.msrb.mxu3 %v6579_v13 }
  0xb4   :  { %879 = vmatpush.msra.mxu0 %v6529_v43  ;;  %903 = vmatpush.msra.mxu1 %v6531_v44 }
  0xb5   :  { %756 = vmatpush.msrb.mxu2 %v6583_v14  ;;  %780 = vmatpush.msrb.mxu3 %v6585_v15 }
  0xb6   :  { %880 = vmatpush.msra.mxu0 %v6535_v46  ;;  %904 = vmatpush.msra.mxu1 %v6537_v47 }
  0xb7   :  { %757 = vmatpush.msrb.mxu2 %v6591_v17  ;;  %781 = vmatpush.msrb.mxu3 %v6593_v18 }
  0xb8   :  { %5061 = vmatmul.msk.f32.vlgmr.msra.gmra.mxu2 %vm542_vm5, %v540_v28  ;;  %5062 = vmatmul.msk.f32.vlgmr.msra.gmra.mxu3 %vm542_vm5, %v540_v28 }
  0xb9   :  { %758 = vmatpush.msrb.mxu2 %v6599_v19  ;;  %782 = vmatpush.msrb.mxu3 %v6601_v20 }
  0xba   :  { %881 = vmatpush.msra.mxu0 %v6544_v50  ;;  %905 = vmatpush.msra.mxu1 %v6546_v51 }
  0xbb   :  { %759 = vmatpush.msrb.mxu2 %v6609_v21  ;;  %783 = vmatpush.msrb.mxu3 %v6611_v22 }
  0xbd   :  { %760 = vmatpush.msrb.mxu2 %v6615_v23  ;;  %784 = vmatpush.msrb.mxu3 %v6617_v25 }
  0xbf   :  { %761 = vmatpush.msrb.mxu2 %v6623_v26  ;;  %785 = vmatpush.msrb.mxu3 %v6625_v27 }
  0xc1   :  { %922 = vmatpush.msra.mxu2 %v6569_v3  ;;  %946 = vmatpush.msra.mxu3 %v6571_v8 }
  0xc3   :  { %923 = vmatpush.msra.mxu2 %v6577_v12  ;;  %947 = vmatpush.msra.mxu3 %v6579_v13 }
  0xc5   :  { %924 = vmatpush.msra.mxu2 %v6583_v14  ;;  %948 = vmatpush.msra.mxu3 %v6585_v15 }
  0xc7   :  { %925 = vmatpush.msra.mxu2 %v6591_v17  ;;  %949 = vmatpush.msra.mxu3 %v6593_v18 }
  0xc9   :  { %926 = vmatpush.msra.mxu2 %v6599_v19  ;;  %950 = vmatpush.msra.mxu3 %v6601_v20 }
  0xcb   :  { %927 = vmatpush.msra.mxu2 %v6609_v21  ;;  %951 = vmatpush.msra.mxu3 %v6611_v22 }
  0xcd   :  { %928 = vmatpush.msra.mxu2 %v6615_v23  ;;  %952 = vmatpush.msra.mxu3 %v6617_v25 }
  0xcf   :  { %929 = vmatpush.msra.mxu2 %v6623_v26  ;;  %953 = vmatpush.msra.mxu3 %v6625_v27 }
 0x11f   :  { %v409_v35 = vpop.f32.mrf.mxu0  ;;  %v439_v36 = vpop.f32.mrf.mxu1 }
 0x120   :  { %v6696_v37 = vadd.f32 %v6688_v33, %v409_v35  ;;  %v6699_v40 = vadd.f32 %v6693_v34, %v439_v36 }
 0x123   :  { %v469_v29 = vpop.f32.mrf.mxu2  ;;  %v499_v30 = vpop.f32.mrf.mxu3 }
 0x124   :  { %v6709_v56 = vadd.f32 %v6706_v53, %v499_v30  ;;  %v6718_v2 = vadd.f32 %v6715_v0, %v469_v29 }
 0x12b   :  { %v6681_v31 = vpop.f32.mrf.mxu2  ;;  %v6683_v32 = vpop.f32.mrf.mxu3 }
 0x12c   :  { %8354 = vst [vmem:[#allocation45_spill] sm:$0xff] %v6681_v31 }
 0x12d   :  { %8355 = vst [vmem:[#allocation46_spill] sm:$0xff] %v6683_v32 }
 0x133   :  { %v563_v45 = vpop.f32.mrf.mxu3  ;;  %v584_v48 = vpop.f32.mrf.mxu2 }
 0x134   :  { %v566_v49 = vadd.f32 %v563_v45, %v6696_v37  ;;  %v587_v52 = vadd.f32 %v584_v48, %v6699_v40 }
 0x136   :  { %v5064_v54 = vmul.f32 -1.442695, %v566_v49  ;;  %v5063_v55 = vmul.f32 -1.442695, %v587_v52 }
 0x138   :  { %5293 = vpow2.f32 %v5064_v54 }
 0x139   :  { %5295 = vpow2.f32 %v5063_v55 }
 0x13b   :  { %v626_v57 = vpop.f32.mrf.mxu3  ;;  %v605_v1 = vpop.f32.mrf.mxu2 }
 0x13c   :  { %v629_v58 = vadd.f32 %v626_v57, %v6709_v56  ;;  %v608_v28 = vadd.f32 %v605_v1, %v6718_v2 }
 0x13e   :  { %v5294_v59 = vpop.eup %5293  ;;  %v5065_v60 = vmul.f32 -1.442695, %v629_v58 }
 0x13f   :  { %v5296_v61 = vpop.eup %5295  ;;  %v653_v62 = vadd.f32 1.0, %v5294_v59 }
 0x140   :  { %v633_v63 = vadd.f32 1.0, %v5296_v61  ;;  %5297 = vpow2.f32 %v5065_v60 }
 0x141   :  { %5299 = vrcp.f32 %v653_v62  ;;  %v665_v52 = vand.u32 2147483648, %v653_v62  ;;  %v663_v57 = vand.u32 2147483647, %v653_v62  ;;  %vm659_vm8 = vweird.f32 %v653_v62 }
 0x142   :  { %5301 = vrcp.f32 %v633_v63  ;;  %v645_v54 = vand.u32 2147483648, %v633_v63  ;;  %v643_v29 = vand.u32 2147483647, %v633_v63  ;;  %vm639_vm9 = vweird.f32 %v633_v63 }
 0x143   :  { %v666_v1 = vor.u32 1.1754944e-38, %v665_v52  ;;  %vm664_vm12 = vcmp.eq.f32.partialorder %v663_v57, 8.507059e+37 }
 0x144   :  { %vm644_vm13 = vcmp.eq.f32.partialorder %v643_v29, 8.507059e+37 }
 0x146   :  { %v5298_v10 = vpop.eup %5297 }
 0x147   :  { %v5300_v16 = vpop.eup %5299  ;;  %v675_v30 = vadd.f32 1.0, %v5298_v10  ;;  %v646_v10 = vor.u32 1.1754944e-38, %v645_v54 }
 0x148   :  { %v5302_v35 = vpop.eup %5301  ;;  %v655_v36 = vmul.f32 %v5300_v16, %v653_v62  ;;  %vm660_vm6 = vweird.f32 %v5300_v16 }
 0x149   :  { %v635_v45 = vmul.f32 %v5302_v35, %v633_v63  ;;  %5303 = vrcp.f32 %v675_v30  ;;  %vm640_vm7 = vweird.f32 %v5302_v35  ;;  %vm661_vm10 = vmor %vm659_vm8, %vm660_vm6  ;;  %v687_v52 = vand.u32 2147483648, %v675_v30 }
 0x14a   :  { %v656_v48 = vsub.f32 1.0, %v655_v36  ;;  %5305 = vtanh.f32 %v608_v28  ;;  %vm641_vm11 = vmor %vm639_vm9, %vm640_vm7  ;;  %v541_v36 = vld [vmem:[#allocation20] sm:$0x3]  ;;  %vm681_vm15 = vweird.f32 %v675_v30 }
 0x14b   :  { %v636_v49 = vsub.f32 1.0, %v635_v45  ;;  %v688_v57 = vor.u32 1.1754944e-38, %v687_v52 }
 0x14c   :  { %v657_v55 = vmul.f32 %v5300_v16, %v656_v48 }
 0x14d   :  { %v637_v58 = vmul.f32 %v5302_v35, %v636_v49 }
 0x14e   :  { %v658_v59 = vadd.f32 %v5300_v16, %v657_v55 }
 0x14f   :  { %v5304_v60 = vpop.eup %5303  ;;  %v638_v61 = vadd.f32 %v5302_v35, %v637_v58 }
 0x150   :  { %v662_v45 = vsel %vm661_vm10, %v5300_v16, %v658_v59  ;;  %v677_v28 = vmul.f32 %v5304_v60, %v675_v30  ;;  %v5306_v24 = vpop.eup %5305  ;;  %vm682_vm14 = vweird.f32 %v5304_v60  ;;  %v685_v16 = vand.u32 2147483647, %v675_v30 }
 0x151   :  { %v642_v48 = vsel %vm641_vm11, %v5302_v35, %v638_v61  ;;  %v667_v0 = vsel %vm664_vm12, %v666_v1, %v662_v45  ;;  %vm683_vm0 = vmor %vm681_vm15, %vm682_vm14 }
 0x152   :  { %v647_v49 = vsel %vm644_vm13, %v646_v10, %v642_v48  ;;  %v670_v31 = vmul.f32 %v5306_v24, %v667_v0  ;;  %v678_v53 = vsub.f32 1.0, %v677_v28  ;;  %vm686_vm1 = vcmp.eq.f32.partialorder %v685_v16, 8.507059e+37 }
 0x153   :  { %v649_v55 = vmul.f32 %v647_v49, %v541_v36 }
 0x154   :  { %v679_v62 = vmul.f32 %v5304_v60, %v678_v53  ;;  %v6763_v53 = vpop.f32.mrf.mxu1 }
 0x155   :  { %v6721_v32 = vadd.f32 %v670_v31, %v649_v55  ;;  %v6761_v31 = vpop.f32.mrf.mxu0  ;;  %8360 = vst [vmem:[#allocation50_spill] sm:$0xff] %v6763_v53 }
 0x156   :  { %v680_v63 = vadd.f32 %v5304_v60, %v679_v62 }
 0x157   :  { %5307 = vtanh.f32 %v6721_v32 }
 0x158   :  { %v684_v54 = vsel %vm683_vm0, %v5304_v60, %v680_v63  ;;  %vm860_vm0 = vcmask 519170  }
 0x159   :  { %v689_v58 = vsel %vm686_vm1, %v688_v57, %v684_v54 }
 0x15d   :  { %v5308_v35 = vpop.eup %5307 }
 0x15e   :  { %v692_v24 = vmul.f32 %v5308_v35, %v689_v58 }
 0x160   :  { %694 = vst.msk [vmem:[#allocation2] sm:$0x3] %vm693_vm2, %v692_v24  ;;  %5066 = vmatmul.msk.f32.vlgmr.msrb.gmra.mxu0 %vm542_vm5, %v692_v24  ;;  %5067 = vmatmul.msk.f32.vlgmr.msrb.gmra.mxu1 %vm542_vm5, %v692_v24 }
 0x161   :  { %5068 = vmatmul.msk.f32.vlgmr.msrb.gmra.mxu2 %vm542_vm5, %v692_v24  ;;  %5069 = vmatmul.msk.f32.vlgmr.msrb.gmra.mxu3 %vm542_vm5, %v692_v24 }
 0x162   :  { %1042 = vmatpush.msrb.mxu0 %v6484_v4  ;;  %1066 = vmatpush.msrb.mxu1 %v6486_v5 }
 0x163   :  { %1090 = vmatpush.msrb.mxu2 %v6569_v3  ;;  %1114 = vmatpush.msrb.mxu3 %v6571_v8 }
 0x164   :  { %1043 = vmatpush.msrb.mxu0 %v6488_v6  ;;  %1067 = vmatpush.msrb.mxu1 %v6490_v7 }
 0x165   :  { %1091 = vmatpush.msrb.mxu2 %v6577_v12  ;;  %1115 = vmatpush.msrb.mxu3 %v6579_v13 }
 0x166   :  { %1044 = vmatpush.msrb.mxu0 %v6494_v9  ;;  %1068 = vmatpush.msrb.mxu1 %v6499_v11 }
 0x167   :  { %1092 = vmatpush.msrb.mxu2 %v6583_v14  ;;  %1116 = vmatpush.msrb.mxu3 %v6585_v15 }
 0x168   :  { %1045 = vmatpush.msrb.mxu0 %v6519_v38  ;;  %1069 = vmatpush.msrb.mxu1 %v6521_v39 }
 0x169   :  { %1093 = vmatpush.msrb.mxu2 %v6591_v17  ;;  %1117 = vmatpush.msrb.mxu3 %v6593_v18 }
 0x16a   :  { %1046 = vmatpush.msrb.mxu0 %v6525_v41  ;;  %1070 = vmatpush.msrb.mxu1 %v6527_v42 }
 0x16b   :  { %1094 = vmatpush.msrb.mxu2 %v6599_v19  ;;  %1118 = vmatpush.msrb.mxu3 %v6601_v20 }
 0x16c   :  { %1047 = vmatpush.msrb.mxu0 %v6529_v43  ;;  %1071 = vmatpush.msrb.mxu1 %v6531_v44 }
 0x16d   :  { %1095 = vmatpush.msrb.mxu2 %v6609_v21  ;;  %1119 = vmatpush.msrb.mxu3 %v6611_v22 }
 0x16e   :  { %1048 = vmatpush.msrb.mxu0 %v6535_v46  ;;  %1072 = vmatpush.msrb.mxu1 %v6537_v47 }
 0x16f   :  { %1096 = vmatpush.msrb.mxu2 %v6615_v23  ;;  %1120 = vmatpush.msrb.mxu3 %v6617_v25 }
 0x170   :  { %1049 = vmatpush.msrb.mxu0 %v6544_v50  ;;  %1073 = vmatpush.msrb.mxu1 %v6546_v51 }
 0x171   :  { %1097 = vmatpush.msrb.mxu2 %v6623_v26  ;;  %1121 = vmatpush.msrb.mxu3 %v6625_v27 }
 0x1dd   :  { %v715_v0 = vpop.f32.mrf.mxu0  ;;  %v739_v30 = vpop.f32.mrf.mxu1 }
 0x1de   :  { %v719_v29 = vrot.slane %v715_v0, 6  ;;  %v743_v59 = vrot.slane %v739_v30, 6 }
 0x1e0   :  { %v721_v60 = vadd.f32 %v719_v29, %v6696_v37  ;;  %v745_v61 = vadd.f32 %v743_v59, %v6699_v40 }
 0x1e2   :  { %v5071_v1 = vmul.f32 -1.442695, %v721_v60  ;;  %v5070_v10 = vmul.f32 -1.442695, %v745_v61 }
 0x1e4   :  { %5309 = vpow2.f32 %v5071_v1  ;;  %v787_v36 = vpop.f32.mrf.mxu3  ;;  %v763_v52 = vpop.f32.mrf.mxu2 }
 0x1e5   :  { %5311 = vpow2.f32 %v5070_v10  ;;  %v791_v45 = vrot.slane %v787_v36, 6  ;;  %v767_v16 = vrot.slane %v763_v52, 6 }
 0x1e7   :  { %v793_v28 = vadd.f32 %v791_v45, %v6709_v56  ;;  %v769_v58 = vadd.f32 %v767_v16, %v6718_v2  ;;  %v814_v16 = vrot.slane %v6721_v32, 6 }
 0x1e9   :  { %v5072_v48 = vmul.f32 -1.442695, %v793_v28 }
 0x1ea   :  { %v5310_v49 = vpop.eup %5309 }
 0x1eb   :  { %v5312_v55 = vpop.eup %5311  ;;  %v820_v62 = vadd.f32 1.0, %v5310_v49  ;;  %5313 = vpow2.f32 %v5072_v48 }
 0x1ec   :  { %v797_v63 = vadd.f32 1.0, %v5312_v55 }
 0x1ed   :  { %5315 = vrcp.f32 %v820_v62  ;;  %v832_v60 = vand.u32 2147483648, %v820_v62  ;;  %v830_v10 = vand.u32 2147483647, %v820_v62  ;;  %vm826_vm6 = vweird.f32 %v820_v62 }
 0x1ee   :  { %5317 = vrcp.f32 %v797_v63  ;;  %v809_v61 = vand.u32 2147483648, %v797_v63  ;;  %v807_v45 = vand.u32 2147483647, %v797_v63  ;;  %vm803_vm7 = vweird.f32 %v797_v63 }
 0x1ef   :  { %v833_v55 = vor.u32 1.1754944e-38, %v832_v60  ;;  %vm831_vm10 = vcmp.eq.f32.partialorder %v830_v10, 8.507059e+37 }
 0x1f0   :  { %vm808_vm11 = vcmp.eq.f32.partialorder %v807_v45, 8.507059e+37 }
 0x1f1   :  { %v5314_v54 = vpop.eup %5313 }
 0x1f2   :  { %v842_v57 = vadd.f32 1.0, %v5314_v54  ;;  %v810_v54 = vor.u32 1.1754944e-38, %v809_v61 }
 0x1f3   :  { %v5316_v35 = vpop.eup %5315 }
 0x1f4   :  { %v5318_v24 = vpop.eup %5317  ;;  %v822_v0 = vmul.f32 %v5316_v35, %v820_v62  ;;  %5319 = vrcp.f32 %v842_v57  ;;  %vm827_vm3 = vweird.f32 %v5316_v35  ;;  %v854_v32 = vand.u32 2147483648, %v842_v57 }
 0x1f5   :  { %v799_v30 = vmul.f32 %v5318_v24, %v797_v63  ;;  %5321 = vtanh.f32 %v769_v58  ;;  %vm804_vm4 = vweird.f32 %v5318_v24  ;;  %vm828_vm8 = vmor %vm826_vm6, %vm827_vm3  ;;  %vm848_vm13 = vweird.f32 %v842_v57 }
 0x1f6   :  { %v823_v29 = vsub.f32 1.0, %v822_v0  ;;  %vm805_vm9 = vmor %vm803_vm7, %vm804_vm4  ;;  %v852_v60 = vand.u32 2147483647, %v842_v57  ;;  %v855_v61 = vor.u32 1.1754944e-38, %v854_v32 }
 0x1f7   :  { %v800_v59 = vsub.f32 1.0, %v799_v30 }
 0x1f8   :  { %v824_v1 = vmul.f32 %v5316_v35, %v823_v29  ;;  %vm853_vm15 = vcmp.eq.f32.partialorder %v852_v60, 8.507059e+37 }
 0x1f9   :  { %v801_v36 = vmul.f32 %v5318_v24, %v800_v59 }
 0x1fa   :  { %v5320_v28 = vpop.eup %5319  ;;  %v825_v48 = vadd.f32 %v5316_v35, %v824_v1 }
 0x1fb   :  { %v802_v49 = vadd.f32 %v5318_v24, %v801_v36  ;;  %v844_v52 = vmul.f32 %v5320_v28, %v842_v57  ;;  %v5322_v0 = vpop.eup %5321  ;;  %vm849_vm12 = vweird.f32 %v5320_v28 }
 0x1fc   :  { %v829_v58 = vsel %vm828_vm8, %v5316_v35, %v825_v48  ;;  %vm850_vm14 = vmor %vm848_vm13, %vm849_vm12 }
 0x1fd   :  { %v806_v30 = vsel %vm805_vm9, %v5318_v24, %v802_v49  ;;  %v834_v29 = vsel %vm831_vm10, %v833_v55, %v829_v58  ;;  %v845_v59 = vsub.f32 1.0, %v844_v52 }
 0x1fe   :  { %v811_v34 = vsel %vm808_vm11, %v810_v54, %v806_v30  ;;  %v837_v53 = vmul.f32 %v5322_v0, %v834_v29 }
 0x1ff   :  { %v816_v1 = vmul.f32 %v814_v16, %v811_v34  ;;  %v846_v62 = vmul.f32 %v5320_v28, %v845_v59 }
 0x201   :  { %v6770_v63 = vadd.f32 %v837_v53, %v816_v1  ;;  %v847_v36 = vadd.f32 %v5320_v28, %v846_v62 }
 0x203   :  { %5323 = vtanh.f32 %v6770_v63  ;;  %v851_v35 = vsel %vm850_vm14, %v5320_v28, %v847_v36 }
 0x204   :  { %v856_v10 = vsel %vm853_vm15, %v855_v61, %v851_v35  ;;  %vm1028_vm15 = vcmask 521220  }
 0x209   :  { %v5324_v24 = vpop.eup %5323 }
 0x20a   :  { %v859_v45 = vmul.f32 %v5324_v24, %v856_v10 }
 0x20c   :  { %861 = vst.msk [vmem:[#allocation2] sm:$0xc] %vm860_vm0, %v859_v45  ;;  %v863_v34 = vrot.slane %v859_v45, 2 }
 0x20e   :  { %5073 = vmatmul.msk.f32.vlgmr.msra.gmra.mxu0 %vm542_vm5, %v863_v34  ;;  %5074 = vmatmul.msk.f32.vlgmr.msra.gmra.mxu1 %vm542_vm5, %v863_v34 }
 0x20f   :  { %5075 = vmatmul.msk.f32.vlgmr.msra.gmra.mxu2 %vm542_vm5, %v863_v34  ;;  %5076 = vmatmul.msk.f32.vlgmr.msra.gmra.mxu3 %vm542_vm5, %v863_v34 }
 0x210   :  { %1210 = vmatpush.msra.mxu0 %v6484_v4  ;;  %1231 = vmatpush.msra.mxu1 %v6486_v5 }
 0x211   :  { %1252 = vmatpush.msra.mxu2 %v6569_v3  ;;  %1273 = vmatpush.msra.mxu3 %v6571_v8 }
 0x212   :  { %1211 = vmatpush.msra.mxu0 %v6488_v6  ;;  %1232 = vmatpush.msra.mxu1 %v6490_v7 }
 0x213   :  { %1253 = vmatpush.msra.mxu2 %v6577_v12  ;;  %1274 = vmatpush.msra.mxu3 %v6579_v13 }
 0x214   :  { %1212 = vmatpush.msra.mxu0 %v6494_v9  ;;  %1233 = vmatpush.msra.mxu1 %v6499_v11 }
 0x215   :  { %1254 = vmatpush.msra.mxu2 %v6583_v14  ;;  %1275 = vmatpush.msra.mxu3 %v6585_v15 }
 0x216   :  { %1213 = vmatpush.msra.mxu0 %v6519_v38  ;;  %1234 = vmatpush.msra.mxu1 %v6521_v39 }
 0x217   :  { %1255 = vmatpush.msra.mxu2 %v6591_v17  ;;  %1276 = vmatpush.msra.mxu3 %v6593_v18 }
 0x218   :  { %1214 = vmatpush.msra.mxu0 %v6525_v41  ;;  %1235 = vmatpush.msra.mxu1 %v6527_v42 }
 0x219   :  { %1256 = vmatpush.msra.mxu2 %v6599_v19  ;;  %1277 = vmatpush.msra.mxu3 %v6601_v20 }
 0x21a   :  { %1215 = vmatpush.msra.mxu0 %v6529_v43  ;;  %1236 = vmatpush.msra.mxu1 %v6531_v44 }
 0x21b   :  { %1257 = vmatpush.msra.mxu2 %v6609_v21  ;;  %1278 = vmatpush.msra.mxu3 %v6611_v22 }
 0x21c   :  { %1216 = vmatpush.msra.mxu0 %v6535_v46  ;;  %1237 = vmatpush.msra.mxu1 %v6537_v47 }
 0x21d   :  { %1258 = vmatpush.msra.mxu2 %v6615_v23  ;;  %1279 = vmatpush.msra.mxu3 %v6617_v25 }
 0x21e   :  { %1217 = vmatpush.msra.mxu0 %v6544_v50  ;;  %1238 = vmatpush.msra.mxu1 %v6546_v51 }
 0x21f   :  { %1259 = vmatpush.msra.mxu2 %v6623_v26  ;;  %1280 = vmatpush.msra.mxu3 %v6625_v27 }
 0x28b   :  { %v883_v4 = vpop.f32.mrf.mxu0  ;;  %v907_v5 = vpop.f32.mrf.mxu1 }
 0x28c   :  { %v887_v6 = vrot.slane %v883_v4, 4  ;;  %v911_v7 = vrot.slane %v907_v5, 4 }
 0x28e   :  { %v889_v9 = vadd.f32 %v887_v6, %v6696_v37  ;;  %v913_v11 = vadd.f32 %v911_v7, %v6699_v40 }
 0x290   :  { %v5078_v53 = vmul.f32 -1.442695, %v889_v9  ;;  %v5077_v57 = vmul.f32 -1.442695, %v913_v11 }
 0x292   :  { %5325 = vpow2.f32 %v5078_v53  ;;  %v955_v28 = vpop.f32.mrf.mxu3  ;;  %v931_v0 = vpop.f32.mrf.mxu2 }
 0x293   :  { %5327 = vpow2.f32 %v5077_v57  ;;  %v959_v48 = vrot.slane %v955_v28, 4  ;;  %v935_v30 = vrot.slane %v931_v0, 4  ;;  %v982_v57 = vrot.slane %v6770_v63, 6 }
 0x295   :  { %v961_v49 = vadd.f32 %v959_v48, %v6709_v56  ;;  %v937_v62 = vadd.f32 %v935_v30, %v6718_v2 }
 0x297   :  { %v5079_v55 = vmul.f32 -1.442695, %v961_v49 }
 0x298   :  { %v5326_v52 = vpop.eup %5325 }
 0x299   :  { %v5328_v16 = vpop.eup %5327  ;;  %v988_v54 = vadd.f32 1.0, %v5326_v52  ;;  %5329 = vpow2.f32 %v5079_v55 }
 0x29a   :  { %v965_v58 = vadd.f32 1.0, %v5328_v16 }
 0x29b   :  { %5331 = vrcp.f32 %v988_v54  ;;  %v1000_v24 = vand.u32 2147483648, %v988_v54  ;;  %v998_v34 = vand.u32 2147483647, %v988_v54  ;;  %vm994_vm4 = vweird.f32 %v988_v54 }
 0x29c   :  { %5333 = vrcp.f32 %v965_v58  ;;  %v977_v10 = vand.u32 2147483648, %v965_v58  ;;  %v975_v5 = vand.u32 2147483647, %v965_v58  ;;  %vm971_vm6 = vweird.f32 %v965_v58 }
 0x29d   :  { %v1001_v11 = vor.u32 1.1754944e-38, %v1000_v24  ;;  %vm999_vm9 = vcmp.eq.f32.partialorder %v998_v34, 8.507059e+37  ;;  %v6834_v34 = vld [vmem:[#allocation8 + $0x70] sm:$0xff] }
 0x29e   :  { %v978_v28 = vor.u32 1.1754944e-38, %v977_v10  ;;  %vm976_vm10 = vcmp.eq.f32.partialorder %v975_v5, 8.507059e+37  ;;  %v6826_v10 = vld [vmem:[#allocation8 + $0x78] sm:$0xff]  ;;  %v6842_v5 = vld [vmem:[#allocation8 + $0x68] sm:$0xff] }
 0x29f   :  { %v5330_v29 = vpop.eup %5329 }
 0x2a0   :  { %v1010_v59 = vadd.f32 1.0, %v5330_v29 }
 0x2a1   :  { %v5332_v1 = vpop.eup %5331 }
 0x2a2   :  { %v5334_v36 = vpop.eup %5333  ;;  %v990_v32 = vmul.f32 %v5332_v1, %v988_v54  ;;  %5335 = vrcp.f32 %v1010_v59  ;;  %vm995_vm1 = vweird.f32 %v5332_v1  ;;  %v1022_v63 = vand.u32 2147483648, %v1010_v59 }
 0x2a3   :  { %v967_v60 = vmul.f32 %v5334_v36, %v965_v58  ;;  %5337 = vtanh.f32 %v937_v62  ;;  %vm972_vm3 = vweird.f32 %v5334_v36  ;;  %vm996_vm7 = vmor %vm994_vm4, %vm995_vm1  ;;  %vm1016_vm12 = vweird.f32 %v1010_v59 }
 0x2a4   :  { %v991_v35 = vsub.f32 1.0, %v990_v32  ;;  %vm973_vm8 = vmor %vm971_vm6, %vm972_vm3  ;;  %v1020_v32 = vand.u32 2147483647, %v1010_v59 }
 0x2a5   :  { %v968_v61 = vsub.f32 1.0, %v967_v60  ;;  %v1023_v60 = vor.u32 1.1754944e-38, %v1022_v63 }
 0x2a6   :  { %v992_v45 = vmul.f32 %v5332_v1, %v991_v35  ;;  %vm1021_vm14 = vcmp.eq.f32.partialorder %v1020_v32, 8.507059e+37 }
 0x2a7   :  { %v969_v4 = vmul.f32 %v5334_v36, %v968_v61 }
 0x2a8   :  { %v5336_v6 = vpop.eup %5335  ;;  %v993_v7 = vadd.f32 %v5332_v1, %v992_v45  ;;  %v6831_v45 = vld [vmem:[#allocation8 + $0x30] sm:$0xff] }
 0x2a9   :  { %v970_v9 = vadd.f32 %v5334_v36, %v969_v4  ;;  %v1012_v53 = vmul.f32 %v5336_v6, %v1010_v59  ;;  %v5338_v49 = vpop.eup %5337  ;;  %vm1017_vm11 = vweird.f32 %v5336_v6  ;;  %v6823_v59 = vld [vmem:[#allocation8 + $0x38] sm:$0xff]  ;;  %v6839_v4 = vld [vmem:[#allocation8 + $0x28] sm:$0xff] }
 0x2aa   :  { %v997_v48 = vsel %vm996_vm7, %v5332_v1, %v993_v7  ;;  %vm1018_vm13 = vmor %vm1016_vm12, %vm1017_vm11 }
 0x2ab   :  { %v974_v55 = vsel %vm973_vm8, %v5334_v36, %v970_v9  ;;  %v1002_v52 = vsel %vm999_vm9, %v1001_v11, %v997_v48  ;;  %v1013_v16 = vsub.f32 1.0, %v1012_v53 }
 0x2ac   :  { %v979_v0 = vsel %vm976_vm10, %v978_v28, %v974_v55  ;;  %v1005_v30 = vmul.f32 %v5338_v49, %v1002_v52 }
 0x2ad   :  { %v984_v29 = vmul.f32 %v982_v57, %v979_v0  ;;  %v1014_v54 = vmul.f32 %v5336_v6, %v1013_v16 }
 0x2af   :  { %v6815_v58 = vadd.f32 %v1005_v30, %v984_v29  ;;  %v1015_v62 = vadd.f32 %v5336_v6, %v1014_v54 }
 0x2b1   :  { %5339 = vtanh.f32 %v6815_v58  ;;  %v1019_v1 = vsel %vm1018_vm13, %v5336_v6, %v1015_v62  ;;  %v1150_v49 = vrot.slane %v6815_v58, 6 }
 0x2b2   :  { %v1024_v35 = vsel %vm1021_vm14, %v1023_v60, %v1019_v1 }
 0x2b7   :  { %v5340_v36 = vpop.eup %5339 }
 0x2b8   :  { %v1027_v61 = vmul.f32 %v5340_v36, %v1024_v35 }
 0x2ba   :  { %1029 = vst.msk [vmem:[#allocation2] sm:$0x30] %vm1028_vm15, %v1027_v61  ;;  %v1031_v24 = vrot.slane %v1027_v61, 4 }
 0x2bc   :  { %5080 = vmatmul.msk.f32.vlgmr.msrb.gmra.mxu0 %vm542_vm5, %v1031_v24  ;;  %5081 = vmatmul.msk.f32.vlgmr.msrb.gmra.mxu1 %vm542_vm5, %v1031_v24 }
 0x2bd   :  { %5082 = vmatmul.msk.f32.vlgmr.msrb.gmra.mxu2 %vm542_vm5, %v1031_v24  ;;  %5083 = vmatmul.msk.f32.vlgmr.msrb.gmra.mxu3 %vm542_vm5, %v1031_v24 }
 0x2be   :  { %1364 = vmatpush.msrb.mxu0 %v6823_v59  ;;  %1388 = vmatpush.msrb.mxu1 %v6826_v10 }
 0x2bf   :  { %1412 = vmatpush.msrb.mxu2 %v6569_v3  ;;  %1436 = vmatpush.msrb.mxu3 %v6571_v8 }
 0x2c0   :  { %1365 = vmatpush.msrb.mxu0 %v6831_v45  ;;  %1389 = vmatpush.msrb.mxu1 %v6834_v34 }
 0x2c1   :  { %1413 = vmatpush.msrb.mxu2 %v6577_v12  ;;  %1437 = vmatpush.msrb.mxu3 %v6579_v13 }
 0x2c2   :  { %1366 = vmatpush.msrb.mxu0 %v6839_v4  ;;  %1390 = vmatpush.msrb.mxu1 %v6842_v5 }
 0x2c3   :  { %1414 = vmatpush.msrb.mxu2 %v6583_v14  ;;  %1438 = vmatpush.msrb.mxu3 %v6585_v15 }
 0x2c4   :  { %1367 = vmatpush.msrb.mxu0 %v6519_v38  ;;  %1391 = vmatpush.msrb.mxu1 %v6521_v39 }
 0x2c5   :  { %1415 = vmatpush.msrb.mxu2 %v6591_v17  ;;  %1439 = vmatpush.msrb.mxu3 %v6593_v18 }
 0x2c6   :  { %1368 = vmatpush.msrb.mxu0 %v6525_v41  ;;  %1392 = vmatpush.msrb.mxu1 %v6527_v42 }
 0x2c7   :  { %1416 = vmatpush.msrb.mxu2 %v6599_v19  ;;  %1440 = vmatpush.msrb.mxu3 %v6601_v20 }
 0x2c8   :  { %1369 = vmatpush.msrb.mxu0 %v6529_v43  ;;  %1393 = vmatpush.msrb.mxu1 %v6531_v44 }
 0x2c9   :  { %1417 = vmatpush.msrb.mxu2 %v6609_v21  ;;  %1441 = vmatpush.msrb.mxu3 %v6611_v22 }
 0x2ca   :  { %1370 = vmatpush.msrb.mxu0 %v6535_v46  ;;  %1394 = vmatpush.msrb.mxu1 %v6537_v47 }
 0x2cb   :  { %1418 = vmatpush.msrb.mxu2 %v6615_v23  ;;  %1442 = vmatpush.msrb.mxu3 %v6617_v25 }
 0x2cc   :  { %1371 = vmatpush.msrb.mxu0 %v6544_v50  ;;  %1395 = vmatpush.msrb.mxu1 %v6546_v51 }
 0x2cd   :  { %1419 = vmatpush.msrb.mxu2 %v6623_v26  ;;  %1443 = vmatpush.msrb.mxu3 %v6625_v27 }
 0x339   :  { %v1051_v38 = vpop.f32.mrf.mxu0  ;;  %v1075_v39 = vpop.f32.mrf.mxu1 }
 0x33a   :  { %v1055_v41 = vrot.slane %v1051_v38, 2  ;;  %v1079_v42 = vrot.slane %v1075_v39, 2 }
 0x33c   :  { %v1057_v43 = vadd.f32 %v1055_v41, %v6696_v37  ;;  %v1081_v44 = vadd.f32 %v1079_v42, %v6699_v40  ;;  %v6882_v42 = vld [vmem:[#allocation8 + $0xb8] sm:$0xff] }
 0x33e   :  { %v5085_v46 = vmul.f32 -1.442695, %v1057_v43  ;;  %v5084_v47 = vmul.f32 -1.442695, %v1081_v44  ;;  %v6885_v43 = vld [vmem:[#allocation8 + $0xf8] sm:$0xff]  ;;  %v6890_v44 = vld [vmem:[#allocation8 + $0xb0] sm:$0xff] }
 0x340   :  { %5341 = vpow2.f32 %v5085_v46  ;;  %v1123_v3 = vpop.f32.mrf.mxu3  ;;  %v1099_v17 = vpop.f32.mrf.mxu2  ;;  %v6893_v46 = vld [vmem:[#allocation8 + $0xf0] sm:$0xff] }
 0x341   :  { %5343 = vpow2.f32 %v5084_v47  ;;  %v1127_v50 = vrot.slane %v1123_v3, 2  ;;  %v1103_v18 = vrot.slane %v1099_v17, 2  ;;  %v6898_v47 = vld [vmem:[#allocation8 + $0xa8] sm:$0xff]  ;;  %v6925_v17 = vld [vmem:[#allocation8 + $0xd8] sm:$0xff] }
 0x342   :  { %v6901_v3 = vld [vmem:[#allocation8 + $0xe8] sm:$0xff] }
 0x343   :  { %v1129_v51 = vadd.f32 %v1127_v50, %v6709_v56  ;;  %v1105_v22 = vadd.f32 %v1103_v18, %v6718_v2  ;;  %v6904_v50 = vld [vmem:[#allocation8 + $0x20] sm:$0xff]  ;;  %v6928_v18 = vld [vmem:[#allocation8 + $0x10] sm:$0xff] }
 0x345   :  { %v5086_v8 = vmul.f32 -1.442695, %v1129_v51  ;;  %v6907_v51 = vld [vmem:[#allocation8 + $0x60] sm:$0xff] }
 0x346   :  { %v5342_v12 = vpop.eup %5341 }
 0x347   :  { %v5344_v13 = vpop.eup %5343  ;;  %v1156_v14 = vadd.f32 1.0, %v5342_v12  ;;  %5345 = vpow2.f32 %v5086_v8  ;;  %v6910_v8 = vld [vmem:[#allocation8 + $0xa0] sm:$0xff] }
 0x348   :  { %v1133_v15 = vadd.f32 1.0, %v5344_v13  ;;  %v6913_v12 = vld [vmem:[#allocation8 + $0xe0] sm:$0xff]  ;;  %v6916_v13 = vld [vmem:[#allocation8 + $0x18] sm:$0xff] }
 0x349   :  { %5347 = vrcp.f32 %v1156_v14  ;;  %v1168_v40 = vand.u32 2147483648, %v1156_v14  ;;  %v1166_v7 = vand.u32 2147483647, %v1156_v14  ;;  %vm1162_vm4 = vweird.f32 %v1156_v14 }
 0x34a   :  { %5349 = vrcp.f32 %v1133_v15  ;;  %v1145_v56 = vand.u32 2147483648, %v1133_v15  ;;  %v1143_v11 = vand.u32 2147483647, %v1133_v15  ;;  %vm1139_vm6 = vweird.f32 %v1133_v15 }
 0x34b   :  { %v1169_v28 = vor.u32 1.1754944e-38, %v1168_v40  ;;  %vm1167_vm9 = vcmp.eq.f32.partialorder %v1166_v7, 8.507059e+37  ;;  %v6958_v40 = vld [vmem:[#allocation8 + $0x80] sm:$0xff]  ;;  %v8361_v7 = vld [vmem:[#allocation50_spill] sm:$0xff] }
 0x34c   :  { %v1146_v55 = vor.u32 1.1754944e-38, %v1145_v56  ;;  %vm1144_vm10 = vcmp.eq.f32.partialorder %v1143_v11, 8.507059e+37  ;;  %v6961_v56 = vld [vmem:[#allocation8 + $0xc0] sm:$0xff] }
 0x34d   :  { %v5346_v19 = vpop.eup %5345 }
 0x34e   :  { %v1178_v20 = vadd.f32 1.0, %v5346_v19  ;;  %v6931_v19 = vld [vmem:[#allocation8 + $0x50] sm:$0xff] }
 0x34f   :  { %v5348_v21 = vpop.eup %5347 }
 0x350   :  { %v5350_v23 = vpop.eup %5349  ;;  %v1158_v25 = vmul.f32 %v5348_v21, %v1156_v14  ;;  %5351 = vrcp.f32 %v1178_v20  ;;  %vm1163_vm1 = vweird.f32 %v5348_v21  ;;  %v1190_v58 = vand.u32 2147483648, %v1178_v20  ;;  %v6919_v14 = vld [vmem:[#allocation8 + $0x58] sm:$0xff] }
 0x351   :  { %v1135_v26 = vmul.f32 %v5350_v23, %v1133_v15  ;;  %5353 = vtanh.f32 %v1105_v22  ;;  %vm1140_vm3 = vweird.f32 %v5350_v23  ;;  %vm1164_vm7 = vmor %vm1162_vm4, %vm1163_vm1  ;;  %vm1184_vm12 = vweird.f32 %v1178_v20  ;;  %v6922_v15 = vld [vmem:[#allocation8 + $0x98] sm:$0xff]  ;;  %v6940_v22 = vld [vmem:[#allocation8 + $0x8] sm:$0xff] }
 0x352   :  { %v1159_v27 = vsub.f32 1.0, %v1158_v25  ;;  %vm1141_vm8 = vmor %vm1139_vm6, %vm1140_vm3  ;;  %v1188_v36 = vand.u32 2147483647, %v1178_v20  ;;  %v1191_v61 = vor.u32 1.1754944e-38, %v1190_v58  ;;  %vm1196_vm1 = vcmask 523270   ;;  %v6946_v25 = vld [vmem:[#allocation8 + $0x88] sm:$0xff] }
 0x353   :  { %v1136_v37 = vsub.f32 1.0, %v1135_v26  ;;  %v6949_v26 = vld [vmem:[#allocation8 + $0xc8] sm:$0xff]  ;;  %v8366_v58 = vld [vmem:[#allocation49_spill] sm:$0xff] }
 0x354   :  { %v1160_v6 = vmul.f32 %v5348_v21, %v1159_v27  ;;  %vm1189_vm14 = vcmp.eq.f32.partialorder %v1188_v36, 8.507059e+37  ;;  %v6952_v27 = vld [vmem:[#allocation8] sm:$0xff] }
 0x355   :  { %v1137_v9 = vmul.f32 %v5350_v23, %v1136_v37  ;;  %v6955_v37 = vld [vmem:[#allocation8 + $0x40] sm:$0xff] }
 0x356   :  { %v5352_v53 = vpop.eup %5351  ;;  %v1161_v57 = vadd.f32 %v5348_v21, %v1160_v6  ;;  %v6966_v6 = vadd.f32 %v6688_v33, %v6761_v31 }
 0x357   :  { %v1138_v2 = vadd.f32 %v5350_v23, %v1137_v9  ;;  %v1180_v48 = vmul.f32 %v5352_v53, %v1178_v20  ;;  %v5354_v16 = vpop.eup %5353  ;;  %vm1185_vm11 = vweird.f32 %v5352_v53  ;;  %v6934_v20 = vld [vmem:[#allocation8 + $0x90] sm:$0xff]  ;;  %v8362_v9 = vld [vmem:[#allocation47_spill] sm:$0xff] }
 0x358   :  { %v1165_v52 = vsel %vm1164_vm7, %v5348_v21, %v1161_v57  ;;  %vm1186_vm13 = vmor %vm1184_vm12, %vm1185_vm11  ;;  %v6937_v21 = vld [vmem:[#allocation8 + $0xd0] sm:$0xff]  ;;  %v6970_v11 = vadd.f32 %v8362_v9, %v8361_v7 }
 0x359   :  { %v1142_v0 = vsel %vm1141_vm8, %v5350_v23, %v1138_v2  ;;  %v1170_v30 = vsel %vm1167_vm9, %v1169_v28, %v1165_v52  ;;  %v1181_v29 = vsub.f32 1.0, %v1180_v48  ;;  %v6943_v23 = vld [vmem:[#allocation8 + $0x48] sm:$0xff] }
 0x35a   :  { %v1147_v54 = vsel %vm1144_vm10, %v1146_v55, %v1142_v0  ;;  %v1173_v62 = vmul.f32 %v5354_v16, %v1170_v30  ;;  %v8363_v55 = vld [vmem:[#allocation46_spill] sm:$0xff]  ;;  %v8364_v52 = vld [vmem:[#allocation48_spill] sm:$0xff] }
 0x35b   :  { %v1152_v63 = vmul.f32 %v1150_v49, %v1147_v54  ;;  %v1182_v32 = vmul.f32 %v5352_v53, %v1181_v29  ;;  %v6976_v16 = vadd.f32 %v8364_v52, %v8363_v55 }
 0x35d   :  { %v6872_v1 = vadd.f32 %v1173_v62, %v1152_v63  ;;  %v1183_v60 = vadd.f32 %v5352_v53, %v1182_v32 }
 0x35f   :  { %5355 = vtanh.f32 %v6872_v1  ;;  %v1187_v35 = vsel %vm1186_vm13, %v5352_v53, %v1183_v60  ;;  %v8365_v60 = vld [vmem:[#allocation45_spill] sm:$0xff] }
 0x360   :  { %v1192_v38 = vsel %vm1189_vm14, %v1191_v61, %v1187_v35  ;;  %v6981_v36 = vadd.f32 %v8366_v58, %v8365_v60 }
 0x365   :  { %v5356_v24 = vpop.eup %5355 }
 0x366   :  { %v1195_v39 = vmul.f32 %v5356_v24, %v1192_v38 }
 0x368   :  { %1197 = vst.msk [vmem:[#allocation2] sm:$0xc0] %vm1196_vm1, %v1195_v39  ;;  %v1199_v41 = vrot.slane %v1195_v39, 6 }
 0x36a   :  { %5087 = vmatmul.msk.f32.vlgmr.msra.gmra.mxu0 %vm542_vm5, %v1199_v41  ;;  %5088 = vmatmul.msk.f32.vlgmr.msra.gmra.mxu1 %vm542_vm5, %v1199_v41 }
 0x36b   :  { %5089 = vmatmul.msk.f32.vlgmr.msra.gmra.mxu2 %vm542_vm5, %v1199_v41  ;;  %5090 = vmatmul.msk.f32.vlgmr.msra.gmra.mxu3 %vm542_vm5, %v1199_v41 }
 0x36c   :  { %1531 = vmatpush.msra.mxu0 %v6823_v59  ;;  %1555 = vmatpush.msra.mxu1 %v6826_v10 }
 0x36d   :  { %1579 = vmatpush.msra.mxu2 %v6882_v42  ;;  %1603 = vmatpush.msra.mxu3 %v6885_v43 }
 0x36e   :  { %1532 = vmatpush.msra.mxu0 %v6831_v45  ;;  %1556 = vmatpush.msra.mxu1 %v6834_v34 }
 0x36f   :  { %1580 = vmatpush.msra.mxu2 %v6890_v44  ;;  %1604 = vmatpush.msra.mxu3 %v6893_v46 }
 0x370   :  { %1533 = vmatpush.msra.mxu0 %v6839_v4  ;;  %1557 = vmatpush.msra.mxu1 %v6842_v5 }
 0x371   :  { %1581 = vmatpush.msra.mxu2 %v6898_v47  ;;  %1605 = vmatpush.msra.mxu3 %v6901_v3 }
 0x372   :  { %1534 = vmatpush.msra.mxu0 %v6904_v50  ;;  %1558 = vmatpush.msra.mxu1 %v6907_v51 }
 0x373   :  { %1582 = vmatpush.msra.mxu2 %v6910_v8  ;;  %1606 = vmatpush.msra.mxu3 %v6913_v12 }
 0x374   :  { %1535 = vmatpush.msra.mxu0 %v6916_v13  ;;  %1559 = vmatpush.msra.mxu1 %v6919_v14 }
 0x375   :  { %1583 = vmatpush.msra.mxu2 %v6922_v15  ;;  %1607 = vmatpush.msra.mxu3 %v6925_v17 }
 0x376   :  { %1536 = vmatpush.msra.mxu0 %v6928_v18  ;;  %1560 = vmatpush.msra.mxu1 %v6931_v19 }
 0x377   :  { %1584 = vmatpush.msra.mxu2 %v6934_v20  ;;  %1608 = vmatpush.msra.mxu3 %v6937_v21 }
 0x378   :  { %1537 = vmatpush.msra.mxu0 %v6940_v22  ;;  %1561 = vmatpush.msra.mxu1 %v6943_v23 }
 0x379   :  { %1585 = vmatpush.msra.mxu2 %v6946_v25  ;;  %1609 = vmatpush.msra.mxu3 %v6949_v26 }
 0x37a   :  { %1538 = vmatpush.msra.mxu0 %v6952_v27  ;;  %1562 = vmatpush.msra.mxu1 %v6955_v37 }
 0x37b   :  { %1586 = vmatpush.msra.mxu2 %v6958_v40  ;;  %1610 = vmatpush.msra.mxu3 %v6961_v56 }
 0x3e7   :  { %v1219_v53 = vpop.f32.mrf.mxu0  ;;  %v1240_v57 = vpop.f32.mrf.mxu1 }
 0x3e8   :  { %v1222_v2 = vadd.f32 %v1219_v53, %v6966_v6  ;;  %v1243_v28 = vadd.f32 %v1240_v57, %v6970_v11 }
 0x3ea   :  { %v5092_v48 = vmul.f32 -1.442695, %v1222_v2  ;;  %v5091_v49 = vmul.f32 -1.442695, %v1243_v28 }
 0x3ec   :  { %5357 = vpow2.f32 %v5092_v48 }
 0x3ed   :  { %5359 = vpow2.f32 %v5091_v49 }
 0x3ee   :  { %v1282_v33 = vpop.f32.mrf.mxu3  ;;  %v1261_v63 = vpop.f32.mrf.mxu2 }
 0x3ef   :  { %v1285_v31 = vadd.f32 %v1282_v33, %v6976_v16  ;;  %v1264_v24 = vadd.f32 %v1261_v63, %v6981_v36 }
 0x3f1   :  { %v5093_v0 = vmul.f32 -1.442695, %v1285_v31 }
 0x3f2   :  { %v5358_v30 = vpop.eup %5357 }
 0x3f3   :  { %v5360_v29 = vpop.eup %5359  ;;  %v1312_v54 = vadd.f32 1.0, %v5358_v30  ;;  %5361 = vpow2.f32 %v5093_v0 }
 0x3f4   :  { %v1289_v62 = vadd.f32 1.0, %v5360_v29  ;;  %v1306_v29 = vrot.slane %v6872_v1, 6 }
 0x3f5   :  { %5363 = vrcp.f32 %v1312_v54  ;;  %v1324_v53 = vand.u32 2147483648, %v1312_v54  ;;  %v1322_v28 = vand.u32 2147483647, %v1312_v54  ;;  %vm1318_vm6 = vweird.f32 %v1312_v54 }
 0x3f6   :  { %5365 = vrcp.f32 %v1289_v62  ;;  %v1301_v57 = vand.u32 2147483648, %v1289_v62  ;;  %v1299_v49 = vand.u32 2147483647, %v1289_v62  ;;  %vm1295_vm7 = vweird.f32 %v1289_v62 }
 0x3f7   :  { %v1325_v31 = vor.u32 1.1754944e-38, %v1324_v53  ;;  %vm1323_vm10 = vcmp.eq.f32.partialorder %v1322_v28, 8.507059e+37 }
 0x3f8   :  { %v1302_v30 = vor.u32 1.1754944e-38, %v1301_v57  ;;  %vm1300_vm11 = vcmp.eq.f32.partialorder %v1299_v49, 8.507059e+37 }
 0x3f9   :  { %v5362_v32 = vpop.eup %5361 }
 0x3fa   :  { %v1334_v35 = vadd.f32 1.0, %v5362_v32 }
 0x3fb   :  { %v5364_v61 = vpop.eup %5363 }
 0x3fc   :  { %v5366_v38 = vpop.eup %5365  ;;  %v1314_v39 = vmul.f32 %v5364_v61, %v1312_v54  ;;  %5367 = vrcp.f32 %v1334_v35  ;;  %vm1319_vm3 = vweird.f32 %v5364_v61  ;;  %v1346_v53 = vand.u32 2147483648, %v1334_v35 }
 0x3fd   :  { %v1291_v41 = vmul.f32 %v5366_v38, %v1289_v62  ;;  %5369 = vtanh.f32 %v1264_v24  ;;  %vm1296_vm4 = vweird.f32 %v5366_v38  ;;  %vm1320_vm8 = vmor %vm1318_vm6, %vm1319_vm3  ;;  %vm1340_vm13 = vweird.f32 %v1334_v35 }
 0x3fe   :  { %v1315_v7 = vsub.f32 1.0, %v1314_v39  ;;  %vm1297_vm9 = vmor %vm1295_vm7, %vm1296_vm4  ;;  %v1344_v1 = vand.u32 2147483647, %v1334_v35  ;;  %v1347_v57 = vor.u32 1.1754944e-38, %v1346_v53 }
 0x3ff   :  { %v1292_v9 = vsub.f32 1.0, %v1291_v41 }
 0x400   :  { %v1316_v2 = vmul.f32 %v5364_v61, %v1315_v7  ;;  %vm1345_vm3 = vcmp.eq.f32.partialorder %v1344_v1, 8.507059e+37 }
 0x401   :  { %v1293_v48 = vmul.f32 %v5366_v38, %v1292_v9 }
 0x402   :  { %v5368_v55 = vpop.eup %5367  ;;  %v1317_v52 = vadd.f32 %v5364_v61, %v1316_v2 }
 0x403   :  { %v1294_v33 = vadd.f32 %v5366_v38, %v1293_v48  ;;  %v1336_v0 = vmul.f32 %v5368_v55, %v1334_v35  ;;  %v5370_v32 = vpop.eup %5369  ;;  %vm1341_vm12 = vweird.f32 %v5368_v55 }
 0x404   :  { %v1321_v63 = vsel %vm1320_vm8, %v5364_v61, %v1317_v52  ;;  %vm1342_vm14 = vmor %vm1340_vm13, %vm1341_vm12 }
 0x405   :  { %v1298_v60 = vsel %vm1297_vm9, %v5366_v38, %v1294_v33  ;;  %v1326_v58 = vsel %vm1323_vm10, %v1325_v31, %v1321_v63  ;;  %v1337_v24 = vsub.f32 1.0, %v1336_v0 }
 0x406   :  { %v1303_v39 = vsel %vm1300_vm11, %v1302_v30, %v1298_v60  ;;  %v1329_v41 = vmul.f32 %v5370_v32, %v1326_v58 }
 0x407   :  { %v1308_v7 = vmul.f32 %v1306_v29, %v1303_v39  ;;  %v1338_v54 = vmul.f32 %v5368_v55, %v1337_v24 }
 0x409   :  { %v6985_v62 = vadd.f32 %v1329_v41, %v1308_v7  ;;  %v1339_v9 = vadd.f32 %v5368_v55, %v1338_v54 }
 0x40b   :  { %5371 = vtanh.f32 %v6985_v62  ;;  %v1343_v61 = vsel %vm1342_vm14, %v5368_v55, %v1339_v9  ;;  %v1472_v31 = vrot.slane %v6985_v62, 6 }
 0x40c   :  { %v1348_v2 = vsel %vm1345_vm3, %v1347_v57, %v1343_v61 }
 0x411   :  { %v5372_v38 = vpop.eup %5371 }
 0x412   :  { %v1351_v28 = vmul.f32 %v5372_v38, %v1348_v2 }
 0x414   :  { %1352 = vst.msk [vmem:[#allocation2 + $0x8] sm:$0x3] %vm693_vm2, %v1351_v28  ;;  %5094 = vmatmul.msk.f32.vlgmr.msrb.gmra.mxu0 %vm542_vm5, %v1351_v28  ;;  %5095 = vmatmul.msk.f32.vlgmr.msrb.gmra.mxu1 %vm542_vm5, %v1351_v28 }
 0x415   :  { %5096 = vmatmul.msk.f32.vlgmr.msrb.gmra.mxu2 %vm542_vm5, %v1351_v28  ;;  %5097 = vmatmul.msk.f32.vlgmr.msrb.gmra.mxu3 %vm542_vm5, %v1351_v28 }
 0x416   :  { %1698 = vmatpush.msrb.mxu0 %v6823_v59  ;;  %1722 = vmatpush.msrb.mxu1 %v6826_v10 }
 0x417   :  { %1746 = vmatpush.msrb.mxu2 %v6882_v42  ;;  %1770 = vmatpush.msrb.mxu3 %v6885_v43 }
 0x418   :  { %1699 = vmatpush.msrb.mxu0 %v6831_v45  ;;  %1723 = vmatpush.msrb.mxu1 %v6834_v34 }
 0x419   :  { %1747 = vmatpush.msrb.mxu2 %v6890_v44  ;;  %1771 = vmatpush.msrb.mxu3 %v6893_v46 }
 0x41a   :  { %1700 = vmatpush.msrb.mxu0 %v6839_v4  ;;  %1724 = vmatpush.msrb.mxu1 %v6842_v5 }
 0x41b   :  { %1748 = vmatpush.msrb.mxu2 %v6898_v47  ;;  %1772 = vmatpush.msrb.mxu3 %v6901_v3 }
 0x41c   :  { %1701 = vmatpush.msrb.mxu0 %v6904_v50  ;;  %1725 = vmatpush.msrb.mxu1 %v6907_v51 }
 0x41d   :  { %1749 = vmatpush.msrb.mxu2 %v6910_v8  ;;  %1773 = vmatpush.msrb.mxu3 %v6913_v12 }
 0x41e   :  { %1702 = vmatpush.msrb.mxu0 %v6916_v13  ;;  %1726 = vmatpush.msrb.mxu1 %v6919_v14 }
 0x41f   :  { %1750 = vmatpush.msrb.mxu2 %v6922_v15  ;;  %1774 = vmatpush.msrb.mxu3 %v6925_v17 }
 0x420   :  { %1703 = vmatpush.msrb.mxu0 %v6928_v18  ;;  %1727 = vmatpush.msrb.mxu1 %v6931_v19 }
 0x421   :  { %1751 = vmatpush.msrb.mxu2 %v6934_v20  ;;  %1775 = vmatpush.msrb.mxu3 %v6937_v21 }
 0x422   :  { %1704 = vmatpush.msrb.mxu0 %v6940_v22  ;;  %1728 = vmatpush.msrb.mxu1 %v6943_v23 }
 0x423   :  { %1752 = vmatpush.msrb.mxu2 %v6946_v25  ;;  %1776 = vmatpush.msrb.mxu3 %v6949_v26 }
 0x424   :  { %1705 = vmatpush.msrb.mxu0 %v6952_v27  ;;  %1729 = vmatpush.msrb.mxu1 %v6955_v37 }
 0x425   :  { %1753 = vmatpush.msrb.mxu2 %v6958_v40  ;;  %1777 = vmatpush.msrb.mxu3 %v6961_v56 }
 0x491   :  { %v1373_v59 = vpop.f32.mrf.mxu0  ;;  %v1397_v10 = vpop.f32.mrf.mxu1 }
 0x492   :  { %v1377_v45 = vrot.slane %v1373_v59, 6  ;;  %v1401_v34 = vrot.slane %v1397_v10, 6 }
 0x494   :  { %v1379_v4 = vadd.f32 %v1377_v45, %v6966_v6  ;;  %v1403_v5 = vadd.f32 %v1401_v34, %v6970_v11 }
 0x496   :  { %v5099_v42 = vmul.f32 -1.442695, %v1379_v4  ;;  %v5098_v43 = vmul.f32 -1.442695, %v1403_v5 }
 0x498   :  { %5373 = vpow2.f32 %v5099_v42  ;;  %v1445_v44 = vpop.f32.mrf.mxu3  ;;  %v1421_v13 = vpop.f32.mrf.mxu2 }
 0x499   :  { %5375 = vpow2.f32 %v5098_v43  ;;  %v1449_v46 = vrot.slane %v1445_v44, 6  ;;  %v1425_v14 = vrot.slane %v1421_v13, 6  ;;  %v1864_v43 = vld [vmem:[#allocation9 + $0x38] sm:$0xff]  ;;  %v1979_v13 = vld [vmem:[#allocation9 + $0xf0] sm:$0xff] }
 0x49a   :  { %v1906_v44 = vld [vmem:[#allocation9 + $0x78] sm:$0xff] }
 0x49b   :  { %v1451_v47 = vadd.f32 %v1449_v46, %v6976_v16  ;;  %v1427_v19 = vadd.f32 %v1425_v14, %v6981_v36  ;;  %v1943_v46 = vld [vmem:[#allocation9 + $0xb8] sm:$0xff]  ;;  %v1862_v14 = vld [vmem:[#allocation9 + $0x28] sm:$0xff] }
 0x49d   :  { %v5100_v3 = vmul.f32 -1.442695, %v1451_v47 }
 0x49e   :  { %v5374_v50 = vpop.eup %5373 }
 0x49f   :  { %v5376_v51 = vpop.eup %5375  ;;  %v1478_v8 = vadd.f32 1.0, %v5374_v50  ;;  %5377 = vpow2.f32 %v5100_v3  ;;  %v1980_v3 = vld [vmem:[#allocation9 + $0xf8] sm:$0xff]  ;;  %v1863_v50 = vld [vmem:[#allocation9 + $0x30] sm:$0xff] }
 0x4a0   :  { %v1455_v12 = vadd.f32 1.0, %v5376_v51  ;;  %v1905_v51 = vld [vmem:[#allocation9 + $0x70] sm:$0xff] }
 0x4a1   :  { %5379 = vrcp.f32 %v1478_v8  ;;  %v1490_v26 = vand.u32 2147483648, %v1478_v8  ;;  %v1488_v40 = vand.u32 2147483647, %v1478_v8  ;;  %vm1484_vm7 = vweird.f32 %v1478_v8 }
 0x4a2   :  { %5381 = vrcp.f32 %v1455_v12  ;;  %v1467_v27 = vand.u32 2147483648, %v1455_v12  ;;  %v1465_v35 = vand.u32 2147483647, %v1455_v12  ;;  %vm1461_vm8 = vweird.f32 %v1455_v12 }
 0x4a3   :  { %v1491_v52 = vor.u32 1.1754944e-38, %v1490_v26  ;;  %vm1489_vm11 = vcmp.eq.f32.partialorder %v1488_v40, 8.507059e+37 }
 0x4a4   :  { %v1468_v0 = vor.u32 1.1754944e-38, %v1467_v27  ;;  %vm1466_vm12 = vcmp.eq.f32.partialorder %v1465_v35, 8.507059e+37 }
 0x4a5   :  { %v5378_v15 = vpop.eup %5377 }
 0x4a6   :  { %v1500_v17 = vadd.f32 1.0, %v5378_v15  ;;  %v1904_v15 = vld [vmem:[#allocation9 + $0x68] sm:$0xff] }
 0x4a7   :  { %v5380_v18 = vpop.eup %5379 }
 0x4a8   :  { %v5382_v20 = vpop.eup %5381  ;;  %v1480_v21 = vmul.f32 %v5380_v18, %v1478_v8  ;;  %5383 = vrcp.f32 %v1500_v17  ;;  %vm1485_vm4 = vweird.f32 %v5380_v18  ;;  %v1512_v62 = vand.u32 2147483648, %v1500_v17 }
 0x4a9   :  { %v1457_v22 = vmul.f32 %v5382_v20, %v1455_v12  ;;  %5385 = vtanh.f32 %v1427_v19  ;;  %vm1462_vm6 = vweird.f32 %v5382_v20  ;;  %vm1486_vm9 = vmor %vm1484_vm7, %vm1485_vm4  ;;  %vm1506_vm14 = vweird.f32 %v1500_v17  ;;  %v1942_v12 = vld [vmem:[#allocation9 + $0xb0] sm:$0xff] }
 0x4aa   :  { %v1481_v23 = vsub.f32 1.0, %v1480_v21  ;;  %vm1463_vm10 = vmor %vm1461_vm8, %vm1462_vm6  ;;  %v1510_v9 = vand.u32 2147483647, %v1500_v17  ;;  %v1513_v1 = vor.u32 1.1754944e-38, %v1512_v62  ;;  %v1903_v21 = vld [vmem:[#allocation9 + $0x60] sm:$0xff] }
 0x4ab   :  { %v1458_v25 = vsub.f32 1.0, %v1457_v22  ;;  %v1940_v22 = vld [vmem:[#allocation9 + $0xa0] sm:$0xff] }
 0x4ac   :  { %v1482_v37 = vmul.f32 %v5380_v18, %v1481_v23  ;;  %vm1511_vm4 = vcmp.eq.f32.partialorder %v1510_v9, 8.507059e+37  ;;  %v1977_v23 = vld [vmem:[#allocation9 + $0xe0] sm:$0xff] }
 0x4ad   :  { %v1459_v56 = vmul.f32 %v5382_v20, %v1458_v25  ;;  %v1899_v62 = vld [vmem:[#allocation9 + $0x40] sm:$0xff] }
 0x4ae   :  { %v5384_v48 = vpop.eup %5383  ;;  %v1483_v49 = vadd.f32 %v5380_v18, %v1482_v37 }
 0x4af   :  { %v1460_v55 = vadd.f32 %v5382_v20, %v1459_v56  ;;  %v1502_v33 = vmul.f32 %v5384_v48, %v1500_v17  ;;  %v5386_v29 = vpop.eup %5385  ;;  %vm1507_vm13 = vweird.f32 %v5384_v48  ;;  %v1941_v17 = vld [vmem:[#allocation9 + $0xa8] sm:$0xff] }
 0x4b0   :  { %v1487_v30 = vsel %vm1486_vm9, %v5380_v18, %v1483_v49  ;;  %vm1508_vm3 = vmor %vm1506_vm14, %vm1507_vm13  ;;  %v1978_v18 = vld [vmem:[#allocation9 + $0xe8] sm:$0xff]  ;;  %v1902_v49 = vld [vmem:[#allocation9 + $0x58] sm:$0xff] }
 0x4b1   :  { %v1464_v63 = vsel %vm1463_vm10, %v5382_v20, %v1460_v55  ;;  %v1492_v32 = vsel %vm1489_vm11, %v1491_v52, %v1487_v30  ;;  %v1503_v60 = vsub.f32 1.0, %v1502_v33  ;;  %v1861_v20 = vld [vmem:[#allocation9 + $0x20] sm:$0xff]  ;;  %v1939_v55 = vld [vmem:[#allocation9 + $0x98] sm:$0xff]  ;;  %v1859_v33 = vld [vmem:[#allocation9 + $0x10] sm:$0xff] }
 0x4b2   :  { %v1469_v58 = vsel %vm1466_vm12, %v1468_v0, %v1464_v63  ;;  %v1495_v24 = vmul.f32 %v5386_v29, %v1492_v32  ;;  %v1976_v52 = vld [vmem:[#allocation9 + $0xd8] sm:$0xff]  ;;  %v1938_v30 = vld [vmem:[#allocation9 + $0x90] sm:$0xff]  ;;  %v1858_v63 = vld [vmem:[#allocation9 + $0x8] sm:$0xff] }
 0x4b3   :  { %v1474_v39 = vmul.f32 %v1472_v31, %v1469_v58  ;;  %v1504_v41 = vmul.f32 %v5384_v48, %v1503_v60  ;;  %v1901_v31 = vld [vmem:[#allocation9 + $0x50] sm:$0xff]  ;;  %v1900_v60 = vld [vmem:[#allocation9 + $0x48] sm:$0xff] }
 0x4b4   :  { %v1975_v29 = vld [vmem:[#allocation9 + $0xd0] sm:$0xff]  ;;  %v1937_v58 = vld [vmem:[#allocation9 + $0x88] sm:$0xff] }
 0x4b5   :  { %v7030_v7 = vadd.f32 %v1495_v24, %v1474_v39  ;;  %v1505_v54 = vadd.f32 %v5384_v48, %v1504_v41  ;;  %v1974_v24 = vld [vmem:[#allocation9 + $0xc8] sm:$0xff] }
 0x4b7   :  { %5387 = vtanh.f32 %v7030_v7  ;;  %v1509_v53 = vsel %vm1508_vm3, %v5384_v48, %v1505_v54  ;;  %v1860_v48 = vld [vmem:[#allocation9 + $0x18] sm:$0xff]  ;;  %v1857_v54 = vld [vmem:[#allocation9] sm:$0xff] }
 0x4b8   :  { %v1514_v57 = vsel %vm1511_vm4, %v1513_v1, %v1509_v53  ;;  %v1936_v1 = vld [vmem:[#allocation9 + $0x80] sm:$0xff] }
 0x4bd   :  { %v5388_v61 = vpop.eup %5387 }
 0x4be   :  { %v1517_v38 = vmul.f32 %v5388_v61, %v1514_v57  ;;  %v1973_v61 = vld [vmem:[#allocation9 + $0xc0] sm:$0xff] }
 0x4c0   :  { %1518 = vst.msk [vmem:[#allocation2 + $0x8] sm:$0xc] %vm860_vm0, %v1517_v38  ;;  %v1520_v2 = vrot.slane %v1517_v38, 2 }
 0x4c2   :  { %5101 = vmatmul.msk.f32.vlgmr.msra.gmra.mxu0 %vm542_vm5, %v1520_v2  ;;  %5102 = vmatmul.msk.f32.vlgmr.msra.gmra.mxu1 %vm542_vm5, %v1520_v2 }
 0x4c3   :  { %5103 = vmatmul.msk.f32.vlgmr.msra.gmra.mxu2 %vm542_vm5, %v1520_v2  ;;  %5104 = vmatmul.msk.f32.vlgmr.msra.gmra.mxu3 %vm542_vm5, %v1520_v2 }
 0x4c4   :  { %1883 = vmatpush.msra.mxu0 %v1864_v43  ;;  %1920 = vmatpush.msra.mxu1 %v1906_v44 }
 0x4c5   :  { %1957 = vmatpush.msra.mxu2 %v1943_v46  ;;  %1994 = vmatpush.msra.mxu3 %v1980_v3 }
 0x4c6   :  { %1884 = vmatpush.msra.mxu0 %v1863_v50  ;;  %1921 = vmatpush.msra.mxu1 %v1905_v51 }
 0x4c7   :  { %1958 = vmatpush.msra.mxu2 %v1942_v12  ;;  %1995 = vmatpush.msra.mxu3 %v1979_v13 }
 0x4c8   :  { %1885 = vmatpush.msra.mxu0 %v1862_v14  ;;  %1922 = vmatpush.msra.mxu1 %v1904_v15 }
 0x4c9   :  { %1959 = vmatpush.msra.mxu2 %v1941_v17  ;;  %1996 = vmatpush.msra.mxu3 %v1978_v18 }
 0x4ca   :  { %1886 = vmatpush.msra.mxu0 %v1861_v20  ;;  %1923 = vmatpush.msra.mxu1 %v1903_v21 }
 0x4cb   :  { %1960 = vmatpush.msra.mxu2 %v1940_v22  ;;  %1997 = vmatpush.msra.mxu3 %v1977_v23 }
 0x4cc   :  { %1887 = vmatpush.msra.mxu0 %v1860_v48  ;;  %1924 = vmatpush.msra.mxu1 %v1902_v49 }
 0x4cd   :  { %1961 = vmatpush.msra.mxu2 %v1939_v55  ;;  %1998 = vmatpush.msra.mxu3 %v1976_v52 }
 0x4ce   :  { %1888 = vmatpush.msra.mxu0 %v1859_v33  ;;  %1925 = vmatpush.msra.mxu1 %v1901_v31 }
 0x4cf   :  { %1962 = vmatpush.msra.mxu2 %v1938_v30  ;;  %1999 = vmatpush.msra.mxu3 %v1975_v29 }
 0x4d0   :  { %1889 = vmatpush.msra.mxu0 %v1858_v63  ;;  %1926 = vmatpush.msra.mxu1 %v1900_v60 }
 0x4d1   :  { %1963 = vmatpush.msra.mxu2 %v1937_v58  ;;  %2000 = vmatpush.msra.mxu3 %v1974_v24 }
 0x4d2   :  { %1890 = vmatpush.msra.mxu0 %v1857_v54  ;;  %1927 = vmatpush.msra.mxu1 %v1899_v62  ;;  %v7095_v54 = vld [vmem:[#allocation11 + $0x30] sm:$0xff] }
 0x4d3   :  { %1964 = vmatpush.msra.mxu2 %v1936_v1  ;;  %2001 = vmatpush.msra.mxu3 %v1973_v61  ;;  %v7097_v62 = vld [vmem:[#allocation11 + $0x70] sm:$0xff]  ;;  %v7105_v61 = vld [vmem:[#allocation11 + $0x28] sm:$0xff] }
 0x4d4   :  { %v7103_v1 = vld [vmem:[#allocation11 + $0xf0] sm:$0xff] }
 0x53f   :  { %v1540_v28 = vpop.f32.mrf.mxu0  ;;  %v1564_v59 = vpop.f32.mrf.mxu1 }
 0x540   :  { %v1544_v10 = vrot.slane %v1540_v28, 4  ;;  %v1568_v45 = vrot.slane %v1564_v59, 4 }
 0x542   :  { %v1546_v34 = vadd.f32 %v1544_v10, %v6966_v6  ;;  %v1570_v4 = vadd.f32 %v1568_v45, %v6970_v11 }
 0x544   :  { %v5106_v5 = vmul.f32 -1.442695, %v1546_v34  ;;  %v5105_v42 = vmul.f32 -1.442695, %v1570_v4 }
 0x546   :  { %5389 = vpow2.f32 %v5106_v5  ;;  %v1612_v47 = vpop.f32.mrf.mxu3  ;;  %v1588_v56 = vpop.f32.mrf.mxu2 }
 0x547   :  { %5391 = vpow2.f32 %v5105_v42  ;;  %v1616_v8 = vrot.slane %v1612_v47, 4  ;;  %v1592_v35 = vrot.slane %v1588_v56, 4  ;;  %v1639_v47 = vrot.slane %v7030_v7, 6 }
 0x549   :  { %v1618_v19 = vadd.f32 %v1616_v8, %v6976_v16  ;;  %v1594_v41 = vadd.f32 %v1592_v35, %v6981_v36 }
 0x54b   :  { %v5107_v25 = vmul.f32 -1.442695, %v1618_v19 }
 0x54c   :  { %v5390_v26 = vpop.eup %5389 }
 0x54d   :  { %v5392_v27 = vpop.eup %5391  ;;  %v7041_v37 = vadd.f32 1.0, %v5390_v26  ;;  %5393 = vpow2.f32 %v5107_v25 }
 0x54e   :  { %v7043_v40 = vadd.f32 1.0, %v5392_v27 }
 0x54f   :  { %5395 = vrcp.f32 %v7041_v37  ;;  %v1657_v28 = vand.u32 2147483648, %v7041_v37  ;;  %v1655_v45 = vand.u32 2147483647, %v7041_v37  ;;  %vm1651_vm8 = vweird.f32 %v7041_v37 }
 0x550   :  { %5397 = vrcp.f32 %v7043_v40  ;;  %v1634_v59 = vand.u32 2147483648, %v7043_v40  ;;  %v1632_v4 = vand.u32 2147483647, %v7043_v40  ;;  %vm1628_vm9 = vweird.f32 %v7043_v40 }
 0x551   :  { %v1658_v44 = vor.u32 1.1754944e-38, %v1657_v28  ;;  %vm1656_vm12 = vcmp.eq.f32.partialorder %v1655_v45, 8.507059e+37 }
 0x552   :  { %v1635_v3 = vor.u32 1.1754944e-38, %v1634_v59  ;;  %vm1633_vm13 = vcmp.eq.f32.partialorder %v1632_v4, 8.507059e+37  ;;  %v7117_v59 = vld [vmem:[#allocation11 + $0x20] sm:$0xff] }
 0x553   :  { %v5394_v0 = vpop.eup %5393  ;;  %v7127_v4 = vld [vmem:[#allocation11 + $0xe0] sm:$0xff] }
 0x554   :  { %v7047_v32 = vadd.f32 1.0, %v5394_v0 }
 0x555   :  { %v5396_v39 = vpop.eup %5395 }
 0x556   :  { %v5398_v9 = vpop.eup %5397  ;;  %v1647_v53 = vmul.f32 %v5396_v39, %v7041_v37  ;;  %5399 = vrcp.f32 %v7047_v32  ;;  %vm1652_vm6 = vweird.f32 %v5396_v39  ;;  %v1679_v7 = vand.u32 2147483648, %v7047_v32 }
 0x557   :  { %v1624_v57 = vmul.f32 %v5398_v9, %v7043_v40  ;;  %5401 = vtanh.f32 %v1594_v41  ;;  %vm1629_vm7 = vweird.f32 %v5398_v9  ;;  %vm1653_vm10 = vmor %vm1651_vm8, %vm1652_vm6  ;;  %vm1673_vm3 = vweird.f32 %v7047_v32  ;;  %v1855_v40 = vld [vmem:[#allocation2] sm:$0xff]  ;;  %v7088_v41 = vld [vmem:[#allocation11 + $0xb8] sm:$0xff] }
 0x558   :  { %v1648_v38 = vsub.f32 1.0, %v1647_v53  ;;  %vm1630_vm11 = vmor %vm1628_vm9, %vm1629_vm7  ;;  %v1677_v21 = vand.u32 2147483647, %v7047_v32  ;;  %v1680_v23 = vor.u32 1.1754944e-38, %v1679_v7  ;;  %v7101_v53 = vld [vmem:[#allocation11 + $0xb0] sm:$0xff] }
 0x559   :  { %v1625_v2 = vsub.f32 1.0, %v1624_v57  ;;  %v7109_v57 = vld [vmem:[#allocation11 + $0x68] sm:$0xff]  ;;  %v7170_v7 = vld [vmem:[#allocation11 + $0xd0] sm:$0xff] }
 0x55a   :  { %v1649_v10 = vmul.f32 %v5396_v39, %v1648_v38  ;;  %vm1678_vm6 = vcmp.eq.f32.partialorder %v1677_v21, 8.507059e+37  ;;  %v7111_v38 = vld [vmem:[#allocation11 + $0xa8] sm:$0xff] }
 0x55b   :  { %v1626_v34 = vmul.f32 %v5398_v9, %v1625_v2  ;;  %v7113_v2 = vld [vmem:[#allocation11 + $0xe8] sm:$0xff] }
 0x55c   :  { %v5400_v5 = vpop.eup %5399  ;;  %v1650_v42 = vadd.f32 %v5396_v39, %v1649_v10  ;;  %v7119_v10 = vld [vmem:[#allocation11 + $0x60] sm:$0xff]  ;;  %v7172_v21 = vld [vmem:[#allocation11 + $0x8] sm:$0xff] }
 0x55d   :  { %v1627_v43 = vadd.f32 %v5398_v9, %v1626_v34  ;;  %v1669_v46 = vmul.f32 %v5400_v5, %v7047_v32  ;;  %v5402_v51 = vpop.eup %5401  ;;  %vm1674_vm14 = vweird.f32 %v5400_v5  ;;  %v7125_v34 = vld [vmem:[#allocation11 + $0xa0] sm:$0xff] }
 0x55e   :  { %v1654_v50 = vsel %vm1653_vm10, %v5396_v39, %v1650_v42  ;;  %vm1675_vm4 = vmor %vm1673_vm3, %vm1674_vm14 }
 0x55f   :  { %v1631_v8 = vsel %vm1630_vm11, %v5398_v9, %v1627_v43  ;;  %v1659_v12 = vsel %vm1656_vm12, %v1658_v44, %v1654_v50  ;;  %v1670_v13 = vsub.f32 1.0, %v1669_v46  ;;  %v7151_v50 = vld [vmem:[#allocation11 + $0x98] sm:$0xff] }
 0x560   :  { %v1636_v14 = vsel %vm1633_vm13, %v1635_v3, %v1631_v8  ;;  %v1662_v15 = vmul.f32 %v5402_v51, %v1659_v12  ;;  %v7153_v51 = vld [vmem:[#allocation11 + $0xd8] sm:$0xff] }
 0x561   :  { %v1641_v17 = vmul.f32 %v1639_v47, %v1636_v14  ;;  %v1671_v18 = vmul.f32 %v5400_v5, %v1670_v13  ;;  %v7147_v47 = vld [vmem:[#allocation11 + $0x58] sm:$0xff]  ;;  %v7158_v13 = vld [vmem:[#allocation11 + $0x10] sm:$0xff] }
 0x562   :  { %v7160_v14 = vld [vmem:[#allocation11 + $0x50] sm:$0xff] }
 0x563   :  { %v7061_v19 = vadd.f32 %v1662_v15, %v1641_v17  ;;  %v1672_v20 = vadd.f32 %v5400_v5, %v1671_v18  ;;  %v7162_v15 = vld [vmem:[#allocation11 + $0x90] sm:$0xff] }
 0x565   :  { %5403 = vtanh.f32 %v7061_v19  ;;  %v1676_v22 = vsel %vm1675_vm4, %v5400_v5, %v1672_v20 }
 0x566   :  { %v1681_v26 = vsel %vm1678_vm6, %v1680_v23, %v1676_v22  ;;  %v7174_v22 = vld [vmem:[#allocation11 + $0x48] sm:$0xff] }
 0x56b   :  { %v5404_v25 = vpop.eup %5403 }
 0x56c   :  { %v1684_v27 = vmul.f32 %v5404_v25, %v1681_v26  ;;  %v7181_v26 = vld [vmem:[#allocation11 + $0x88] sm:$0xff] }
 0x56e   :  { %1685 = vst.msk [vmem:[#allocation2 + $0x8] sm:$0x30] %vm1028_vm15, %v1684_v27  ;;  %v1687_v37 = vrot.slane %v1684_v27, 4  ;;  %v7183_v27 = vld [vmem:[#allocation11 + $0xc8] sm:$0xff] }
 0x570   :  { %5108 = vmatmul.msk.f32.vlgmr.msrb.gmra.mxu0 %vm542_vm5, %v1687_v37  ;;  %5109 = vmatmul.msk.f32.vlgmr.msrb.gmra.mxu1 %vm542_vm5, %v1687_v37 }
 0x571   :  { %5110 = vmatmul.msk.f32.vlgmr.msrb.gmra.mxu2 %vm542_vm5, %v1687_v37  ;;  %5111 = vmatmul.msk.f32.vlgmr.msrb.gmra.mxu3 %vm542_vm5, %v1687_v37  ;;  %v7185_v37 = vld [vmem:[#allocation11] sm:$0xff] }
 0x572   :  { %2101 = vmatpush.msrb.mxu2 %v7088_v41 }
 0x574   :  { %2102 = vmatpush.msrb.mxu2 %v7101_v53 }
 0x576   :  { %2103 = vmatpush.msrb.mxu2 %v7111_v38 }
 0x578   :  { %5115 = vmatmul.msk.f32.vlgmr.msra.gmra.mxu0 %vm542_vm5, %v1855_v40  ;;  %5117 = vmatmul.msk.f32.vlgmr.msra.gmra.mxu1 %vm542_vm5, %v1855_v40 }
 0x579   :  { %5119 = vmatmul.msk.f32.vlgmr.msra.gmra.mxu2 %vm542_vm5, %v1855_v40  ;;  %5121 = vmatmul.msk.f32.vlgmr.msra.gmra.mxu3 %vm542_vm5, %v1855_v40 }
 0x57a   :  { %2104 = vmatpush.msrb.mxu2 %v7125_v34 }
 0x57c   :  { %2105 = vmatpush.msrb.mxu2 %v7151_v50 }
 0x57e   :  { %2106 = vmatpush.msrb.mxu2 %v7162_v15 }
 0x580   :  { %2107 = vmatpush.msrb.mxu2 %v7181_v26 }
 0x5ed   :  { %v1707_v56 = vpop.f32.mrf.mxu0  ;;  %v1731_v35 = vpop.f32.mrf.mxu1 }
 0x5ee   :  { %v1711_v48 = vrot.slane %v1707_v56, 2  ;;  %v1735_v49 = vrot.slane %v1731_v35, 2  ;;  %v7193_v35 = vld [vmem:[#allocation11 + $0x40] sm:$0xff] }
 0x5f0   :  { %v1713_v55 = vadd.f32 %v1711_v48, %v6966_v6  ;;  %v1737_v52 = vadd.f32 %v1735_v49, %v6970_v11  ;;  %v7084_v6 = vld [vmem:[#allocation11 + $0x38] sm:$0xff]  ;;  %v7195_v48 = vld [vmem:[#allocation11 + $0x80] sm:$0xff] }
 0x5f1   :  { %v7086_v11 = vld [vmem:[#allocation11 + $0x78] sm:$0xff]  ;;  %2059 = vmatpush.msrb.mxu0 %v7084_v6  ;;  %v7197_v49 = vld [vmem:[#allocation11 + $0xc0] sm:$0xff]  ;;  %2108 = vmatpush.msrb.mxu2 %v7195_v48 }
 0x5f2   :  { %v5113_v33 = vmul.f32 -1.442695, %v1713_v55  ;;  %v5112_v31 = vmul.f32 -1.442695, %v1737_v52  ;;  %2080 = vmatpush.msrb.mxu1 %v7086_v11 }
 0x5f3   :  { %2060 = vmatpush.msrb.mxu0 %v7095_v54  ;;  %2258 = vmatpush.msra.mxu2 %v7088_v41 }
 0x5f4   :  { %5405 = vpow2.f32 %v5113_v33  ;;  %v1779_v0 = vpop.f32.mrf.mxu3  ;;  %v1755_v39 = vpop.f32.mrf.mxu2  ;;  %2081 = vmatpush.msrb.mxu1 %v7097_v62 }
 0x5f5   :  { %5407 = vpow2.f32 %v5112_v31  ;;  %v1783_v30 = vrot.slane %v1779_v0, 2  ;;  %v1759_v9 = vrot.slane %v1755_v39, 2  ;;  %2061 = vmatpush.msrb.mxu0 %v7105_v61  ;;  %v1806_v0 = vrot.slane %v7061_v19, 6  ;;  %2259 = vmatpush.msra.mxu2 %v7101_v53 }
 0x5f6   :  { %2082 = vmatpush.msrb.mxu1 %v7109_v57 }
 0x5f7   :  { %v1785_v29 = vadd.f32 %v1783_v30, %v6976_v16  ;;  %v7093_v16 = vld [vmem:[#allocation11 + $0xf8] sm:$0xff]  ;;  %v1761_v42 = vadd.f32 %v1759_v9, %v6981_v36  ;;  %2062 = vmatpush.msrb.mxu0 %v7117_v59  ;;  %2260 = vmatpush.msra.mxu2 %v7111_v38 }
 0x5f8   :  { %2122 = vmatpush.msrb.mxu3 %v7093_v16  ;;  %2083 = vmatpush.msrb.mxu1 %v7119_v10  ;;  %v7145_v36 = vld [vmem:[#allocation11 + $0x18] sm:$0xff] }
 0x5f9   :  { %v5114_v63 = vmul.f32 -1.442695, %v1785_v29  ;;  %2063 = vmatpush.msrb.mxu0 %v7145_v36  ;;  %2261 = vmatpush.msra.mxu2 %v7125_v34 }
 0x5fa   :  { %v5406_v32 = vpop.eup %5405  ;;  %2123 = vmatpush.msrb.mxu3 %v7103_v1  ;;  %2084 = vmatpush.msrb.mxu1 %v7147_v47 }
 0x5fb   :  { %v5408_v60 = vpop.eup %5407  ;;  %v7079_v58 = vadd.f32 1.0, %v5406_v32  ;;  %5409 = vpow2.f32 %v5114_v63  ;;  %2064 = vmatpush.msrb.mxu0 %v7158_v13  ;;  %2262 = vmatpush.msra.mxu2 %v7151_v50 }
 0x5fc   :  { %v7081_v24 = vadd.f32 1.0, %v5408_v60  ;;  %2124 = vmatpush.msrb.mxu3 %v7113_v2  ;;  %2085 = vmatpush.msrb.mxu1 %v7160_v14 }
 0x5fd   :  { %5411 = vrcp.f32 %v7079_v58  ;;  %v1824_v12 = vand.u32 2147483648, %v7079_v58  ;;  %v1822_v20 = vand.u32 2147483647, %v7079_v58  ;;  %vm1818_vm9 = vweird.f32 %v7079_v58  ;;  %2065 = vmatpush.msrb.mxu0 %v7172_v21  ;;  %2263 = vmatpush.msra.mxu2 %v7162_v15 }
 0x5fe   :  { %5413 = vrcp.f32 %v7081_v24  ;;  %2125 = vmatpush.msrb.mxu3 %v7127_v4  ;;  %v1801_v17 = vand.u32 2147483648, %v7081_v24  ;;  %v1799_v25 = vand.u32 2147483647, %v7081_v24  ;;  %2086 = vmatpush.msrb.mxu1 %v7174_v22  ;;  %vm1795_vm10 = vweird.f32 %v7081_v24 }
 0x5ff   :  { %v1825_v33 = vor.u32 1.1754944e-38, %v1824_v12  ;;  %vm1823_vm13 = vcmp.eq.f32.partialorder %v1822_v20, 8.507059e+37  ;;  %2066 = vmatpush.msrb.mxu0 %v7185_v37  ;;  %2264 = vmatpush.msra.mxu2 %v7181_v26  ;;  %v1929_v20 = vpop.f32.mrf.mxu1 }
 0x600   :  { %2126 = vmatpush.msrb.mxu3 %v7153_v51  ;;  %v1802_v30 = vor.u32 1.1754944e-38, %v1801_v17  ;;  %2087 = vmatpush.msrb.mxu1 %v7193_v35  ;;  %vm1800_vm14 = vcmp.eq.f32.partialorder %v1799_v25, 8.507059e+37  ;;  %v2045_v17 = vld [vmem:[#allocation18 + $0x2] sm:$0x3] }
 0x601   :  { %v5410_v28 = vpop.eup %5409  ;;  %2210 = vmatpush.msra.mxu0 %v7084_v6  ;;  %2265 = vmatpush.msra.mxu2 %v7195_v48 }
 0x602   :  { %v7121_v45 = vadd.f32 1.0, %v5410_v28  ;;  %2127 = vmatpush.msrb.mxu3 %v7170_v7  ;;  %2234 = vmatpush.msra.mxu1 %v7086_v11 }
 0x603   :  { %v7129_v5 = vpop.eup %5411  ;;  %2211 = vmatpush.msra.mxu0 %v7095_v54 }
 0x604   :  { %v7134_v43 = vpop.eup %5413  ;;  %v1814_v44 = vmul.f32 %v7129_v5, %v7079_v58  ;;  %5415 = vrcp.f32 %v7121_v45  ;;  %vm1819_vm7 = vweird.f32 %v7129_v5  ;;  %2128 = vmatpush.msrb.mxu3 %v7183_v27  ;;  %2235 = vmatpush.msra.mxu1 %v7097_v62  ;;  %vm1840_vm4 = vweird.f32 %v7121_v45 }
 0x605   :  { %v1791_v46 = vmul.f32 %v7134_v43, %v7081_v24  ;;  %5417 = vtanh.f32 %v1761_v42  ;;  %vm1796_vm8 = vweird.f32 %v7134_v43  ;;  %vm7203_vm11 = vmor %vm1818_vm9, %vm1819_vm7  ;;  %2212 = vmatpush.msra.mxu0 %v7105_v61  ;;  %v1846_v42 = vand.u32 2147483648, %v7121_v45 }
 0x606   :  { %v1815_v3 = vsub.f32 1.0, %v1814_v44  ;;  %vm1797_vm12 = vmor %vm1795_vm10, %vm1796_vm8  ;;  %2129 = vmatpush.msrb.mxu3 %v7197_v49  ;;  %2236 = vmatpush.msra.mxu1 %v7109_v57 }
 0x607   :  { %v1792_v8 = vsub.f32 1.0, %v1791_v46  ;;  %2213 = vmatpush.msra.mxu0 %v7117_v59  ;;  %v1847_v46 = vor.u32 1.1754944e-38, %v1846_v42 }
 0x608   :  { %v1816_v18 = vmul.f32 %v7129_v5, %v1815_v3  ;;  %2282 = vmatpush.msra.mxu3 %v7093_v16  ;;  %2237 = vmatpush.msra.mxu1 %v7119_v10 }
 0x609   :  { %v1793_v23 = vmul.f32 %v7134_v43, %v1792_v8  ;;  %2214 = vmatpush.msra.mxu0 %v7145_v36 }
 0x60a   :  { %v7187_v40 = vpop.eup %5415  ;;  %v1817_v56 = vadd.f32 %v7129_v5, %v1816_v18  ;;  %2283 = vmatpush.msra.mxu3 %v7103_v1  ;;  %2238 = vmatpush.msra.mxu1 %v7147_v47  ;;  %v1892_v18 = vpop.f32.mrf.mxu0 }
 0x60b   :  { %v1794_v55 = vadd.f32 %v7134_v43, %v1793_v23  ;;  %v1836_v31 = vmul.f32 %v7187_v40, %v7121_v45  ;;  %v5418_v63 = vpop.eup %5417  ;;  %vm1841_vm3 = vweird.f32 %v7187_v40  ;;  %2215 = vmatpush.msra.mxu0 %v7158_v13  ;;  %v2003_v23 = vpop.f32.mrf.mxu3 }
 0x60c   :  { %v1821_v29 = vsel %vm7203_vm11, %v7129_v5, %v1817_v56  ;;  %2284 = vmatpush.msra.mxu3 %v7113_v2  ;;  %vm1842_vm6 = vmor %vm1840_vm4, %vm1841_vm3  ;;  %2239 = vmatpush.msra.mxu1 %v7160_v14  ;;  %v7308_v56 = vld [vmem:[#allocation12] ss:$0 sm:$0xff] }
 0x60d   :  { %v1798_v32 = vsel %vm1797_vm12, %v7134_v43, %v1794_v55  ;;  %v1826_v60 = vsel %vm1823_vm13, %v1825_v33, %v1821_v29  ;;  %v1837_v58 = vsub.f32 1.0, %v1836_v31  ;;  %v1844_v43 = vand.u32 2147483647, %v7121_v45  ;;  %2216 = vmatpush.msra.mxu0 %v7172_v21  ;;  %v7310_v55 = vld [vmem:[#allocation12 + $0x1] ss:$0 sm:$0xff]  ;;  %v1966_v31 = vpop.f32.mrf.mxu2 }
 0x60e   :  { %v1803_v19 = vsel %vm1800_vm14, %v1802_v30, %v1798_v32  ;;  %v1829_v24 = vmul.f32 %v5418_v63, %v1826_v60  ;;  %2285 = vmatpush.msra.mxu3 %v7127_v4  ;;  %2240 = vmatpush.msra.mxu1 %v7174_v22  ;;  %8370 = vst [vmem:[#allocation47_spill] sm:$0xff] %v7310_v55  ;;  %v7322_v60 = vld [vmem:[#allocation12 + $0x3] ss:$0 sm:$0xff] }
 0x60f   :  { %v1808_v39 = vmul.f32 %v1806_v0, %v1803_v19  ;;  %v1838_v9 = vmul.f32 %v7187_v40, %v1837_v58  ;;  %vm1845_vm7 = vcmp.eq.f32.partialorder %v1844_v43, 8.507059e+37  ;;  %2217 = vmatpush.msra.mxu0 %v7185_v37  ;;  %v7313_v52 = vadd.f32 %v7308_v56, %v1892_v18  ;;  %8372 = vst [vmem:[#allocation48_spill] sm:$0xff] %v7322_v60 }
 0x610   :  { %2286 = vmatpush.msra.mxu3 %v7153_v51  ;;  %2241 = vmatpush.msra.mxu1 %v7193_v35  ;;  %v7316_v33 = vadd.f32 %v7310_v55, %v1929_v20 }
 0x611   :  { %v1830_v28 = vadd.f32 %v1829_v24, %v1808_v39  ;;  %v1839_v5 = vadd.f32 %v7187_v40, %v1838_v9  ;;  %v7325_v24 = vadd.f32 %v7322_v60, %v2003_v23 }
 0x612   :  { %2287 = vmatpush.msra.mxu3 %v7170_v7 }
 0x613   :  { %5419 = vtanh.f32 %v1830_v28  ;;  %1854 = vst.msk [vmem:[#allocation31 - $0x6] sm:$0xc0] %vm1196_vm1, %v1830_v28  ;;  %v1843_v44 = vsel %vm1842_vm6, %v7187_v40, %v1839_v5 }
 0x614   :  { %v1848_v3 = vsel %vm1845_vm7, %v1847_v46, %v1843_v44  ;;  %2288 = vmatpush.msra.mxu3 %v7183_v27 }
 0x616   :  { %2289 = vmatpush.msra.mxu3 %v7197_v49 }
 0x619   :  { %v5420_v45 = vpop.eup %5419 }
 0x61a   :  { %v1851_v8 = vmul.f32 %v5420_v45, %v1848_v3  ;;  %v7330_v45 = vld [vmem:[#allocation12 + $0x2] ss:$0 sm:$0xff] }
 0x61b   :  { %8374 = vst [vmem:[#allocation49_spill] sm:$0xff] %v7330_v45 }
 0x61c   :  { %1852 = vst.msk [vmem:[#allocation2 + $0x8] sm:$0xc0] %vm1196_vm1, %v1851_v8 }
 0x61d   :  { %1853 = vst.msk [vmem:[#allocation30 - $0x6] sm:$0xc0] %vm1196_vm1, %v1851_v8 }
 0x623   :  { %v1856_v12 = vld [vmem:[#allocation2 + $0x8] sm:$0xff] }
 0x624   :  { %5116 = vmatmul.msk.f32.gmra.mxu0 %vm542_vm5, %v1856_v12  ;;  %5118 = vmatmul.msk.f32.gmra.mxu1 %vm542_vm5, %v1856_v12 }
 0x625   :  { %5120 = vmatmul.msk.f32.gmra.mxu2 %vm542_vm5, %v1856_v12  ;;  %5122 = vmatmul.msk.f32.gmra.mxu3 %vm542_vm5, %v1856_v12  ;;  %v7333_v12 = vadd.f32 %v7330_v45, %v1966_v31 }
 0x62c   :  { %5123 = vmatmul.msk.f32.vlgmr.msrb.gmra.mxu0 %vm542_vm5, %v2045_v17  ;;  %5124 = vmatmul.msk.f32.vlgmr.msrb.gmra.mxu1 %vm542_vm5, %v2045_v17 }
 0x62d   :  { %5125 = vmatmul.msk.f32.vlgmr.msrb.gmra.mxu2 %vm542_vm5, %v2045_v17  ;;  %5126 = vmatmul.msk.f32.vlgmr.msrb.gmra.mxu3 %vm542_vm5, %v2045_v17 }
 0x62e   :  { %2377 = vmatpush.msrb.mxu0 %v7084_v6  ;;  %2401 = vmatpush.msrb.mxu1 %v7086_v11 }
 0x62f   :  { %2425 = vmatpush.msrb.mxu2 %v7088_v41  ;;  %2449 = vmatpush.msrb.mxu3 %v7093_v16 }
 0x630   :  { %2378 = vmatpush.msrb.mxu0 %v7095_v54  ;;  %2402 = vmatpush.msrb.mxu1 %v7097_v62 }
 0x631   :  { %2426 = vmatpush.msrb.mxu2 %v7101_v53  ;;  %2450 = vmatpush.msrb.mxu3 %v7103_v1 }
 0x632   :  { %2379 = vmatpush.msrb.mxu0 %v7105_v61  ;;  %2403 = vmatpush.msrb.mxu1 %v7109_v57 }
 0x633   :  { %2427 = vmatpush.msrb.mxu2 %v7111_v38  ;;  %2451 = vmatpush.msrb.mxu3 %v7113_v2 }
 0x634   :  { %2380 = vmatpush.msrb.mxu0 %v7117_v59  ;;  %2404 = vmatpush.msrb.mxu1 %v7119_v10 }
 0x635   :  { %2428 = vmatpush.msrb.mxu2 %v7125_v34  ;;  %2452 = vmatpush.msrb.mxu3 %v7127_v4 }
 0x636   :  { %2381 = vmatpush.msrb.mxu0 %v7145_v36  ;;  %2405 = vmatpush.msrb.mxu1 %v7147_v47 }
 0x637   :  { %2429 = vmatpush.msrb.mxu2 %v7151_v50  ;;  %2453 = vmatpush.msrb.mxu3 %v7153_v51 }
 0x638   :  { %2382 = vmatpush.msrb.mxu0 %v7158_v13  ;;  %2406 = vmatpush.msrb.mxu1 %v7160_v14 }
 0x639   :  { %2430 = vmatpush.msrb.mxu2 %v7162_v15  ;;  %2454 = vmatpush.msrb.mxu3 %v7170_v7 }
 0x63a   :  { %2383 = vmatpush.msrb.mxu0 %v7172_v21  ;;  %2407 = vmatpush.msrb.mxu1 %v7174_v22 }
 0x63b   :  { %2431 = vmatpush.msrb.mxu2 %v7181_v26  ;;  %2455 = vmatpush.msrb.mxu3 %v7183_v27 }
 0x63c   :  { %2384 = vmatpush.msrb.mxu0 %v7185_v37  ;;  %2408 = vmatpush.msrb.mxu1 %v7193_v35 }
 0x63d   :  { %2432 = vmatpush.msrb.mxu2 %v7195_v48  ;;  %2456 = vmatpush.msrb.mxu3 %v7197_v49 }
 0x6a1   :  { %v7304_v25 = vpop.f32.mrf.mxu0  ;;  %v7306_v40 = vpop.f32.mrf.mxu1 }
 0x6a2   :  { %8369 = vst [vmem:[#allocation50_spill] sm:$0xff] %v7306_v40 }
 0x6a8   :  { %v7318_v0 = vpop.f32.mrf.mxu3  ;;  %v7327_v39 = vpop.f32.mrf.mxu2 }
 0x6a9   :  { %8371 = vst [vmem:[#allocation46_spill] sm:$0xff] %v7318_v0  ;;  %v2068_v30 = vpop.f32.mrf.mxu0  ;;  %v2089_v29 = vpop.f32.mrf.mxu1 }
 0x6aa   :  { %v2071_v63 = vadd.f32 %v2068_v30, %v7313_v52  ;;  %v2092_v32 = vadd.f32 %v2089_v29, %v7316_v33  ;;  %8373 = vst [vmem:[#allocation45_spill] sm:$0xff] %v7327_v39 }
 0x6ac   :  { %v5128_v58 = vmul.f32 -1.442695, %v2071_v63  ;;  %v5127_v19 = vmul.f32 -1.442695, %v2092_v32 }
 0x6ae   :  { %5421 = vpow2.f32 %v5128_v58 }
 0x6af   :  { %5423 = vpow2.f32 %v5127_v19 }
 0x6b0   :  { %v2131_v9 = vpop.f32.mrf.mxu3  ;;  %v2110_v3 = vpop.f32.mrf.mxu2 }
 0x6b1   :  { %v2134_v28 = vadd.f32 %v2131_v9, %v7325_v24  ;;  %v2113_v20 = vadd.f32 %v2110_v3, %v7333_v12 }
 0x6b3   :  { %v5129_v5 = vmul.f32 -1.442695, %v2134_v28 }
 0x6b4   :  { %v5422_v42 = vpop.eup %5421 }
 0x6b5   :  { %v5424_v43 = vpop.eup %5423  ;;  %v2158_v44 = vadd.f32 1.0, %v5422_v42  ;;  %5425 = vpow2.f32 %v5129_v5 }
 0x6b6   :  { %v2138_v46 = vadd.f32 1.0, %v5424_v43 }
 0x6b7   :  { %5427 = vrcp.f32 %v2158_v44  ;;  %v2170_v58 = vand.u32 2147483648, %v2158_v44  ;;  %v2168_v28 = vand.u32 2147483647, %v2158_v44  ;;  %vm2164_vm10 = vweird.f32 %v2158_v44 }
 0x6b8   :  { %5429 = vrcp.f32 %v2138_v46  ;;  %v2150_v19 = vand.u32 2147483648, %v2138_v46  ;;  %v2148_v31 = vand.u32 2147483647, %v2138_v46  ;;  %vm2144_vm11 = vweird.f32 %v2138_v46 }
 0x6b9   :  { %vm2169_vm14 = vcmp.eq.f32.partialorder %v2168_v28, 8.507059e+37 }
 0x6ba   :  { %vm2149_vm3 = vcmp.eq.f32.partialorder %v2148_v31, 8.507059e+37 }
 0x6bb   :  { %v5426_v8 = vpop.eup %5425 }
 0x6bc   :  { %v2180_v17 = vadd.f32 1.0, %v5426_v8  ;;  %v2171_v8 = vor.u32 1.1754944e-38, %v2170_v58 }
 0x6bd   :  { %v5428_v18 = vpop.eup %5427 }
 0x6be   :  { %v5430_v23 = vpop.eup %5429  ;;  %v2160_v30 = vmul.f32 %v5428_v18, %v2158_v44  ;;  %5431 = vrcp.f32 %v2180_v17  ;;  %vm2165_vm8 = vweird.f32 %v5428_v18  ;;  %v2192_v58 = vand.u32 2147483648, %v2180_v17 }
 0x6bf   :  { %v2140_v29 = vmul.f32 %v5430_v23, %v2138_v46  ;;  %5433 = vtanh.f32 %v2113_v20  ;;  %vm2145_vm9 = vweird.f32 %v5430_v23  ;;  %vm2166_vm12 = vmor %vm2164_vm10, %vm2165_vm8  ;;  %vm2186_vm6 = vweird.f32 %v2180_v17 }
 0x6c0   :  { %v2161_v63 = vsub.f32 1.0, %v2160_v30  ;;  %vm2146_vm13 = vmor %vm2144_vm11, %vm2145_vm9  ;;  %v2151_v30 = vor.u32 1.1754944e-38, %v2150_v19  ;;  %v2190_v19 = vand.u32 2147483647, %v2180_v17  ;;  %v2193_v28 = vor.u32 1.1754944e-38, %v2192_v58 }
 0x6c1   :  { %v2141_v32 = vsub.f32 1.0, %v2140_v29  ;;  %v2047_v29 = vld [vmem:[#allocation20 + $0x2] sm:$0x3] }
 0x6c2   :  { %v2162_v9 = vmul.f32 %v5428_v18, %v2161_v63  ;;  %vm2191_vm8 = vcmp.eq.f32.partialorder %v2190_v19, 8.507059e+37 }
 0x6c3   :  { %v2142_v5 = vmul.f32 %v5430_v23, %v2141_v32 }
 0x6c4   :  { %v5432_v42 = vpop.eup %5431  ;;  %v2163_v43 = vadd.f32 %v5428_v18, %v2162_v9 }
 0x6c5   :  { %v2143_v3 = vadd.f32 %v5430_v23, %v2142_v5  ;;  %v2182_v45 = vmul.f32 %v5432_v42, %v2180_v17  ;;  %v5434_v20 = vpop.eup %5433  ;;  %vm2187_vm4 = vweird.f32 %v5432_v42 }
 0x6c6   :  { %v2167_v39 = vsel %vm2166_vm12, %v5428_v18, %v2163_v43  ;;  %vm2188_vm7 = vmor %vm2186_vm6, %vm2187_vm4 }
 0x6c7   :  { %v2147_v63 = vsel %vm2146_vm13, %v5430_v23, %v2143_v3  ;;  %v2172_v60 = vsel %vm2169_vm14, %v2171_v8, %v2167_v39  ;;  %v2183_v32 = vsub.f32 1.0, %v2182_v45 }
 0x6c8   :  { %v2152_v0 = vsel %vm2149_vm3, %v2151_v30, %v2147_v63  ;;  %v2175_v55 = vmul.f32 %v5434_v20, %v2172_v60 }
 0x6c9   :  { %v2154_v40 = vmul.f32 %v2152_v0, %v2047_v29  ;;  %v2184_v9 = vmul.f32 %v5432_v42, %v2183_v32 }
 0x6cb   :  { %v7336_v44 = vadd.f32 %v2175_v55, %v2154_v40  ;;  %v2185_v46 = vadd.f32 %v5432_v42, %v2184_v9 }
 0x6cd   :  { %5435 = vtanh.f32 %v7336_v44  ;;  %v2189_v18 = vsel %vm2188_vm7, %v5432_v42, %v2185_v46 }
 0x6ce   :  { %v2194_v39 = vsel %vm2191_vm8, %v2193_v28, %v2189_v18 }
 0x6d3   :  { %v5436_v23 = vpop.eup %5435 }
 0x6d4   :  { %v2197_v45 = vmul.f32 %v5436_v23, %v2194_v39 }
 0x6d6   :  { %2198 = vst.msk [vmem:[#allocation2] sm:$0x3] %vm693_vm2, %v2197_v45  ;;  %5130 = vmatmul.msk.f32.vlgmr.msra.gmra.mxu0 %vm542_vm5, %v2197_v45  ;;  %5131 = vmatmul.msk.f32.vlgmr.msra.gmra.mxu1 %vm542_vm5, %v2197_v45 }
 0x6d7   :  { %5132 = vmatmul.msk.f32.vlgmr.msra.gmra.mxu2 %vm542_vm5, %v2197_v45  ;;  %5133 = vmatmul.msk.f32.vlgmr.msra.gmra.mxu3 %vm542_vm5, %v2197_v45 }
 0x6d8   :  { %2544 = vmatpush.msra.mxu0 %v7084_v6  ;;  %2568 = vmatpush.msra.mxu1 %v7086_v11 }
 0x6d9   :  { %2592 = vmatpush.msra.mxu2 %v7088_v41  ;;  %2616 = vmatpush.msra.mxu3 %v7093_v16 }
 0x6da   :  { %2545 = vmatpush.msra.mxu0 %v7095_v54  ;;  %2569 = vmatpush.msra.mxu1 %v7097_v62 }
 0x6db   :  { %2593 = vmatpush.msra.mxu2 %v7101_v53  ;;  %2617 = vmatpush.msra.mxu3 %v7103_v1 }
 0x6dc   :  { %2546 = vmatpush.msra.mxu0 %v7105_v61  ;;  %2570 = vmatpush.msra.mxu1 %v7109_v57 }
 0x6dd   :  { %2594 = vmatpush.msra.mxu2 %v7111_v38  ;;  %2618 = vmatpush.msra.mxu3 %v7113_v2 }
 0x6de   :  { %2547 = vmatpush.msra.mxu0 %v7117_v59  ;;  %2571 = vmatpush.msra.mxu1 %v7119_v10 }
 0x6df   :  { %2595 = vmatpush.msra.mxu2 %v7125_v34  ;;  %2619 = vmatpush.msra.mxu3 %v7127_v4 }
 0x6e0   :  { %2548 = vmatpush.msra.mxu0 %v7145_v36  ;;  %2572 = vmatpush.msra.mxu1 %v7147_v47 }
 0x6e1   :  { %2596 = vmatpush.msra.mxu2 %v7151_v50  ;;  %2620 = vmatpush.msra.mxu3 %v7153_v51 }
 0x6e2   :  { %2549 = vmatpush.msra.mxu0 %v7158_v13  ;;  %2573 = vmatpush.msra.mxu1 %v7160_v14 }
 0x6e3   :  { %2597 = vmatpush.msra.mxu2 %v7162_v15  ;;  %2621 = vmatpush.msra.mxu3 %v7170_v7 }
 0x6e4   :  { %2550 = vmatpush.msra.mxu0 %v7172_v21  ;;  %2574 = vmatpush.msra.mxu1 %v7174_v22 }
 0x6e5   :  { %2598 = vmatpush.msra.mxu2 %v7181_v26  ;;  %2622 = vmatpush.msra.mxu3 %v7183_v27 }
 0x6e6   :  { %2551 = vmatpush.msra.mxu0 %v7185_v37  ;;  %2575 = vmatpush.msra.mxu1 %v7193_v35 }
 0x6e7   :  { %2599 = vmatpush.msra.mxu2 %v7195_v48  ;;  %2623 = vmatpush.msra.mxu3 %v7197_v49 }
 0x753   :  { %v2219_v40 = vpop.f32.mrf.mxu0  ;;  %v2243_v55 = vpop.f32.mrf.mxu1 }
 0x754   :  { %v2223_v0 = vrot.slane %v2219_v40, 6  ;;  %v2247_v60 = vrot.slane %v2243_v55, 6 }
 0x756   :  { %v2225_v17 = vadd.f32 %v2223_v0, %v7313_v52  ;;  %v2249_v5 = vadd.f32 %v2247_v60, %v7316_v33 }
 0x758   :  { %v5135_v31 = vmul.f32 -1.442695, %v2225_v17  ;;  %v5134_v42 = vmul.f32 -1.442695, %v2249_v5 }
 0x75a   :  { %5437 = vpow2.f32 %v5135_v31  ;;  %v2291_v43 = vpop.f32.mrf.mxu3  ;;  %v2267_v9 = vpop.f32.mrf.mxu2 }
 0x75b   :  { %5439 = vpow2.f32 %v5134_v42  ;;  %v2295_v3 = vrot.slane %v2291_v43, 6  ;;  %v2271_v46 = vrot.slane %v2267_v9, 6 }
 0x75d   :  { %v2297_v8 = vadd.f32 %v2295_v3, %v7325_v24  ;;  %v2273_v28 = vadd.f32 %v2271_v46, %v7333_v12 }
 0x75f   :  { %v5136_v30 = vmul.f32 -1.442695, %v2297_v8 }
 0x760   :  { %v5438_v29 = vpop.eup %5437 }
 0x761   :  { %v5440_v20 = vpop.eup %5439  ;;  %v2324_v63 = vadd.f32 1.0, %v5438_v29  ;;  %5441 = vpow2.f32 %v5136_v30 }
 0x762   :  { %v2301_v32 = vadd.f32 1.0, %v5440_v20  ;;  %v2318_v20 = vrot.slane %v7336_v44, 6 }
 0x763   :  { %5443 = vrcp.f32 %v2324_v63  ;;  %v2336_v0 = vand.u32 2147483648, %v2324_v63  ;;  %v2334_v5 = vand.u32 2147483647, %v2324_v63  ;;  %vm2330_vm11 = vweird.f32 %v2324_v63 }
 0x764   :  { %5445 = vrcp.f32 %v2301_v32  ;;  %v2313_v60 = vand.u32 2147483648, %v2301_v32  ;;  %v2311_v42 = vand.u32 2147483647, %v2301_v32  ;;  %vm2307_vm12 = vweird.f32 %v2301_v32 }
 0x765   :  { %v2337_v30 = vor.u32 1.1754944e-38, %v2336_v0  ;;  %vm2335_vm3 = vcmp.eq.f32.partialorder %v2334_v5, 8.507059e+37 }
 0x766   :  { %v2314_v9 = vor.u32 1.1754944e-38, %v2313_v60  ;;  %vm2312_vm4 = vcmp.eq.f32.partialorder %v2311_v42, 8.507059e+37 }
 0x767   :  { %v5442_v58 = vpop.eup %5441 }
 0x768   :  { %v2346_v19 = vadd.f32 1.0, %v5442_v58 }
 0x769   :  { %v5444_v18 = vpop.eup %5443 }
 0x76a   :  { %v5446_v23 = vpop.eup %5445  ;;  %v2326_v39 = vmul.f32 %v5444_v18, %v2324_v63  ;;  %5447 = vrcp.f32 %v2346_v19  ;;  %vm2331_vm9 = vweird.f32 %v5444_v18  ;;  %v2358_v44 = vand.u32 2147483648, %v2346_v19 }
 0x76b   :  { %v2303_v45 = vmul.f32 %v5446_v23, %v2301_v32  ;;  %5449 = vtanh.f32 %v2273_v28  ;;  %vm2308_vm10 = vweird.f32 %v5446_v23  ;;  %vm2332_vm13 = vmor %vm2330_vm11, %vm2331_vm9  ;;  %vm2352_vm7 = vweird.f32 %v2346_v19 }
 0x76c   :  { %v2327_v40 = vsub.f32 1.0, %v2326_v39  ;;  %vm2309_vm14 = vmor %vm2307_vm12, %vm2308_vm10  ;;  %v2356_v60 = vand.u32 2147483647, %v2346_v19  ;;  %v2359_v5 = vor.u32 1.1754944e-38, %v2358_v44 }
 0x76d   :  { %v2304_v55 = vsub.f32 1.0, %v2303_v45 }
 0x76e   :  { %v2328_v17 = vmul.f32 %v5444_v18, %v2327_v40  ;;  %vm2357_vm9 = vcmp.eq.f32.partialorder %v2356_v60, 8.507059e+37 }
 0x76f   :  { %v2305_v31 = vmul.f32 %v5446_v23, %v2304_v55 }
 0x770   :  { %v5448_v43 = vpop.eup %5447  ;;  %v2329_v3 = vadd.f32 %v5444_v18, %v2328_v17 }
 0x771   :  { %v2306_v8 = vadd.f32 %v5446_v23, %v2305_v31  ;;  %v2348_v29 = vmul.f32 %v5448_v43, %v2346_v19  ;;  %v5450_v58 = vpop.eup %5449  ;;  %vm2353_vm6 = vweird.f32 %v5448_v43 }
 0x772   :  { %v2333_v46 = vsel %vm2332_vm13, %v5444_v18, %v2329_v3  ;;  %vm2354_vm8 = vmor %vm2352_vm7, %vm2353_vm6 }
 0x773   :  { %v2310_v28 = vsel %vm2309_vm14, %v5446_v23, %v2306_v8  ;;  %v2338_v39 = vsel %vm2335_vm3, %v2337_v30, %v2333_v46  ;;  %v2349_v45 = vsub.f32 1.0, %v2348_v29 }
 0x774   :  { %v2315_v40 = vsel %vm2312_vm4, %v2314_v9, %v2310_v28  ;;  %v2341_v55 = vmul.f32 %v5450_v58, %v2338_v39 }
 0x775   :  { %v2320_v17 = vmul.f32 %v2318_v20, %v2315_v40  ;;  %v2350_v63 = vmul.f32 %v5448_v43, %v2349_v45 }
 0x777   :  { %v7381_v32 = vadd.f32 %v2341_v55, %v2320_v17  ;;  %v2351_v0 = vadd.f32 %v5448_v43, %v2350_v63 }
 0x779   :  { %5451 = vtanh.f32 %v7381_v32  ;;  %v2355_v18 = vsel %vm2354_vm8, %v5448_v43, %v2351_v0 }
 0x77a   :  { %v2360_v31 = vsel %vm2357_vm9, %v2359_v5, %v2355_v18 }
 0x77f   :  { %v5452_v23 = vpop.eup %5451 }
 0x780   :  { %v2363_v42 = vmul.f32 %v5452_v23, %v2360_v31 }
 0x782   :  { %2364 = vst.msk [vmem:[#allocation2] sm:$0xc] %vm860_vm0, %v2363_v42  ;;  %v2366_v3 = vrot.slane %v2363_v42, 2 }
 0x784   :  { %5137 = vmatmul.msk.f32.vlgmr.msrb.gmra.mxu0 %vm542_vm5, %v2366_v3  ;;  %5138 = vmatmul.msk.f32.vlgmr.msrb.gmra.mxu1 %vm542_vm5, %v2366_v3 }
 0x785   :  { %5139 = vmatmul.msk.f32.vlgmr.msrb.gmra.mxu2 %vm542_vm5, %v2366_v3  ;;  %5140 = vmatmul.msk.f32.vlgmr.msrb.gmra.mxu3 %vm542_vm5, %v2366_v3  ;;  %v2485_v3 = vrot.slane %v7381_v32, 6 }
 0x786   :  { %2711 = vmatpush.msrb.mxu0 %v7084_v6  ;;  %2732 = vmatpush.msrb.mxu1 %v7086_v11 }
 0x787   :  { %2753 = vmatpush.msrb.mxu2 %v7088_v41  ;;  %2774 = vmatpush.msrb.mxu3 %v7093_v16 }
 0x788   :  { %2712 = vmatpush.msrb.mxu0 %v7095_v54  ;;  %2733 = vmatpush.msrb.mxu1 %v7097_v62 }
 0x789   :  { %2754 = vmatpush.msrb.mxu2 %v7101_v53  ;;  %2775 = vmatpush.msrb.mxu3 %v7103_v1 }
 0x78a   :  { %2713 = vmatpush.msrb.mxu0 %v7105_v61  ;;  %2734 = vmatpush.msrb.mxu1 %v7109_v57 }
 0x78b   :  { %2755 = vmatpush.msrb.mxu2 %v7111_v38  ;;  %2776 = vmatpush.msrb.mxu3 %v7113_v2 }
 0x78c   :  { %2714 = vmatpush.msrb.mxu0 %v7117_v59  ;;  %2735 = vmatpush.msrb.mxu1 %v7119_v10 }
 0x78d   :  { %2756 = vmatpush.msrb.mxu2 %v7125_v34  ;;  %2777 = vmatpush.msrb.mxu3 %v7127_v4 }
 0x78e   :  { %2715 = vmatpush.msrb.mxu0 %v7145_v36  ;;  %2736 = vmatpush.msrb.mxu1 %v7147_v47 }
 0x78f   :  { %2757 = vmatpush.msrb.mxu2 %v7151_v50  ;;  %2778 = vmatpush.msrb.mxu3 %v7153_v51 }
 0x790   :  { %2716 = vmatpush.msrb.mxu0 %v7158_v13  ;;  %2737 = vmatpush.msrb.mxu1 %v7160_v14 }
 0x791   :  { %2758 = vmatpush.msrb.mxu2 %v7162_v15  ;;  %2779 = vmatpush.msrb.mxu3 %v7170_v7 }
 0x792   :  { %2717 = vmatpush.msrb.mxu0 %v7172_v21  ;;  %2738 = vmatpush.msrb.mxu1 %v7174_v22 }
 0x793   :  { %2759 = vmatpush.msrb.mxu2 %v7181_v26  ;;  %2780 = vmatpush.msrb.mxu3 %v7183_v27 }
 0x794   :  { %2718 = vmatpush.msrb.mxu0 %v7185_v37  ;;  %2739 = vmatpush.msrb.mxu1 %v7193_v35 }
 0x795   :  { %2760 = vmatpush.msrb.mxu2 %v7195_v48  ;;  %2781 = vmatpush.msrb.mxu3 %v7197_v49 }
 0x801   :  { %v2386_v6 = vpop.f32.mrf.mxu0  ;;  %v2410_v11 = vpop.f32.mrf.mxu1 }
 0x802   :  { %v2390_v41 = vrot.slane %v2386_v6, 4  ;;  %v2414_v16 = vrot.slane %v2410_v11, 4 }
 0x804   :  { %v2392_v54 = vadd.f32 %v2390_v41, %v7313_v52  ;;  %v2416_v62 = vadd.f32 %v2414_v16, %v7316_v33 }
 0x806   :  { %v5142_v53 = vmul.f32 -1.442695, %v2392_v54  ;;  %v5141_v1 = vmul.f32 -1.442695, %v2416_v62 }
 0x808   :  { %5453 = vpow2.f32 %v5142_v53  ;;  %v2458_v61 = vpop.f32.mrf.mxu3  ;;  %v2434_v8 = vpop.f32.mrf.mxu2 }
 0x809   :  { %5455 = vpow2.f32 %v5141_v1  ;;  %v2462_v57 = vrot.slane %v2458_v61, 4  ;;  %v2438_v30 = vrot.slane %v2434_v8, 4 }
 0x80b   :  { %v2464_v38 = vadd.f32 %v2462_v57, %v7325_v24  ;;  %v2440_v46 = vadd.f32 %v2438_v30, %v7333_v12 }
 0x80d   :  { %v5143_v2 = vmul.f32 -1.442695, %v2464_v38 }
 0x80e   :  { %v5454_v59 = vpop.eup %5453 }
 0x80f   :  { %v5456_v10 = vpop.eup %5455  ;;  %v2491_v19 = vadd.f32 1.0, %v5454_v59  ;;  %5457 = vpow2.f32 %v5143_v2 }
 0x810   :  { %v2468_v43 = vadd.f32 1.0, %v5456_v10 }
 0x811   :  { %5459 = vrcp.f32 %v2491_v19  ;;  %v2503_v55 = vand.u32 2147483648, %v2491_v19  ;;  %v2501_v0 = vand.u32 2147483647, %v2491_v19  ;;  %vm2497_vm12 = vweird.f32 %v2491_v19 }
 0x812   :  { %5461 = vrcp.f32 %v2468_v43  ;;  %v2480_v17 = vand.u32 2147483648, %v2468_v43  ;;  %v2478_v60 = vand.u32 2147483647, %v2468_v43  ;;  %vm2474_vm13 = vweird.f32 %v2468_v43 }
 0x813   :  { %v2504_v31 = vor.u32 1.1754944e-38, %v2503_v55  ;;  %vm2502_vm4 = vcmp.eq.f32.partialorder %v2501_v0, 8.507059e+37  ;;  %v7458_v55 = vld [vmem:[#allocation11 + $0x28] sm:$0xff] }
 0x814   :  { %v2481_v6 = vor.u32 1.1754944e-38, %v2480_v17  ;;  %vm2479_vm6 = vcmp.eq.f32.partialorder %v2478_v60, 8.507059e+37  ;;  %v7461_v17 = vld [vmem:[#allocation11 + $0x68] sm:$0xff]  ;;  %v7473_v60 = vld [vmem:[#allocation11 + $0x60] sm:$0xff] }
 0x815   :  { %v5458_v29 = vpop.eup %5457  ;;  %v7467_v0 = vld [vmem:[#allocation11 + $0xe8] sm:$0xff] }
 0x816   :  { %v2513_v20 = vadd.f32 1.0, %v5458_v29 }
 0x817   :  { %v5460_v9 = vpop.eup %5459 }
 0x818   :  { %v5462_v58 = vpop.eup %5461  ;;  %v2493_v28 = vmul.f32 %v5460_v9, %v2491_v19  ;;  %5463 = vrcp.f32 %v2513_v20  ;;  %vm2498_vm10 = vweird.f32 %v5460_v9  ;;  %v2525_v32 = vand.u32 2147483648, %v2513_v20 }
 0x819   :  { %v2470_v39 = vmul.f32 %v5462_v58, %v2468_v43  ;;  %5465 = vtanh.f32 %v2440_v46  ;;  %vm2475_vm11 = vweird.f32 %v5462_v58  ;;  %vm2499_vm14 = vmor %vm2497_vm12, %vm2498_vm10  ;;  %vm2519_vm8 = vweird.f32 %v2513_v20  ;;  %v7440_v46 = vld [vmem:[#allocation11 + $0xb8] sm:$0xff] }
 0x81a   :  { %v2494_v45 = vsub.f32 1.0, %v2493_v28  ;;  %vm2476_vm3 = vmor %vm2474_vm13, %vm2475_vm11  ;;  %v2523_v59 = vand.u32 2147483647, %v2513_v20  ;;  %v2526_v19 = vor.u32 1.1754944e-38, %v2525_v32  ;;  %v7446_v28 = vld [vmem:[#allocation11 + $0x30] sm:$0xff] }
 0x81b   :  { %v2471_v40 = vsub.f32 1.0, %v2470_v39  ;;  %v7449_v39 = vld [vmem:[#allocation11 + $0x70] sm:$0xff] }
 0x81c   :  { %v2495_v63 = vmul.f32 %v5460_v9, %v2494_v45  ;;  %vm2524_vm10 = vcmp.eq.f32.partialorder %v2523_v59, 8.507059e+37  ;;  %v7452_v45 = vld [vmem:[#allocation11 + $0xb0] sm:$0xff] }
 0x81d   :  { %v2472_v44 = vmul.f32 %v5462_v58, %v2471_v40  ;;  %v7455_v40 = vld [vmem:[#allocation11 + $0xf0] sm:$0xff] }
 0x81e   :  { %v5464_v18 = vpop.eup %5463  ;;  %v2496_v5 = vadd.f32 %v5460_v9, %v2495_v63  ;;  %v7464_v63 = vld [vmem:[#allocation11 + $0xa8] sm:$0xff] }
 0x81f   :  { %v2473_v23 = vadd.f32 %v5462_v58, %v2472_v44  ;;  %v2515_v42 = vmul.f32 %v5464_v18, %v2513_v20  ;;  %v5466_v41 = vpop.eup %5465  ;;  %vm2520_vm7 = vweird.f32 %v5464_v18  ;;  %v7437_v20 = vld [vmem:[#allocation11 + $0x78] sm:$0xff]  ;;  %v7470_v44 = vld [vmem:[#allocation11 + $0x20] sm:$0xff] }
 0x820   :  { %v2500_v11 = vsel %vm2499_vm14, %v5460_v9, %v2496_v5  ;;  %vm2521_vm9 = vmor %vm2519_vm8, %vm2520_vm7  ;;  %v7434_v9 = vld [vmem:[#allocation11 + $0x38] sm:$0xff] }
 0x821   :  { %v2477_v16 = vsel %vm2476_vm3, %v5462_v58, %v2473_v23  ;;  %v2505_v54 = vsel %vm2502_vm4, %v2504_v31, %v2500_v11  ;;  %v2516_v62 = vsub.f32 1.0, %v2515_v42  ;;  %v7443_v58 = vld [vmem:[#allocation11 + $0xf8] sm:$0xff] }
 0x822   :  { %v2482_v53 = vsel %vm2479_vm6, %v2481_v6, %v2477_v16  ;;  %v2508_v1 = vmul.f32 %v5466_v41, %v2505_v54 }
 0x823   :  { %v2487_v61 = vmul.f32 %v2485_v3, %v2482_v53  ;;  %v2517_v57 = vmul.f32 %v5464_v18, %v2516_v62 }
 0x825   :  { %v7426_v38 = vadd.f32 %v2508_v1, %v2487_v61  ;;  %v2518_v2 = vadd.f32 %v5464_v18, %v2517_v57 }
 0x827   :  { %5467 = vtanh.f32 %v7426_v38  ;;  %v2522_v10 = vsel %vm2521_vm9, %v5464_v18, %v2518_v2  ;;  %v2652_v2 = vrot.slane %v7426_v38, 6 }
 0x828   :  { %v2527_v8 = vsel %vm2524_vm10, %v2526_v19, %v2522_v10 }
 0x82d   :  { %v5468_v43 = vpop.eup %5467 }
 0x82e   :  { %v2530_v30 = vmul.f32 %v5468_v43, %v2527_v8 }
 0x830   :  { %2531 = vst.msk [vmem:[#allocation2] sm:$0x30] %vm1028_vm15, %v2530_v30  ;;  %v2533_v29 = vrot.slane %v2530_v30, 4 }
 0x832   :  { %5144 = vmatmul.msk.f32.vlgmr.msra.gmra.mxu0 %vm542_vm5, %v2533_v29  ;;  %5145 = vmatmul.msk.f32.vlgmr.msra.gmra.mxu1 %vm542_vm5, %v2533_v29 }
 0x833   :  { %5146 = vmatmul.msk.f32.vlgmr.msra.gmra.mxu2 %vm542_vm5, %v2533_v29  ;;  %5147 = vmatmul.msk.f32.vlgmr.msra.gmra.mxu3 %vm542_vm5, %v2533_v29 }
 0x834   :  { %2865 = vmatpush.msra.mxu0 %v7434_v9  ;;  %2889 = vmatpush.msra.mxu1 %v7437_v20 }
 0x835   :  { %2913 = vmatpush.msra.mxu2 %v7440_v46  ;;  %2937 = vmatpush.msra.mxu3 %v7443_v58 }
 0x836   :  { %2866 = vmatpush.msra.mxu0 %v7446_v28  ;;  %2890 = vmatpush.msra.mxu1 %v7449_v39 }
 0x837   :  { %2914 = vmatpush.msra.mxu2 %v7452_v45  ;;  %2938 = vmatpush.msra.mxu3 %v7455_v40 }
 0x838   :  { %2867 = vmatpush.msra.mxu0 %v7458_v55  ;;  %2891 = vmatpush.msra.mxu1 %v7461_v17 }
 0x839   :  { %2915 = vmatpush.msra.mxu2 %v7464_v63  ;;  %2939 = vmatpush.msra.mxu3 %v7467_v0 }
 0x83a   :  { %2868 = vmatpush.msra.mxu0 %v7470_v44  ;;  %2892 = vmatpush.msra.mxu1 %v7473_v60 }
 0x83b   :  { %2916 = vmatpush.msra.mxu2 %v7125_v34  ;;  %2940 = vmatpush.msra.mxu3 %v7127_v4 }
 0x83c   :  { %2869 = vmatpush.msra.mxu0 %v7145_v36  ;;  %2893 = vmatpush.msra.mxu1 %v7147_v47 }
 0x83d   :  { %2917 = vmatpush.msra.mxu2 %v7151_v50  ;;  %2941 = vmatpush.msra.mxu3 %v7153_v51 }
 0x83e   :  { %2870 = vmatpush.msra.mxu0 %v7158_v13  ;;  %2894 = vmatpush.msra.mxu1 %v7160_v14 }
 0x83f   :  { %2918 = vmatpush.msra.mxu2 %v7162_v15  ;;  %2942 = vmatpush.msra.mxu3 %v7170_v7 }
 0x840   :  { %2871 = vmatpush.msra.mxu0 %v7172_v21  ;;  %2895 = vmatpush.msra.mxu1 %v7174_v22 }
 0x841   :  { %2919 = vmatpush.msra.mxu2 %v7181_v26  ;;  %2943 = vmatpush.msra.mxu3 %v7183_v27 }
 0x842   :  { %2872 = vmatpush.msra.mxu0 %v7185_v37  ;;  %2896 = vmatpush.msra.mxu1 %v7193_v35 }
 0x843   :  { %2920 = vmatpush.msra.mxu2 %v7195_v48  ;;  %2944 = vmatpush.msra.mxu3 %v7197_v49 }
 0x8af   :  { %v2553_v34 = vpop.f32.mrf.mxu0  ;;  %v2577_v4 = vpop.f32.mrf.mxu1 }
 0x8b0   :  { %v2557_v36 = vrot.slane %v2553_v34, 2  ;;  %v2581_v47 = vrot.slane %v2577_v4, 2 }
 0x8b2   :  { %v2559_v50 = vadd.f32 %v2557_v36, %v7313_v52  ;;  %v2583_v51 = vadd.f32 %v2581_v47, %v7316_v33 }
 0x8b4   :  { %v5149_v13 = vmul.f32 -1.442695, %v2559_v50  ;;  %v5148_v14 = vmul.f32 -1.442695, %v2583_v51 }
 0x8b6   :  { %5469 = vpow2.f32 %v5149_v13  ;;  %v2625_v15 = vpop.f32.mrf.mxu3  ;;  %v2601_v48 = vpop.f32.mrf.mxu2 }
 0x8b7   :  { %5471 = vpow2.f32 %v5148_v14  ;;  %v2629_v7 = vrot.slane %v2625_v15, 2  ;;  %v2605_v49 = vrot.slane %v2601_v48, 2  ;;  %v7536_v48 = vld [vmem:[#allocation11 + $0xd8] sm:$0xff] }
 0x8b9   :  { %v2631_v21 = vadd.f32 %v2629_v7, %v7325_v24  ;;  %v2607_v5 = vadd.f32 %v2605_v49, %v7333_v12  ;;  %v7539_v49 = vld [vmem:[#allocation11 + $0x10] sm:$0xff] }
 0x8bb   :  { %v5150_v22 = vmul.f32 -1.442695, %v2631_v21 }
 0x8bc   :  { %v5470_v26 = vpop.eup %5469 }
 0x8bd   :  { %v5472_v27 = vpop.eup %5471  ;;  %v2658_v37 = vadd.f32 1.0, %v5470_v26  ;;  %5473 = vpow2.f32 %v5150_v22  ;;  %v7521_v22 = vld [vmem:[#allocation11 + $0xa0] sm:$0xff] }
 0x8be   :  { %v2635_v35 = vadd.f32 1.0, %v5472_v27  ;;  %v7524_v26 = vld [vmem:[#allocation11 + $0xe0] sm:$0xff]  ;;  %v7527_v27 = vld [vmem:[#allocation11 + $0x18] sm:$0xff] }
 0x8bf   :  { %5475 = vrcp.f32 %v2658_v37  ;;  %v2670_v6 = vand.u32 2147483648, %v2658_v37  ;;  %v2668_v16 = vand.u32 2147483647, %v2658_v37  ;;  %vm2664_vm13 = vweird.f32 %v2658_v37 }
 0x8c0   :  { %5477 = vrcp.f32 %v2635_v35  ;;  %v2647_v11 = vand.u32 2147483648, %v2635_v35  ;;  %v2645_v62 = vand.u32 2147483647, %v2635_v35  ;;  %vm2641_vm14 = vweird.f32 %v2635_v35 }
 0x8c1   :  { %v2671_v61 = vor.u32 1.1754944e-38, %v2670_v6  ;;  %vm2669_vm6 = vcmp.eq.f32.partialorder %v2668_v16, 8.507059e+37  ;;  %v7569_v6 = vld [vmem:[#allocation11 + $0x80] sm:$0xff]  ;;  %v8375_v16 = vld [vmem:[#allocation50_spill] sm:$0xff] }
 0x8c2   :  { %v2648_v32 = vor.u32 1.1754944e-38, %v2647_v11  ;;  %vm2646_vm7 = vcmp.eq.f32.partialorder %v2645_v62, 8.507059e+37  ;;  %v7572_v11 = vld [vmem:[#allocation11 + $0xc0] sm:$0xff] }
 0x8c3   :  { %v5474_v52 = vpop.eup %5473 }
 0x8c4   :  { %v2680_v33 = vadd.f32 1.0, %v5474_v52  ;;  %v7542_v52 = vld [vmem:[#allocation11 + $0x50] sm:$0xff] }
 0x8c5   :  { %v5476_v18 = vpop.eup %5475 }
 0x8c6   :  { %v5478_v23 = vpop.eup %5477  ;;  %v2660_v31 = vmul.f32 %v5476_v18, %v2658_v37  ;;  %5479 = vrcp.f32 %v2680_v33  ;;  %vm2665_vm11 = vweird.f32 %v5476_v18  ;;  %v2692_v38 = vand.u32 2147483648, %v2680_v33  ;;  %v7530_v37 = vld [vmem:[#allocation11 + $0x58] sm:$0xff] }
 0x8c7   :  { %v2637_v42 = vmul.f32 %v5478_v23, %v2635_v35  ;;  %5481 = vtanh.f32 %v2607_v5  ;;  %vm2642_vm12 = vweird.f32 %v5478_v23  ;;  %vm2666_vm3 = vmor %vm2664_vm13, %vm2665_vm11  ;;  %vm2686_vm9 = vweird.f32 %v2680_v33  ;;  %v7533_v35 = vld [vmem:[#allocation11 + $0x98] sm:$0xff]  ;;  %v7551_v5 = vld [vmem:[#allocation11 + $0x8] sm:$0xff] }
 0x8c8   :  { %v2661_v24 = vsub.f32 1.0, %v2660_v31  ;;  %vm2643_vm4 = vmor %vm2641_vm14, %vm2642_vm12  ;;  %v2690_v50 = vand.u32 2147483647, %v2680_v33  ;;  %v2693_v13 = vor.u32 1.1754944e-38, %v2692_v38  ;;  %v7557_v31 = vld [vmem:[#allocation11 + $0x88] sm:$0xff]  ;;  %v8380_v38 = vld [vmem:[#allocation49_spill] sm:$0xff] }
 0x8c9   :  { %v2638_v3 = vsub.f32 1.0, %v2637_v42  ;;  %v7560_v42 = vld [vmem:[#allocation11 + $0xc8] sm:$0xff] }
 0x8ca   :  { %v2662_v41 = vmul.f32 %v5476_v18, %v2661_v24  ;;  %vm2691_vm11 = vcmp.eq.f32.partialorder %v2690_v50, 8.507059e+37  ;;  %v7563_v24 = vld [vmem:[#allocation11] sm:$0xff] }
 0x8cb   :  { %v2639_v54 = vmul.f32 %v5478_v23, %v2638_v3  ;;  %v7566_v3 = vld [vmem:[#allocation11 + $0x40] sm:$0xff] }
 0x8cc   :  { %v5480_v53 = vpop.eup %5479  ;;  %v2663_v1 = vadd.f32 %v5476_v18, %v2662_v41  ;;  %v7577_v41 = vadd.f32 %v7308_v56, %v7304_v25 }
 0x8cd   :  { %v2640_v12 = vadd.f32 %v5478_v23, %v2639_v54  ;;  %v2682_v57 = vmul.f32 %v5480_v53, %v2680_v33  ;;  %v5482_v10 = vpop.eup %5481  ;;  %vm2687_vm8 = vweird.f32 %v5480_v53  ;;  %v7545_v33 = vld [vmem:[#allocation11 + $0x90] sm:$0xff]  ;;  %v8376_v54 = vld [vmem:[#allocation47_spill] sm:$0xff] }
 0x8ce   :  { %v2667_v59 = vsel %vm2666_vm3, %v5476_v18, %v2663_v1  ;;  %vm2688_vm10 = vmor %vm2686_vm9, %vm2687_vm8  ;;  %v7548_v18 = vld [vmem:[#allocation11 + $0xd0] sm:$0xff]  ;;  %v7581_v62 = vadd.f32 %v8376_v54, %v8375_v16 }
 0x8cf   :  { %v2644_v19 = vsel %vm2643_vm4, %v5478_v23, %v2640_v12  ;;  %v2672_v43 = vsel %vm2669_vm6, %v2671_v61, %v2667_v59  ;;  %v2683_v8 = vsub.f32 1.0, %v2682_v57  ;;  %v7554_v23 = vld [vmem:[#allocation11 + $0x48] sm:$0xff] }
 0x8d0   :  { %v2649_v30 = vsel %vm2646_vm7, %v2648_v32, %v2644_v19  ;;  %v2675_v29 = vmul.f32 %v5482_v10, %v2672_v43  ;;  %v8377_v32 = vld [vmem:[#allocation46_spill] sm:$0xff]  ;;  %v8378_v59 = vld [vmem:[#allocation48_spill] sm:$0xff] }
 0x8d1   :  { %v2654_v34 = vmul.f32 %v2652_v2, %v2649_v30  ;;  %v2684_v4 = vmul.f32 %v5480_v53, %v2683_v8  ;;  %v7587_v10 = vadd.f32 %v8378_v59, %v8377_v32 }
 0x8d3   :  { %v7499_v36 = vadd.f32 %v2675_v29, %v2654_v34  ;;  %v2685_v47 = vadd.f32 %v5480_v53, %v2684_v4 }
 0x8d5   :  { %5483 = vtanh.f32 %v7499_v36  ;;  %v2689_v51 = vsel %vm2688_vm10, %v5480_v53, %v2685_v47  ;;  %v8379_v47 = vld [vmem:[#allocation45_spill] sm:$0xff] }
 0x8d6   :  { %v2694_v15 = vsel %vm2691_vm11, %v2693_v13, %v2689_v51  ;;  %v7592_v50 = vadd.f32 %v8380_v38, %v8379_v47 }
 0x8db   :  { %v5484_v14 = vpop.eup %5483 }
 0x8dc   :  { %v2697_v7 = vmul.f32 %v5484_v14, %v2694_v15 }
 0x8de   :  { %2698 = vst.msk [vmem:[#allocation2] sm:$0xc0] %vm1196_vm1, %v2697_v7  ;;  %v2700_v21 = vrot.slane %v2697_v7, 6 }
 0x8e0   :  { %5151 = vmatmul.msk.f32.vlgmr.msrb.gmra.mxu0 %vm542_vm5, %v2700_v21  ;;  %5152 = vmatmul.msk.f32.vlgmr.msrb.gmra.mxu1 %vm542_vm5, %v2700_v21 }
 0x8e1   :  { %5153 = vmatmul.msk.f32.vlgmr.msrb.gmra.mxu2 %vm542_vm5, %v2700_v21  ;;  %5154 = vmatmul.msk.f32.vlgmr.msrb.gmra.mxu3 %vm542_vm5, %v2700_v21 }
 0x8e2   :  { %3032 = vmatpush.msrb.mxu0 %v7434_v9  ;;  %3056 = vmatpush.msrb.mxu1 %v7437_v20 }
 0x8e3   :  { %3080 = vmatpush.msrb.mxu2 %v7440_v46  ;;  %3104 = vmatpush.msrb.mxu3 %v7443_v58 }
 0x8e4   :  { %3033 = vmatpush.msrb.mxu0 %v7446_v28  ;;  %3057 = vmatpush.msrb.mxu1 %v7449_v39 }
 0x8e5   :  { %3081 = vmatpush.msrb.mxu2 %v7452_v45  ;;  %3105 = vmatpush.msrb.mxu3 %v7455_v40 }
 0x8e6   :  { %3034 = vmatpush.msrb.mxu0 %v7458_v55  ;;  %3058 = vmatpush.msrb.mxu1 %v7461_v17 }
 0x8e7   :  { %3082 = vmatpush.msrb.mxu2 %v7464_v63  ;;  %3106 = vmatpush.msrb.mxu3 %v7467_v0 }
 0x8e8   :  { %3035 = vmatpush.msrb.mxu0 %v7470_v44  ;;  %3059 = vmatpush.msrb.mxu1 %v7473_v60 }
 0x8e9   :  { %3083 = vmatpush.msrb.mxu2 %v7521_v22  ;;  %3107 = vmatpush.msrb.mxu3 %v7524_v26 }
 0x8ea   :  { %3036 = vmatpush.msrb.mxu0 %v7527_v27  ;;  %3060 = vmatpush.msrb.mxu1 %v7530_v37 }
 0x8eb   :  { %3084 = vmatpush.msrb.mxu2 %v7533_v35  ;;  %3108 = vmatpush.msrb.mxu3 %v7536_v48 }
 0x8ec   :  { %3037 = vmatpush.msrb.mxu0 %v7539_v49  ;;  %3061 = vmatpush.msrb.mxu1 %v7542_v52 }
 0x8ed   :  { %3085 = vmatpush.msrb.mxu2 %v7545_v33  ;;  %3109 = vmatpush.msrb.mxu3 %v7548_v18 }
 0x8ee   :  { %3038 = vmatpush.msrb.mxu0 %v7551_v5  ;;  %3062 = vmatpush.msrb.mxu1 %v7554_v23 }
 0x8ef   :  { %3086 = vmatpush.msrb.mxu2 %v7557_v31  ;;  %3110 = vmatpush.msrb.mxu3 %v7560_v42 }
 0x8f0   :  { %3039 = vmatpush.msrb.mxu0 %v7563_v24  ;;  %3063 = vmatpush.msrb.mxu1 %v7566_v3 }
 0x8f1   :  { %3087 = vmatpush.msrb.mxu2 %v7569_v6  ;;  %3111 = vmatpush.msrb.mxu3 %v7572_v11 }
 0x95d   :  { %v2720_v53 = vpop.f32.mrf.mxu0  ;;  %v2741_v1 = vpop.f32.mrf.mxu1 }
 0x95e   :  { %v2723_v12 = vadd.f32 %v2720_v53, %v7577_v41  ;;  %v2744_v61 = vadd.f32 %v2741_v1, %v7581_v62 }
 0x960   :  { %v5156_v57 = vmul.f32 -1.442695, %v2723_v12  ;;  %v5155_v2 = vmul.f32 -1.442695, %v2744_v61 }
 0x962   :  { %5485 = vpow2.f32 %v5156_v57 }
 0x963   :  { %5487 = vpow2.f32 %v5155_v2 }
 0x964   :  { %v2783_v25 = vpop.f32.mrf.mxu3  ;;  %v2762_v34 = vpop.f32.mrf.mxu2 }
 0x965   :  { %v2786_v56 = vadd.f32 %v2783_v25, %v7587_v10  ;;  %v2765_v14 = vadd.f32 %v2762_v34, %v7592_v50 }
 0x967   :  { %v5157_v19 = vmul.f32 -1.442695, %v2786_v56 }
 0x968   :  { %v5486_v43 = vpop.eup %5485 }
 0x969   :  { %v5488_v8 = vpop.eup %5487  ;;  %v2813_v30 = vadd.f32 1.0, %v5486_v43  ;;  %5489 = vpow2.f32 %v5157_v19 }
 0x96a   :  { %v2790_v29 = vadd.f32 1.0, %v5488_v8  ;;  %v2807_v8 = vrot.slane %v7499_v36, 6 }
 0x96b   :  { %5491 = vrcp.f32 %v2813_v30  ;;  %v2825_v53 = vand.u32 2147483648, %v2813_v30  ;;  %v2823_v61 = vand.u32 2147483647, %v2813_v30  ;;  %vm2819_vm14 = vweird.f32 %v2813_v30 }
 0x96c   :  { %5493 = vrcp.f32 %v2790_v29  ;;  %v2802_v1 = vand.u32 2147483648, %v2790_v29  ;;  %v2800_v2 = vand.u32 2147483647, %v2790_v29  ;;  %vm2796_vm3 = vweird.f32 %v2790_v29 }
 0x96d   :  { %v2826_v56 = vor.u32 1.1754944e-38, %v2825_v53  ;;  %vm2824_vm7 = vcmp.eq.f32.partialorder %v2823_v61, 8.507059e+37 }
 0x96e   :  { %v2803_v43 = vor.u32 1.1754944e-38, %v2802_v1  ;;  %vm2801_vm8 = vcmp.eq.f32.partialorder %v2800_v2, 8.507059e+37 }
 0x96f   :  { %v5490_v4 = vpop.eup %5489 }
 0x970   :  { %v2835_v51 = vadd.f32 1.0, %v5490_v4 }
 0x971   :  { %v5492_v13 = vpop.eup %5491 }
 0x972   :  { %v5494_v15 = vpop.eup %5493  ;;  %v2815_v7 = vmul.f32 %v5492_v13, %v2813_v30  ;;  %5495 = vrcp.f32 %v2835_v51  ;;  %vm2820_vm12 = vweird.f32 %v5492_v13  ;;  %v2847_v53 = vand.u32 2147483648, %v2835_v51 }
 0x973   :  { %v2792_v21 = vmul.f32 %v5494_v15, %v2790_v29  ;;  %5497 = vtanh.f32 %v2765_v14  ;;  %vm2797_vm13 = vweird.f32 %v5494_v15  ;;  %vm2821_vm4 = vmor %vm2819_vm14, %vm2820_vm12  ;;  %vm2841_vm10 = vweird.f32 %v2835_v51 }
 0x974   :  { %v2816_v16 = vsub.f32 1.0, %v2815_v7  ;;  %vm2798_vm6 = vmor %vm2796_vm3, %vm2797_vm13  ;;  %v2845_v36 = vand.u32 2147483647, %v2835_v51  ;;  %v2848_v1 = vor.u32 1.1754944e-38, %v2847_v53 }
 0x975   :  { %v2793_v54 = vsub.f32 1.0, %v2792_v21 }
 0x976   :  { %v2817_v12 = vmul.f32 %v5492_v13, %v2816_v16  ;;  %vm2846_vm12 = vcmp.eq.f32.partialorder %v2845_v36, 8.507059e+37 }
 0x977   :  { %v2794_v57 = vmul.f32 %v5494_v15, %v2793_v54 }
 0x978   :  { %v5496_v32 = vpop.eup %5495  ;;  %v2818_v59 = vadd.f32 %v5492_v13, %v2817_v12 }
 0x979   :  { %v2795_v25 = vadd.f32 %v5494_v15, %v2794_v57  ;;  %v2837_v19 = vmul.f32 %v5496_v32, %v2835_v51  ;;  %v5498_v4 = vpop.eup %5497  ;;  %vm2842_vm9 = vweird.f32 %v5496_v32 }
 0x97a   :  { %v2822_v34 = vsel %vm2821_vm4, %v5492_v13, %v2818_v59  ;;  %vm2843_vm11 = vmor %vm2841_vm10, %vm2842_vm9 }
 0x97b   :  { %v2799_v47 = vsel %vm2798_vm6, %v5494_v15, %v2795_v25  ;;  %v2827_v38 = vsel %vm2824_vm7, %v2826_v56, %v2822_v34  ;;  %v2838_v14 = vsub.f32 1.0, %v2837_v19 }
 0x97c   :  { %v2804_v7 = vsel %vm2801_vm8, %v2803_v43, %v2799_v47  ;;  %v2830_v21 = vmul.f32 %v5498_v4, %v2827_v38 }
 0x97d   :  { %v2809_v16 = vmul.f32 %v2807_v8, %v2804_v7  ;;  %v2839_v30 = vmul.f32 %v5496_v32, %v2838_v14 }
 0x97f   :  { %v7596_v29 = vadd.f32 %v2830_v21, %v2809_v16  ;;  %v2840_v54 = vadd.f32 %v5496_v32, %v2839_v30 }
 0x981   :  { %5499 = vtanh.f32 %v7596_v29  ;;  %v2844_v13 = vsel %vm2843_vm11, %v5496_v32, %v2840_v54  ;;  %v2973_v56 = vrot.slane %v7596_v29, 6 }
 0x982   :  { %v2849_v12 = vsel %vm2846_vm12, %v2848_v1, %v2844_v13 }
 0x987   :  { %v5500_v15 = vpop.eup %5499 }
 0x988   :  { %v2852_v61 = vmul.f32 %v5500_v15, %v2849_v12 }
 0x98a   :  { %2853 = vst.msk [vmem:[#allocation2 + $0x8] sm:$0x3] %vm693_vm2, %v2852_v61  ;;  %5158 = vmatmul.msk.f32.vlgmr.msra.gmra.mxu0 %vm542_vm5, %v2852_v61  ;;  %5159 = vmatmul.msk.f32.vlgmr.msra.gmra.mxu1 %vm542_vm5, %v2852_v61 }
 0x98b   :  { %5160 = vmatmul.msk.f32.vlgmr.msra.gmra.mxu2 %vm542_vm5, %v2852_v61  ;;  %5161 = vmatmul.msk.f32.vlgmr.msra.gmra.mxu3 %vm542_vm5, %v2852_v61 }
 0x98c   :  { %3199 = vmatpush.msra.mxu0 %v7434_v9  ;;  %3223 = vmatpush.msra.mxu1 %v7437_v20 }
 0x98d   :  { %3247 = vmatpush.msra.mxu2 %v7440_v46  ;;  %3271 = vmatpush.msra.mxu3 %v7443_v58 }
 0x98e   :  { %3200 = vmatpush.msra.mxu0 %v7446_v28  ;;  %3224 = vmatpush.msra.mxu1 %v7449_v39 }
 0x98f   :  { %3248 = vmatpush.msra.mxu2 %v7452_v45  ;;  %3272 = vmatpush.msra.mxu3 %v7455_v40 }
 0x990   :  { %3201 = vmatpush.msra.mxu0 %v7458_v55  ;;  %3225 = vmatpush.msra.mxu1 %v7461_v17 }
 0x991   :  { %3249 = vmatpush.msra.mxu2 %v7464_v63  ;;  %3273 = vmatpush.msra.mxu3 %v7467_v0 }
 0x992   :  { %3202 = vmatpush.msra.mxu0 %v7470_v44  ;;  %3226 = vmatpush.msra.mxu1 %v7473_v60 }
 0x993   :  { %3250 = vmatpush.msra.mxu2 %v7521_v22  ;;  %3274 = vmatpush.msra.mxu3 %v7524_v26 }
 0x994   :  { %3203 = vmatpush.msra.mxu0 %v7527_v27  ;;  %3227 = vmatpush.msra.mxu1 %v7530_v37 }
 0x995   :  { %3251 = vmatpush.msra.mxu2 %v7533_v35  ;;  %3275 = vmatpush.msra.mxu3 %v7536_v48 }
 0x996   :  { %3204 = vmatpush.msra.mxu0 %v7539_v49  ;;  %3228 = vmatpush.msra.mxu1 %v7542_v52 }
 0x997   :  { %3252 = vmatpush.msra.mxu2 %v7545_v33  ;;  %3276 = vmatpush.msra.mxu3 %v7548_v18 }
 0x998   :  { %3205 = vmatpush.msra.mxu0 %v7551_v5  ;;  %3229 = vmatpush.msra.mxu1 %v7554_v23 }
 0x999   :  { %3253 = vmatpush.msra.mxu2 %v7557_v31  ;;  %3277 = vmatpush.msra.mxu3 %v7560_v42 }
 0x99a   :  { %3206 = vmatpush.msra.mxu0 %v7563_v24  ;;  %3230 = vmatpush.msra.mxu1 %v7566_v3 }
 0x99b   :  { %3254 = vmatpush.msra.mxu2 %v7569_v6  ;;  %3278 = vmatpush.msra.mxu3 %v7572_v11 }
 0xa07   :  { %v2874_v9 = vpop.f32.mrf.mxu0  ;;  %v2898_v20 = vpop.f32.mrf.mxu1 }
 0xa08   :  { %v2878_v46 = vrot.slane %v2874_v9, 6  ;;  %v2902_v58 = vrot.slane %v2898_v20, 6 }
 0xa0a   :  { %v2880_v28 = vadd.f32 %v2878_v46, %v7577_v41  ;;  %v2904_v39 = vadd.f32 %v2902_v58, %v7581_v62 }
 0xa0c   :  { %v5163_v45 = vmul.f32 -1.442695, %v2880_v28  ;;  %v5162_v40 = vmul.f32 -1.442695, %v2904_v39 }
 0xa0e   :  { %5501 = vpow2.f32 %v5163_v45  ;;  %v2946_v55 = vpop.f32.mrf.mxu3  ;;  %v2922_v27 = vpop.f32.mrf.mxu2 }
 0xa0f   :  { %5503 = vpow2.f32 %v5162_v40  ;;  %v2950_v17 = vrot.slane %v2946_v55, 6  ;;  %v2926_v37 = vrot.slane %v2922_v27, 6  ;;  %v3367_v40 = vld [vmem:[#allocation14 + $0x38] sm:$0xff]  ;;  %v3482_v27 = vld [vmem:[#allocation14 + $0xf0] sm:$0xff] }
 0xa10   :  { %v3409_v55 = vld [vmem:[#allocation14 + $0x78] sm:$0xff] }
 0xa11   :  { %v2952_v63 = vadd.f32 %v2950_v17, %v7587_v10  ;;  %v2928_v52 = vadd.f32 %v2926_v37, %v7592_v50  ;;  %v3446_v17 = vld [vmem:[#allocation14 + $0xb8] sm:$0xff]  ;;  %v3365_v37 = vld [vmem:[#allocation14 + $0x28] sm:$0xff] }
 0xa13   :  { %v5164_v0 = vmul.f32 -1.442695, %v2952_v63 }
 0xa14   :  { %v5502_v44 = vpop.eup %5501 }
 0xa15   :  { %v5504_v60 = vpop.eup %5503  ;;  %v2979_v22 = vadd.f32 1.0, %v5502_v44  ;;  %5505 = vpow2.f32 %v5164_v0  ;;  %v3483_v0 = vld [vmem:[#allocation14 + $0xf8] sm:$0xff]  ;;  %v3366_v44 = vld [vmem:[#allocation14 + $0x30] sm:$0xff] }
 0xa16   :  { %v2956_v26 = vadd.f32 1.0, %v5504_v60  ;;  %v3408_v60 = vld [vmem:[#allocation14 + $0x70] sm:$0xff] }
 0xa17   :  { %5507 = vrcp.f32 %v2979_v22  ;;  %v2991_v42 = vand.u32 2147483648, %v2979_v22  ;;  %v2989_v6 = vand.u32 2147483647, %v2979_v22  ;;  %vm2985_vm3 = vweird.f32 %v2979_v22 }
 0xa18   :  { %5509 = vrcp.f32 %v2956_v26  ;;  %v2968_v24 = vand.u32 2147483648, %v2956_v26  ;;  %v2966_v51 = vand.u32 2147483647, %v2956_v26  ;;  %vm2962_vm4 = vweird.f32 %v2956_v26 }
 0xa19   :  { %v2992_v59 = vor.u32 1.1754944e-38, %v2991_v42  ;;  %vm2990_vm8 = vcmp.eq.f32.partialorder %v2989_v6, 8.507059e+37 }
 0xa1a   :  { %v2969_v19 = vor.u32 1.1754944e-38, %v2968_v24  ;;  %vm2967_vm9 = vcmp.eq.f32.partialorder %v2966_v51, 8.507059e+37 }
 0xa1b   :  { %v5506_v35 = vpop.eup %5505 }
 0xa1c   :  { %v3001_v48 = vadd.f32 1.0, %v5506_v35  ;;  %v3407_v35 = vld [vmem:[#allocation14 + $0x68] sm:$0xff] }
 0xa1d   :  { %v5508_v49 = vpop.eup %5507 }
 0xa1e   :  { %v5510_v33 = vpop.eup %5509  ;;  %v2981_v18 = vmul.f32 %v5508_v49, %v2979_v22  ;;  %5511 = vrcp.f32 %v3001_v48  ;;  %vm2986_vm13 = vweird.f32 %v5508_v49  ;;  %v3013_v29 = vand.u32 2147483648, %v3001_v48 }
 0xa1f   :  { %v2958_v5 = vmul.f32 %v5510_v33, %v2956_v26  ;;  %5513 = vtanh.f32 %v2928_v52  ;;  %vm2963_vm14 = vweird.f32 %v5510_v33  ;;  %vm2987_vm6 = vmor %vm2985_vm3, %vm2986_vm13  ;;  %vm3007_vm11 = vweird.f32 %v3001_v48  ;;  %v3445_v26 = vld [vmem:[#allocation14 + $0xb0] sm:$0xff] }
 0xa20   :  { %v2982_v23 = vsub.f32 1.0, %v2981_v18  ;;  %vm2964_vm7 = vmor %vm2962_vm4, %vm2963_vm14  ;;  %v3011_v54 = vand.u32 2147483647, %v3001_v48  ;;  %v3014_v36 = vor.u32 1.1754944e-38, %v3013_v29  ;;  %v3406_v18 = vld [vmem:[#allocation14 + $0x60] sm:$0xff] }
 0xa21   :  { %v2959_v31 = vsub.f32 1.0, %v2958_v5  ;;  %v3443_v5 = vld [vmem:[#allocation14 + $0xa0] sm:$0xff] }
 0xa22   :  { %v2983_v3 = vmul.f32 %v5508_v49, %v2982_v23  ;;  %vm3012_vm13 = vcmp.eq.f32.partialorder %v3011_v54, 8.507059e+37  ;;  %v3480_v23 = vld [vmem:[#allocation14 + $0xe0] sm:$0xff] }
 0xa23   :  { %v2960_v11 = vmul.f32 %v5510_v33, %v2959_v31  ;;  %v3402_v29 = vld [vmem:[#allocation14 + $0x40] sm:$0xff] }
 0xa24   :  { %v5512_v57 = vpop.eup %5511  ;;  %v2984_v2 = vadd.f32 %v5508_v49, %v2983_v3 }
 0xa25   :  { %v2961_v32 = vadd.f32 %v5510_v33, %v2960_v11  ;;  %v3003_v25 = vmul.f32 %v5512_v57, %v3001_v48  ;;  %v5514_v8 = vpop.eup %5513  ;;  %vm3008_vm10 = vweird.f32 %v5512_v57  ;;  %v3444_v48 = vld [vmem:[#allocation14 + $0xa8] sm:$0xff] }
 0xa26   :  { %v2988_v43 = vsel %vm2987_vm6, %v5508_v49, %v2984_v2  ;;  %vm3009_vm12 = vmor %vm3007_vm11, %vm3008_vm10  ;;  %v3481_v49 = vld [vmem:[#allocation14 + $0xe8] sm:$0xff]  ;;  %v3405_v2 = vld [vmem:[#allocation14 + $0x58] sm:$0xff] }
 0xa27   :  { %v2965_v34 = vsel %vm2964_vm7, %v5510_v33, %v2961_v32  ;;  %v2993_v4 = vsel %vm2990_vm8, %v2992_v59, %v2988_v43  ;;  %v3004_v47 = vsub.f32 1.0, %v3003_v25  ;;  %v3364_v33 = vld [vmem:[#allocation14 + $0x20] sm:$0xff]  ;;  %v3442_v32 = vld [vmem:[#allocation14 + $0x98] sm:$0xff]  ;;  %v3362_v25 = vld [vmem:[#allocation14 + $0x10] sm:$0xff] }
 0xa28   :  { %v2970_v38 = vsel %vm2967_vm9, %v2969_v19, %v2965_v34  ;;  %v2996_v14 = vmul.f32 %v5514_v8, %v2993_v4  ;;  %v3479_v59 = vld [vmem:[#allocation14 + $0xd8] sm:$0xff]  ;;  %v3441_v43 = vld [vmem:[#allocation14 + $0x90] sm:$0xff]  ;;  %v3361_v34 = vld [vmem:[#allocation14 + $0x8] sm:$0xff] }
 0xa29   :  { %v2975_v7 = vmul.f32 %v2973_v56, %v2970_v38  ;;  %v3005_v21 = vmul.f32 %v5512_v57, %v3004_v47  ;;  %v3404_v56 = vld [vmem:[#allocation14 + $0x50] sm:$0xff]  ;;  %v3403_v47 = vld [vmem:[#allocation14 + $0x48] sm:$0xff] }
 0xa2a   :  { %v3478_v8 = vld [vmem:[#allocation14 + $0xd0] sm:$0xff]  ;;  %v3440_v38 = vld [vmem:[#allocation14 + $0x88] sm:$0xff] }
 0xa2b   :  { %v7641_v16 = vadd.f32 %v2996_v14, %v2975_v7  ;;  %v3006_v30 = vadd.f32 %v5512_v57, %v3005_v21  ;;  %v3477_v14 = vld [vmem:[#allocation14 + $0xc8] sm:$0xff] }
 0xa2d   :  { %5515 = vtanh.f32 %v7641_v16  ;;  %v3010_v53 = vsel %vm3009_vm12, %v5512_v57, %v3006_v30  ;;  %v3363_v57 = vld [vmem:[#allocation14 + $0x18] sm:$0xff]  ;;  %v3360_v30 = vld [vmem:[#allocation14] sm:$0xff] }
 0xa2e   :  { %v3015_v1 = vsel %vm3012_vm13, %v3014_v36, %v3010_v53  ;;  %v3439_v36 = vld [vmem:[#allocation14 + $0x80] sm:$0xff] }
 0xa33   :  { %v5516_v13 = vpop.eup %5515 }
 0xa34   :  { %v3018_v15 = vmul.f32 %v5516_v13, %v3015_v1  ;;  %v3476_v13 = vld [vmem:[#allocation14 + $0xc0] sm:$0xff] }
 0xa36   :  { %3019 = vst.msk [vmem:[#allocation2 + $0x8] sm:$0xc] %vm860_vm0, %v3018_v15  ;;  %v3021_v12 = vrot.slane %v3018_v15, 2 }
 0xa38   :  { %5165 = vmatmul.msk.f32.vlgmr.msrb.gmra.mxu0 %vm542_vm5, %v3021_v12  ;;  %5166 = vmatmul.msk.f32.vlgmr.msrb.gmra.mxu1 %vm542_vm5, %v3021_v12 }
 0xa39   :  { %5167 = vmatmul.msk.f32.vlgmr.msrb.gmra.mxu2 %vm542_vm5, %v3021_v12  ;;  %5168 = vmatmul.msk.f32.vlgmr.msrb.gmra.mxu3 %vm542_vm5, %v3021_v12 }
 0xa3a   :  { %3386 = vmatpush.msrb.mxu0 %v3367_v40  ;;  %3423 = vmatpush.msrb.mxu1 %v3409_v55 }
 0xa3b   :  { %3460 = vmatpush.msrb.mxu2 %v3446_v17  ;;  %3497 = vmatpush.msrb.mxu3 %v3483_v0 }
 0xa3c   :  { %3387 = vmatpush.msrb.mxu0 %v3366_v44  ;;  %3424 = vmatpush.msrb.mxu1 %v3408_v60 }
 0xa3d   :  { %3461 = vmatpush.msrb.mxu2 %v3445_v26  ;;  %3498 = vmatpush.msrb.mxu3 %v3482_v27 }
 0xa3e   :  { %3388 = vmatpush.msrb.mxu0 %v3365_v37  ;;  %3425 = vmatpush.msrb.mxu1 %v3407_v35 }
 0xa3f   :  { %3462 = vmatpush.msrb.mxu2 %v3444_v48  ;;  %3499 = vmatpush.msrb.mxu3 %v3481_v49 }
 0xa40   :  { %3389 = vmatpush.msrb.mxu0 %v3364_v33  ;;  %3426 = vmatpush.msrb.mxu1 %v3406_v18 }
 0xa41   :  { %3463 = vmatpush.msrb.mxu2 %v3443_v5  ;;  %3500 = vmatpush.msrb.mxu3 %v3480_v23 }
 0xa42   :  { %3390 = vmatpush.msrb.mxu0 %v3363_v57  ;;  %3427 = vmatpush.msrb.mxu1 %v3405_v2 }
 0xa43   :  { %3464 = vmatpush.msrb.mxu2 %v3442_v32  ;;  %3501 = vmatpush.msrb.mxu3 %v3479_v59 }
 0xa44   :  { %3391 = vmatpush.msrb.mxu0 %v3362_v25  ;;  %3428 = vmatpush.msrb.mxu1 %v3404_v56 }
 0xa45   :  { %3465 = vmatpush.msrb.mxu2 %v3441_v43  ;;  %3502 = vmatpush.msrb.mxu3 %v3478_v8 }
 0xa46   :  { %3392 = vmatpush.msrb.mxu0 %v3361_v34  ;;  %3429 = vmatpush.msrb.mxu1 %v3403_v47 }
 0xa47   :  { %3466 = vmatpush.msrb.mxu2 %v3440_v38  ;;  %3503 = vmatpush.msrb.mxu3 %v3477_v14 }
 0xa48   :  { %3393 = vmatpush.msrb.mxu0 %v3360_v30  ;;  %3430 = vmatpush.msrb.mxu1 %v3402_v29  ;;  %v7706_v30 = vld [vmem:[#allocation15 + $0x30] sm:$0xff] }
 0xa49   :  { %3467 = vmatpush.msrb.mxu2 %v3439_v36  ;;  %3504 = vmatpush.msrb.mxu3 %v3476_v13  ;;  %v7708_v29 = vld [vmem:[#allocation15 + $0x70] sm:$0xff]  ;;  %v7716_v13 = vld [vmem:[#allocation15 + $0x28] sm:$0xff] }
 0xa4a   :  { %v7714_v36 = vld [vmem:[#allocation15 + $0xf0] sm:$0xff] }
 0xab5   :  { %v3041_v61 = vpop.f32.mrf.mxu0  ;;  %v3065_v9 = vpop.f32.mrf.mxu1 }
 0xab6   :  { %v3045_v20 = vrot.slane %v3041_v61, 4  ;;  %v3069_v46 = vrot.slane %v3065_v9, 4 }
 0xab8   :  { %v3047_v58 = vadd.f32 %v3045_v20, %v7577_v41  ;;  %v3071_v28 = vadd.f32 %v3069_v46, %v7581_v62 }
 0xaba   :  { %v5170_v39 = vmul.f32 -1.442695, %v3047_v58  ;;  %v5169_v45 = vmul.f32 -1.442695, %v3071_v28 }
 0xabc   :  { %5517 = vpow2.f32 %v5170_v39  ;;  %v3113_v63 = vpop.f32.mrf.mxu3  ;;  %v3089_v11 = vpop.f32.mrf.mxu2 }
 0xabd   :  { %5519 = vpow2.f32 %v5169_v45  ;;  %v3117_v22 = vrot.slane %v3113_v63, 4  ;;  %v3093_v51 = vrot.slane %v3089_v11, 4  ;;  %v3140_v63 = vrot.slane %v7641_v16, 6 }
 0xabf   :  { %v3119_v52 = vadd.f32 %v3117_v22, %v7587_v10  ;;  %v3095_v21 = vadd.f32 %v3093_v51, %v7592_v50 }
 0xac1   :  { %v5171_v31 = vmul.f32 -1.442695, %v3119_v52 }
 0xac2   :  { %v5518_v42 = vpop.eup %5517 }
 0xac3   :  { %v5520_v24 = vpop.eup %5519  ;;  %v7652_v3 = vadd.f32 1.0, %v5518_v42  ;;  %5521 = vpow2.f32 %v5171_v31 }
 0xac4   :  { %v7654_v6 = vadd.f32 1.0, %v5520_v24 }
 0xac5   :  { %5523 = vrcp.f32 %v7652_v3  ;;  %v3158_v61 = vand.u32 2147483648, %v7652_v3  ;;  %v3156_v46 = vand.u32 2147483647, %v7652_v3  ;;  %vm3152_vm4 = vweird.f32 %v7652_v3 }
 0xac6   :  { %5525 = vrcp.f32 %v7654_v6  ;;  %v3135_v9 = vand.u32 2147483648, %v7654_v6  ;;  %v3133_v28 = vand.u32 2147483647, %v7654_v6  ;;  %vm3129_vm6 = vweird.f32 %v7654_v6 }
 0xac7   :  { %v3159_v55 = vor.u32 1.1754944e-38, %v3158_v61  ;;  %vm3157_vm9 = vcmp.eq.f32.partialorder %v3156_v46, 8.507059e+37 }
 0xac8   :  { %v3136_v0 = vor.u32 1.1754944e-38, %v3135_v9  ;;  %vm3134_vm10 = vcmp.eq.f32.partialorder %v3133_v28, 8.507059e+37  ;;  %v7728_v9 = vld [vmem:[#allocation15 + $0x20] sm:$0xff] }
 0xac9   :  { %v5522_v19 = vpop.eup %5521  ;;  %v7738_v28 = vld [vmem:[#allocation15 + $0xe0] sm:$0xff] }
 0xaca   :  { %v7658_v4 = vadd.f32 1.0, %v5522_v19 }
 0xacb   :  { %v5524_v7 = vpop.eup %5523 }
 0xacc   :  { %v5526_v54 = vpop.eup %5525  ;;  %v3148_v53 = vmul.f32 %v5524_v7, %v7652_v3  ;;  %5527 = vrcp.f32 %v7658_v4  ;;  %vm3153_vm14 = vweird.f32 %v5524_v7  ;;  %v3180_v16 = vand.u32 2147483648, %v7658_v4 }
 0xacd   :  { %v3125_v1 = vmul.f32 %v5526_v54, %v7654_v6  ;;  %5529 = vtanh.f32 %v3095_v21  ;;  %vm3130_vm3 = vweird.f32 %v5526_v54  ;;  %vm3154_vm7 = vmor %vm3152_vm4, %vm3153_vm14  ;;  %vm3174_vm12 = vweird.f32 %v7658_v4  ;;  %v3358_v6 = vld [vmem:[#allocation2] sm:$0xff]  ;;  %v7699_v21 = vld [vmem:[#allocation15 + $0xb8] sm:$0xff] }
 0xace   :  { %v3149_v15 = vsub.f32 1.0, %v3148_v53  ;;  %vm3131_vm8 = vmor %vm3129_vm6, %vm3130_vm3  ;;  %v3178_v18 = vand.u32 2147483647, %v7658_v4  ;;  %v3181_v23 = vor.u32 1.1754944e-38, %v3180_v16  ;;  %v7712_v53 = vld [vmem:[#allocation15 + $0xb0] sm:$0xff] }
 0xacf   :  { %v3126_v12 = vsub.f32 1.0, %v3125_v1  ;;  %v7720_v1 = vld [vmem:[#allocation15 + $0x68] sm:$0xff]  ;;  %v7781_v16 = vld [vmem:[#allocation15 + $0xd0] sm:$0xff] }
 0xad0   :  { %v3150_v20 = vmul.f32 %v5524_v7, %v3149_v15  ;;  %vm3179_vm14 = vcmp.eq.f32.partialorder %v3178_v18, 8.507059e+37  ;;  %v7722_v15 = vld [vmem:[#allocation15 + $0xa8] sm:$0xff] }
 0xad1   :  { %v3127_v58 = vmul.f32 %v5526_v54, %v3126_v12  ;;  %v7724_v12 = vld [vmem:[#allocation15 + $0xe8] sm:$0xff] }
 0xad2   :  { %v5528_v39 = vpop.eup %5527  ;;  %v3151_v45 = vadd.f32 %v5524_v7, %v3150_v20  ;;  %v7730_v20 = vld [vmem:[#allocation15 + $0x60] sm:$0xff]  ;;  %v7783_v18 = vld [vmem:[#allocation15 + $0x8] sm:$0xff] }
 0xad3   :  { %v3128_v40 = vadd.f32 %v5526_v54, %v3127_v58  ;;  %v3170_v17 = vmul.f32 %v5528_v39, %v7658_v4  ;;  %v5530_v60 = vpop.eup %5529  ;;  %vm3175_vm11 = vweird.f32 %v5528_v39  ;;  %v7736_v58 = vld [vmem:[#allocation15 + $0xa0] sm:$0xff] }
 0xad4   :  { %v3155_v44 = vsel %vm3154_vm7, %v5524_v7, %v3151_v45  ;;  %vm3176_vm13 = vmor %vm3174_vm12, %vm3175_vm11 }
 0xad5   :  { %v3132_v22 = vsel %vm3131_vm8, %v5526_v54, %v3128_v40  ;;  %v3160_v26 = vsel %vm3157_vm9, %v3159_v55, %v3155_v44  ;;  %v3171_v27 = vsub.f32 1.0, %v3170_v17  ;;  %v7762_v44 = vld [vmem:[#allocation15 + $0x98] sm:$0xff] }
 0xad6   :  { %v3137_v37 = vsel %vm3134_vm10, %v3136_v0, %v3132_v22  ;;  %v3163_v35 = vmul.f32 %v5530_v60, %v3160_v26  ;;  %v7764_v60 = vld [vmem:[#allocation15 + $0xd8] sm:$0xff] }
 0xad7   :  { %v3142_v48 = vmul.f32 %v3140_v63, %v3137_v37  ;;  %v3172_v49 = vmul.f32 %v5528_v39, %v3171_v27  ;;  %v7758_v63 = vld [vmem:[#allocation15 + $0x58] sm:$0xff]  ;;  %v7769_v27 = vld [vmem:[#allocation15 + $0x10] sm:$0xff] }
 0xad8   :  { %v7771_v37 = vld [vmem:[#allocation15 + $0x50] sm:$0xff] }
 0xad9   :  { %v7672_v52 = vadd.f32 %v3163_v35, %v3142_v48  ;;  %v3173_v33 = vadd.f32 %v5528_v39, %v3172_v49  ;;  %v7773_v35 = vld [vmem:[#allocation15 + $0x90] sm:$0xff] }
 0xadb   :  { %5531 = vtanh.f32 %v7672_v52  ;;  %v3177_v5 = vsel %vm3176_vm13, %v5528_v39, %v3173_v33 }
 0xadc   :  { %v3182_v42 = vsel %vm3179_vm14, %v3181_v23, %v3177_v5  ;;  %v7785_v5 = vld [vmem:[#allocation15 + $0x48] sm:$0xff] }
 0xae1   :  { %v5532_v31 = vpop.eup %5531 }
 0xae2   :  { %v3185_v24 = vmul.f32 %v5532_v31, %v3182_v42  ;;  %v7792_v42 = vld [vmem:[#allocation15 + $0x88] sm:$0xff] }
 0xae4   :  { %3186 = vst.msk [vmem:[#allocation2 + $0x8] sm:$0x30] %vm1028_vm15, %v3185_v24  ;;  %v3188_v3 = vrot.slane %v3185_v24, 4  ;;  %v7794_v24 = vld [vmem:[#allocation15 + $0xc8] sm:$0xff] }
 0xae6   :  { %5172 = vmatmul.msk.f32.vlgmr.msra.gmra.mxu0 %vm542_vm5, %v3188_v3  ;;  %5173 = vmatmul.msk.f32.vlgmr.msra.gmra.mxu1 %vm542_vm5, %v3188_v3 }
 0xae7   :  { %5174 = vmatmul.msk.f32.vlgmr.msra.gmra.mxu2 %vm542_vm5, %v3188_v3  ;;  %5175 = vmatmul.msk.f32.vlgmr.msra.gmra.mxu3 %vm542_vm5, %v3188_v3  ;;  %v7796_v3 = vld [vmem:[#allocation15] sm:$0xff] }
 0xae8   :  { %3604 = vmatpush.msra.mxu2 %v7699_v21 }
 0xaea   :  { %3605 = vmatpush.msra.mxu2 %v7712_v53 }
 0xaec   :  { %3606 = vmatpush.msra.mxu2 %v7722_v15 }
 0xaee   :  { %5179 = vmatmul.msk.f32.vlgmr.msrb.gmra.mxu0 %vm542_vm5, %v3358_v6  ;;  %5181 = vmatmul.msk.f32.vlgmr.msrb.gmra.mxu1 %vm542_vm5, %v3358_v6 }
 0xaef   :  { %5183 = vmatmul.msk.f32.vlgmr.msrb.gmra.mxu2 %vm542_vm5, %v3358_v6  ;;  %5185 = vmatmul.msk.f32.vlgmr.msrb.gmra.mxu3 %vm542_vm5, %v3358_v6 }
 0xaf0   :  { %3607 = vmatpush.msra.mxu2 %v7736_v58 }
 0xaf2   :  { %3608 = vmatpush.msra.mxu2 %v7762_v44 }
 0xaf4   :  { %3609 = vmatpush.msra.mxu2 %v7773_v35 }
 0xaf6   :  { %3610 = vmatpush.msra.mxu2 %v7792_v42 }
 0xb63   :  { %v3208_v11 = vpop.f32.mrf.mxu0  ;;  %v3232_v51 = vpop.f32.mrf.mxu1 }
 0xb64   :  { %v3212_v57 = vrot.slane %v3208_v11, 2  ;;  %v3236_v2 = vrot.slane %v3232_v51, 2  ;;  %v7804_v51 = vld [vmem:[#allocation15 + $0x40] sm:$0xff] }
 0xb66   :  { %v3214_v32 = vadd.f32 %v3212_v57, %v7577_v41  ;;  %v3238_v59 = vadd.f32 %v3236_v2, %v7581_v62  ;;  %v7695_v41 = vld [vmem:[#allocation15 + $0x38] sm:$0xff]  ;;  %v7806_v57 = vld [vmem:[#allocation15 + $0x80] sm:$0xff] }
 0xb67   :  { %v7697_v62 = vld [vmem:[#allocation15 + $0x78] sm:$0xff]  ;;  %3562 = vmatpush.msra.mxu0 %v7695_v41  ;;  %v7808_v2 = vld [vmem:[#allocation15 + $0xc0] sm:$0xff]  ;;  %3611 = vmatpush.msra.mxu2 %v7806_v57 }
 0xb68   :  { %v5177_v25 = vmul.f32 -1.442695, %v3214_v32  ;;  %v5176_v56 = vmul.f32 -1.442695, %v3238_v59  ;;  %3583 = vmatpush.msra.mxu1 %v7697_v62 }
 0xb69   :  { %3563 = vmatpush.msra.mxu0 %v7706_v30  ;;  %3761 = vmatpush.msrb.mxu2 %v7699_v21 }
 0xb6a   :  { %5533 = vpow2.f32 %v5177_v25  ;;  %v3280_v19 = vpop.f32.mrf.mxu3  ;;  %v3256_v7 = vpop.f32.mrf.mxu2  ;;  %3584 = vmatpush.msra.mxu1 %v7708_v29 }
 0xb6b   :  { %5535 = vpow2.f32 %v5176_v56  ;;  %v3284_v43 = vrot.slane %v3280_v19, 2  ;;  %v3260_v54 = vrot.slane %v3256_v7, 2  ;;  %3564 = vmatpush.msra.mxu0 %v7716_v13  ;;  %v3307_v19 = vrot.slane %v7672_v52, 6  ;;  %3762 = vmatpush.msrb.mxu2 %v7712_v53 }
 0xb6c   :  { %3585 = vmatpush.msra.mxu1 %v7720_v1 }
 0xb6d   :  { %v3286_v8 = vadd.f32 %v3284_v43, %v7587_v10  ;;  %v7704_v10 = vld [vmem:[#allocation15 + $0xf8] sm:$0xff]  ;;  %v3262_v45 = vadd.f32 %v3260_v54, %v7592_v50  ;;  %3565 = vmatpush.msra.mxu0 %v7728_v9  ;;  %3763 = vmatpush.msrb.mxu2 %v7722_v15 }
 0xb6e   :  { %3625 = vmatpush.msra.mxu3 %v7704_v10  ;;  %3586 = vmatpush.msra.mxu1 %v7730_v20  ;;  %v7756_v50 = vld [vmem:[#allocation15 + $0x18] sm:$0xff] }
 0xb6f   :  { %v5178_v34 = vmul.f32 -1.442695, %v3286_v8  ;;  %3566 = vmatpush.msra.mxu0 %v7756_v50  ;;  %3764 = vmatpush.msrb.mxu2 %v7736_v58 }
 0xb70   :  { %v5534_v4 = vpop.eup %5533  ;;  %3626 = vmatpush.msra.mxu3 %v7714_v36  ;;  %3587 = vmatpush.msra.mxu1 %v7758_v63 }
 0xb71   :  { %v5536_v47 = vpop.eup %5535  ;;  %v7690_v38 = vadd.f32 1.0, %v5534_v4  ;;  %5537 = vpow2.f32 %v5178_v34  ;;  %3567 = vmatpush.msra.mxu0 %v7769_v27  ;;  %3765 = vmatpush.msrb.mxu2 %v7762_v44 }
 0xb72   :  { %v7692_v14 = vadd.f32 1.0, %v5536_v47  ;;  %3627 = vmatpush.msra.mxu3 %v7724_v12  ;;  %3588 = vmatpush.msra.mxu1 %v7771_v37 }
 0xb73   :  { %5539 = vrcp.f32 %v7690_v38  ;;  %v3325_v26 = vand.u32 2147483648, %v7690_v38  ;;  %v3323_v33 = vand.u32 2147483647, %v7690_v38  ;;  %vm3319_vm6 = vweird.f32 %v7690_v38  ;;  %3568 = vmatpush.msra.mxu0 %v7783_v18  ;;  %3766 = vmatpush.msrb.mxu2 %v7773_v35 }
 0xb74   :  { %5541 = vrcp.f32 %v7692_v14  ;;  %3628 = vmatpush.msra.mxu3 %v7738_v28  ;;  %v3302_v48 = vand.u32 2147483648, %v7692_v14  ;;  %v3300_v31 = vand.u32 2147483647, %v7692_v14  ;;  %3589 = vmatpush.msra.mxu1 %v7785_v5  ;;  %vm3296_vm7 = vweird.f32 %v7692_v14 }
 0xb75   :  { %v3326_v25 = vor.u32 1.1754944e-38, %v3325_v26  ;;  %vm3324_vm10 = vcmp.eq.f32.partialorder %v3323_v33, 8.507059e+37  ;;  %3569 = vmatpush.msra.mxu0 %v7796_v3  ;;  %3767 = vmatpush.msrb.mxu2 %v7792_v42  ;;  %v3432_v33 = vpop.f32.mrf.mxu1 }
 0xb76   :  { %3629 = vmatpush.msra.mxu3 %v7764_v60  ;;  %v3303_v43 = vor.u32 1.1754944e-38, %v3302_v48  ;;  %3590 = vmatpush.msra.mxu1 %v7804_v51  ;;  %vm3301_vm11 = vcmp.eq.f32.partialorder %v3300_v31, 8.507059e+37  ;;  %v3548_v48 = vld [vmem:[#allocation18 + $0x4] sm:$0x3] }
 0xb77   :  { %v5538_v61 = vpop.eup %5537  ;;  %3713 = vmatpush.msrb.mxu0 %v7695_v41  ;;  %3768 = vmatpush.msrb.mxu2 %v7806_v57 }
 0xb78   :  { %v7732_v46 = vadd.f32 1.0, %v5538_v61  ;;  %3630 = vmatpush.msra.mxu3 %v7781_v16  ;;  %3737 = vmatpush.msrb.mxu1 %v7697_v62 }
 0xb79   :  { %v7740_v39 = vpop.eup %5539  ;;  %3714 = vmatpush.msrb.mxu0 %v7706_v30 }
 0xb7a   :  { %v7745_v40 = vpop.eup %5541  ;;  %v3315_v55 = vmul.f32 %v7740_v39, %v7690_v38  ;;  %5543 = vrcp.f32 %v7732_v46  ;;  %vm3320_vm3 = vweird.f32 %v7740_v39  ;;  %3631 = vmatpush.msra.mxu3 %v7794_v24  ;;  %3738 = vmatpush.msrb.mxu1 %v7708_v29  ;;  %vm3341_vm13 = vweird.f32 %v7732_v46 }
 0xb7b   :  { %v3292_v17 = vmul.f32 %v7745_v40, %v7692_v14  ;;  %5545 = vtanh.f32 %v3262_v45  ;;  %vm3297_vm4 = vweird.f32 %v7745_v40  ;;  %vm7814_vm8 = vmor %vm3319_vm6, %vm3320_vm3  ;;  %3715 = vmatpush.msrb.mxu0 %v7716_v13  ;;  %v3347_v45 = vand.u32 2147483648, %v7732_v46 }
 0xb7c   :  { %v3316_v0 = vsub.f32 1.0, %v3315_v55  ;;  %vm3298_vm9 = vmor %vm3296_vm7, %vm3297_vm4  ;;  %3632 = vmatpush.msra.mxu3 %v7808_v2  ;;  %3739 = vmatpush.msrb.mxu1 %v7720_v1 }
 0xb7d   :  { %v3293_v22 = vsub.f32 1.0, %v3292_v17  ;;  %3716 = vmatpush.msrb.mxu0 %v7728_v9  ;;  %v3348_v17 = vor.u32 1.1754944e-38, %v3347_v45 }
 0xb7e   :  { %v3317_v49 = vmul.f32 %v7740_v39, %v3316_v0  ;;  %3785 = vmatpush.msrb.mxu3 %v7704_v10  ;;  %3740 = vmatpush.msrb.mxu1 %v7730_v20 }
 0xb7f   :  { %v3294_v23 = vmul.f32 %v7745_v40, %v3293_v22  ;;  %3717 = vmatpush.msrb.mxu0 %v7756_v50 }
 0xb80   :  { %v7798_v6 = vpop.eup %5543  ;;  %v3318_v11 = vadd.f32 %v7740_v39, %v3317_v49  ;;  %3786 = vmatpush.msrb.mxu3 %v7714_v36  ;;  %3741 = vmatpush.msrb.mxu1 %v7758_v63  ;;  %v3395_v49 = vpop.f32.mrf.mxu0 }
 0xb81   :  { %v3295_v32 = vadd.f32 %v7745_v40, %v3294_v23  ;;  %v3337_v56 = vmul.f32 %v7798_v6, %v7732_v46  ;;  %v5546_v34 = vpop.eup %5545  ;;  %vm3342_vm12 = vweird.f32 %v7798_v6  ;;  %3718 = vmatpush.msrb.mxu0 %v7769_v27  ;;  %v3506_v23 = vpop.f32.mrf.mxu3 }
 0xb82   :  { %v3322_v8 = vsel %vm7814_vm8, %v7740_v39, %v3318_v11  ;;  %3787 = vmatpush.msrb.mxu3 %v7724_v12  ;;  %vm3343_vm14 = vmor %vm3341_vm13, %vm3342_vm12  ;;  %3742 = vmatpush.msrb.mxu1 %v7771_v37  ;;  %v7919_v11 = vld [vmem:[#allocation17] ss:$0 sm:$0xff] }
 0xb83   :  { %v3299_v4 = vsel %vm3298_vm9, %v7745_v40, %v3295_v32  ;;  %v3327_v47 = vsel %vm3324_vm10, %v3326_v25, %v3322_v8  ;;  %v3338_v38 = vsub.f32 1.0, %v3337_v56  ;;  %v3345_v40 = vand.u32 2147483647, %v7732_v46  ;;  %3719 = vmatpush.msrb.mxu0 %v7783_v18  ;;  %v7921_v32 = vld [vmem:[#allocation17 + $0x1] ss:$0 sm:$0xff]  ;;  %v3469_v56 = vpop.f32.mrf.mxu2 }
 0xb84   :  { %v3304_v52 = vsel %vm3301_vm11, %v3303_v43, %v3299_v4  ;;  %v3330_v14 = vmul.f32 %v5546_v34, %v3327_v47  ;;  %3788 = vmatpush.msrb.mxu3 %v7738_v28  ;;  %3743 = vmatpush.msrb.mxu1 %v7785_v5  ;;  %8384 = vst [vmem:[#allocation47_spill] sm:$0xff] %v7921_v32  ;;  %v7933_v47 = vld [vmem:[#allocation17 + $0x3] ss:$0 sm:$0xff] }
 0xb85   :  { %v3309_v7 = vmul.f32 %v3307_v19, %v3304_v52  ;;  %v3339_v54 = vmul.f32 %v7798_v6, %v3338_v38  ;;  %vm3346_vm3 = vcmp.eq.f32.partialorder %v3345_v40, 8.507059e+37  ;;  %3720 = vmatpush.msrb.mxu0 %v7796_v3  ;;  %v7924_v59 = vadd.f32 %v7919_v11, %v3395_v49  ;;  %8386 = vst [vmem:[#allocation48_spill] sm:$0xff] %v7933_v47 }
 0xb86   :  { %3789 = vmatpush.msrb.mxu3 %v7764_v60  ;;  %3744 = vmatpush.msrb.mxu1 %v7804_v51  ;;  %v7927_v25 = vadd.f32 %v7921_v32, %v3432_v33 }
 0xb87   :  { %v3331_v61 = vadd.f32 %v3330_v14, %v3309_v7  ;;  %v3340_v39 = vadd.f32 %v7798_v6, %v3339_v54  ;;  %v7936_v14 = vadd.f32 %v7933_v47, %v3506_v23 }
 0xb88   :  { %3790 = vmatpush.msrb.mxu3 %v7781_v16 }
 0xb89   :  { %5547 = vtanh.f32 %v3331_v61  ;;  %3357 = vst.msk [vmem:[#allocation31 - $0x4] sm:$0xc0] %vm1196_vm1, %v3331_v61  ;;  %v3344_v55 = vsel %vm3343_vm14, %v7798_v6, %v3340_v39 }
 0xb8a   :  { %v3349_v0 = vsel %vm3346_vm3, %v3348_v17, %v3344_v55  ;;  %3791 = vmatpush.msrb.mxu3 %v7794_v24 }
 0xb8c   :  { %3792 = vmatpush.msrb.mxu3 %v7808_v2 }
 0xb8f   :  { %v5548_v46 = vpop.eup %5547 }
 0xb90   :  { %v3352_v22 = vmul.f32 %v5548_v46, %v3349_v0  ;;  %v7941_v46 = vld [vmem:[#allocation17 + $0x2] ss:$0 sm:$0xff] }
 0xb91   :  { %8388 = vst [vmem:[#allocation49_spill] sm:$0xff] %v7941_v46 }
 0xb92   :  { %3353 = vst.msk [vmem:[#allocation2 + $0x8] sm:$0xc0] %vm1196_vm1, %v3352_v22 }
 0xb93   :  { %3355 = vst.msk [vmem:[#allocation30 - $0x4] sm:$0xc0] %vm1196_vm1, %v3352_v22 }
 0xb99   :  { %v3359_v26 = vld [vmem:[#allocation2 + $0x8] sm:$0xff] }
 0xb9a   :  { %5180 = vmatmul.msk.f32.gmra.mxu0 %vm542_vm5, %v3359_v26  ;;  %5182 = vmatmul.msk.f32.gmra.mxu1 %vm542_vm5, %v3359_v26 }
 0xb9b   :  { %5184 = vmatmul.msk.f32.gmra.mxu2 %vm542_vm5, %v3359_v26  ;;  %5186 = vmatmul.msk.f32.gmra.mxu3 %vm542_vm5, %v3359_v26  ;;  %v7944_v26 = vadd.f32 %v7941_v46, %v3469_v56 }
 0xba2   :  { %5187 = vmatmul.msk.f32.vlgmr.msra.gmra.mxu0 %vm542_vm5, %v3548_v48  ;;  %5188 = vmatmul.msk.f32.vlgmr.msra.gmra.mxu1 %vm542_vm5, %v3548_v48 }
 0xba3   :  { %5189 = vmatmul.msk.f32.vlgmr.msra.gmra.mxu2 %vm542_vm5, %v3548_v48  ;;  %5190 = vmatmul.msk.f32.vlgmr.msra.gmra.mxu3 %vm542_vm5, %v3548_v48 }
 0xba4   :  { %3880 = vmatpush.msra.mxu0 %v7695_v41  ;;  %3904 = vmatpush.msra.mxu1 %v7697_v62 }
 0xba5   :  { %3928 = vmatpush.msra.mxu2 %v7699_v21  ;;  %3952 = vmatpush.msra.mxu3 %v7704_v10 }
 0xba6   :  { %3881 = vmatpush.msra.mxu0 %v7706_v30  ;;  %3905 = vmatpush.msra.mxu1 %v7708_v29 }
 0xba7   :  { %3929 = vmatpush.msra.mxu2 %v7712_v53  ;;  %3953 = vmatpush.msra.mxu3 %v7714_v36 }
 0xba8   :  { %3882 = vmatpush.msra.mxu0 %v7716_v13  ;;  %3906 = vmatpush.msra.mxu1 %v7720_v1 }
 0xba9   :  { %3930 = vmatpush.msra.mxu2 %v7722_v15  ;;  %3954 = vmatpush.msra.mxu3 %v7724_v12 }
 0xbaa   :  { %3883 = vmatpush.msra.mxu0 %v7728_v9  ;;  %3907 = vmatpush.msra.mxu1 %v7730_v20 }
 0xbab   :  { %3931 = vmatpush.msra.mxu2 %v7736_v58  ;;  %3955 = vmatpush.msra.mxu3 %v7738_v28 }
 0xbac   :  { %3884 = vmatpush.msra.mxu0 %v7756_v50  ;;  %3908 = vmatpush.msra.mxu1 %v7758_v63 }
 0xbad   :  { %3932 = vmatpush.msra.mxu2 %v7762_v44  ;;  %3956 = vmatpush.msra.mxu3 %v7764_v60 }
 0xbae   :  { %3885 = vmatpush.msra.mxu0 %v7769_v27  ;;  %3909 = vmatpush.msra.mxu1 %v7771_v37 }
 0xbaf   :  { %3933 = vmatpush.msra.mxu2 %v7773_v35  ;;  %3957 = vmatpush.msra.mxu3 %v7781_v16 }
 0xbb0   :  { %3886 = vmatpush.msra.mxu0 %v7783_v18  ;;  %3910 = vmatpush.msra.mxu1 %v7785_v5 }
 0xbb1   :  { %3934 = vmatpush.msra.mxu2 %v7792_v42  ;;  %3958 = vmatpush.msra.mxu3 %v7794_v24 }
 0xbb2   :  { %3887 = vmatpush.msra.mxu0 %v7796_v3  ;;  %3911 = vmatpush.msra.mxu1 %v7804_v51 }
 0xbb3   :  { %3935 = vmatpush.msra.mxu2 %v7806_v57  ;;  %3959 = vmatpush.msra.mxu3 %v7808_v2 }
 0xc17   :  { %v7915_v31 = vpop.f32.mrf.mxu0  ;;  %v7917_v6 = vpop.f32.mrf.mxu1 }
 0xc18   :  { %8383 = vst [vmem:[#allocation50_spill] sm:$0xff] %v7917_v6 }
 0xc1e   :  { %v7929_v19 = vpop.f32.mrf.mxu3  ;;  %v7938_v7 = vpop.f32.mrf.mxu2 }
 0xc1f   :  { %8385 = vst [vmem:[#allocation46_spill] sm:$0xff] %v7929_v19  ;;  %v3571_v43 = vpop.f32.mrf.mxu0  ;;  %v3592_v8 = vpop.f32.mrf.mxu1 }
 0xc20   :  { %v3574_v34 = vadd.f32 %v3571_v43, %v7924_v59  ;;  %v3595_v4 = vadd.f32 %v3592_v8, %v7927_v25  ;;  %8387 = vst [vmem:[#allocation45_spill] sm:$0xff] %v7938_v7 }
 0xc22   :  { %v5192_v38 = vmul.f32 -1.442695, %v3574_v34  ;;  %v5191_v52 = vmul.f32 -1.442695, %v3595_v4 }
 0xc24   :  { %5549 = vpow2.f32 %v5192_v38 }
 0xc25   :  { %5551 = vpow2.f32 %v5191_v52 }
 0xc26   :  { %v3634_v54 = vpop.f32.mrf.mxu3  ;;  %v3613_v0 = vpop.f32.mrf.mxu2 }
 0xc27   :  { %v3637_v61 = vadd.f32 %v3634_v54, %v7936_v14  ;;  %v3616_v33 = vadd.f32 %v3613_v0, %v7944_v26 }
 0xc29   :  { %v5193_v39 = vmul.f32 -1.442695, %v3637_v61 }
 0xc2a   :  { %v5550_v45 = vpop.eup %5549 }
 0xc2b   :  { %v5552_v40 = vpop.eup %5551  ;;  %v3661_v55 = vadd.f32 1.0, %v5550_v45  ;;  %5553 = vpow2.f32 %v5193_v39 }
 0xc2c   :  { %v3641_v17 = vadd.f32 1.0, %v5552_v40 }
 0xc2d   :  { %5555 = vrcp.f32 %v3661_v55  ;;  %v3673_v38 = vand.u32 2147483648, %v3661_v55  ;;  %v3671_v61 = vand.u32 2147483647, %v3661_v55  ;;  %vm3667_vm7 = vweird.f32 %v3661_v55 }
 0xc2e   :  { %5557 = vrcp.f32 %v3641_v17  ;;  %v3653_v52 = vand.u32 2147483648, %v3641_v17  ;;  %v3651_v56 = vand.u32 2147483647, %v3641_v17  ;;  %vm3647_vm8 = vweird.f32 %v3641_v17 }
 0xc2f   :  { %vm3672_vm11 = vcmp.eq.f32.partialorder %v3671_v61, 8.507059e+37 }
 0xc30   :  { %vm3652_vm12 = vcmp.eq.f32.partialorder %v3651_v56, 8.507059e+37 }
 0xc31   :  { %v5554_v22 = vpop.eup %5553 }
 0xc32   :  { %v3683_v48 = vadd.f32 1.0, %v5554_v22  ;;  %v3674_v22 = vor.u32 1.1754944e-38, %v3673_v38 }
 0xc33   :  { %v5556_v49 = vpop.eup %5555 }
 0xc34   :  { %v5558_v23 = vpop.eup %5557  ;;  %v3663_v43 = vmul.f32 %v5556_v49, %v3661_v55  ;;  %5559 = vrcp.f32 %v3683_v48  ;;  %vm3668_vm4 = vweird.f32 %v5556_v49  ;;  %v3695_v38 = vand.u32 2147483648, %v3683_v48 }
 0xc35   :  { %v3643_v8 = vmul.f32 %v5558_v23, %v3641_v17  ;;  %5561 = vtanh.f32 %v3616_v33  ;;  %vm3648_vm6 = vweird.f32 %v5558_v23  ;;  %vm3669_vm9 = vmor %vm3667_vm7, %vm3668_vm4  ;;  %vm3689_vm14 = vweird.f32 %v3683_v48 }
 0xc36   :  { %v3664_v34 = vsub.f32 1.0, %v3663_v43  ;;  %vm3649_vm10 = vmor %vm3647_vm8, %vm3648_vm6  ;;  %v3654_v43 = vor.u32 1.1754944e-38, %v3653_v52  ;;  %v3693_v52 = vand.u32 2147483647, %v3683_v48  ;;  %v3696_v61 = vor.u32 1.1754944e-38, %v3695_v38 }
 0xc37   :  { %v3644_v4 = vsub.f32 1.0, %v3643_v8  ;;  %v3550_v8 = vld [vmem:[#allocation20 + $0x4] sm:$0x3] }
 0xc38   :  { %v3665_v54 = vmul.f32 %v5556_v49, %v3664_v34  ;;  %vm3694_vm4 = vcmp.eq.f32.partialorder %v3693_v52, 8.507059e+37 }
 0xc39   :  { %v3645_v39 = vmul.f32 %v5558_v23, %v3644_v4 }
 0xc3a   :  { %v5560_v45 = vpop.eup %5559  ;;  %v3666_v40 = vadd.f32 %v5556_v49, %v3665_v54 }
 0xc3b   :  { %v3646_v0 = vadd.f32 %v5558_v23, %v3645_v39  ;;  %v3685_v46 = vmul.f32 %v5560_v45, %v3683_v48  ;;  %v5562_v33 = vpop.eup %5561  ;;  %vm3690_vm13 = vweird.f32 %v5560_v45 }
 0xc3c   :  { %v3670_v7 = vsel %vm3669_vm9, %v5556_v49, %v3666_v40  ;;  %vm3691_vm3 = vmor %vm3689_vm14, %vm3690_vm13 }
 0xc3d   :  { %v3650_v34 = vsel %vm3649_vm10, %v5558_v23, %v3646_v0  ;;  %v3675_v47 = vsel %vm3672_vm11, %v3674_v22, %v3670_v7  ;;  %v3686_v4 = vsub.f32 1.0, %v3685_v46 }
 0xc3e   :  { %v3655_v19 = vsel %vm3652_vm12, %v3654_v43, %v3650_v34  ;;  %v3678_v32 = vmul.f32 %v5562_v33, %v3675_v47 }
 0xc3f   :  { %v3657_v6 = vmul.f32 %v3655_v19, %v3550_v8  ;;  %v3687_v54 = vmul.f32 %v5560_v45, %v3686_v4 }
 0xc41   :  { %v7947_v55 = vadd.f32 %v3678_v32, %v3657_v6  ;;  %v3688_v17 = vadd.f32 %v5560_v45, %v3687_v54 }
 0xc43   :  { %5563 = vtanh.f32 %v7947_v55  ;;  %v3692_v49 = vsel %vm3691_vm3, %v5560_v45, %v3688_v17 }
 0xc44   :  { %v3697_v7 = vsel %vm3694_vm4, %v3696_v61, %v3692_v49 }
 0xc49   :  { %v5564_v23 = vpop.eup %5563 }
 0xc4a   :  { %v3700_v46 = vmul.f32 %v5564_v23, %v3697_v7 }
 0xc4c   :  { %3701 = vst.msk [vmem:[#allocation2] sm:$0x3] %vm693_vm2, %v3700_v46  ;;  %5194 = vmatmul.msk.f32.vlgmr.msrb.gmra.mxu0 %vm542_vm5, %v3700_v46  ;;  %5195 = vmatmul.msk.f32.vlgmr.msrb.gmra.mxu1 %vm542_vm5, %v3700_v46 }
 0xc4d   :  { %5196 = vmatmul.msk.f32.vlgmr.msrb.gmra.mxu2 %vm542_vm5, %v3700_v46  ;;  %5197 = vmatmul.msk.f32.vlgmr.msrb.gmra.mxu3 %vm542_vm5, %v3700_v46 }
 0xc4e   :  { %4047 = vmatpush.msrb.mxu0 %v7695_v41  ;;  %4071 = vmatpush.msrb.mxu1 %v7697_v62 }
 0xc4f   :  { %4095 = vmatpush.msrb.mxu2 %v7699_v21  ;;  %4119 = vmatpush.msrb.mxu3 %v7704_v10 }
 0xc50   :  { %4048 = vmatpush.msrb.mxu0 %v7706_v30  ;;  %4072 = vmatpush.msrb.mxu1 %v7708_v29 }
 0xc51   :  { %4096 = vmatpush.msrb.mxu2 %v7712_v53  ;;  %4120 = vmatpush.msrb.mxu3 %v7714_v36 }
 0xc52   :  { %4049 = vmatpush.msrb.mxu0 %v7716_v13  ;;  %4073 = vmatpush.msrb.mxu1 %v7720_v1 }
 0xc53   :  { %4097 = vmatpush.msrb.mxu2 %v7722_v15  ;;  %4121 = vmatpush.msrb.mxu3 %v7724_v12 }
 0xc54   :  { %4050 = vmatpush.msrb.mxu0 %v7728_v9  ;;  %4074 = vmatpush.msrb.mxu1 %v7730_v20 }
 0xc55   :  { %4098 = vmatpush.msrb.mxu2 %v7736_v58  ;;  %4122 = vmatpush.msrb.mxu3 %v7738_v28 }
 0xc56   :  { %4051 = vmatpush.msrb.mxu0 %v7756_v50  ;;  %4075 = vmatpush.msrb.mxu1 %v7758_v63 }
 0xc57   :  { %4099 = vmatpush.msrb.mxu2 %v7762_v44  ;;  %4123 = vmatpush.msrb.mxu3 %v7764_v60 }
 0xc58   :  { %4052 = vmatpush.msrb.mxu0 %v7769_v27  ;;  %4076 = vmatpush.msrb.mxu1 %v7771_v37 }
 0xc59   :  { %4100 = vmatpush.msrb.mxu2 %v7773_v35  ;;  %4124 = vmatpush.msrb.mxu3 %v7781_v16 }
 0xc5a   :  { %4053 = vmatpush.msrb.mxu0 %v7783_v18  ;;  %4077 = vmatpush.msrb.mxu1 %v7785_v5 }
 0xc5b   :  { %4101 = vmatpush.msrb.mxu2 %v7792_v42  ;;  %4125 = vmatpush.msrb.mxu3 %v7794_v24 }
 0xc5c   :  { %4054 = vmatpush.msrb.mxu0 %v7796_v3  ;;  %4078 = vmatpush.msrb.mxu1 %v7804_v51 }
 0xc5d   :  { %4102 = vmatpush.msrb.mxu2 %v7806_v57  ;;  %4126 = vmatpush.msrb.mxu3 %v7808_v2 }
 0xcc9   :  { %v3722_v6 = vpop.f32.mrf.mxu0  ;;  %v3746_v32 = vpop.f32.mrf.mxu1 }
 0xcca   :  { %v3726_v19 = vrot.slane %v3722_v6, 6  ;;  %v3750_v47 = vrot.slane %v3746_v32, 6 }
 0xccc   :  { %v3728_v48 = vadd.f32 %v3726_v19, %v7924_v59  ;;  %v3752_v39 = vadd.f32 %v3750_v47, %v7927_v25 }
 0xcce   :  { %v5199_v56 = vmul.f32 -1.442695, %v3728_v48  ;;  %v5198_v45 = vmul.f32 -1.442695, %v3752_v39 }
 0xcd0   :  { %5565 = vpow2.f32 %v5199_v56  ;;  %v3794_v40 = vpop.f32.mrf.mxu3  ;;  %v3770_v54 = vpop.f32.mrf.mxu2 }
 0xcd1   :  { %5567 = vpow2.f32 %v5198_v45  ;;  %v3798_v0 = vrot.slane %v3794_v40, 6  ;;  %v3774_v17 = vrot.slane %v3770_v54, 6 }
 0xcd3   :  { %v3800_v22 = vadd.f32 %v3798_v0, %v7936_v14  ;;  %v3776_v61 = vadd.f32 %v3774_v17, %v7944_v26 }
 0xcd5   :  { %v5200_v43 = vmul.f32 -1.442695, %v3800_v22 }
 0xcd6   :  { %v5566_v8 = vpop.eup %5565 }
 0xcd7   :  { %v5568_v33 = vpop.eup %5567  ;;  %v3827_v34 = vadd.f32 1.0, %v5566_v8  ;;  %5569 = vpow2.f32 %v5200_v43 }
 0xcd8   :  { %v3804_v4 = vadd.f32 1.0, %v5568_v33  ;;  %v3821_v33 = vrot.slane %v7947_v55, 6 }
 0xcd9   :  { %5571 = vrcp.f32 %v3827_v34  ;;  %v3839_v19 = vand.u32 2147483648, %v3827_v34  ;;  %v3837_v39 = vand.u32 2147483647, %v3827_v34  ;;  %vm3833_vm8 = vweird.f32 %v3827_v34 }
 0xcda   :  { %5573 = vrcp.f32 %v3804_v4  ;;  %v3816_v47 = vand.u32 2147483648, %v3804_v4  ;;  %v3814_v45 = vand.u32 2147483647, %v3804_v4  ;;  %vm3810_vm9 = vweird.f32 %v3804_v4 }
 0xcdb   :  { %v3840_v43 = vor.u32 1.1754944e-38, %v3839_v19  ;;  %vm3838_vm12 = vcmp.eq.f32.partialorder %v3837_v39, 8.507059e+37 }
 0xcdc   :  { %v3817_v54 = vor.u32 1.1754944e-38, %v3816_v47  ;;  %vm3815_vm13 = vcmp.eq.f32.partialorder %v3814_v45, 8.507059e+37 }
 0xcdd   :  { %v5570_v38 = vpop.eup %5569 }
 0xcde   :  { %v3849_v52 = vadd.f32 1.0, %v5570_v38 }
 0xcdf   :  { %v5572_v49 = vpop.eup %5571 }
 0xce0   :  { %v5574_v23 = vpop.eup %5573  ;;  %v3829_v7 = vmul.f32 %v5572_v49, %v3827_v34  ;;  %5575 = vrcp.f32 %v3849_v52  ;;  %vm3834_vm6 = vweird.f32 %v5572_v49  ;;  %v3861_v55 = vand.u32 2147483648, %v3849_v52 }
 0xce1   :  { %v3806_v46 = vmul.f32 %v5574_v23, %v3804_v4  ;;  %5577 = vtanh.f32 %v3776_v61  ;;  %vm3811_vm7 = vweird.f32 %v5574_v23  ;;  %vm3835_vm10 = vmor %vm3833_vm8, %vm3834_vm6  ;;  %vm3855_vm3 = vweird.f32 %v3849_v52 }
 0xce2   :  { %v3830_v6 = vsub.f32 1.0, %v3829_v7  ;;  %vm3812_vm11 = vmor %vm3810_vm9, %vm3811_vm7  ;;  %v3859_v47 = vand.u32 2147483647, %v3849_v52  ;;  %v3862_v39 = vor.u32 1.1754944e-38, %v3861_v55 }
 0xce3   :  { %v3807_v32 = vsub.f32 1.0, %v3806_v46 }
 0xce4   :  { %v3831_v48 = vmul.f32 %v5572_v49, %v3830_v6  ;;  %vm3860_vm6 = vcmp.eq.f32.partialorder %v3859_v47, 8.507059e+37 }
 0xce5   :  { %v3808_v56 = vmul.f32 %v5574_v23, %v3807_v32 }
 0xce6   :  { %v5576_v40 = vpop.eup %5575  ;;  %v3832_v0 = vadd.f32 %v5572_v49, %v3831_v48 }
 0xce7   :  { %v3809_v22 = vadd.f32 %v5574_v23, %v3808_v56  ;;  %v3851_v8 = vmul.f32 %v5576_v40, %v3849_v52  ;;  %v5578_v38 = vpop.eup %5577  ;;  %vm3856_vm14 = vweird.f32 %v5576_v40 }
 0xce8   :  { %v3836_v17 = vsel %vm3835_vm10, %v5572_v49, %v3832_v0  ;;  %vm3857_vm4 = vmor %vm3855_vm3, %vm3856_vm14 }
 0xce9   :  { %v3813_v61 = vsel %vm3812_vm11, %v5574_v23, %v3809_v22  ;;  %v3841_v7 = vsel %vm3838_vm12, %v3840_v43, %v3836_v17  ;;  %v3852_v46 = vsub.f32 1.0, %v3851_v8 }
 0xcea   :  { %v3818_v6 = vsel %vm3815_vm13, %v3817_v54, %v3813_v61  ;;  %v3844_v32 = vmul.f32 %v5578_v38, %v3841_v7 }
 0xceb   :  { %v3823_v48 = vmul.f32 %v3821_v33, %v3818_v6  ;;  %v3853_v34 = vmul.f32 %v5576_v40, %v3852_v46 }
 0xced   :  { %v7992_v4 = vadd.f32 %v3844_v32, %v3823_v48  ;;  %v3854_v19 = vadd.f32 %v5576_v40, %v3853_v34 }
 0xcef   :  { %5579 = vtanh.f32 %v7992_v4  ;;  %v3858_v49 = vsel %vm3857_vm4, %v5576_v40, %v3854_v19 }
 0xcf0   :  { %v3863_v56 = vsel %vm3860_vm6, %v3862_v39, %v3858_v49 }
 0xcf5   :  { %v5580_v23 = vpop.eup %5579 }
 0xcf6   :  { %v3866_v45 = vmul.f32 %v5580_v23, %v3863_v56 }
 0xcf8   :  { %3867 = vst.msk [vmem:[#allocation2] sm:$0xc] %vm860_vm0, %v3866_v45  ;;  %v3869_v0 = vrot.slane %v3866_v45, 2 }
 0xcfa   :  { %5201 = vmatmul.msk.f32.vlgmr.msra.gmra.mxu0 %vm542_vm5, %v3869_v0  ;;  %5202 = vmatmul.msk.f32.vlgmr.msra.gmra.mxu1 %vm542_vm5, %v3869_v0 }
 0xcfb   :  { %5203 = vmatmul.msk.f32.vlgmr.msra.gmra.mxu2 %vm542_vm5, %v3869_v0  ;;  %5204 = vmatmul.msk.f32.vlgmr.msra.gmra.mxu3 %vm542_vm5, %v3869_v0  ;;  %v3988_v0 = vrot.slane %v7992_v4, 6 }
 0xcfc   :  { %4214 = vmatpush.msra.mxu0 %v7695_v41  ;;  %4235 = vmatpush.msra.mxu1 %v7697_v62 }
 0xcfd   :  { %4256 = vmatpush.msra.mxu2 %v7699_v21  ;;  %4277 = vmatpush.msra.mxu3 %v7704_v10 }
 0xcfe   :  { %4215 = vmatpush.msra.mxu0 %v7706_v30  ;;  %4236 = vmatpush.msra.mxu1 %v7708_v29 }
 0xcff   :  { %4257 = vmatpush.msra.mxu2 %v7712_v53  ;;  %4278 = vmatpush.msra.mxu3 %v7714_v36 }
 0xd00   :  { %4216 = vmatpush.msra.mxu0 %v7716_v13  ;;  %4237 = vmatpush.msra.mxu1 %v7720_v1 }
 0xd01   :  { %4258 = vmatpush.msra.mxu2 %v7722_v15  ;;  %4279 = vmatpush.msra.mxu3 %v7724_v12 }
 0xd02   :  { %4217 = vmatpush.msra.mxu0 %v7728_v9  ;;  %4238 = vmatpush.msra.mxu1 %v7730_v20 }
 0xd03   :  { %4259 = vmatpush.msra.mxu2 %v7736_v58  ;;  %4280 = vmatpush.msra.mxu3 %v7738_v28 }
 0xd04   :  { %4218 = vmatpush.msra.mxu0 %v7756_v50  ;;  %4239 = vmatpush.msra.mxu1 %v7758_v63 }
 0xd05   :  { %4260 = vmatpush.msra.mxu2 %v7762_v44  ;;  %4281 = vmatpush.msra.mxu3 %v7764_v60 }
 0xd06   :  { %4219 = vmatpush.msra.mxu0 %v7769_v27  ;;  %4240 = vmatpush.msra.mxu1 %v7771_v37 }
 0xd07   :  { %4261 = vmatpush.msra.mxu2 %v7773_v35  ;;  %4282 = vmatpush.msra.mxu3 %v7781_v16 }
 0xd08   :  { %4220 = vmatpush.msra.mxu0 %v7783_v18  ;;  %4241 = vmatpush.msra.mxu1 %v7785_v5 }
 0xd09   :  { %4262 = vmatpush.msra.mxu2 %v7792_v42  ;;  %4283 = vmatpush.msra.mxu3 %v7794_v24 }
 0xd0a   :  { %4221 = vmatpush.msra.mxu0 %v7796_v3  ;;  %4242 = vmatpush.msra.mxu1 %v7804_v51 }
 0xd0b   :  { %4263 = vmatpush.msra.mxu2 %v7806_v57  ;;  %4284 = vmatpush.msra.mxu3 %v7808_v2 }
 0xd77   :  { %v3889_v41 = vpop.f32.mrf.mxu0  ;;  %v3913_v62 = vpop.f32.mrf.mxu1 }
 0xd78   :  { %v3893_v21 = vrot.slane %v3889_v41, 4  ;;  %v3917_v10 = vrot.slane %v3913_v62, 4 }
 0xd7a   :  { %v3895_v30 = vadd.f32 %v3893_v21, %v7924_v59  ;;  %v3919_v29 = vadd.f32 %v3917_v10, %v7927_v25 }
 0xd7c   :  { %v5206_v53 = vmul.f32 -1.442695, %v3895_v30  ;;  %v5205_v36 = vmul.f32 -1.442695, %v3919_v29 }
 0xd7e   :  { %5581 = vpow2.f32 %v5206_v53  ;;  %v3961_v13 = vpop.f32.mrf.mxu3  ;;  %v3937_v22 = vpop.f32.mrf.mxu2 }
 0xd7f   :  { %5583 = vpow2.f32 %v5205_v36  ;;  %v3965_v1 = vrot.slane %v3961_v13, 4  ;;  %v3941_v43 = vrot.slane %v3937_v22, 4 }
 0xd81   :  { %v3967_v15 = vadd.f32 %v3965_v1, %v7936_v14  ;;  %v3943_v17 = vadd.f32 %v3941_v43, %v7944_v26 }
 0xd83   :  { %v5207_v12 = vmul.f32 -1.442695, %v3967_v15 }
 0xd84   :  { %v5582_v9 = vpop.eup %5581 }
 0xd85   :  { %v5584_v20 = vpop.eup %5583  ;;  %v3994_v52 = vadd.f32 1.0, %v5582_v9  ;;  %5585 = vpow2.f32 %v5207_v12 }
 0xd86   :  { %v3971_v40 = vadd.f32 1.0, %v5584_v20 }
 0xd87   :  { %5587 = vrcp.f32 %v3994_v52  ;;  %v4006_v32 = vand.u32 2147483648, %v3994_v52  ;;  %v4004_v19 = vand.u32 2147483647, %v3994_v52  ;;  %vm4000_vm9 = vweird.f32 %v3994_v52 }
 0xd88   :  { %5589 = vrcp.f32 %v3971_v40  ;;  %v3983_v48 = vand.u32 2147483648, %v3971_v40  ;;  %v3981_v47 = vand.u32 2147483647, %v3971_v40  ;;  %vm3977_vm10 = vweird.f32 %v3971_v40 }
 0xd89   :  { %v4007_v56 = vor.u32 1.1754944e-38, %v4006_v32  ;;  %vm4005_vm13 = vcmp.eq.f32.partialorder %v4004_v19, 8.507059e+37  ;;  %v8069_v32 = vld [vmem:[#allocation15 + $0x28] sm:$0xff] }
 0xd8a   :  { %v3984_v41 = vor.u32 1.1754944e-38, %v3983_v48  ;;  %vm3982_vm14 = vcmp.eq.f32.partialorder %v3981_v47, 8.507059e+37  ;;  %v8072_v48 = vld [vmem:[#allocation15 + $0x68] sm:$0xff]  ;;  %v8084_v47 = vld [vmem:[#allocation15 + $0x60] sm:$0xff] }
 0xd8b   :  { %v5586_v8 = vpop.eup %5585  ;;  %v8078_v19 = vld [vmem:[#allocation15 + $0xe8] sm:$0xff] }
 0xd8c   :  { %v4016_v33 = vadd.f32 1.0, %v5586_v8 }
 0xd8d   :  { %v5588_v54 = vpop.eup %5587 }
 0xd8e   :  { %v5590_v38 = vpop.eup %5589  ;;  %v3996_v61 = vmul.f32 %v5588_v54, %v3994_v52  ;;  %5591 = vrcp.f32 %v4016_v33  ;;  %vm4001_vm7 = vweird.f32 %v5588_v54  ;;  %v4028_v4 = vand.u32 2147483648, %v4016_v33 }
 0xd8f   :  { %v3973_v7 = vmul.f32 %v5590_v38, %v3971_v40  ;;  %5593 = vtanh.f32 %v3943_v17  ;;  %vm3978_vm8 = vweird.f32 %v5590_v38  ;;  %vm4002_vm11 = vmor %vm4000_vm9, %vm4001_vm7  ;;  %vm4022_vm4 = vweird.f32 %v4016_v33  ;;  %v8051_v17 = vld [vmem:[#allocation15 + $0xb8] sm:$0xff] }
 0xd90   :  { %v3997_v46 = vsub.f32 1.0, %v3996_v61  ;;  %vm3979_vm12 = vmor %vm3977_vm10, %vm3978_vm8  ;;  %v4026_v9 = vand.u32 2147483647, %v4016_v33  ;;  %v4029_v52 = vor.u32 1.1754944e-38, %v4028_v4  ;;  %v8057_v61 = vld [vmem:[#allocation15 + $0x30] sm:$0xff] }
 0xd91   :  { %v3974_v6 = vsub.f32 1.0, %v3973_v7  ;;  %v8060_v7 = vld [vmem:[#allocation15 + $0x70] sm:$0xff] }
 0xd92   :  { %v3998_v34 = vmul.f32 %v5588_v54, %v3997_v46  ;;  %vm4027_vm7 = vcmp.eq.f32.partialorder %v4026_v9, 8.507059e+37  ;;  %v8063_v46 = vld [vmem:[#allocation15 + $0xb0] sm:$0xff] }
 0xd93   :  { %v3975_v55 = vmul.f32 %v5590_v38, %v3974_v6  ;;  %v8066_v6 = vld [vmem:[#allocation15 + $0xf0] sm:$0xff] }
 0xd94   :  { %v5592_v49 = vpop.eup %5591  ;;  %v3999_v39 = vadd.f32 %v5588_v54, %v3998_v34  ;;  %v8075_v34 = vld [vmem:[#allocation15 + $0xa8] sm:$0xff] }
 0xd95   :  { %v3976_v23 = vadd.f32 %v5590_v38, %v3975_v55  ;;  %v4018_v45 = vmul.f32 %v5592_v49, %v4016_v33  ;;  %v5594_v21 = vpop.eup %5593  ;;  %vm4023_vm3 = vweird.f32 %v5592_v49  ;;  %v8048_v33 = vld [vmem:[#allocation15 + $0x78] sm:$0xff]  ;;  %v8081_v55 = vld [vmem:[#allocation15 + $0x20] sm:$0xff] }
 0xd96   :  { %v4003_v62 = vsel %vm4002_vm11, %v5588_v54, %v3999_v39  ;;  %vm4024_vm6 = vmor %vm4022_vm4, %vm4023_vm3  ;;  %v8045_v54 = vld [vmem:[#allocation15 + $0x38] sm:$0xff] }
 0xd97   :  { %v3980_v10 = vsel %vm3979_vm12, %v5590_v38, %v3976_v23  ;;  %v4008_v30 = vsel %vm4005_vm13, %v4007_v56, %v4003_v62  ;;  %v4019_v29 = vsub.f32 1.0, %v4018_v45  ;;  %v8054_v38 = vld [vmem:[#allocation15 + $0xf8] sm:$0xff] }
 0xd98   :  { %v3985_v53 = vsel %vm3982_vm14, %v3984_v41, %v3980_v10  ;;  %v4011_v36 = vmul.f32 %v5594_v21, %v4008_v30 }
 0xd99   :  { %v3990_v13 = vmul.f32 %v3988_v0, %v3985_v53  ;;  %v4020_v1 = vmul.f32 %v5592_v49, %v4019_v29 }
 0xd9b   :  { %v8037_v15 = vadd.f32 %v4011_v36, %v3990_v13  ;;  %v4021_v12 = vadd.f32 %v5592_v49, %v4020_v1 }
 0xd9d   :  { %5595 = vtanh.f32 %v8037_v15  ;;  %v4025_v20 = vsel %vm4024_vm6, %v5592_v49, %v4021_v12  ;;  %v4155_v12 = vrot.slane %v8037_v15, 6 }
 0xd9e   :  { %v4030_v22 = vsel %vm4027_vm7, %v4029_v52, %v4025_v20 }
 0xda3   :  { %v5596_v40 = vpop.eup %5595 }
 0xda4   :  { %v4033_v43 = vmul.f32 %v5596_v40, %v4030_v22 }
 0xda6   :  { %4034 = vst.msk [vmem:[#allocation2] sm:$0x30] %vm1028_vm15, %v4033_v43  ;;  %v4036_v8 = vrot.slane %v4033_v43, 4 }
 0xda8   :  { %5208 = vmatmul.msk.f32.vlgmr.msrb.gmra.mxu0 %vm542_vm5, %v4036_v8  ;;  %5209 = vmatmul.msk.f32.vlgmr.msrb.gmra.mxu1 %vm542_vm5, %v4036_v8 }
 0xda9   :  { %5210 = vmatmul.msk.f32.vlgmr.msrb.gmra.mxu2 %vm542_vm5, %v4036_v8  ;;  %5211 = vmatmul.msk.f32.vlgmr.msrb.gmra.mxu3 %vm542_vm5, %v4036_v8 }
 0xdaa   :  { %4368 = vmatpush.msrb.mxu0 %v8045_v54  ;;  %4392 = vmatpush.msrb.mxu1 %v8048_v33 }
 0xdab   :  { %4416 = vmatpush.msrb.mxu2 %v8051_v17  ;;  %4440 = vmatpush.msrb.mxu3 %v8054_v38 }
 0xdac   :  { %4369 = vmatpush.msrb.mxu0 %v8057_v61  ;;  %4393 = vmatpush.msrb.mxu1 %v8060_v7 }
 0xdad   :  { %4417 = vmatpush.msrb.mxu2 %v8063_v46  ;;  %4441 = vmatpush.msrb.mxu3 %v8066_v6 }
 0xdae   :  { %4370 = vmatpush.msrb.mxu0 %v8069_v32  ;;  %4394 = vmatpush.msrb.mxu1 %v8072_v48 }
 0xdaf   :  { %4418 = vmatpush.msrb.mxu2 %v8075_v34  ;;  %4442 = vmatpush.msrb.mxu3 %v8078_v19 }
 0xdb0   :  { %4371 = vmatpush.msrb.mxu0 %v8081_v55  ;;  %4395 = vmatpush.msrb.mxu1 %v8084_v47 }
 0xdb1   :  { %4419 = vmatpush.msrb.mxu2 %v7736_v58  ;;  %4443 = vmatpush.msrb.mxu3 %v7738_v28 }
 0xdb2   :  { %4372 = vmatpush.msrb.mxu0 %v7756_v50  ;;  %4396 = vmatpush.msrb.mxu1 %v7758_v63 }
 0xdb3   :  { %4420 = vmatpush.msrb.mxu2 %v7762_v44  ;;  %4444 = vmatpush.msrb.mxu3 %v7764_v60 }
 0xdb4   :  { %4373 = vmatpush.msrb.mxu0 %v7769_v27  ;;  %4397 = vmatpush.msrb.mxu1 %v7771_v37 }
 0xdb5   :  { %4421 = vmatpush.msrb.mxu2 %v7773_v35  ;;  %4445 = vmatpush.msrb.mxu3 %v7781_v16 }
 0xdb6   :  { %4374 = vmatpush.msrb.mxu0 %v7783_v18  ;;  %4398 = vmatpush.msrb.mxu1 %v7785_v5 }
 0xdb7   :  { %4422 = vmatpush.msrb.mxu2 %v7792_v42  ;;  %4446 = vmatpush.msrb.mxu3 %v7794_v24 }
 0xdb8   :  { %4375 = vmatpush.msrb.mxu0 %v7796_v3  ;;  %4399 = vmatpush.msrb.mxu1 %v7804_v51 }
 0xdb9   :  { %4423 = vmatpush.msrb.mxu2 %v7806_v57  ;;  %4447 = vmatpush.msrb.mxu3 %v7808_v2 }
 0xe25   :  { %v4056_v58 = vpop.f32.mrf.mxu0  ;;  %v4080_v28 = vpop.f32.mrf.mxu1 }
 0xe26   :  { %v4060_v50 = vrot.slane %v4056_v58, 2  ;;  %v4084_v63 = vrot.slane %v4080_v28, 2 }
 0xe28   :  { %v4062_v44 = vadd.f32 %v4060_v50, %v7924_v59  ;;  %v4086_v60 = vadd.f32 %v4084_v63, %v7927_v25 }
 0xe2a   :  { %v5213_v27 = vmul.f32 -1.442695, %v4062_v44  ;;  %v5212_v37 = vmul.f32 -1.442695, %v4086_v60 }
 0xe2c   :  { %5597 = vpow2.f32 %v5213_v27  ;;  %v4128_v35 = vpop.f32.mrf.mxu3  ;;  %v4104_v57 = vpop.f32.mrf.mxu2 }
 0xe2d   :  { %5599 = vpow2.f32 %v5212_v37  ;;  %v4132_v16 = vrot.slane %v4128_v35, 2  ;;  %v4108_v2 = vrot.slane %v4104_v57, 2  ;;  %v8147_v57 = vld [vmem:[#allocation15 + $0xd8] sm:$0xff] }
 0xe2f   :  { %v4134_v18 = vadd.f32 %v4132_v16, %v7936_v14  ;;  %v4110_v39 = vadd.f32 %v4108_v2, %v7944_v26  ;;  %v8150_v2 = vld [vmem:[#allocation15 + $0x10] sm:$0xff] }
 0xe31   :  { %v5214_v5 = vmul.f32 -1.442695, %v4134_v18 }
 0xe32   :  { %v5598_v42 = vpop.eup %5597 }
 0xe33   :  { %v5600_v24 = vpop.eup %5599  ;;  %v4161_v3 = vadd.f32 1.0, %v5598_v42  ;;  %5601 = vpow2.f32 %v5214_v5  ;;  %v8132_v5 = vld [vmem:[#allocation15 + $0xa0] sm:$0xff] }
 0xe34   :  { %v4138_v51 = vadd.f32 1.0, %v5600_v24  ;;  %v8135_v42 = vld [vmem:[#allocation15 + $0xe0] sm:$0xff]  ;;  %v8138_v24 = vld [vmem:[#allocation15 + $0x18] sm:$0xff] }
 0xe35   :  { %5603 = vrcp.f32 %v4161_v3  ;;  %v4173_v41 = vand.u32 2147483648, %v4161_v3  ;;  %v4171_v10 = vand.u32 2147483647, %v4161_v3  ;;  %vm4167_vm10 = vweird.f32 %v4161_v3 }
 0xe36   :  { %5605 = vrcp.f32 %v4138_v51  ;;  %v4150_v62 = vand.u32 2147483648, %v4138_v51  ;;  %v4148_v29 = vand.u32 2147483647, %v4138_v51  ;;  %vm4144_vm11 = vweird.f32 %v4138_v51 }
 0xe37   :  { %v4174_v13 = vor.u32 1.1754944e-38, %v4173_v41  ;;  %vm4172_vm14 = vcmp.eq.f32.partialorder %v4171_v10, 8.507059e+37  ;;  %v8180_v41 = vld [vmem:[#allocation15 + $0x80] sm:$0xff]  ;;  %v8389_v10 = vld [vmem:[#allocation50_spill] sm:$0xff] }
 0xe38   :  { %v4151_v4 = vor.u32 1.1754944e-38, %v4150_v62  ;;  %vm4149_vm3 = vcmp.eq.f32.partialorder %v4148_v29, 8.507059e+37  ;;  %v8183_v62 = vld [vmem:[#allocation15 + $0xc0] sm:$0xff] }
 0xe39   :  { %v5602_v59 = vpop.eup %5601 }
 0xe3a   :  { %v4183_v25 = vadd.f32 1.0, %v5602_v59  ;;  %v8153_v59 = vld [vmem:[#allocation15 + $0x50] sm:$0xff] }
 0xe3b   :  { %v5604_v49 = vpop.eup %5603 }
 0xe3c   :  { %v5606_v23 = vpop.eup %5605  ;;  %v4163_v56 = vmul.f32 %v5604_v49, %v4161_v3  ;;  %5607 = vrcp.f32 %v4183_v25  ;;  %vm4168_vm8 = vweird.f32 %v5604_v49  ;;  %v4195_v15 = vand.u32 2147483648, %v4183_v25  ;;  %v8141_v3 = vld [vmem:[#allocation15 + $0x58] sm:$0xff] }
 0xe3d   :  { %v4140_v45 = vmul.f32 %v5606_v23, %v4138_v51  ;;  %5609 = vtanh.f32 %v4110_v39  ;;  %vm4145_vm9 = vweird.f32 %v5606_v23  ;;  %vm4169_vm12 = vmor %vm4167_vm10, %vm4168_vm8  ;;  %vm4189_vm6 = vweird.f32 %v4183_v25  ;;  %v8144_v51 = vld [vmem:[#allocation15 + $0x98] sm:$0xff]  ;;  %v8162_v39 = vld [vmem:[#allocation15 + $0x8] sm:$0xff] }
 0xe3e   :  { %v4164_v14 = vsub.f32 1.0, %v4163_v56  ;;  %vm4146_vm13 = vmor %vm4144_vm11, %vm4145_vm9  ;;  %v4193_v44 = vand.u32 2147483647, %v4183_v25  ;;  %v4196_v27 = vor.u32 1.1754944e-38, %v4195_v15  ;;  %v8168_v56 = vld [vmem:[#allocation15 + $0x88] sm:$0xff] }
 0xe3f   :  { %v4141_v0 = vsub.f32 1.0, %v4140_v45  ;;  %v8171_v45 = vld [vmem:[#allocation15 + $0xc8] sm:$0xff] }
 0xe40   :  { %v4165_v21 = vmul.f32 %v5604_v49, %v4164_v14  ;;  %vm4194_vm8 = vcmp.eq.f32.partialorder %v4193_v44, 8.507059e+37  ;;  %v8174_v14 = vld [vmem:[#allocation15] sm:$0xff]  ;;  %v8394_v15 = vld [vmem:[#allocation49_spill] sm:$0xff] }
 0xe41   :  { %v4142_v30 = vmul.f32 %v5606_v23, %v4141_v0  ;;  %v8177_v0 = vld [vmem:[#allocation15 + $0x40] sm:$0xff] }
 0xe42   :  { %v5608_v53 = vpop.eup %5607  ;;  %v4166_v36 = vadd.f32 %v5604_v49, %v4165_v21  ;;  %v8188_v21 = vadd.f32 %v7919_v11, %v7915_v31 }
 0xe43   :  { %v4143_v26 = vadd.f32 %v5606_v23, %v4142_v30  ;;  %v4185_v1 = vmul.f32 %v5608_v53, %v4183_v25  ;;  %v5610_v20 = vpop.eup %5609  ;;  %vm4190_vm4 = vweird.f32 %v5608_v53  ;;  %v8156_v25 = vld [vmem:[#allocation15 + $0x90] sm:$0xff]  ;;  %v8390_v30 = vld [vmem:[#allocation47_spill] sm:$0xff] }
 0xe44   :  { %v4170_v9 = vsel %vm4169_vm12, %v5604_v49, %v4166_v36  ;;  %vm4191_vm7 = vmor %vm4189_vm6, %vm4190_vm4  ;;  %v8159_v49 = vld [vmem:[#allocation15 + $0xd0] sm:$0xff]  ;;  %v8192_v29 = vadd.f32 %v8390_v30, %v8389_v10 }
 0xe45   :  { %v4147_v52 = vsel %vm4146_vm13, %v5606_v23, %v4143_v26  ;;  %v4175_v40 = vsel %vm4172_vm14, %v4174_v13, %v4170_v9  ;;  %v4186_v22 = vsub.f32 1.0, %v4185_v1  ;;  %v8165_v23 = vld [vmem:[#allocation15 + $0x48] sm:$0xff] }
 0xe46   :  { %v4152_v43 = vsel %vm4149_vm3, %v4151_v4, %v4147_v52  ;;  %v4178_v8 = vmul.f32 %v5610_v20, %v4175_v40  ;;  %v8391_v4 = vld [vmem:[#allocation46_spill] sm:$0xff]  ;;  %v8392_v9 = vld [vmem:[#allocation48_spill] sm:$0xff] }
 0xe47   :  { %v4157_v58 = vmul.f32 %v4155_v12, %v4152_v43  ;;  %v4187_v28 = vmul.f32 %v5608_v53, %v4186_v22  ;;  %v8198_v20 = vadd.f32 %v8392_v9, %v8391_v4 }
 0xe49   :  { %v8110_v50 = vadd.f32 %v4178_v8, %v4157_v58  ;;  %v4188_v63 = vadd.f32 %v5608_v53, %v4187_v28 }
 0xe4b   :  { %5611 = vtanh.f32 %v8110_v50  ;;  %v4192_v60 = vsel %vm4191_vm7, %v5608_v53, %v4188_v63  ;;  %v8393_v63 = vld [vmem:[#allocation45_spill] sm:$0xff] }
 0xe4c   :  { %v4197_v35 = vsel %vm4194_vm8, %v4196_v27, %v4192_v60  ;;  %v8203_v44 = vadd.f32 %v8394_v15, %v8393_v63 }
 0xe51   :  { %v5612_v37 = vpop.eup %5611 }
 0xe52   :  { %v4200_v16 = vmul.f32 %v5612_v37, %v4197_v35 }
 0xe54   :  { %4201 = vst.msk [vmem:[#allocation2] sm:$0xc0] %vm1196_vm1, %v4200_v16  ;;  %v4203_v18 = vrot.slane %v4200_v16, 6 }
 0xe56   :  { %5215 = vmatmul.msk.f32.vlgmr.msra.gmra.mxu0 %vm542_vm5, %v4203_v18  ;;  %5216 = vmatmul.msk.f32.vlgmr.msra.gmra.mxu1 %vm542_vm5, %v4203_v18 }
 0xe57   :  { %5217 = vmatmul.msk.f32.vlgmr.msra.gmra.mxu2 %vm542_vm5, %v4203_v18  ;;  %5218 = vmatmul.msk.f32.vlgmr.msra.gmra.mxu3 %vm542_vm5, %v4203_v18 }
 0xe58   :  { %4535 = vmatpush.msra.mxu0 %v8045_v54  ;;  %4559 = vmatpush.msra.mxu1 %v8048_v33 }
 0xe59   :  { %4583 = vmatpush.msra.mxu2 %v8051_v17  ;;  %4607 = vmatpush.msra.mxu3 %v8054_v38 }
 0xe5a   :  { %4536 = vmatpush.msra.mxu0 %v8057_v61  ;;  %4560 = vmatpush.msra.mxu1 %v8060_v7 }
 0xe5b   :  { %4584 = vmatpush.msra.mxu2 %v8063_v46  ;;  %4608 = vmatpush.msra.mxu3 %v8066_v6 }
 0xe5c   :  { %4537 = vmatpush.msra.mxu0 %v8069_v32  ;;  %4561 = vmatpush.msra.mxu1 %v8072_v48 }
 0xe5d   :  { %4585 = vmatpush.msra.mxu2 %v8075_v34  ;;  %4609 = vmatpush.msra.mxu3 %v8078_v19 }
 0xe5e   :  { %4538 = vmatpush.msra.mxu0 %v8081_v55  ;;  %4562 = vmatpush.msra.mxu1 %v8084_v47 }
 0xe5f   :  { %4586 = vmatpush.msra.mxu2 %v8132_v5  ;;  %4610 = vmatpush.msra.mxu3 %v8135_v42 }
 0xe60   :  { %4539 = vmatpush.msra.mxu0 %v8138_v24  ;;  %4563 = vmatpush.msra.mxu1 %v8141_v3 }
 0xe61   :  { %4587 = vmatpush.msra.mxu2 %v8144_v51  ;;  %4611 = vmatpush.msra.mxu3 %v8147_v57 }
 0xe62   :  { %4540 = vmatpush.msra.mxu0 %v8150_v2  ;;  %4564 = vmatpush.msra.mxu1 %v8153_v59 }
 0xe63   :  { %4588 = vmatpush.msra.mxu2 %v8156_v25  ;;  %4612 = vmatpush.msra.mxu3 %v8159_v49 }
 0xe64   :  { %4541 = vmatpush.msra.mxu0 %v8162_v39  ;;  %4565 = vmatpush.msra.mxu1 %v8165_v23 }
 0xe65   :  { %4589 = vmatpush.msra.mxu2 %v8168_v56  ;;  %4613 = vmatpush.msra.mxu3 %v8171_v45 }
 0xe66   :  { %4542 = vmatpush.msra.mxu0 %v8174_v14  ;;  %4566 = vmatpush.msra.mxu1 %v8177_v0 }
 0xe67   :  { %4590 = vmatpush.msra.mxu2 %v8180_v41  ;;  %4614 = vmatpush.msra.mxu3 %v8183_v62 }
 0xed3   :  { %v4223_v53 = vpop.f32.mrf.mxu0  ;;  %v4244_v36 = vpop.f32.mrf.mxu1 }
 0xed4   :  { %v4226_v26 = vadd.f32 %v4223_v53, %v8188_v21  ;;  %v4247_v13 = vadd.f32 %v4244_v36, %v8192_v29 }
 0xed6   :  { %v5220_v1 = vmul.f32 -1.442695, %v4226_v26  ;;  %v5219_v12 = vmul.f32 -1.442695, %v4247_v13 }
 0xed8   :  { %5613 = vpow2.f32 %v5220_v1 }
 0xed9   :  { %5615 = vpow2.f32 %v5219_v12 }
 0xeda   :  { %v4286_v31 = vpop.f32.mrf.mxu3  ;;  %v4265_v58 = vpop.f32.mrf.mxu2 }
 0xedb   :  { %v4289_v11 = vadd.f32 %v4286_v31, %v8198_v20  ;;  %v4268_v37 = vadd.f32 %v4265_v58, %v8203_v44 }
 0xedd   :  { %v5221_v52 = vmul.f32 -1.442695, %v4289_v11 }
 0xede   :  { %v5614_v40 = vpop.eup %5613 }
 0xedf   :  { %v5616_v22 = vpop.eup %5615  ;;  %v4316_v43 = vadd.f32 1.0, %v5614_v40  ;;  %5617 = vpow2.f32 %v5221_v52 }
 0xee0   :  { %v4293_v8 = vadd.f32 1.0, %v5616_v22  ;;  %v4310_v22 = vrot.slane %v8110_v50, 6 }
 0xee1   :  { %5619 = vrcp.f32 %v4316_v43  ;;  %v4328_v53 = vand.u32 2147483648, %v4316_v43  ;;  %v4326_v13 = vand.u32 2147483647, %v4316_v43  ;;  %vm4322_vm11 = vweird.f32 %v4316_v43 }
 0xee2   :  { %5621 = vrcp.f32 %v4293_v8  ;;  %v4305_v36 = vand.u32 2147483648, %v4293_v8  ;;  %v4303_v12 = vand.u32 2147483647, %v4293_v8  ;;  %vm4299_vm12 = vweird.f32 %v4293_v8 }
 0xee3   :  { %v4329_v11 = vor.u32 1.1754944e-38, %v4328_v53  ;;  %vm4327_vm3 = vcmp.eq.f32.partialorder %v4326_v13, 8.507059e+37 }
 0xee4   :  { %v4306_v40 = vor.u32 1.1754944e-38, %v4305_v36  ;;  %vm4304_vm4 = vcmp.eq.f32.partialorder %v4303_v12, 8.507059e+37 }
 0xee5   :  { %v5618_v28 = vpop.eup %5617 }
 0xee6   :  { %v4338_v60 = vadd.f32 1.0, %v5618_v28 }
 0xee7   :  { %v5620_v27 = vpop.eup %5619 }
 0xee8   :  { %v5622_v35 = vpop.eup %5621  ;;  %v4318_v16 = vmul.f32 %v5620_v27, %v4316_v43  ;;  %5623 = vrcp.f32 %v4338_v60  ;;  %vm4323_vm9 = vweird.f32 %v5620_v27  ;;  %v4350_v53 = vand.u32 2147483648, %v4338_v60 }
 0xee9   :  { %v4295_v18 = vmul.f32 %v5622_v35, %v4293_v8  ;;  %5625 = vtanh.f32 %v4268_v37  ;;  %vm4300_vm10 = vweird.f32 %v5622_v35  ;;  %vm4324_vm13 = vmor %vm4322_vm11, %vm4323_vm9  ;;  %vm4344_vm7 = vweird.f32 %v4338_v60 }
 0xeea   :  { %v4319_v10 = vsub.f32 1.0, %v4318_v16  ;;  %vm4301_vm14 = vmor %vm4299_vm12, %vm4300_vm10  ;;  %v4348_v50 = vand.u32 2147483647, %v4338_v60  ;;  %v4351_v36 = vor.u32 1.1754944e-38, %v4350_v53 }
 0xeeb   :  { %v4296_v30 = vsub.f32 1.0, %v4295_v18 }
 0xeec   :  { %v4320_v26 = vmul.f32 %v5620_v27, %v4319_v10  ;;  %vm4349_vm9 = vcmp.eq.f32.partialorder %v4348_v50, 8.507059e+37 }
 0xeed   :  { %v4297_v1 = vmul.f32 %v5622_v35, %v4296_v30 }
 0xeee   :  { %v5624_v4 = vpop.eup %5623  ;;  %v4321_v9 = vadd.f32 %v5620_v27, %v4320_v26 }
 0xeef   :  { %v4298_v31 = vadd.f32 %v5622_v35, %v4297_v1  ;;  %v4340_v52 = vmul.f32 %v5624_v4, %v4338_v60  ;;  %v5626_v28 = vpop.eup %5625  ;;  %vm4345_vm6 = vweird.f32 %v5624_v4 }
 0xef0   :  { %v4325_v58 = vsel %vm4324_vm13, %v5620_v27, %v4321_v9  ;;  %vm4346_vm8 = vmor %vm4344_vm7, %vm4345_vm6 }
 0xef1   :  { %v4302_v63 = vsel %vm4301_vm14, %v5622_v35, %v4298_v31  ;;  %v4330_v15 = vsel %vm4327_vm3, %v4329_v11, %v4325_v58  ;;  %v4341_v37 = vsub.f32 1.0, %v4340_v52 }
 0xef2   :  { %v4307_v16 = vsel %vm4304_vm4, %v4306_v40, %v4302_v63  ;;  %v4333_v18 = vmul.f32 %v5626_v28, %v4330_v15 }
 0xef3   :  { %v4312_v10 = vmul.f32 %v4310_v22, %v4307_v16  ;;  %v4342_v43 = vmul.f32 %v5624_v4, %v4341_v37 }
 0xef5   :  { %v8207_v8 = vadd.f32 %v4333_v18, %v4312_v10  ;;  %v4343_v30 = vadd.f32 %v5624_v4, %v4342_v43 }
 0xef7   :  { %5627 = vtanh.f32 %v8207_v8  ;;  %v4347_v27 = vsel %vm4346_vm8, %v5624_v4, %v4343_v30  ;;  %v4476_v11 = vrot.slane %v8207_v8, 6 }
 0xef8   :  { %v4352_v26 = vsel %vm4349_vm9, %v4351_v36, %v4347_v27 }
 0xefd   :  { %v5628_v35 = vpop.eup %5627 }
 0xefe   :  { %v4355_v13 = vmul.f32 %v5628_v35, %v4352_v26 }
 0xf00   :  { %5222 = vmatmul.msk.f32.vlgmr.msrb.gmra.mxu0 %vm542_vm5, %v4355_v13  ;;  %4356 = vst.msk [vmem:[#allocation2 + $0x8] sm:$0x3] %vm693_vm2, %v4355_v13  ;;  %5223 = vmatmul.msk.f32.vlgmr.msrb.gmra.mxu1 %vm542_vm5, %v4355_v13 }
 0xf01   :  { %5224 = vmatmul.msk.f32.vlgmr.msrb.gmra.mxu2 %vm542_vm5, %v4355_v13  ;;  %5225 = vmatmul.msk.f32.vlgmr.msrb.gmra.mxu3 %vm542_vm5, %v4355_v13 }
 0xf02   :  { %4702 = vmatpush.msrb.mxu0 %v8045_v54  ;;  %4726 = vmatpush.msrb.mxu1 %v8048_v33 }
 0xf03   :  { %4750 = vmatpush.msrb.mxu2 %v8051_v17  ;;  %4774 = vmatpush.msrb.mxu3 %v8054_v38 }
 0xf04   :  { %4703 = vmatpush.msrb.mxu0 %v8057_v61  ;;  %4727 = vmatpush.msrb.mxu1 %v8060_v7 }
 0xf05   :  { %4751 = vmatpush.msrb.mxu2 %v8063_v46  ;;  %4775 = vmatpush.msrb.mxu3 %v8066_v6 }
 0xf06   :  { %4704 = vmatpush.msrb.mxu0 %v8069_v32  ;;  %4728 = vmatpush.msrb.mxu1 %v8072_v48 }
 0xf07   :  { %4752 = vmatpush.msrb.mxu2 %v8075_v34  ;;  %4776 = vmatpush.msrb.mxu3 %v8078_v19 }
 0xf08   :  { %4705 = vmatpush.msrb.mxu0 %v8081_v55  ;;  %4729 = vmatpush.msrb.mxu1 %v8084_v47 }
 0xf09   :  { %4753 = vmatpush.msrb.mxu2 %v8132_v5  ;;  %4777 = vmatpush.msrb.mxu3 %v8135_v42 }
 0xf0a   :  { %4706 = vmatpush.msrb.mxu0 %v8138_v24  ;;  %4730 = vmatpush.msrb.mxu1 %v8141_v3 }
 0xf0b   :  { %4754 = vmatpush.msrb.mxu2 %v8144_v51  ;;  %4778 = vmatpush.msrb.mxu3 %v8147_v57 }
 0xf0c   :  { %4707 = vmatpush.msrb.mxu0 %v8150_v2  ;;  %4731 = vmatpush.msrb.mxu1 %v8153_v59 }
 0xf0d   :  { %4755 = vmatpush.msrb.mxu2 %v8156_v25  ;;  %4779 = vmatpush.msrb.mxu3 %v8159_v49 }
 0xf0e   :  { %4708 = vmatpush.msrb.mxu0 %v8162_v39  ;;  %4732 = vmatpush.msrb.mxu1 %v8165_v23 }
 0xf0f   :  { %4756 = vmatpush.msrb.mxu2 %v8168_v56  ;;  %4780 = vmatpush.msrb.mxu3 %v8171_v45 }
 0xf10   :  { %4709 = vmatpush.msrb.mxu0 %v8174_v14  ;;  %4733 = vmatpush.msrb.mxu1 %v8177_v0 }
 0xf11   :  { %4757 = vmatpush.msrb.mxu2 %v8180_v41  ;;  %4781 = vmatpush.msrb.mxu3 %v8183_v62 }
 0xf7d   :  { %v4377_v54 = vpop.f32.mrf.mxu0  ;;  %v4401_v33 = vpop.f32.mrf.mxu1 }
 0xf7e   :  { %v4381_v17 = vrot.slane %v4377_v54, 6  ;;  %v4405_v38 = vrot.slane %v4401_v33, 6 }
 0xf80   :  { %v4383_v61 = vadd.f32 %v4381_v17, %v8188_v21  ;;  %v4407_v7 = vadd.f32 %v4405_v38, %v8192_v29 }
 0xf82   :  { %v5227_v46 = vmul.f32 -1.442695, %v4383_v61  ;;  %v5226_v6 = vmul.f32 -1.442695, %v4407_v7 }
 0xf84   :  { %5629 = vpow2.f32 %v5227_v46  ;;  %v4449_v32 = vpop.f32.mrf.mxu3  ;;  %v4425_v24 = vpop.f32.mrf.mxu2 }
 0xf85   :  { %5631 = vpow2.f32 %v5226_v6  ;;  %v4453_v48 = vrot.slane %v4449_v32, 6  ;;  %v4429_v3 = vrot.slane %v4425_v24, 6  ;;  %v4870_v6 = vld [vmem:[#allocation21 + $0x38] sm:$0xff]  ;;  %v4869_v32 = vld [vmem:[#allocation21 + $0x30] sm:$0xff] }
 0xf87   :  { %v4455_v34 = vadd.f32 %v4453_v48, %v8198_v20  ;;  %v4431_v59 = vadd.f32 %v4429_v3, %v8203_v44 }
 0xf89   :  { %v5228_v19 = vmul.f32 -1.442695, %v4455_v34 }
 0xf8a   :  { %v5630_v55 = vpop.eup %5629 }
 0xf8b   :  { %v5632_v47 = vpop.eup %5631  ;;  %v4482_v5 = vadd.f32 1.0, %v5630_v55  ;;  %5633 = vpow2.f32 %v5228_v19  ;;  %v4868_v19 = vld [vmem:[#allocation21 + $0x28] sm:$0xff] }
 0xf8c   :  { %v4459_v42 = vadd.f32 1.0, %v5632_v47  ;;  %v4867_v47 = vld [vmem:[#allocation21 + $0x20] sm:$0xff] }
 0xf8d   :  { %5635 = vrcp.f32 %v4482_v5  ;;  %v4494_v45 = vand.u32 2147483648, %v4482_v5  ;;  %v4492_v41 = vand.u32 2147483647, %v4482_v5  ;;  %vm4488_vm11 = vweird.f32 %v4482_v5 }
 0xf8e   :  { %5637 = vrcp.f32 %v4459_v42  ;;  %v4471_v14 = vand.u32 2147483648, %v4459_v42  ;;  %v4469_v60 = vand.u32 2147483647, %v4459_v42  ;;  %vm4465_vm12 = vweird.f32 %v4459_v42 }
 0xf8f   :  { %v4495_v9 = vor.u32 1.1754944e-38, %v4494_v45  ;;  %vm4493_vm3 = vcmp.eq.f32.partialorder %v4492_v41, 8.507059e+37 }
 0xf90   :  { %v4472_v52 = vor.u32 1.1754944e-38, %v4471_v14  ;;  %vm4470_vm4 = vcmp.eq.f32.partialorder %v4469_v60, 8.507059e+37  ;;  %v4863_v14 = vld [vmem:[#allocation21] sm:$0xff] }
 0xf91   :  { %v5634_v51 = vpop.eup %5633 }
 0xf92   :  { %v4504_v57 = vadd.f32 1.0, %v5634_v51 }
 0xf93   :  { %v5636_v2 = vpop.eup %5635 }
 0xf94   :  { %v5638_v25 = vpop.eup %5637  ;;  %v4484_v49 = vmul.f32 %v5636_v2, %v4482_v5  ;;  %5639 = vrcp.f32 %v4504_v57  ;;  %vm4489_vm2 = vweird.f32 %v5636_v2  ;;  %v4516_v8 = vand.u32 2147483648, %v4504_v57 }
 0xf95   :  { %v4461_v39 = vmul.f32 %v5638_v25, %v4459_v42  ;;  %5641 = vtanh.f32 %v4431_v59  ;;  %vm4466_vm10 = vweird.f32 %v5638_v25  ;;  %vm4490_vm13 = vmor %vm4488_vm11, %vm4489_vm2  ;;  %vm4510_vm7 = vweird.f32 %v4504_v57  ;;  %v4866_v59 = vld [vmem:[#allocation21 + $0x18] sm:$0xff] }
 0xf96   :  { %v4485_v23 = vsub.f32 1.0, %v4484_v49  ;;  %vm4467_vm14 = vmor %vm4465_vm12, %vm4466_vm10  ;;  %v4514_v30 = vand.u32 2147483647, %v4504_v57  ;;  %v4517_v50 = vor.u32 1.1754944e-38, %v4516_v8 }
 0xf97   :  { %v4462_v56 = vsub.f32 1.0, %v4461_v39  ;;  %v4864_v39 = vld [vmem:[#allocation21 + $0x8] sm:$0xff] }
 0xf98   :  { %v4486_v0 = vmul.f32 %v5636_v2, %v4485_v23  ;;  %vm4515_vm9 = vcmp.eq.f32.partialorder %v4514_v30, 8.507059e+37 }
 0xf99   :  { %v4463_v62 = vmul.f32 %v5638_v25, %v4462_v56 }
 0xf9a   :  { %v5640_v1 = vpop.eup %5639  ;;  %v4487_v12 = vadd.f32 %v5636_v2, %v4486_v0 }
 0xf9b   :  { %v4464_v4 = vadd.f32 %v5638_v25, %v4463_v62  ;;  %v4506_v31 = vmul.f32 %v5640_v1, %v4504_v57  ;;  %v5642_v22 = vpop.eup %5641  ;;  %vm4511_vm6 = vweird.f32 %v5640_v1 }
 0xf9c   :  { %v4491_v40 = vsel %vm4490_vm13, %v5636_v2, %v4487_v12  ;;  %vm4512_vm8 = vmor %vm4510_vm7, %vm4511_vm6 }
 0xf9d   :  { %v4468_v58 = vsel %vm4467_vm14, %v5638_v25, %v4464_v4  ;;  %v4496_v28 = vsel %vm4493_vm3, %v4495_v9, %v4491_v40  ;;  %v4507_v63 = vsub.f32 1.0, %v4506_v31  ;;  %v4865_v25 = vld [vmem:[#allocation21 + $0x10] sm:$0xff] }
 0xf9e   :  { %v4473_v15 = vsel %vm4470_vm4, %v4472_v52, %v4468_v58  ;;  %v4499_v37 = vmul.f32 %v5642_v22, %v4496_v28 }
 0xf9f   :  { %v4478_v16 = vmul.f32 %v4476_v11, %v4473_v15  ;;  %v4508_v18 = vmul.f32 %v5640_v1, %v4507_v63 }
 0xfa1   :  { %v8252_v10 = vadd.f32 %v4499_v37, %v4478_v16  ;;  %v4509_v43 = vadd.f32 %v5640_v1, %v4508_v18 }
 0xfa3   :  { %5643 = vtanh.f32 %v8252_v10  ;;  %v4513_v53 = vsel %vm4512_vm8, %v5640_v1, %v4509_v43  ;;  %v4643_v15 = vrot.slane %v8252_v10, 6 }
 0xfa4   :  { %v4518_v36 = vsel %vm4515_vm9, %v4517_v50, %v4513_v53 }
 0xfa9   :  { %v5644_v27 = vpop.eup %5643 }
 0xfaa   :  { %v4521_v35 = vmul.f32 %v5644_v27, %v4518_v36 }
 0xfac   :  { %v4524_v26 = vrot.slane %v4521_v35, 2  ;;  %4522 = vst.msk [vmem:[#allocation2 + $0x8] sm:$0xc] %vm860_vm0, %v4521_v35 }
 0xfae   :  { %5229 = vmatmul.msk.f32.vlgmr.msra.gmra.mxu0 %vm542_vm5, %v4524_v26  ;;  %5230 = vmatmul.msk.f32.vlgmr.msra.gmra.mxu1 %vm542_vm5, %v4524_v26 }
 0xfaf   :  { %5231 = vmatmul.msk.f32.vlgmr.msra.gmra.mxu2 %vm542_vm5, %v4524_v26  ;;  %5232 = vmatmul.msk.f32.vlgmr.msra.gmra.mxu3 %vm542_vm5, %v4524_v26 }
 0xfb0   :  { %4889 = vmatpush.msra.mxu0 %v4870_v6 }
 0xfb2   :  { %4890 = vmatpush.msra.mxu0 %v4869_v32 }
 0xfb4   :  { %4891 = vmatpush.msra.mxu0 %v4868_v19 }
 0xfb6   :  { %4892 = vmatpush.msra.mxu0 %v4867_v47 }
 0xfb8   :  { %4893 = vmatpush.msra.mxu0 %v4866_v59 }
 0xfba   :  { %4894 = vmatpush.msra.mxu0 %v4865_v25 }
 0xfbc   :  { %4895 = vmatpush.msra.mxu0 %v4864_v39 }
 0xfbe   :  { %4896 = vmatpush.msra.mxu0 %v4863_v14 }
0x102b   :  { %v4544_v13 = vpop.f32.mrf.mxu0  ;;  %v4568_v54 = vpop.f32.mrf.mxu1 }
0x102c   :  { %v4548_v33 = vrot.slane %v4544_v13, 4  ;;  %v4572_v17 = vrot.slane %v4568_v54, 4 }
0x102e   :  { %v4550_v38 = vadd.f32 %v4548_v33, %v8188_v21  ;;  %v4574_v61 = vadd.f32 %v4572_v17, %v8192_v29 }
0x1030   :  { %v5234_v7 = vmul.f32 -1.442695, %v4550_v38  ;;  %v5233_v46 = vmul.f32 -1.442695, %v4574_v61 }
0x1032   :  { %5645 = vpow2.f32 %v5234_v7  ;;  %v4616_v48 = vpop.f32.mrf.mxu3  ;;  %v4592_v57 = vpop.f32.mrf.mxu2 }
0x1033   :  { %5647 = vpow2.f32 %v5233_v46  ;;  %v4620_v34 = vrot.slane %v4616_v48, 4  ;;  %v4596_v2 = vrot.slane %v4592_v57, 4  ;;  %v4861_v46 = vld [vmem:[#allocation2] sm:$0xff] }
0x1035   :  { %v4622_v55 = vadd.f32 %v4620_v34, %v8198_v20  ;;  %v4598_v45 = vadd.f32 %v4596_v2, %v8203_v44 }
0x1037   :  { %v5235_v5 = vmul.f32 -1.442695, %v4622_v55 }
0x1038   :  { %v5646_v42 = vpop.eup %5645 }
0x1039   :  { %v5648_v24 = vpop.eup %5647  ;;  %v4649_v3 = vadd.f32 1.0, %v5646_v42  ;;  %5649 = vpow2.f32 %v5235_v5 }
0x103a   :  { %v4626_v51 = vadd.f32 1.0, %v5648_v24 }
0x103b   :  { %5651 = vrcp.f32 %v4649_v3  ;;  %v4661_v12 = vand.u32 2147483648, %v4649_v3  ;;  %v4659_v31 = vand.u32 2147483647, %v4649_v3  ;;  %vm4655_vm10 = vweird.f32 %v4649_v3 }
0x103c   :  { %5653 = vrcp.f32 %v4626_v51  ;;  %v4638_v4 = vand.u32 2147483648, %v4626_v51  ;;  %v4636_v52 = vand.u32 2147483647, %v4626_v51  ;;  %vm4632_vm11 = vweird.f32 %v4626_v51 }
0x103d   :  { %v4662_v28 = vor.u32 1.1754944e-38, %v4661_v12  ;;  %vm4660_vm14 = vcmp.eq.f32.partialorder %v4659_v31, 8.507059e+37 }
0x103e   :  { %v4639_v37 = vor.u32 1.1754944e-38, %v4638_v4  ;;  %vm4637_vm3 = vcmp.eq.f32.partialorder %v4636_v52, 8.507059e+37 }
0x103f   :  { %v5650_v49 = vpop.eup %5649 }
0x1040   :  { %v4671_v23 = vadd.f32 1.0, %v5650_v49 }
0x1041   :  { %v5652_v56 = vpop.eup %5651 }
0x1042   :  { %v5654_v0 = vpop.eup %5653  ;;  %v4651_v41 = vmul.f32 %v5652_v56, %v4649_v3  ;;  %5655 = vrcp.f32 %v4671_v23  ;;  %vm4656_vm0 = vweird.f32 %v5652_v56  ;;  %v4683_v10 = vand.u32 2147483648, %v4671_v23 }
0x1043   :  { %v4628_v62 = vmul.f32 %v5654_v0, %v4626_v51  ;;  %5657 = vtanh.f32 %v4598_v45  ;;  %vm4633_vm2 = vweird.f32 %v5654_v0  ;;  %vm4657_vm12 = vmor %vm4655_vm10, %vm4656_vm0  ;;  %vm4677_vm6 = vweird.f32 %v4671_v23 }
0x1044   :  { %v4652_v60 = vsub.f32 1.0, %v4651_v41  ;;  %vm4634_vm13 = vmor %vm4632_vm11, %vm4633_vm2  ;;  %v4681_v13 = vand.u32 2147483647, %v4671_v23  ;;  %v4684_v33 = vor.u32 1.1754944e-38, %v4683_v10 }
0x1045   :  { %v4629_v1 = vsub.f32 1.0, %v4628_v62 }
0x1046   :  { %v4653_v9 = vmul.f32 %v5652_v56, %v4652_v60  ;;  %vm4682_vm8 = vcmp.eq.f32.partialorder %v4681_v13, 8.507059e+37 }
0x1047   :  { %v4630_v11 = vmul.f32 %v5654_v0, %v4629_v1 }
0x1048   :  { %v5656_v40 = vpop.eup %5655  ;;  %v4654_v22 = vadd.f32 %v5652_v56, %v4653_v9 }
0x1049   :  { %v4631_v58 = vadd.f32 %v5654_v0, %v4630_v11  ;;  %v4673_v63 = vmul.f32 %v5656_v40, %v4671_v23  ;;  %v5658_v18 = vpop.eup %5657  ;;  %vm4678_vm4 = vweird.f32 %v5656_v40 }
0x104a   :  { %v4658_v16 = vsel %vm4657_vm12, %v5652_v56, %v4654_v22  ;;  %vm4679_vm7 = vmor %vm4677_vm6, %vm4678_vm4 }
0x104b   :  { %v4635_v43 = vsel %vm4634_vm13, %v5654_v0, %v4631_v58  ;;  %v4663_v8 = vsel %vm4660_vm14, %v4662_v28, %v4658_v16  ;;  %v4674_v30 = vsub.f32 1.0, %v4673_v63 }
0x104c   :  { %v4640_v53 = vsel %vm4637_vm3, %v4639_v37, %v4635_v43  ;;  %v4666_v50 = vmul.f32 %v5658_v18, %v4663_v8 }
0x104d   :  { %v4645_v27 = vmul.f32 %v4643_v15, %v4640_v53  ;;  %v4675_v36 = vmul.f32 %v5656_v40, %v4674_v30 }
0x104f   :  { %v8265_v35 = vadd.f32 %v4666_v50, %v4645_v27  ;;  %v4676_v26 = vadd.f32 %v5656_v40, %v4675_v36 }
0x1051   :  { %5659 = vtanh.f32 %v8265_v35  ;;  %v4680_v54 = vsel %vm4679_vm7, %v5656_v40, %v4676_v26  ;;  %v4810_v22 = vrot.slane %v8265_v35, 6 }
0x1052   :  { %v4685_v38 = vsel %vm4682_vm8, %v4684_v33, %v4680_v54 }
0x1057   :  { %v5660_v17 = vpop.eup %5659 }
0x1058   :  { %v4688_v61 = vmul.f32 %v5660_v17, %v4685_v38  ;;  %v5285_v38 = vld [vmem:[#allocation23] ss:$0 sm:$0xff] }
0x105a   :  { %v4691_v7 = vrot.slane %v4688_v61, 4  ;;  %4689 = vst.msk [vmem:[#allocation2 + $0x8] sm:$0x30] %vm1028_vm15, %v4688_v61 }
0x105c   :  { %5236 = vmatmul.msk.f32.vlgmr.msrb.gmra.mxu0 %vm542_vm5, %v4691_v7  ;;  %5237 = vmatmul.msk.f32.vlgmr.msrb.gmra.mxu1 %vm542_vm5, %v4691_v7 }
0x105d   :  { %5238 = vmatmul.msk.f32.vlgmr.msrb.gmra.mxu2 %vm542_vm5, %v4691_v7  ;;  %5239 = vmatmul.msk.f32.vlgmr.msrb.gmra.mxu3 %vm542_vm5, %v4691_v7 }
0x1064   :  { %5243 = vmatmul.msk.f32.vlgmr.msra.gmra.mxu0 %vm542_vm5, %v4861_v46 }
0x10d9   :  { %v4711_v6 = vpop.f32.mrf.mxu0  ;;  %v4735_v32 = vpop.f32.mrf.mxu1 }
0x10da   :  { %v4715_v48 = vrot.slane %v4711_v6, 2  ;;  %v4739_v34 = vrot.slane %v4735_v32, 2  ;;  %v4966_v32 = vld [vmem:[#allocation27 + $0x78] sm:$0xff] }
0x10db   :  { %4971 = vmatpush.msra.mxu1 %v4966_v32 }
0x10dc   :  { %v4717_v19 = vadd.f32 %v4715_v48, %v8188_v21  ;;  %v4741_v55 = vadd.f32 %v4739_v34, %v8192_v29  ;;  %v4965_v34 = vld [vmem:[#allocation27 + $0x70] sm:$0xff] }
0x10dd   :  { %4972 = vmatpush.msra.mxu1 %v4965_v34 }
0x10de   :  { %v5241_v47 = vmul.f32 -1.442695, %v4717_v19  ;;  %v5240_v5 = vmul.f32 -1.442695, %v4741_v55  ;;  %v4964_v55 = vld [vmem:[#allocation27 + $0x68] sm:$0xff] }
0x10df   :  { %4973 = vmatpush.msra.mxu1 %v4964_v55 }
0x10e0   :  { %5661 = vpow2.f32 %v5241_v47  ;;  %v4783_v42 = vpop.f32.mrf.mxu3  ;;  %v4759_v49 = vpop.f32.mrf.mxu2 }
0x10e1   :  { %5663 = vpow2.f32 %v5240_v5  ;;  %v4787_v24 = vrot.slane %v4783_v42, 2  ;;  %v4763_v21 = vrot.slane %v4759_v49, 2  ;;  %v4898_v17 = vpop.f32.mrf.mxu0  ;;  %v4963_v5 = vld [vmem:[#allocation27 + $0x60] sm:$0xff] }
0x10e2   :  { %v4899_v7 = vadd.f32 %v5285_v38, %v4898_v17  ;;  %4974 = vmatpush.msra.mxu1 %v4963_v5  ;;  %v4959_v49 = vld [vmem:[#allocation27 + $0x40] sm:$0xff] }
0x10e3   :  { %v4789_v3 = vadd.f32 %v4787_v24, %v8198_v20  ;;  %v4765_v56 = vadd.f32 %v4763_v21, %v8203_v44  ;;  %v4962_v24 = vld [vmem:[#allocation27 + $0x58] sm:$0xff] }
0x10e4   :  { %4975 = vmatpush.msra.mxu1 %v4962_v24 }
0x10e5   :  { %v5242_v51 = vmul.f32 -1.442695, %v4789_v3 }
0x10e6   :  { %v5662_v57 = vpop.eup %5661 }
0x10e7   :  { %v5664_v2 = vpop.eup %5663  ;;  %v4816_v59 = vadd.f32 1.0, %v5662_v57  ;;  %5665 = vpow2.f32 %v5242_v51  ;;  %v4961_v51 = vld [vmem:[#allocation27 + $0x50] sm:$0xff] }
0x10e8   :  { %v4793_v25 = vadd.f32 1.0, %v5664_v2  ;;  %4976 = vmatpush.msra.mxu1 %v4961_v51  ;;  %v4960_v2 = vld [vmem:[#allocation27 + $0x48] sm:$0xff] }
0x10e9   :  { %5667 = vrcp.f32 %v4816_v59  ;;  %v4828_v62 = vand.u32 2147483648, %v4816_v59  ;;  %v4826_v12 = vand.u32 2147483647, %v4816_v59  ;;  %vm4822_vm0 = vweird.f32 %v4816_v59 }
0x10ea   :  { %5669 = vrcp.f32 %v4793_v25  ;;  %v4805_v60 = vand.u32 2147483648, %v4793_v25  ;;  %v4803_v9 = vand.u32 2147483647, %v4793_v25  ;;  %vm4799_vm2 = vweird.f32 %v4793_v25  ;;  %4977 = vmatpush.msra.mxu1 %v4960_v2 }
0x10eb   :  { %v4829_v52 = vor.u32 1.1754944e-38, %v4828_v62  ;;  %vm4827_vm12 = vcmp.eq.f32.partialorder %v4826_v12, 8.507059e+37  ;;  %v4953_v12 = vld [vmem:[#allocation27 + $0x10] sm:$0xff] }
0x10ec   :  { %v4806_v58 = vor.u32 1.1754944e-38, %v4805_v60  ;;  %vm4804_vm13 = vcmp.eq.f32.partialorder %v4803_v9, 8.507059e+37  ;;  %4978 = vmatpush.msra.mxu1 %v4959_v49  ;;  %v4954_v60 = vld [vmem:[#allocation27 + $0x18] sm:$0xff]  ;;  %v4952_v9 = vld [vmem:[#allocation27 + $0x8] sm:$0xff] }
0x10ed   :  { %v5666_v39 = vpop.eup %5665 }
0x10ee   :  { %v4838_v29 = vadd.f32 1.0, %v5666_v39 }
0x10ef   :  { %v5668_v23 = vpop.eup %5667 }
0x10f0   :  { %v5670_v45 = vpop.eup %5669  ;;  %v4818_v14 = vmul.f32 %v5668_v23, %v4816_v59  ;;  %5671 = vrcp.f32 %v4838_v29  ;;  %vm4823_vm15 = vweird.f32 %v5668_v23  ;;  %v4850_v27 = vand.u32 2147483648, %v4838_v29  ;;  %v8395_v59 = vld [vmem:[#allocation44_spill] sm:$0xff] }
0x10f1   :  { %v4795_v0 = vmul.f32 %v5670_v45, %v4793_v25  ;;  %5673 = vtanh.f32 %v4765_v56  ;;  %vm4800_vm9 = vweird.f32 %v5670_v45  ;;  %vm4824_vm10 = vmor %vm4822_vm0, %vm4823_vm15  ;;  %vm4844_vm3 = vweird.f32 %v4838_v29 }
0x10f2   :  { %v4819_v20 = vsub.f32 1.0, %v4818_v14  ;;  %vm4801_vm11 = vmor %vm4799_vm2, %vm4800_vm9  ;;  %v4848_v36 = vand.u32 2147483647, %v4838_v29  ;;  %v4851_v26 = vor.u32 1.1754944e-38, %v4850_v27 }
0x10f3   :  { %v4796_v41 = vsub.f32 1.0, %v4795_v0  ;;  %v4956_v0 = vld [vmem:[#allocation27 + $0x28] sm:$0xff] }
0x10f4   :  { %v4820_v1 = vmul.f32 %v5668_v23, %v4819_v20  ;;  %vm4849_vm6 = vcmp.eq.f32.partialorder %v4848_v36, 8.507059e+37 }
0x10f5   :  { %v4797_v4 = vmul.f32 %v5670_v45, %v4796_v41  ;;  %v4955_v41 = vld [vmem:[#allocation27 + $0x20] sm:$0xff] }
0x10f6   :  { %v5672_v31 = vpop.eup %5671  ;;  %v4821_v11 = vadd.f32 %v5668_v23, %v4820_v1 }
0x10f7   :  { %v4798_v44 = vadd.f32 %v5670_v45, %v4797_v4  ;;  %v4840_v40 = vmul.f32 %v5672_v31, %v4838_v29  ;;  %v5674_v63 = vpop.eup %5673  ;;  %vm4845_vm14 = vweird.f32 %v5672_v31  ;;  %v4958_v29 = vld [vmem:[#allocation27 + $0x38] sm:$0xff] }
0x10f8   :  { %v4825_v28 = vsel %vm4824_vm10, %v5668_v23, %v4821_v11  ;;  %vm4846_vm4 = vmor %vm4844_vm3, %vm4845_vm14  ;;  %4979 = vmatpush.msra.mxu1 %v4958_v29  ;;  %v4951_v11 = vld [vmem:[#allocation27] sm:$0xff] }
0x10f9   :  { %v4802_v15 = vsel %vm4801_vm11, %v5670_v45, %v4798_v44  ;;  %v4830_v37 = vsel %vm4827_vm12, %v4829_v52, %v4825_v28  ;;  %v4841_v16 = vsub.f32 1.0, %v4840_v40  ;;  %v4957_v45 = vld [vmem:[#allocation27 + $0x30] sm:$0xff] }
0x10fa   :  { %v4807_v18 = vsel %vm4804_vm13, %v4806_v58, %v4802_v15  ;;  %v4833_v43 = vmul.f32 %v5674_v63, %v4830_v37  ;;  %4980 = vmatpush.msra.mxu1 %v4957_v45 }
0x10fb   :  { %v4812_v8 = vmul.f32 %v4810_v22, %v4807_v18  ;;  %v4842_v30 = vmul.f32 %v5672_v31, %v4841_v16  ;;  %v5286_v16 = vld [vmem:[#allocation24] ss:$0 sm:$0xff] }
0x10fc   :  { %4981 = vmatpush.msra.mxu1 %v4956_v0 }
0x10fd   :  { %v4834_v53 = vadd.f32 %v4833_v43, %v4812_v8  ;;  %v4843_v50 = vadd.f32 %v5672_v31, %v4842_v30  ;;  %v5287_v8 = vld [vmem:[#allocation26] ss:$0 sm:$0xff] }
0x10fe   :  { %4982 = vmatpush.msra.mxu1 %v4955_v41 }
0x10ff   :  { %5675 = vtanh.f32 %v4834_v53  ;;  %4860 = vst.msk [vmem:[#allocation31 - $0x2] sm:$0xc0] %vm1196_vm1, %v4834_v53  ;;  %v4847_v35 = vsel %vm4846_vm4, %v5672_v31, %v4843_v50 }
0x1100   :  { %v4852_v13 = vsel %vm4849_vm6, %v4851_v26, %v4847_v35  ;;  %4983 = vmatpush.msra.mxu1 %v4954_v60  ;;  %5023 = dma.vmem_to_hbm [thread:$0]  %s5016_s29, 96, %s5018_s23, [#allocation32], %s6262_s30, %s6262_s30, %s6263_s0  }
0x1102   :  { %4984 = vmatpush.msra.mxu1 %v4953_v12 }
0x1104   :  { %4985 = vmatpush.msra.mxu1 %v4952_v9 }
0x1105   :  { %v5676_v10 = vpop.eup %5675 }
0x1106   :  { %v4855_v54 = vmul.f32 %v5676_v10, %v4852_v13  ;;  %4986 = vmatpush.msra.mxu1 %v4951_v11  ;;  %v5288_v10 = vld [vmem:[#allocation29] ss:$0 sm:$0xff] }
0x1108   :  { %4856 = vst.msk [vmem:[#allocation2 + $0x8] sm:$0xc0] %vm1196_vm1, %v4855_v54 }
0x1109   :  { %4858 = vst.msk [vmem:[#allocation30 - $0x2] sm:$0xc0] %vm1196_vm1, %v4855_v54 }
0x110a   :  { %5010 = dma.vmem_to_hbm [thread:$0]  %s5003_s7, 96, %s5005_s19, [#allocation5], %s6262_s30, %s6262_s30, %s6263_s0  }
0x110f   :  { %v4862_v33 = vld [vmem:[#allocation2 + $0x8] sm:$0xff] }
0x1110   :  { %5244 = vmatmul.msk.f32.gmra.mxu0 %vm542_vm5, %v4862_v33 }
0x118d   :  { %v4901_v61 = vpop.f32.mrf.mxu0 }
0x118e   :  { %v4902_v46 = vadd.f32 %v5285_v38, %v4901_v61 }
0x1190   :  { %v4904_v6 = vadd.f32 %v4902_v46, %v4899_v7 }
0x1192   :  { %v4905_v48 = vrot.slane %v4904_v6, 4 }
0x1194   :  { %v4906_v19 = vadd.f32 %v4905_v48, %v4904_v6 }
0x1196   :  { %v4907_v47 = vrot.slane %v4906_v19, 2 }
0x1198   :  { %v4908_v42 = vadd.f32 %v4907_v47, %v4906_v19 }
0x119a   :  { %v4909_v3 = vrot.slane %v4908_v42, 1 }
0x119c   :  { %v4910_v57 = vadd.f32 %v4909_v3, %v4908_v42 }
0x119e   :  { %v4911_v25 = vmul.f32 %v4910_v57, %v8395_v59 }
0x11a0   :  { %v4912_v21 = vsub.f32 %v4899_v7, %v4911_v25  ;;  %v4913_v39 = vsub.f32 %v4902_v46, %v4911_v25 }
0x11a2   :  { %v4914_v23 = vmul.f32 %v4912_v21, %v4912_v21  ;;  %v4915_v56 = vmul.f32 %v4913_v39, %v4913_v39 }
0x11a4   :  { %v4916_v14 = vadd.f32 %v4915_v56, %v4914_v23 }
0x11a6   :  { %v4917_v20 = vrot.slane %v4916_v14, 4 }
0x11a8   :  { %v4918_v62 = vadd.f32 %v4917_v20, %v4916_v14 }
0x11aa   :  { %v4919_v1 = vrot.slane %v4918_v62, 2 }
0x11ac   :  { %v4920_v4 = vadd.f32 %v4919_v1, %v4918_v62 }
0x11ae   :  { %v4921_v31 = vrot.slane %v4920_v4, 1 }
0x11b0   :  { %v4922_v44 = vadd.f32 %v4921_v31, %v4920_v4 }
0x11b2   :  { %v4923_v52 = vmul.f32 %v4922_v44, %v8395_v59 }
0x11b4   :  { %v4924_v40 = vadd.f32 1e-05, %v4923_v52 }
0x11b6   :  { %5677 = vrsqrt.f32 %v4924_v40  ;;  %vm4931_vm1 = vweird.f32 %v4924_v40 }
0x11bc   :  { %v5678_v22 = vpop.eup %5677 }
0x11bd   :  { %v4926_v58 = vmul.f32 %v5678_v22, %v4924_v40  ;;  %vm4932_vm5 = vweird.f32 %v5678_v22 }
0x11be   :  { %vm4933_vm7 = vmor %vm4931_vm1, %vm4932_vm5 }
0x11bf   :  { %v4927_v28 = vmul.f32 %v5678_v22, %v4926_v58 }
0x11c1   :  { %v4928_v63 = vmul.f32 0.5, %v4927_v28 }
0x11c3   :  { %v4929_v15 = vsub.f32 1.5, %v4928_v63 }
0x11c5   :  { %v4930_v37 = vmul.f32 %v5678_v22, %v4929_v15 }
0x11c7   :  { %v4934_v18 = vsel %vm4933_vm7, %v5678_v22, %v4930_v37 }
0x11c8   :  { %v4935_v43 = vmul.f32 %v4934_v18, %v4912_v21  ;;  %v4936_v30 = vmul.f32 %v4934_v18, %v4913_v39 }
0x11ca   :  { %v4941_v53 = vmul.f32 %v5286_v16, %v4935_v43  ;;  %v4942_v36 = vmul.f32 %v5286_v16, %v4936_v30 }
0x11cc   :  { %v4947_v50 = vadd.f32 %v5287_v8, %v4941_v53  ;;  %v4948_v35 = vadd.f32 %v5287_v8, %v4942_v36 }
0x11ce   :  { %v4949_v27 = vmax.f32 %v4947_v50, 0.0  ;;  %v4950_v26 = vmax.f32 %v4948_v35, 0.0 }
0x11d0   :  { %4987 = vmatmul.f32.vlgmr.msra.gmra.mxu1 %v4949_v27 }
0x11d8   :  { %4990 = vmatmul.f32.gmra.mxu1 %v4950_v26 }
0x124d   :  { %v4988_v13 = vpop.f32.mrf.mxu1 }
0x124e   :  { %v4989_v54 = vadd.f32 %v5288_v10, %v4988_v13 }
0x1250   :  { %4994 = vst [vmem:[%s8323_s20] sm:$0xff] %v4989_v54 }
0x1255   :  { %v4991_v33 = vpop.f32.mrf.mxu1 }
0x1256   :  { %v4992_v17 = vadd.f32 %v5288_v10, %v4991_v33 }
0x1258   :  { %4995 = vst [vmem:[%s8323_s20 + $0x8] sm:$0xff] %v4992_v17 }
0x1259   :  { %6249 = dma.done.wait [#allocation5], 96  }
0x125a   :  { %6250 = vsyncadd [#allocation5], 4294967200 }
0x125b   :  { %6251 = dma.done.wait [#allocation32], 96  }
0x125c   :  { %6252 = vsyncadd [#allocation32], 4294967200 }
0x125d   :  { %5034 = vsyncpa [#allocation4], 1 }
0x125e   :  { %5035 = vsyncpa [#allocation7], 1 }
0x125f   :  { %5036 = vsyncpa [#allocation10], 1 }
0x1260   :  { %5037 = vsyncpa [#allocation13], 1 }
0x1261   :  { %5038 = vsyncpa [#allocation16], 1 }
0x1262   :  { %5039 = vsyncpa [#allocation19], 1 }
0x1263   :  { %5040 = vsyncpa [#allocation22], 1 }
0x1264   :  { %5041 = vsyncpa [#allocation25], 1 }
0x1265   :  { %5042 = vsyncpa [#allocation28], 1 }
0x1266   :  { %5043 = vsyncpa [#allocation5], 1 }
0x1267   :  { %5044 = vsyncpa [#allocation32], 1 }

</bundles_post_ra>
